<compile_context>
chip_gen: v5e
topology: v5e:2x2
jax: 0.10.0
libtpu: 0.0.40
codegen_flags: <defaults>
</compile_context>

<pallas_src>
import functools
import math

import jax
import jax.numpy as jnp
from jax.experimental import pallas as pl
from jax.experimental.pallas import tpu as pltpu

EPS = 1e-5  # PyTorch nn.LayerNorm default eps


# ---------------------------------------------------------------------------
# In-kernel math helpers (traced inside the Pallas kernel body)
# ---------------------------------------------------------------------------
def _layernorm(x, gamma, beta):
    mean = jnp.mean(x, axis=-1, keepdims=True)
    var = jnp.mean((x - mean) ** 2, axis=-1, keepdims=True)
    return (x - mean) * jax.lax.rsqrt(var + EPS) * gamma + beta


def _softmax_last(x):
    m = jnp.max(x, axis=-1, keepdims=True)
    e = jnp.exp(x - m)
    # EUP approximate reciprocal instead of a VALU divide.
    return e * pl.reciprocal(jnp.sum(e, axis=-1, keepdims=True), approx=True)


def _gelu_exact(x):
    # nn.GELU() default: exact erf formulation (kept for semantic fidelity).
    # TODO(synk): jax.nn.gelu(approximate=True) moves this VALU-heavy polynomial to a single
    # EUP tanh if exact-erf fidelity is not required.
    return 0.5 * x * (1.0 + jax.lax.erf(x * (1.0 / math.sqrt(2.0))))


def _mha(q, k, v, proj_w, proj_b, num_heads, tb, nq, nk):
    """Shared-weight multi-head cross attention over a tile of tb batch elements.

    q: (tb*nq, C) bf16 with 1/sqrt(Dh) already folded in; k, v: (tb*nk, C) bf16.
    proj_w: (C, C) bf16, proj_b: (C,) f32.

    Per-head attention outputs are concatenated once along the lane axis and pushed
    through a single K=C output-projection matmul (one full-width MXU contraction
    instead of num_heads K=Dh matmuls + f32 accumulate adds).
    """
    C = q.shape[-1]
    Dh = C // num_heads
    q3 = q.reshape(tb, nq, C)
    k3 = k.reshape(tb, nk, C)
    v3 = v.reshape(tb, nk, C)
    head_outs = []
    for h in range(num_heads):           # static unroll; only the bf16 copies are sliced
        sl = slice(h * Dh, (h + 1) * Dh)
        logits = jnp.einsum("bqd,bkd->bqk", q3[:, :, sl], k3[:, :, sl],
                            preferred_element_type=jnp.float32)          # (tb, nq, nk) f32
        p = _softmax_last(logits)
        head_outs.append(
            jnp.einsum("bqk,bkd->bqd", p.astype(jnp.bfloat16), v3[:, :, sl],
                       preferred_element_type=jnp.float32))               # (tb, nq, Dh) f32
    # Single lane-axis concat (XLU, idle slot) -> one full-width projection matmul.
    o = jnp.concatenate(head_outs, axis=-1).astype(jnp.bfloat16).reshape(tb * nq, C)
    return jnp.dot(o, proj_w, preferred_element_type=jnp.float32) + proj_b


def _mlp(x_bf16, w1, b1, w2, b2):
    h = jnp.dot(x_bf16, w1, preferred_element_type=jnp.float32) + b1
    h = _gelu_exact(h)                                   # f32 activation
    return jnp.dot(h.astype(jnp.bfloat16), w2, preferred_element_type=jnp.float32) + b2


# ---------------------------------------------------------------------------
# Pallas kernel: one TB-batch tile per grid step
# ---------------------------------------------------------------------------
def cross_encoder_kernel(
    x0_ref, x1_ref,
    n00_g, n00_b, n01_g, n01_b,
    qkv0_w, qkv0_b, qkv1_w, qkv1_b,
    proj_w, proj_b,
    n10_g, n10_b, n11_g, n11_b,
    m0_w1, m0_b1, m0_w2, m0_b2,
    m1_w1, m1_b1, m1_w2, m1_b2,
    out0_ref, out1_ref,
    *, num_heads,
):
    TB, N0, C = x0_ref.shape
    _, N1, _ = x1_ref.shape
    Dh = C // num_heads
    scale = Dh ** -0.5

    # Fold the TB sub-batches into the matmul M dimension for every dense op.
    x0 = x0_ref[...].astype(jnp.float32).reshape(TB * N0, C)
    x1 = x1_ref[...].astype(jnp.float32).reshape(TB * N1, C)

    # Pre-LN -> QKV projections (bf16 MXU inputs, f32 accumulation).
    h0 = _layernorm(x0, n00_g[0], n00_b[0]).astype(jnp.bfloat16)
    h1 = _layernorm(x1, n01_g[0], n01_b[0]).astype(jnp.bfloat16)
    qkv0 = jnp.dot(h0, qkv0_w[...], preferred_element_type=jnp.float32) + qkv0_b[0]  # (TB*N0, 3C)
    qkv1 = jnp.dot(h1, qkv1_w[...], preferred_element_type=jnp.float32) + qkv1_b[0]  # (TB*N1, 3C)

    # bf16 q/k/v built once (scale folded into q); per-head loops slice only these copies.
    q0 = (qkv0[:, :C] * scale).astype(jnp.bfloat16)
    k0 = qkv0[:, C:2 * C].astype(jnp.bfloat16)
    v0 = qkv0[:, 2 * C:].astype(jnp.bfloat16)
    q1 = (qkv1[:, :C] * scale).astype(jnp.bfloat16)
    k1 = qkv1[:, C:2 * C].astype(jnp.bfloat16)
    v1 = qkv1[:, 2 * C:].astype(jnp.bfloat16)

    # Shared cross-attention module (same projection weights for both directions).
    pw = proj_w[...]
    pb = proj_b[0]
    x0 = x0 + _mha(q0, k1, v1, pw, pb, num_heads, TB, N0, N1)
    x1 = x1 + _mha(q1, k0, v0, pw, pb, num_heads, TB, N1, N0)

    # MLP blocks with pre-LayerNorm and residual.
    x0 = x0 + _mlp(_layernorm(x0, n10_g[0], n10_b[0]).astype(jnp.bfloat16),
                   m0_w1[...], m0_b1[0], m0_w2[...], m0_b2[0])
    x1 = x1 + _mlp(_layernorm(x1, n11_g[0], n11_b[0]).astype(jnp.bfloat16),
                   m1_w1[...], m1_b1[0], m1_w2[...], m1_b2[0])

    out0_ref[...] = x0.reshape(TB, N0, C).astype(out0_ref.dtype)
    out1_ref[...] = x1.reshape(TB, N1, C).astype(out1_ref.dtype)


# ---------------------------------------------------------------------------
# Wrapper
# ---------------------------------------------------------------------------
def _pick_tb(B, max_tb=8):
    """Largest divisor of B <= max_tb, preferring >= 2 grid steps (v7x core split)."""
    candidates = [d for d in range(1, min(B, max_tb) + 1) if B % d == 0]
    tb = candidates[-1]
    if tb == B and B > 1:
        smaller = [d for d in candidates if d < B]
        if smaller:
            tb = smaller[-1]
    return tb


def transformer_cross_encoder_layer(x0, x1, params, num_heads, *, tb=None):
    B, N0, C = x0.shape
    _, N1, _ = x1.shape
    H_mlp = params["m0_w1"].shape[1]

    if tb is None:
        tb = _pick_tb(B)
    assert B % tb == 0, "batch must be divisible by the batch tile"

    bf16 = lambda a: a.astype(jnp.bfloat16)
    # Weight matrices are cast to bf16 once here (MXU-native, half the VMEM footprint);
    # biases and LayerNorm affine params stay f32.
    param_list = [
        params["n00_g"], params["n00_b"], params["n01_g"], params["n01_b"],
        bf16(params["qkv0_w"]), params["qkv0_b"], bf16(params["qkv1_w"]), params["qkv1_b"],
        bf16(params["proj_w"]), params["proj_b"],
        params["n10_g"], params["n10_b"], params["n11_g"], params["n11_b"],
        bf16(params["m0_w1"]), params["m0_b1"], bf16(params["m0_w2"]), params["m0_b2"],
        bf16(params["m1_w1"]), params["m1_b1"], bf16(params["m1_w2"]), params["m1_b2"],
    ]

    def batch_spec(N):
        return pl.BlockSpec((tb, N, C), lambda b: (b, 0, 0))

    # Grid-invariant params: fully resident in VMEM, no per-step pipelining / double-buffering.
    weight_spec = pl.BlockSpec(memory_space=pltpu.MemorySpace.VMEM)

    in_specs = [batch_spec(N0), batch_spec(N1)] + [weight_spec] * len(param_list)
    out_specs = [batch_spec(N0), batch_spec(N1)]

    # Advisory cost estimate so XLA schedules neighbours around the custom call sensibly.
    flops = 2 * B * (
        N0 * C * 3 * C + N1 * C * 3 * C            # QKV projections
        + 2 * N0 * N1 * C + N0 * C * C             # attn x0<-x1: logits + attn@v + proj
        + 2 * N1 * N0 * C + N1 * C * C             # attn x1<-x0
        + 2 * N0 * C * H_mlp + 2 * N1 * C * H_mlp  # MLPs
    )
    transcendentals = B * (2 * num_heads * N0 * N1 + N0 * H_mlp + N1 * H_mlp)
    bytes_accessed = (
        2 * x0.dtype.itemsize * (x0.size + x1.size)          # activations in + out
        + sum(int(p.size) * p.dtype.itemsize for p in param_list)
    )
    cost = pl.CostEstimate(flops=int(flops), transcendentals=int(transcendentals),
                           bytes_accessed=int(bytes_accessed))

    kernel = functools.partial(cross_encoder_kernel, num_heads=num_heads)

    # NOTE: callers may pass bf16 activations (x0/x1) to halve HBM traffic; outputs follow
    # the input dtype.  48 MiB VMEM budget is safe on v7x (64 MiB/TC); raise toward ~96 MiB
    # on v5e/v6e for larger batch/token tiles.
    return pl.pallas_call(
        kernel,
        out_shape=(
            jax.ShapeDtypeStruct((B, N0, C), x0.dtype),
            jax.ShapeDtypeStruct((B, N1, C), x1.dtype),
        ),
        grid_spec=pltpu.PrefetchScalarGridSpec(
            num_scalar_prefetch=0,
            grid=(B // tb,),
            in_specs=in_specs,
            out_specs=out_specs,
        ),
        compiler_params=pltpu.CompilerParams(
            # pltpu.CORE_PARALLEL would force the split across v7x's two TensorCores;
            # plain "parallel" kept for portability across v5e/v6e.
            dimension_semantics=("parallel",),
            vmem_limit_bytes=48 * 1024 * 1024,
        ),
        cost_estimate=cost,
    )(x0, x1, *param_list)


# ---------------------------------------------------------------------------
# Pure-JAX f32 reference (same math, for correctness check)
# ---------------------------------------------------------------------------
def reference_forward(x0, x1, p, num_heads):
    def ln(x, g, b):
        m = jnp.mean(x, axis=-1, keepdims=True)
        v = jnp.mean((x - m) ** 2, axis=-1, keepdims=True)
        return (x - m) / jnp.sqrt(v + EPS) * g + b

    def mha(q, k, v):
        B, Nq, C = q.shape
        Nk = k.shape[1]
        Dh = C // num_heads
        scale = Dh ** -0.5
        qh = q.reshape(B, Nq, num_heads, Dh).transpose(0, 2, 1, 3)
        kh = k.reshape(B, Nk, num_heads, Dh).transpose(0, 2, 1, 3)
        vh = v.reshape(B, Nk, num_heads, Dh).transpose(0, 2, 1, 3)
        attn = jnp.einsum("bhqd,bhkd->bhqk", qh, kh) * scale
        attn = jax.nn.softmax(attn, axis=-1)
        out = jnp.einsum("bhqk,bhkd->bhqd", attn, vh)
        out = out.transpose(0, 2, 1, 3).reshape(B, Nq, C)
        return out @ p["proj_w"] + p["proj_b"][0]

    def mlp(x, w1, b1, w2, b2):
        h = x @ w1 + b1[0]
        h = 0.5 * h * (1.0 + jax.lax.erf(h / jnp.sqrt(2.0)))
        return h @ w2 + b2[0]

    B, N0, C = x0.shape
    qkv0 = ln(x0, p["n00_g"][0], p["n00_b"][0]) @ p["qkv0_w"] + p["qkv0_b"][0]
    qkv1 = ln(x1, p["n01_g"][0], p["n01_b"][0]) @ p["qkv1_w"] + p["qkv1_b"][0]
    q0, k0, v0 = qkv0[..., :C], qkv0[..., C:2 * C], qkv0[..., 2 * C:]
    q1, k1, v1 = qkv1[..., :C], qkv1[..., C:2 * C], qkv1[..., 2 * C:]
    x0 = x0 + mha(q0, k1, v1)
    x1 = x1 + mha(q1, k0, v0)
    x0 = x0 + mlp(ln(x0, p["n10_g"][0], p["n10_b"][0]),
                  p["m0_w1"], p["m0_b1"], p["m0_w2"], p["m0_b2"])
    x1 = x1 + mlp(ln(x1, p["n11_g"][0], p["n11_b"][0]),
                  p["m1_w1"], p["m1_b1"], p["m1_w2"], p["m1_b2"])
    return x0, x1


# ---------------------------------------------------------------------------
# Deterministic parameter init + demo
# ---------------------------------------------------------------------------
def init_params(key, C, num_heads, mlp_ratio=4.0):
    H = int(C * mlp_ratio)
    ks = jax.random.split(key, 16)
    s = 0.05
    p = {
        # LayerNorms (stored as (1, C) for clean broadcasting in-kernel)
        "n00_g": 1.0 + s * jax.random.normal(ks[0], (1, C), jnp.float32),
        "n00_b": s * jax.random.normal(ks[1], (1, C), jnp.float32),
        "n01_g": 1.0 + s * jax.random.normal(ks[2], (1, C), jnp.float32),
        "n01_b": s * jax.random.normal(ks[3], (1, C), jnp.float32),
        "n10_g": 1.0 + s * jax.random.normal(ks[4], (1, C), jnp.float32),
        "n10_b": s * jax.random.normal(ks[5], (1, C), jnp.float32),
        "n11_g": 1.0 + s * jax.random.normal(ks[6], (1, C), jnp.float32),
        "n11_b": s * jax.random.normal(ks[7], (1, C), jnp.float32),
        # QKV projections (weights stored (in, out) = x @ W + b)
        "qkv0_w": s * jax.random.normal(ks[8], (C, 3 * C), jnp.float32),
        "qkv0_b": s * jax.random.normal(ks[9], (1, 3 * C), jnp.float32),
        "qkv1_w": s * jax.random.normal(ks[10], (C, 3 * C), jnp.float32),
        "qkv1_b": s * jax.random.normal(ks[11], (1, 3 * C), jnp.float32),
        # Shared attention output projection
        "proj_w": s * jax.random.normal(ks[12], (C, C), jnp.float32),
        "proj_b": s * jax.random.normal(ks[13], (1, C), jnp.float32),
    }
    km = jax.random.split(ks[14], 8)
    p.update({
        "m0_w1": s * jax.random.normal(km[0], (C, H), jnp.float32),
        "m0_b1": s * jax.random.normal(km[1], (1, H), jnp.float32),
        "m0_w2": s * jax.random.normal(km[2], (H, C), jnp.float32),
        "m0_b2": s * jax.random.normal(km[3], (1, C), jnp.float32),
        "m1_w1": s * jax.random.normal(km[4], (C, H), jnp.float32),
        "m1_b1": s * jax.random.normal(km[5], (1, H), jnp.float32),
        "m1_w2": s * jax.random.normal(km[6], (H, C), jnp.float32),
        "m1_b2": s * jax.random.normal(km[7], (1, C), jnp.float32),
    })
    return p


if __name__ == "__main__":
    # Lane-friendly small shapes: C multiple of 128, tokens multiple of 8.  B = 8 with a
    # batch tile of 4 -> grid of 2 steps, each step feeding the MXU 64-row matmuls.
    B, N0, N1, C, num_heads = 8, 16, 16, 128, 4

    key = jax.random.PRNGKey(0)
    k0, k1, kp = jax.random.split(key, 3)
    x0 = jax.random.normal(k0, (B, N0, C), jnp.float32)
    x1 = jax.random.normal(k1, (B, N1, C), jnp.float32)
    params = init_params(kp, C, num_heads)

    out0, out1 = transformer_cross_encoder_layer(x0, x1, params, num_heads)
    out0 = jax.block_until_ready(out0)
    out1 = jax.block_until_ready(out1)

    ref0, ref1 = reference_forward(x0, x1, params, num_heads)
    # Kernel uses bf16 matmul inputs (f32 accumulation) + approx reciprocal in softmax;
    # compare against the f32 reference with a correspondingly relaxed tolerance.
    assert jnp.allclose(out0, ref0, rtol=2e-2, atol=2e-2), "x0 mismatch"
    assert jnp.allclose(out1, ref1, rtol=2e-2, atol=2e-2), "x1 mismatch"

    print("KERNEL_OK")
</pallas_src>

<mosaic_0001>
module attributes {stable_mosaic.version = 11 : i64} {
  func.func @cross_encoder_kernel(%arg0: i32, %arg1: memref<4x16x128xf32, #tpu.memory_space<vmem>>, %arg2: memref<4x16x128xf32, #tpu.memory_space<vmem>>, %arg3: memref<1x128xf32, #tpu.memory_space<vmem>>, %arg4: memref<1x128xf32, #tpu.memory_space<vmem>>, %arg5: memref<1x128xf32, #tpu.memory_space<vmem>>, %arg6: memref<1x128xf32, #tpu.memory_space<vmem>>, %arg7: memref<128x384xbf16, #tpu.memory_space<vmem>>, %arg8: memref<1x384xf32, #tpu.memory_space<vmem>>, %arg9: memref<128x384xbf16, #tpu.memory_space<vmem>>, %arg10: memref<1x384xf32, #tpu.memory_space<vmem>>, %arg11: memref<128x128xbf16, #tpu.memory_space<vmem>>, %arg12: memref<1x128xf32, #tpu.memory_space<vmem>>, %arg13: memref<1x128xf32, #tpu.memory_space<vmem>>, %arg14: memref<1x128xf32, #tpu.memory_space<vmem>>, %arg15: memref<1x128xf32, #tpu.memory_space<vmem>>, %arg16: memref<1x128xf32, #tpu.memory_space<vmem>>, %arg17: memref<128x512xbf16, #tpu.memory_space<vmem>>, %arg18: memref<1x512xf32, #tpu.memory_space<vmem>>, %arg19: memref<512x128xbf16, #tpu.memory_space<vmem>>, %arg20: memref<1x128xf32, #tpu.memory_space<vmem>>, %arg21: memref<128x512xbf16, #tpu.memory_space<vmem>>, %arg22: memref<1x512xf32, #tpu.memory_space<vmem>>, %arg23: memref<512x128xbf16, #tpu.memory_space<vmem>>, %arg24: memref<1x128xf32, #tpu.memory_space<vmem>>, %arg25: memref<4x16x128xf32, #tpu.memory_space<vmem>>, %arg26: memref<4x16x128xf32, #tpu.memory_space<vmem>>) attributes {dimension_semantics = [#tpu.dimension_semantics<parallel>], iteration_bounds = array<i64: 2>, scalar_prefetch = 0 : i64, scratch_operands = 0 : i64, tpu.core_type = #tpu.core_type<tc>, window_params = [{transform_indices = @transform_0, window_bounds = array<i64: 4, 16, 128>}, {transform_indices = @transform_1, window_bounds = array<i64: 4, 16, 128>}, {pipeline_mode = #tpu.pipeline_mode<synchronous>, transform_indices = @transform_2, window_bounds = array<i64: 1, 128>}, {pipeline_mode = #tpu.pipeline_mode<synchronous>, transform_indices = @transform_3, window_bounds = array<i64: 1, 128>}, {pipeline_mode = #tpu.pipeline_mode<synchronous>, transform_indices = @transform_4, window_bounds = array<i64: 1, 128>}, {pipeline_mode = #tpu.pipeline_mode<synchronous>, transform_indices = @transform_5, window_bounds = array<i64: 1, 128>}, {pipeline_mode = #tpu.pipeline_mode<synchronous>, transform_indices = @transform_6, window_bounds = array<i64: 128, 384>}, {pipeline_mode = #tpu.pipeline_mode<synchronous>, transform_indices = @transform_7, window_bounds = array<i64: 1, 384>}, {pipeline_mode = #tpu.pipeline_mode<synchronous>, transform_indices = @transform_8, window_bounds = array<i64: 128, 384>}, {pipeline_mode = #tpu.pipeline_mode<synchronous>, transform_indices = @transform_9, window_bounds = array<i64: 1, 384>}, {pipeline_mode = #tpu.pipeline_mode<synchronous>, transform_indices = @transform_10, window_bounds = array<i64: 128, 128>}, {pipeline_mode = #tpu.pipeline_mode<synchronous>, transform_indices = @transform_11, window_bounds = array<i64: 1, 128>}, {pipeline_mode = #tpu.pipeline_mode<synchronous>, transform_indices = @transform_12, window_bounds = array<i64: 1, 128>}, {pipeline_mode = #tpu.pipeline_mode<synchronous>, transform_indices = @transform_13, window_bounds = array<i64: 1, 128>}, {pipeline_mode = #tpu.pipeline_mode<synchronous>, transform_indices = @transform_14, window_bounds = array<i64: 1, 128>}, {pipeline_mode = #tpu.pipeline_mode<synchronous>, transform_indices = @transform_15, window_bounds = array<i64: 1, 128>}, {pipeline_mode = #tpu.pipeline_mode<synchronous>, transform_indices = @transform_16, window_bounds = array<i64: 128, 512>}, {pipeline_mode = #tpu.pipeline_mode<synchronous>, transform_indices = @transform_17, window_bounds = array<i64: 1, 512>}, {pipeline_mode = #tpu.pipeline_mode<synchronous>, transform_indices = @transform_18, window_bounds = array<i64: 512, 128>}, {pipeline_mode = #tpu.pipeline_mode<synchronous>, transform_indices = @transform_19, window_bounds = array<i64: 1, 128>}, {pipeline_mode = #tpu.pipeline_mode<synchronous>, transform_indices = @transform_20, window_bounds = array<i64: 128, 512>}, {pipeline_mode = #tpu.pipeline_mode<synchronous>, transform_indices = @transform_21, window_bounds = array<i64: 1, 512>}, {pipeline_mode = #tpu.pipeline_mode<synchronous>, transform_indices = @transform_22, window_bounds = array<i64: 512, 128>}, {pipeline_mode = #tpu.pipeline_mode<synchronous>, transform_indices = @transform_23, window_bounds = array<i64: 1, 128>}, {transform_indices = @transform_24, window_bounds = array<i64: 4, 16, 128>}, {transform_indices = @transform_25, window_bounds = array<i64: 4, 16, 128>}]} {
    %c0 = arith.constant 0 : index
    %c0_0 = arith.constant 0 : index
    %c0_1 = arith.constant 0 : index
    %0 = vector.load %arg1[%c0, %c0_0, %c0_1] : memref<4x16x128xf32, #tpu.memory_space<vmem>>, vector<4x16x128xf32>
    %1 = vector.shape_cast %0 : vector<4x16x128xf32> to vector<64x128xf32>
    %c0_2 = arith.constant 0 : index
    %c0_3 = arith.constant 0 : index
    %c0_4 = arith.constant 0 : index
    %2 = vector.load %arg2[%c0_2, %c0_3, %c0_4] : memref<4x16x128xf32, #tpu.memory_space<vmem>>, vector<4x16x128xf32>
    %3 = vector.shape_cast %2 : vector<4x16x128xf32> to vector<64x128xf32>
    %c0_5 = arith.constant 0 : index
    %c0_6 = arith.constant 0 : index
    %4 = vector.load %arg3[%c0_5, %c0_6] : memref<1x128xf32, #tpu.memory_space<vmem>>, vector<1x128xf32>
    %5 = vector.shape_cast %4 : vector<1x128xf32> to vector<128xf32>
    %c0_7 = arith.constant 0 : index
    %c0_8 = arith.constant 0 : index
    %6 = vector.load %arg4[%c0_7, %c0_8] : memref<1x128xf32, #tpu.memory_space<vmem>>, vector<1x128xf32>
    %7 = vector.shape_cast %6 : vector<1x128xf32> to vector<128xf32>
    %cst = arith.constant dense<0.000000e+00> : vector<64xf32>
    %8 = vector.multi_reduction <add>, %1, %cst [1] : vector<64x128xf32> to vector<64xf32>
    %9 = vector.shape_cast %8 : vector<64xf32> to vector<64x1xf32>
    %cst_9 = arith.constant 1.280000e+02 : f32
    %10 = vector.broadcast %cst_9 : f32 to vector<64x1xf32>
    %11 = arith.divf %9, %10 : vector<64x1xf32>
    %12 = vector.broadcast %11 : vector<64x1xf32> to vector<64x128xf32>
    %13 = arith.subf %1, %12 : vector<64x128xf32>
    %14 = arith.mulf %13, %13 : vector<64x128xf32>
    %cst_10 = arith.constant dense<0.000000e+00> : vector<64xf32>
    %15 = vector.multi_reduction <add>, %14, %cst_10 [1] : vector<64x128xf32> to vector<64xf32>
    %16 = vector.shape_cast %15 : vector<64xf32> to vector<64x1xf32>
    %cst_11 = arith.constant 1.280000e+02 : f32
    %17 = vector.broadcast %cst_11 : f32 to vector<64x1xf32>
    %18 = arith.divf %16, %17 : vector<64x1xf32>
    %19 = vector.broadcast %11 : vector<64x1xf32> to vector<64x128xf32>
    %20 = arith.subf %1, %19 : vector<64x128xf32>
    %cst_12 = arith.constant 9.99999974E-6 : f32
    %21 = vector.broadcast %cst_12 : f32 to vector<64x1xf32>
    %22 = arith.addf %18, %21 : vector<64x1xf32>
    %23 = math.rsqrt %22 : vector<64x1xf32>
    %24 = vector.broadcast %23 : vector<64x1xf32> to vector<64x128xf32>
    %25 = arith.mulf %20, %24 : vector<64x128xf32>
    %26 = vector.shape_cast %5 : vector<128xf32> to vector<1x128xf32>
    %27 = vector.broadcast %26 : vector<1x128xf32> to vector<64x128xf32>
    %28 = arith.mulf %25, %27 : vector<64x128xf32>
    %29 = vector.shape_cast %7 : vector<128xf32> to vector<1x128xf32>
    %30 = vector.broadcast %29 : vector<1x128xf32> to vector<64x128xf32>
    %31 = arith.addf %28, %30 : vector<64x128xf32>
    %32 = arith.truncf %31 : vector<64x128xf32> to vector<64x128xbf16>
    %c0_13 = arith.constant 0 : index
    %c0_14 = arith.constant 0 : index
    %33 = vector.load %arg5[%c0_13, %c0_14] : memref<1x128xf32, #tpu.memory_space<vmem>>, vector<1x128xf32>
    %34 = vector.shape_cast %33 : vector<1x128xf32> to vector<128xf32>
    %c0_15 = arith.constant 0 : index
    %c0_16 = arith.constant 0 : index
    %35 = vector.load %arg6[%c0_15, %c0_16] : memref<1x128xf32, #tpu.memory_space<vmem>>, vector<1x128xf32>
    %36 = vector.shape_cast %35 : vector<1x128xf32> to vector<128xf32>
    %cst_17 = arith.constant dense<0.000000e+00> : vector<64xf32>
    %37 = vector.multi_reduction <add>, %3, %cst_17 [1] : vector<64x128xf32> to vector<64xf32>
    %38 = vector.shape_cast %37 : vector<64xf32> to vector<64x1xf32>
    %cst_18 = arith.constant 1.280000e+02 : f32
    %39 = vector.broadcast %cst_18 : f32 to vector<64x1xf32>
    %40 = arith.divf %38, %39 : vector<64x1xf32>
    %41 = vector.broadcast %40 : vector<64x1xf32> to vector<64x128xf32>
    %42 = arith.subf %3, %41 : vector<64x128xf32>
    %43 = arith.mulf %42, %42 : vector<64x128xf32>
    %cst_19 = arith.constant dense<0.000000e+00> : vector<64xf32>
    %44 = vector.multi_reduction <add>, %43, %cst_19 [1] : vector<64x128xf32> to vector<64xf32>
    %45 = vector.shape_cast %44 : vector<64xf32> to vector<64x1xf32>
    %cst_20 = arith.constant 1.280000e+02 : f32
    %46 = vector.broadcast %cst_20 : f32 to vector<64x1xf32>
    %47 = arith.divf %45, %46 : vector<64x1xf32>
    %48 = vector.broadcast %40 : vector<64x1xf32> to vector<64x128xf32>
    %49 = arith.subf %3, %48 : vector<64x128xf32>
    %cst_21 = arith.constant 9.99999974E-6 : f32
    %50 = vector.broadcast %cst_21 : f32 to vector<64x1xf32>
    %51 = arith.addf %47, %50 : vector<64x1xf32>
    %52 = math.rsqrt %51 : vector<64x1xf32>
    %53 = vector.broadcast %52 : vector<64x1xf32> to vector<64x128xf32>
    %54 = arith.mulf %49, %53 : vector<64x128xf32>
    %55 = vector.shape_cast %34 : vector<128xf32> to vector<1x128xf32>
    %56 = vector.broadcast %55 : vector<1x128xf32> to vector<64x128xf32>
    %57 = arith.mulf %54, %56 : vector<64x128xf32>
    %58 = vector.shape_cast %36 : vector<128xf32> to vector<1x128xf32>
    %59 = vector.broadcast %58 : vector<1x128xf32> to vector<64x128xf32>
    %60 = arith.addf %57, %59 : vector<64x128xf32>
    %61 = arith.truncf %60 : vector<64x128xf32> to vector<64x128xbf16>
    %c0_22 = arith.constant 0 : index
    %c0_23 = arith.constant 0 : index
    %62 = vector.load %arg7[%c0_22, %c0_23] : memref<128x384xbf16, #tpu.memory_space<vmem>>, vector<128x384xbf16>
    %cst_24 = arith.constant dense<0.000000e+00> : vector<64x384xf32>
    %63 = tpu.matmul %32, %62, %cst_24 {dimension_numbers = #tpu.dot_dimension_numbers<[1], [0], [0], [1], [0, 0, 1, 1], [], []>} : vector<64x128xbf16>, vector<128x384xbf16>, vector<64x384xf32> -> vector<64x384xf32>
    %c0_25 = arith.constant 0 : index
    %c0_26 = arith.constant 0 : index
    %64 = vector.load %arg8[%c0_25, %c0_26] : memref<1x384xf32, #tpu.memory_space<vmem>>, vector<1x384xf32>
    %65 = vector.shape_cast %64 : vector<1x384xf32> to vector<384xf32>
    %66 = vector.shape_cast %65 : vector<384xf32> to vector<1x384xf32>
    %67 = vector.broadcast %66 : vector<1x384xf32> to vector<64x384xf32>
    %68 = arith.addf %63, %67 : vector<64x384xf32>
    %c0_27 = arith.constant 0 : index
    %c0_28 = arith.constant 0 : index
    %69 = vector.load %arg9[%c0_27, %c0_28] : memref<128x384xbf16, #tpu.memory_space<vmem>>, vector<128x384xbf16>
    %cst_29 = arith.constant dense<0.000000e+00> : vector<64x384xf32>
    %70 = tpu.matmul %61, %69, %cst_29 {dimension_numbers = #tpu.dot_dimension_numbers<[1], [0], [0], [1], [0, 0, 1, 1], [], []>} : vector<64x128xbf16>, vector<128x384xbf16>, vector<64x384xf32> -> vector<64x384xf32>
    %c0_30 = arith.constant 0 : index
    %c0_31 = arith.constant 0 : index
    %71 = vector.load %arg10[%c0_30, %c0_31] : memref<1x384xf32, #tpu.memory_space<vmem>>, vector<1x384xf32>
    %72 = vector.shape_cast %71 : vector<1x384xf32> to vector<384xf32>
    %73 = vector.shape_cast %72 : vector<384xf32> to vector<1x384xf32>
    %74 = vector.broadcast %73 : vector<1x384xf32> to vector<64x384xf32>
    %75 = arith.addf %70, %74 : vector<64x384xf32>
    %76 = vector.extract_strided_slice %68 {offsets = [0, 0], sizes = [64, 128], strides = [1, 1]} : vector<64x384xf32> to vector<64x128xf32>
    %cst_32 = arith.constant 0.176776692 : f32
    %77 = vector.broadcast %cst_32 : f32 to vector<64x128xf32>
    %78 = arith.mulf %76, %77 : vector<64x128xf32>
    %79 = arith.truncf %78 : vector<64x128xf32> to vector<64x128xbf16>
    %80 = vector.extract_strided_slice %68 {offsets = [0, 128], sizes = [64, 128], strides = [1, 1]} : vector<64x384xf32> to vector<64x128xf32>
    %81 = arith.truncf %80 : vector<64x128xf32> to vector<64x128xbf16>
    %82 = vector.extract_strided_slice %68 {offsets = [0, 256], sizes = [64, 128], strides = [1, 1]} : vector<64x384xf32> to vector<64x128xf32>
    %83 = arith.truncf %82 : vector<64x128xf32> to vector<64x128xbf16>
    %84 = vector.extract_strided_slice %75 {offsets = [0, 0], sizes = [64, 128], strides = [1, 1]} : vector<64x384xf32> to vector<64x128xf32>
    %cst_33 = arith.constant 0.176776692 : f32
    %85 = vector.broadcast %cst_33 : f32 to vector<64x128xf32>
    %86 = arith.mulf %84, %85 : vector<64x128xf32>
    %87 = arith.truncf %86 : vector<64x128xf32> to vector<64x128xbf16>
    %88 = vector.extract_strided_slice %75 {offsets = [0, 128], sizes = [64, 128], strides = [1, 1]} : vector<64x384xf32> to vector<64x128xf32>
    %89 = arith.truncf %88 : vector<64x128xf32> to vector<64x128xbf16>
    %90 = vector.extract_strided_slice %75 {offsets = [0, 256], sizes = [64, 128], strides = [1, 1]} : vector<64x384xf32> to vector<64x128xf32>
    %91 = arith.truncf %90 : vector<64x128xf32> to vector<64x128xbf16>
    %c0_34 = arith.constant 0 : index
    %c0_35 = arith.constant 0 : index
    %92 = vector.load %arg11[%c0_34, %c0_35] : memref<128x128xbf16, #tpu.memory_space<vmem>>, vector<128x128xbf16>
    %c0_36 = arith.constant 0 : index
    %c0_37 = arith.constant 0 : index
    %93 = vector.load %arg12[%c0_36, %c0_37] : memref<1x128xf32, #tpu.memory_space<vmem>>, vector<1x128xf32>
    %94 = vector.shape_cast %93 : vector<1x128xf32> to vector<128xf32>
    %95 = vector.shape_cast %79 : vector<64x128xbf16> to vector<4x16x128xbf16>
    %96 = vector.shape_cast %89 : vector<64x128xbf16> to vector<4x16x128xbf16>
    %97 = vector.shape_cast %91 : vector<64x128xbf16> to vector<4x16x128xbf16>
    %98 = vector.extract_strided_slice %95 {offsets = [0, 0, 0], sizes = [4, 16, 32], strides = [1, 1, 1]} : vector<4x16x128xbf16> to vector<4x16x32xbf16>
    %99 = vector.extract_strided_slice %96 {offsets = [0, 0, 0], sizes = [4, 16, 32], strides = [1, 1, 1]} : vector<4x16x128xbf16> to vector<4x16x32xbf16>
    "tpu.trace_start"() <{level = 10 : i32, message = "bqd,bkd->bqk"}> : () -> ()
    %cst_38 = arith.constant dense<0.000000e+00> : vector<4x16x16xf32>
    %100 = tpu.matmul %98, %99, %cst_38 {dimension_numbers = #tpu.dot_dimension_numbers<[2], [2], [1], [1], [0, 0, 0, 1, 1, 1], [0], [0]>} : vector<4x16x32xbf16>, vector<4x16x32xbf16>, vector<4x16x16xf32> -> vector<4x16x16xf32>
    "tpu.trace_stop"() : () -> ()
    %cst_39 = arith.constant dense<0xFF800000> : vector<4x16xf32>
    %101 = vector.multi_reduction <maximumf>, %100, %cst_39 [2] : vector<4x16x16xf32> to vector<4x16xf32>
    %102 = vector.shape_cast %101 : vector<4x16xf32> to vector<4x16x1xf32>
    %103 = vector.broadcast %102 : vector<4x16x1xf32> to vector<4x16x16xf32>
    %104 = arith.subf %100, %103 : vector<4x16x16xf32>
    %105 = math.exp %104 : vector<4x16x16xf32>
    %cst_40 = arith.constant dense<0.000000e+00> : vector<4x16xf32>
    %106 = vector.multi_reduction <add>, %105, %cst_40 [2] : vector<4x16x16xf32> to vector<4x16xf32>
    %107 = vector.shape_cast %106 : vector<4x16xf32> to vector<4x16x1xf32>
    %108 = tpu.reciprocal %107 {approx = true} : vector<4x16x1xf32> -> vector<4x16x1xf32>
    %109 = vector.broadcast %108 : vector<4x16x1xf32> to vector<4x16x16xf32>
    %110 = arith.mulf %105, %109 : vector<4x16x16xf32>
    %111 = arith.truncf %110 : vector<4x16x16xf32> to vector<4x16x16xbf16>
    %112 = vector.extract_strided_slice %97 {offsets = [0, 0, 0], sizes = [4, 16, 32], strides = [1, 1, 1]} : vector<4x16x128xbf16> to vector<4x16x32xbf16>
    "tpu.trace_start"() <{level = 10 : i32, message = "bqk,bkd->bqd"}> : () -> ()
    %cst_41 = arith.constant dense<0.000000e+00> : vector<4x16x32xf32>
    %113 = tpu.matmul %111, %112, %cst_41 {dimension_numbers = #tpu.dot_dimension_numbers<[2], [1], [1], [2], [0, 0, 0, 1, 1, 2], [0], [0]>} : vector<4x16x16xbf16>, vector<4x16x32xbf16>, vector<4x16x32xf32> -> vector<4x16x32xf32>
    "tpu.trace_stop"() : () -> ()
    %114 = vector.extract_strided_slice %95 {offsets = [0, 0, 32], sizes = [4, 16, 32], strides = [1, 1, 1]} : vector<4x16x128xbf16> to vector<4x16x32xbf16>
    %115 = vector.extract_strided_slice %96 {offsets = [0, 0, 32], sizes = [4, 16, 32], strides = [1, 1, 1]} : vector<4x16x128xbf16> to vector<4x16x32xbf16>
    "tpu.trace_start"() <{level = 10 : i32, message = "bqd,bkd->bqk"}> : () -> ()
    %cst_42 = arith.constant dense<0.000000e+00> : vector<4x16x16xf32>
    %116 = tpu.matmul %114, %115, %cst_42 {dimension_numbers = #tpu.dot_dimension_numbers<[2], [2], [1], [1], [0, 0, 0, 1, 1, 1], [0], [0]>} : vector<4x16x32xbf16>, vector<4x16x32xbf16>, vector<4x16x16xf32> -> vector<4x16x16xf32>
    "tpu.trace_stop"() : () -> ()
    %cst_43 = arith.constant dense<0xFF800000> : vector<4x16xf32>
    %117 = vector.multi_reduction <maximumf>, %116, %cst_43 [2] : vector<4x16x16xf32> to vector<4x16xf32>
    %118 = vector.shape_cast %117 : vector<4x16xf32> to vector<4x16x1xf32>
    %119 = vector.broadcast %118 : vector<4x16x1xf32> to vector<4x16x16xf32>
    %120 = arith.subf %116, %119 : vector<4x16x16xf32>
    %121 = math.exp %120 : vector<4x16x16xf32>
    %cst_44 = arith.constant dense<0.000000e+00> : vector<4x16xf32>
    %122 = vector.multi_reduction <add>, %121, %cst_44 [2] : vector<4x16x16xf32> to vector<4x16xf32>
    %123 = vector.shape_cast %122 : vector<4x16xf32> to vector<4x16x1xf32>
    %124 = tpu.reciprocal %123 {approx = true} : vector<4x16x1xf32> -> vector<4x16x1xf32>
    %125 = vector.broadcast %124 : vector<4x16x1xf32> to vector<4x16x16xf32>
    %126 = arith.mulf %121, %125 : vector<4x16x16xf32>
    %127 = arith.truncf %126 : vector<4x16x16xf32> to vector<4x16x16xbf16>
    %128 = vector.extract_strided_slice %97 {offsets = [0, 0, 32], sizes = [4, 16, 32], strides = [1, 1, 1]} : vector<4x16x128xbf16> to vector<4x16x32xbf16>
    "tpu.trace_start"() <{level = 10 : i32, message = "bqk,bkd->bqd"}> : () -> ()
    %cst_45 = arith.constant dense<0.000000e+00> : vector<4x16x32xf32>
    %129 = tpu.matmul %127, %128, %cst_45 {dimension_numbers = #tpu.dot_dimension_numbers<[2], [1], [1], [2], [0, 0, 0, 1, 1, 2], [0], [0]>} : vector<4x16x16xbf16>, vector<4x16x32xbf16>, vector<4x16x32xf32> -> vector<4x16x32xf32>
    "tpu.trace_stop"() : () -> ()
    %130 = vector.extract_strided_slice %95 {offsets = [0, 0, 64], sizes = [4, 16, 32], strides = [1, 1, 1]} : vector<4x16x128xbf16> to vector<4x16x32xbf16>
    %131 = vector.extract_strided_slice %96 {offsets = [0, 0, 64], sizes = [4, 16, 32], strides = [1, 1, 1]} : vector<4x16x128xbf16> to vector<4x16x32xbf16>
    "tpu.trace_start"() <{level = 10 : i32, message = "bqd,bkd->bqk"}> : () -> ()
    %cst_46 = arith.constant dense<0.000000e+00> : vector<4x16x16xf32>
    %132 = tpu.matmul %130, %131, %cst_46 {dimension_numbers = #tpu.dot_dimension_numbers<[2], [2], [1], [1], [0, 0, 0, 1, 1, 1], [0], [0]>} : vector<4x16x32xbf16>, vector<4x16x32xbf16>, vector<4x16x16xf32> -> vector<4x16x16xf32>
    "tpu.trace_stop"() : () -> ()
    %cst_47 = arith.constant dense<0xFF800000> : vector<4x16xf32>
    %133 = vector.multi_reduction <maximumf>, %132, %cst_47 [2] : vector<4x16x16xf32> to vector<4x16xf32>
    %134 = vector.shape_cast %133 : vector<4x16xf32> to vector<4x16x1xf32>
    %135 = vector.broadcast %134 : vector<4x16x1xf32> to vector<4x16x16xf32>
    %136 = arith.subf %132, %135 : vector<4x16x16xf32>
    %137 = math.exp %136 : vector<4x16x16xf32>
    %cst_48 = arith.constant dense<0.000000e+00> : vector<4x16xf32>
    %138 = vector.multi_reduction <add>, %137, %cst_48 [2] : vector<4x16x16xf32> to vector<4x16xf32>
    %139 = vector.shape_cast %138 : vector<4x16xf32> to vector<4x16x1xf32>
    %140 = tpu.reciprocal %139 {approx = true} : vector<4x16x1xf32> -> vector<4x16x1xf32>
    %141 = vector.broadcast %140 : vector<4x16x1xf32> to vector<4x16x16xf32>
    %142 = arith.mulf %137, %141 : vector<4x16x16xf32>
    %143 = arith.truncf %142 : vector<4x16x16xf32> to vector<4x16x16xbf16>
    %144 = vector.extract_strided_slice %97 {offsets = [0, 0, 64], sizes = [4, 16, 32], strides = [1, 1, 1]} : vector<4x16x128xbf16> to vector<4x16x32xbf16>
    "tpu.trace_start"() <{level = 10 : i32, message = "bqk,bkd->bqd"}> : () -> ()
    %cst_49 = arith.constant dense<0.000000e+00> : vector<4x16x32xf32>
    %145 = tpu.matmul %143, %144, %cst_49 {dimension_numbers = #tpu.dot_dimension_numbers<[2], [1], [1], [2], [0, 0, 0, 1, 1, 2], [0], [0]>} : vector<4x16x16xbf16>, vector<4x16x32xbf16>, vector<4x16x32xf32> -> vector<4x16x32xf32>
    "tpu.trace_stop"() : () -> ()
    %146 = vector.extract_strided_slice %95 {offsets = [0, 0, 96], sizes = [4, 16, 32], strides = [1, 1, 1]} : vector<4x16x128xbf16> to vector<4x16x32xbf16>
    %147 = vector.extract_strided_slice %96 {offsets = [0, 0, 96], sizes = [4, 16, 32], strides = [1, 1, 1]} : vector<4x16x128xbf16> to vector<4x16x32xbf16>
    "tpu.trace_start"() <{level = 10 : i32, message = "bqd,bkd->bqk"}> : () -> ()
    %cst_50 = arith.constant dense<0.000000e+00> : vector<4x16x16xf32>
    %148 = tpu.matmul %146, %147, %cst_50 {dimension_numbers = #tpu.dot_dimension_numbers<[2], [2], [1], [1], [0, 0, 0, 1, 1, 1], [0], [0]>} : vector<4x16x32xbf16>, vector<4x16x32xbf16>, vector<4x16x16xf32> -> vector<4x16x16xf32>
    "tpu.trace_stop"() : () -> ()
    %cst_51 = arith.constant dense<0xFF800000> : vector<4x16xf32>
    %149 = vector.multi_reduction <maximumf>, %148, %cst_51 [2] : vector<4x16x16xf32> to vector<4x16xf32>
    %150 = vector.shape_cast %149 : vector<4x16xf32> to vector<4x16x1xf32>
    %151 = vector.broadcast %150 : vector<4x16x1xf32> to vector<4x16x16xf32>
    %152 = arith.subf %148, %151 : vector<4x16x16xf32>
    %153 = math.exp %152 : vector<4x16x16xf32>
    %cst_52 = arith.constant dense<0.000000e+00> : vector<4x16xf32>
    %154 = vector.multi_reduction <add>, %153, %cst_52 [2] : vector<4x16x16xf32> to vector<4x16xf32>
    %155 = vector.shape_cast %154 : vector<4x16xf32> to vector<4x16x1xf32>
    %156 = tpu.reciprocal %155 {approx = true} : vector<4x16x1xf32> -> vector<4x16x1xf32>
    %157 = vector.broadcast %156 : vector<4x16x1xf32> to vector<4x16x16xf32>
    %158 = arith.mulf %153, %157 : vector<4x16x16xf32>
    %159 = arith.truncf %158 : vector<4x16x16xf32> to vector<4x16x16xbf16>
    %160 = vector.extract_strided_slice %97 {offsets = [0, 0, 96], sizes = [4, 16, 32], strides = [1, 1, 1]} : vector<4x16x128xbf16> to vector<4x16x32xbf16>
    "tpu.trace_start"() <{level = 10 : i32, message = "bqk,bkd->bqd"}> : () -> ()
    %cst_53 = arith.constant dense<0.000000e+00> : vector<4x16x32xf32>
    %161 = tpu.matmul %159, %160, %cst_53 {dimension_numbers = #tpu.dot_dimension_numbers<[2], [1], [1], [2], [0, 0, 0, 1, 1, 2], [0], [0]>} : vector<4x16x16xbf16>, vector<4x16x32xbf16>, vector<4x16x32xf32> -> vector<4x16x32xf32>
    "tpu.trace_stop"() : () -> ()
    %162 = tpu.concatenate %113, %129, %145, %161 in 2 : vector<4x16x32xf32>, vector<4x16x32xf32>, vector<4x16x32xf32>, vector<4x16x32xf32> -> vector<4x16x128xf32>
    %163 = arith.truncf %162 : vector<4x16x128xf32> to vector<4x16x128xbf16>
    %164 = vector.shape_cast %163 : vector<4x16x128xbf16> to vector<64x128xbf16>
    %cst_54 = arith.constant dense<0.000000e+00> : vector<64x128xf32>
    %165 = tpu.matmul %164, %92, %cst_54 {dimension_numbers = #tpu.dot_dimension_numbers<[1], [0], [0], [1], [0, 0, 1, 1], [], []>} : vector<64x128xbf16>, vector<128x128xbf16>, vector<64x128xf32> -> vector<64x128xf32>
    %166 = vector.shape_cast %94 : vector<128xf32> to vector<1x128xf32>
    %167 = vector.broadcast %166 : vector<1x128xf32> to vector<64x128xf32>
    %168 = arith.addf %165, %167 : vector<64x128xf32>
    %169 = arith.addf %1, %168 : vector<64x128xf32>
    %170 = vector.shape_cast %87 : vector<64x128xbf16> to vector<4x16x128xbf16>
    %171 = vector.shape_cast %81 : vector<64x128xbf16> to vector<4x16x128xbf16>
    %172 = vector.shape_cast %83 : vector<64x128xbf16> to vector<4x16x128xbf16>
    %173 = vector.extract_strided_slice %170 {offsets = [0, 0, 0], sizes = [4, 16, 32], strides = [1, 1, 1]} : vector<4x16x128xbf16> to vector<4x16x32xbf16>
    %174 = vector.extract_strided_slice %171 {offsets = [0, 0, 0], sizes = [4, 16, 32], strides = [1, 1, 1]} : vector<4x16x128xbf16> to vector<4x16x32xbf16>
    "tpu.trace_start"() <{level = 10 : i32, message = "bqd,bkd->bqk"}> : () -> ()
    %cst_55 = arith.constant dense<0.000000e+00> : vector<4x16x16xf32>
    %175 = tpu.matmul %173, %174, %cst_55 {dimension_numbers = #tpu.dot_dimension_numbers<[2], [2], [1], [1], [0, 0, 0, 1, 1, 1], [0], [0]>} : vector<4x16x32xbf16>, vector<4x16x32xbf16>, vector<4x16x16xf32> -> vector<4x16x16xf32>
    "tpu.trace_stop"() : () -> ()
    %cst_56 = arith.constant dense<0xFF800000> : vector<4x16xf32>
    %176 = vector.multi_reduction <maximumf>, %175, %cst_56 [2] : vector<4x16x16xf32> to vector<4x16xf32>
    %177 = vector.shape_cast %176 : vector<4x16xf32> to vector<4x16x1xf32>
    %178 = vector.broadcast %177 : vector<4x16x1xf32> to vector<4x16x16xf32>
    %179 = arith.subf %175, %178 : vector<4x16x16xf32>
    %180 = math.exp %179 : vector<4x16x16xf32>
    %cst_57 = arith.constant dense<0.000000e+00> : vector<4x16xf32>
    %181 = vector.multi_reduction <add>, %180, %cst_57 [2] : vector<4x16x16xf32> to vector<4x16xf32>
    %182 = vector.shape_cast %181 : vector<4x16xf32> to vector<4x16x1xf32>
    %183 = tpu.reciprocal %182 {approx = true} : vector<4x16x1xf32> -> vector<4x16x1xf32>
    %184 = vector.broadcast %183 : vector<4x16x1xf32> to vector<4x16x16xf32>
    %185 = arith.mulf %180, %184 : vector<4x16x16xf32>
    %186 = arith.truncf %185 : vector<4x16x16xf32> to vector<4x16x16xbf16>
    %187 = vector.extract_strided_slice %172 {offsets = [0, 0, 0], sizes = [4, 16, 32], strides = [1, 1, 1]} : vector<4x16x128xbf16> to vector<4x16x32xbf16>
    "tpu.trace_start"() <{level = 10 : i32, message = "bqk,bkd->bqd"}> : () -> ()
    %cst_58 = arith.constant dense<0.000000e+00> : vector<4x16x32xf32>
    %188 = tpu.matmul %186, %187, %cst_58 {dimension_numbers = #tpu.dot_dimension_numbers<[2], [1], [1], [2], [0, 0, 0, 1, 1, 2], [0], [0]>} : vector<4x16x16xbf16>, vector<4x16x32xbf16>, vector<4x16x32xf32> -> vector<4x16x32xf32>
    "tpu.trace_stop"() : () -> ()
    %189 = vector.extract_strided_slice %170 {offsets = [0, 0, 32], sizes = [4, 16, 32], strides = [1, 1, 1]} : vector<4x16x128xbf16> to vector<4x16x32xbf16>
    %190 = vector.extract_strided_slice %171 {offsets = [0, 0, 32], sizes = [4, 16, 32], strides = [1, 1, 1]} : vector<4x16x128xbf16> to vector<4x16x32xbf16>
    "tpu.trace_start"() <{level = 10 : i32, message = "bqd,bkd->bqk"}> : () -> ()
    %cst_59 = arith.constant dense<0.000000e+00> : vector<4x16x16xf32>
    %191 = tpu.matmul %189, %190, %cst_59 {dimension_numbers = #tpu.dot_dimension_numbers<[2], [2], [1], [1], [0, 0, 0, 1, 1, 1], [0], [0]>} : vector<4x16x32xbf16>, vector<4x16x32xbf16>, vector<4x16x16xf32> -> vector<4x16x16xf32>
    "tpu.trace_stop"() : () -> ()
    %cst_60 = arith.constant dense<0xFF800000> : vector<4x16xf32>
    %192 = vector.multi_reduction <maximumf>, %191, %cst_60 [2] : vector<4x16x16xf32> to vector<4x16xf32>
    %193 = vector.shape_cast %192 : vector<4x16xf32> to vector<4x16x1xf32>
    %194 = vector.broadcast %193 : vector<4x16x1xf32> to vector<4x16x16xf32>
    %195 = arith.subf %191, %194 : vector<4x16x16xf32>
    %196 = math.exp %195 : vector<4x16x16xf32>
    %cst_61 = arith.constant dense<0.000000e+00> : vector<4x16xf32>
    %197 = vector.multi_reduction <add>, %196, %cst_61 [2] : vector<4x16x16xf32> to vector<4x16xf32>
    %198 = vector.shape_cast %197 : vector<4x16xf32> to vector<4x16x1xf32>
    %199 = tpu.reciprocal %198 {approx = true} : vector<4x16x1xf32> -> vector<4x16x1xf32>
    %200 = vector.broadcast %199 : vector<4x16x1xf32> to vector<4x16x16xf32>
    %201 = arith.mulf %196, %200 : vector<4x16x16xf32>
    %202 = arith.truncf %201 : vector<4x16x16xf32> to vector<4x16x16xbf16>
    %203 = vector.extract_strided_slice %172 {offsets = [0, 0, 32], sizes = [4, 16, 32], strides = [1, 1, 1]} : vector<4x16x128xbf16> to vector<4x16x32xbf16>
    "tpu.trace_start"() <{level = 10 : i32, message = "bqk,bkd->bqd"}> : () -> ()
    %cst_62 = arith.constant dense<0.000000e+00> : vector<4x16x32xf32>
    %204 = tpu.matmul %202, %203, %cst_62 {dimension_numbers = #tpu.dot_dimension_numbers<[2], [1], [1], [2], [0, 0, 0, 1, 1, 2], [0], [0]>} : vector<4x16x16xbf16>, vector<4x16x32xbf16>, vector<4x16x32xf32> -> vector<4x16x32xf32>
    "tpu.trace_stop"() : () -> ()
    %205 = vector.extract_strided_slice %170 {offsets = [0, 0, 64], sizes = [4, 16, 32], strides = [1, 1, 1]} : vector<4x16x128xbf16> to vector<4x16x32xbf16>
    %206 = vector.extract_strided_slice %171 {offsets = [0, 0, 64], sizes = [4, 16, 32], strides = [1, 1, 1]} : vector<4x16x128xbf16> to vector<4x16x32xbf16>
    "tpu.trace_start"() <{level = 10 : i32, message = "bqd,bkd->bqk"}> : () -> ()
    %cst_63 = arith.constant dense<0.000000e+00> : vector<4x16x16xf32>
    %207 = tpu.matmul %205, %206, %cst_63 {dimension_numbers = #tpu.dot_dimension_numbers<[2], [2], [1], [1], [0, 0, 0, 1, 1, 1], [0], [0]>} : vector<4x16x32xbf16>, vector<4x16x32xbf16>, vector<4x16x16xf32> -> vector<4x16x16xf32>
    "tpu.trace_stop"() : () -> ()
    %cst_64 = arith.constant dense<0xFF800000> : vector<4x16xf32>
    %208 = vector.multi_reduction <maximumf>, %207, %cst_64 [2] : vector<4x16x16xf32> to vector<4x16xf32>
    %209 = vector.shape_cast %208 : vector<4x16xf32> to vector<4x16x1xf32>
    %210 = vector.broadcast %209 : vector<4x16x1xf32> to vector<4x16x16xf32>
    %211 = arith.subf %207, %210 : vector<4x16x16xf32>
    %212 = math.exp %211 : vector<4x16x16xf32>
    %cst_65 = arith.constant dense<0.000000e+00> : vector<4x16xf32>
    %213 = vector.multi_reduction <add>, %212, %cst_65 [2] : vector<4x16x16xf32> to vector<4x16xf32>
    %214 = vector.shape_cast %213 : vector<4x16xf32> to vector<4x16x1xf32>
    %215 = tpu.reciprocal %214 {approx = true} : vector<4x16x1xf32> -> vector<4x16x1xf32>
    %216 = vector.broadcast %215 : vector<4x16x1xf32> to vector<4x16x16xf32>
    %217 = arith.mulf %212, %216 : vector<4x16x16xf32>
    %218 = arith.truncf %217 : vector<4x16x16xf32> to vector<4x16x16xbf16>
    %219 = vector.extract_strided_slice %172 {offsets = [0, 0, 64], sizes = [4, 16, 32], strides = [1, 1, 1]} : vector<4x16x128xbf16> to vector<4x16x32xbf16>
    "tpu.trace_start"() <{level = 10 : i32, message = "bqk,bkd->bqd"}> : () -> ()
    %cst_66 = arith.constant dense<0.000000e+00> : vector<4x16x32xf32>
    %220 = tpu.matmul %218, %219, %cst_66 {dimension_numbers = #tpu.dot_dimension_numbers<[2], [1], [1], [2], [0, 0, 0, 1, 1, 2], [0], [0]>} : vector<4x16x16xbf16>, vector<4x16x32xbf16>, vector<4x16x32xf32> -> vector<4x16x32xf32>
    "tpu.trace_stop"() : () -> ()
    %221 = vector.extract_strided_slice %170 {offsets = [0, 0, 96], sizes = [4, 16, 32], strides = [1, 1, 1]} : vector<4x16x128xbf16> to vector<4x16x32xbf16>
    %222 = vector.extract_strided_slice %171 {offsets = [0, 0, 96], sizes = [4, 16, 32], strides = [1, 1, 1]} : vector<4x16x128xbf16> to vector<4x16x32xbf16>
    "tpu.trace_start"() <{level = 10 : i32, message = "bqd,bkd->bqk"}> : () -> ()
    %cst_67 = arith.constant dense<0.000000e+00> : vector<4x16x16xf32>
    %223 = tpu.matmul %221, %222, %cst_67 {dimension_numbers = #tpu.dot_dimension_numbers<[2], [2], [1], [1], [0, 0, 0, 1, 1, 1], [0], [0]>} : vector<4x16x32xbf16>, vector<4x16x32xbf16>, vector<4x16x16xf32> -> vector<4x16x16xf32>
    "tpu.trace_stop"() : () -> ()
    %cst_68 = arith.constant dense<0xFF800000> : vector<4x16xf32>
    %224 = vector.multi_reduction <maximumf>, %223, %cst_68 [2] : vector<4x16x16xf32> to vector<4x16xf32>
    %225 = vector.shape_cast %224 : vector<4x16xf32> to vector<4x16x1xf32>
    %226 = vector.broadcast %225 : vector<4x16x1xf32> to vector<4x16x16xf32>
    %227 = arith.subf %223, %226 : vector<4x16x16xf32>
    %228 = math.exp %227 : vector<4x16x16xf32>
    %cst_69 = arith.constant dense<0.000000e+00> : vector<4x16xf32>
    %229 = vector.multi_reduction <add>, %228, %cst_69 [2] : vector<4x16x16xf32> to vector<4x16xf32>
    %230 = vector.shape_cast %229 : vector<4x16xf32> to vector<4x16x1xf32>
    %231 = tpu.reciprocal %230 {approx = true} : vector<4x16x1xf32> -> vector<4x16x1xf32>
    %232 = vector.broadcast %231 : vector<4x16x1xf32> to vector<4x16x16xf32>
    %233 = arith.mulf %228, %232 : vector<4x16x16xf32>
    %234 = arith.truncf %233 : vector<4x16x16xf32> to vector<4x16x16xbf16>
    %235 = vector.extract_strided_slice %172 {offsets = [0, 0, 96], sizes = [4, 16, 32], strides = [1, 1, 1]} : vector<4x16x128xbf16> to vector<4x16x32xbf16>
    "tpu.trace_start"() <{level = 10 : i32, message = "bqk,bkd->bqd"}> : () -> ()
    %cst_70 = arith.constant dense<0.000000e+00> : vector<4x16x32xf32>
    %236 = tpu.matmul %234, %235, %cst_70 {dimension_numbers = #tpu.dot_dimension_numbers<[2], [1], [1], [2], [0, 0, 0, 1, 1, 2], [0], [0]>} : vector<4x16x16xbf16>, vector<4x16x32xbf16>, vector<4x16x32xf32> -> vector<4x16x32xf32>
    "tpu.trace_stop"() : () -> ()
    %237 = tpu.concatenate %188, %204, %220, %236 in 2 : vector<4x16x32xf32>, vector<4x16x32xf32>, vector<4x16x32xf32>, vector<4x16x32xf32> -> vector<4x16x128xf32>
    %238 = arith.truncf %237 : vector<4x16x128xf32> to vector<4x16x128xbf16>
    %239 = vector.shape_cast %238 : vector<4x16x128xbf16> to vector<64x128xbf16>
    %cst_71 = arith.constant dense<0.000000e+00> : vector<64x128xf32>
    %240 = tpu.matmul %239, %92, %cst_71 {dimension_numbers = #tpu.dot_dimension_numbers<[1], [0], [0], [1], [0, 0, 1, 1], [], []>} : vector<64x128xbf16>, vector<128x128xbf16>, vector<64x128xf32> -> vector<64x128xf32>
    %241 = vector.shape_cast %94 : vector<128xf32> to vector<1x128xf32>
    %242 = vector.broadcast %241 : vector<1x128xf32> to vector<64x128xf32>
    %243 = arith.addf %240, %242 : vector<64x128xf32>
    %244 = arith.addf %3, %243 : vector<64x128xf32>
    %c0_72 = arith.constant 0 : index
    %c0_73 = arith.constant 0 : index
    %245 = vector.load %arg13[%c0_72, %c0_73] : memref<1x128xf32, #tpu.memory_space<vmem>>, vector<1x128xf32>
    %246 = vector.shape_cast %245 : vector<1x128xf32> to vector<128xf32>
    %c0_74 = arith.constant 0 : index
    %c0_75 = arith.constant 0 : index
    %247 = vector.load %arg14[%c0_74, %c0_75] : memref<1x128xf32, #tpu.memory_space<vmem>>, vector<1x128xf32>
    %248 = vector.shape_cast %247 : vector<1x128xf32> to vector<128xf32>
    %cst_76 = arith.constant dense<0.000000e+00> : vector<64xf32>
    %249 = vector.multi_reduction <add>, %169, %cst_76 [1] : vector<64x128xf32> to vector<64xf32>
    %250 = vector.shape_cast %249 : vector<64xf32> to vector<64x1xf32>
    %cst_77 = arith.constant 1.280000e+02 : f32
    %251 = vector.broadcast %cst_77 : f32 to vector<64x1xf32>
    %252 = arith.divf %250, %251 : vector<64x1xf32>
    %253 = vector.broadcast %252 : vector<64x1xf32> to vector<64x128xf32>
    %254 = arith.subf %169, %253 : vector<64x128xf32>
    %255 = arith.mulf %254, %254 : vector<64x128xf32>
    %cst_78 = arith.constant dense<0.000000e+00> : vector<64xf32>
    %256 = vector.multi_reduction <add>, %255, %cst_78 [1] : vector<64x128xf32> to vector<64xf32>
    %257 = vector.shape_cast %256 : vector<64xf32> to vector<64x1xf32>
    %cst_79 = arith.constant 1.280000e+02 : f32
    %258 = vector.broadcast %cst_79 : f32 to vector<64x1xf32>
    %259 = arith.divf %257, %258 : vector<64x1xf32>
    %260 = vector.broadcast %252 : vector<64x1xf32> to vector<64x128xf32>
    %261 = arith.subf %169, %260 : vector<64x128xf32>
    %cst_80 = arith.constant 9.99999974E-6 : f32
    %262 = vector.broadcast %cst_80 : f32 to vector<64x1xf32>
    %263 = arith.addf %259, %262 : vector<64x1xf32>
    %264 = math.rsqrt %263 : vector<64x1xf32>
    %265 = vector.broadcast %264 : vector<64x1xf32> to vector<64x128xf32>
    %266 = arith.mulf %261, %265 : vector<64x128xf32>
    %267 = vector.shape_cast %246 : vector<128xf32> to vector<1x128xf32>
    %268 = vector.broadcast %267 : vector<1x128xf32> to vector<64x128xf32>
    %269 = arith.mulf %266, %268 : vector<64x128xf32>
    %270 = vector.shape_cast %248 : vector<128xf32> to vector<1x128xf32>
    %271 = vector.broadcast %270 : vector<1x128xf32> to vector<64x128xf32>
    %272 = arith.addf %269, %271 : vector<64x128xf32>
    %273 = arith.truncf %272 : vector<64x128xf32> to vector<64x128xbf16>
    %c0_81 = arith.constant 0 : index
    %c0_82 = arith.constant 0 : index
    %274 = vector.load %arg17[%c0_81, %c0_82] : memref<128x512xbf16, #tpu.memory_space<vmem>>, vector<128x512xbf16>
    %c0_83 = arith.constant 0 : index
    %c0_84 = arith.constant 0 : index
    %275 = vector.load %arg18[%c0_83, %c0_84] : memref<1x512xf32, #tpu.memory_space<vmem>>, vector<1x512xf32>
    %276 = vector.shape_cast %275 : vector<1x512xf32> to vector<512xf32>
    %c0_85 = arith.constant 0 : index
    %c0_86 = arith.constant 0 : index
    %277 = vector.load %arg19[%c0_85, %c0_86] : memref<512x128xbf16, #tpu.memory_space<vmem>>, vector<512x128xbf16>
    %c0_87 = arith.constant 0 : index
    %c0_88 = arith.constant 0 : index
    %278 = vector.load %arg20[%c0_87, %c0_88] : memref<1x128xf32, #tpu.memory_space<vmem>>, vector<1x128xf32>
    %279 = vector.shape_cast %278 : vector<1x128xf32> to vector<128xf32>
    %cst_89 = arith.constant dense<0.000000e+00> : vector<64x512xf32>
    %280 = tpu.matmul %273, %274, %cst_89 {dimension_numbers = #tpu.dot_dimension_numbers<[1], [0], [0], [1], [0, 0, 1, 1], [], []>} : vector<64x128xbf16>, vector<128x512xbf16>, vector<64x512xf32> -> vector<64x512xf32>
    %281 = vector.shape_cast %276 : vector<512xf32> to vector<1x512xf32>
    %282 = vector.broadcast %281 : vector<1x512xf32> to vector<64x512xf32>
    %283 = arith.addf %280, %282 : vector<64x512xf32>
    %cst_90 = arith.constant 5.000000e-01 : f32
    %284 = vector.broadcast %cst_90 : f32 to vector<64x512xf32>
    %285 = arith.mulf %284, %283 : vector<64x512xf32>
    %cst_91 = arith.constant 0.707106769 : f32
    %286 = vector.broadcast %cst_91 : f32 to vector<64x512xf32>
    %287 = arith.mulf %283, %286 : vector<64x512xf32>
    %288 = math.erf %287 : vector<64x512xf32>
    %cst_92 = arith.constant 1.000000e+00 : f32
    %289 = vector.broadcast %cst_92 : f32 to vector<64x512xf32>
    %290 = arith.addf %289, %288 : vector<64x512xf32>
    %291 = arith.mulf %285, %290 : vector<64x512xf32>
    %292 = arith.truncf %291 : vector<64x512xf32> to vector<64x512xbf16>
    %cst_93 = arith.constant dense<0.000000e+00> : vector<64x128xf32>
    %293 = tpu.matmul %292, %277, %cst_93 {dimension_numbers = #tpu.dot_dimension_numbers<[1], [0], [0], [1], [0, 0, 1, 1], [], []>} : vector<64x512xbf16>, vector<512x128xbf16>, vector<64x128xf32> -> vector<64x128xf32>
    %294 = vector.shape_cast %279 : vector<128xf32> to vector<1x128xf32>
    %295 = vector.broadcast %294 : vector<1x128xf32> to vector<64x128xf32>
    %296 = arith.addf %293, %295 : vector<64x128xf32>
    %297 = arith.addf %169, %296 : vector<64x128xf32>
    %c0_94 = arith.constant 0 : index
    %c0_95 = arith.constant 0 : index
    %298 = vector.load %arg15[%c0_94, %c0_95] : memref<1x128xf32, #tpu.memory_space<vmem>>, vector<1x128xf32>
    %299 = vector.shape_cast %298 : vector<1x128xf32> to vector<128xf32>
    %c0_96 = arith.constant 0 : index
    %c0_97 = arith.constant 0 : index
    %300 = vector.load %arg16[%c0_96, %c0_97] : memref<1x128xf32, #tpu.memory_space<vmem>>, vector<1x128xf32>
    %301 = vector.shape_cast %300 : vector<1x128xf32> to vector<128xf32>
    %cst_98 = arith.constant dense<0.000000e+00> : vector<64xf32>
    %302 = vector.multi_reduction <add>, %244, %cst_98 [1] : vector<64x128xf32> to vector<64xf32>
    %303 = vector.shape_cast %302 : vector<64xf32> to vector<64x1xf32>
    %cst_99 = arith.constant 1.280000e+02 : f32
    %304 = vector.broadcast %cst_99 : f32 to vector<64x1xf32>
    %305 = arith.divf %303, %304 : vector<64x1xf32>
    %306 = vector.broadcast %305 : vector<64x1xf32> to vector<64x128xf32>
    %307 = arith.subf %244, %306 : vector<64x128xf32>
    %308 = arith.mulf %307, %307 : vector<64x128xf32>
    %cst_100 = arith.constant dense<0.000000e+00> : vector<64xf32>
    %309 = vector.multi_reduction <add>, %308, %cst_100 [1] : vector<64x128xf32> to vector<64xf32>
    %310 = vector.shape_cast %309 : vector<64xf32> to vector<64x1xf32>
    %cst_101 = arith.constant 1.280000e+02 : f32
    %311 = vector.broadcast %cst_101 : f32 to vector<64x1xf32>
    %312 = arith.divf %310, %311 : vector<64x1xf32>
    %313 = vector.broadcast %305 : vector<64x1xf32> to vector<64x128xf32>
    %314 = arith.subf %244, %313 : vector<64x128xf32>
    %cst_102 = arith.constant 9.99999974E-6 : f32
    %315 = vector.broadcast %cst_102 : f32 to vector<64x1xf32>
    %316 = arith.addf %312, %315 : vector<64x1xf32>
    %317 = math.rsqrt %316 : vector<64x1xf32>
    %318 = vector.broadcast %317 : vector<64x1xf32> to vector<64x128xf32>
    %319 = arith.mulf %314, %318 : vector<64x128xf32>
    %320 = vector.shape_cast %299 : vector<128xf32> to vector<1x128xf32>
    %321 = vector.broadcast %320 : vector<1x128xf32> to vector<64x128xf32>
    %322 = arith.mulf %319, %321 : vector<64x128xf32>
    %323 = vector.shape_cast %301 : vector<128xf32> to vector<1x128xf32>
    %324 = vector.broadcast %323 : vector<1x128xf32> to vector<64x128xf32>
    %325 = arith.addf %322, %324 : vector<64x128xf32>
    %326 = arith.truncf %325 : vector<64x128xf32> to vector<64x128xbf16>
    %c0_103 = arith.constant 0 : index
    %c0_104 = arith.constant 0 : index
    %327 = vector.load %arg21[%c0_103, %c0_104] : memref<128x512xbf16, #tpu.memory_space<vmem>>, vector<128x512xbf16>
    %c0_105 = arith.constant 0 : index
    %c0_106 = arith.constant 0 : index
    %328 = vector.load %arg22[%c0_105, %c0_106] : memref<1x512xf32, #tpu.memory_space<vmem>>, vector<1x512xf32>
    %329 = vector.shape_cast %328 : vector<1x512xf32> to vector<512xf32>
    %c0_107 = arith.constant 0 : index
    %c0_108 = arith.constant 0 : index
    %330 = vector.load %arg23[%c0_107, %c0_108] : memref<512x128xbf16, #tpu.memory_space<vmem>>, vector<512x128xbf16>
    %c0_109 = arith.constant 0 : index
    %c0_110 = arith.constant 0 : index
    %331 = vector.load %arg24[%c0_109, %c0_110] : memref<1x128xf32, #tpu.memory_space<vmem>>, vector<1x128xf32>
    %332 = vector.shape_cast %331 : vector<1x128xf32> to vector<128xf32>
    %cst_111 = arith.constant dense<0.000000e+00> : vector<64x512xf32>
    %333 = tpu.matmul %326, %327, %cst_111 {dimension_numbers = #tpu.dot_dimension_numbers<[1], [0], [0], [1], [0, 0, 1, 1], [], []>} : vector<64x128xbf16>, vector<128x512xbf16>, vector<64x512xf32> -> vector<64x512xf32>
    %334 = vector.shape_cast %329 : vector<512xf32> to vector<1x512xf32>
    %335 = vector.broadcast %334 : vector<1x512xf32> to vector<64x512xf32>
    %336 = arith.addf %333, %335 : vector<64x512xf32>
    %cst_112 = arith.constant 5.000000e-01 : f32
    %337 = vector.broadcast %cst_112 : f32 to vector<64x512xf32>
    %338 = arith.mulf %337, %336 : vector<64x512xf32>
    %cst_113 = arith.constant 0.707106769 : f32
    %339 = vector.broadcast %cst_113 : f32 to vector<64x512xf32>
    %340 = arith.mulf %336, %339 : vector<64x512xf32>
    %341 = math.erf %340 : vector<64x512xf32>
    %cst_114 = arith.constant 1.000000e+00 : f32
    %342 = vector.broadcast %cst_114 : f32 to vector<64x512xf32>
    %343 = arith.addf %342, %341 : vector<64x512xf32>
    %344 = arith.mulf %338, %343 : vector<64x512xf32>
    %345 = arith.truncf %344 : vector<64x512xf32> to vector<64x512xbf16>
    %cst_115 = arith.constant dense<0.000000e+00> : vector<64x128xf32>
    %346 = tpu.matmul %345, %330, %cst_115 {dimension_numbers = #tpu.dot_dimension_numbers<[1], [0], [0], [1], [0, 0, 1, 1], [], []>} : vector<64x512xbf16>, vector<512x128xbf16>, vector<64x128xf32> -> vector<64x128xf32>
    %347 = vector.shape_cast %332 : vector<128xf32> to vector<1x128xf32>
    %348 = vector.broadcast %347 : vector<1x128xf32> to vector<64x128xf32>
    %349 = arith.addf %346, %348 : vector<64x128xf32>
    %350 = arith.addf %244, %349 : vector<64x128xf32>
    %351 = vector.shape_cast %297 : vector<64x128xf32> to vector<4x16x128xf32>
    %c0_116 = arith.constant 0 : index
    %c0_117 = arith.constant 0 : index
    %c0_118 = arith.constant 0 : index
    %352 = vector.load %arg25[%c0_116, %c0_117, %c0_118] : memref<4x16x128xf32, #tpu.memory_space<vmem>>, vector<4x16x128xf32>
    tpu.vector_store %arg25[%c0_116, %c0_117, %c0_118], %351 {strides = array<i32>} : memref<4x16x128xf32, #tpu.memory_space<vmem>>, vector<4x16x128xf32>,
    %353 = vector.shape_cast %350 : vector<64x128xf32> to vector<4x16x128xf32>
    %c0_119 = arith.constant 0 : index
    %c0_120 = arith.constant 0 : index
    %c0_121 = arith.constant 0 : index
    %354 = vector.load %arg26[%c0_119, %c0_120, %c0_121] : memref<4x16x128xf32, #tpu.memory_space<vmem>>, vector<4x16x128xf32>
    tpu.vector_store %arg26[%c0_119, %c0_120, %c0_121], %353 {strides = array<i32>} : memref<4x16x128xf32, #tpu.memory_space<vmem>>, vector<4x16x128xf32>,
    return
  }
  func.func @transform_0(%arg0: i32) -> (i32, i32, i32) {
    %c0_i32 = arith.constant 0 : i32
    %c0_i32_0 = arith.constant 0 : i32
    %c0_i32_1 = arith.constant 0 : i32
    return %arg0, %c0_i32, %c0_i32_0 : i32, i32, i32
  }
  func.func @transform_1(%arg0: i32) -> (i32, i32, i32) {
    %c0_i32 = arith.constant 0 : i32
    %c0_i32_0 = arith.constant 0 : i32
    %c0_i32_1 = arith.constant 0 : i32
    return %arg0, %c0_i32, %c0_i32_0 : i32, i32, i32
  }
  func.func @transform_2(%arg0: i32) -> (i32, i32) {
    %c0_i32 = arith.constant 0 : i32
    %c0_i32_0 = arith.constant 0 : i32
    %c0_i32_1 = arith.constant 0 : i32
    return %c0_i32, %c0_i32_0 : i32, i32
  }
  func.func @transform_3(%arg0: i32) -> (i32, i32) {
    %c0_i32 = arith.constant 0 : i32
    %c0_i32_0 = arith.constant 0 : i32
    %c0_i32_1 = arith.constant 0 : i32
    return %c0_i32, %c0_i32_0 : i32, i32
  }
  func.func @transform_4(%arg0: i32) -> (i32, i32) {
    %c0_i32 = arith.constant 0 : i32
    %c0_i32_0 = arith.constant 0 : i32
    %c0_i32_1 = arith.constant 0 : i32
    return %c0_i32, %c0_i32_0 : i32, i32
  }
  func.func @transform_5(%arg0: i32) -> (i32, i32) {
    %c0_i32 = arith.constant 0 : i32
    %c0_i32_0 = arith.constant 0 : i32
    %c0_i32_1 = arith.constant 0 : i32
    return %c0_i32, %c0_i32_0 : i32, i32
  }
  func.func @transform_6(%arg0: i32) -> (i32, i32) {
    %c0_i32 = arith.constant 0 : i32
    %c0_i32_0 = arith.constant 0 : i32
    %c0_i32_1 = arith.constant 0 : i32
    return %c0_i32, %c0_i32_0 : i32, i32
  }
  func.func @transform_7(%arg0: i32) -> (i32, i32) {
    %c0_i32 = arith.constant 0 : i32
    %c0_i32_0 = arith.constant 0 : i32
    %c0_i32_1 = arith.constant 0 : i32
    return %c0_i32, %c0_i32_0 : i32, i32
  }
  func.func @transform_8(%arg0: i32) -> (i32, i32) {
    %c0_i32 = arith.constant 0 : i32
    %c0_i32_0 = arith.constant 0 : i32
    %c0_i32_1 = arith.constant 0 : i32
    return %c0_i32, %c0_i32_0 : i32, i32
  }
  func.func @transform_9(%arg0: i32) -> (i32, i32) {
    %c0_i32 = arith.constant 0 : i32
    %c0_i32_0 = arith.constant 0 : i32
    %c0_i32_1 = arith.constant 0 : i32
    return %c0_i32, %c0_i32_0 : i32, i32
  }
  func.func @transform_10(%arg0: i32) -> (i32, i32) {
    %c0_i32 = arith.constant 0 : i32
    %c0_i32_0 = arith.constant 0 : i32
    %c0_i32_1 = arith.constant 0 : i32
    return %c0_i32, %c0_i32_0 : i32, i32
  }
  func.func @transform_11(%arg0: i32) -> (i32, i32) {
    %c0_i32 = arith.constant 0 : i32
    %c0_i32_0 = arith.constant 0 : i32
    %c0_i32_1 = arith.constant 0 : i32
    return %c0_i32, %c0_i32_0 : i32, i32
  }
  func.func @transform_12(%arg0: i32) -> (i32, i32) {
    %c0_i32 = arith.constant 0 : i32
    %c0_i32_0 = arith.constant 0 : i32
    %c0_i32_1 = arith.constant 0 : i32
    return %c0_i32, %c0_i32_0 : i32, i32
  }
  func.func @transform_13(%arg0: i32) -> (i32, i32) {
    %c0_i32 = arith.constant 0 : i32
    %c0_i32_0 = arith.constant 0 : i32
    %c0_i32_1 = arith.constant 0 : i32
    return %c0_i32, %c0_i32_0 : i32, i32
  }
  func.func @transform_14(%arg0: i32) -> (i32, i32) {
    %c0_i32 = arith.constant 0 : i32
    %c0_i32_0 = arith.constant 0 : i32
    %c0_i32_1 = arith.constant 0 : i32
    return %c0_i32, %c0_i32_0 : i32, i32
  }
  func.func @transform_15(%arg0: i32) -> (i32, i32) {
    %c0_i32 = arith.constant 0 : i32
    %c0_i32_0 = arith.constant 0 : i32
    %c0_i32_1 = arith.constant 0 : i32
    return %c0_i32, %c0_i32_0 : i32, i32
  }
  func.func @transform_16(%arg0: i32) -> (i32, i32) {
    %c0_i32 = arith.constant 0 : i32
    %c0_i32_0 = arith.constant 0 : i32
    %c0_i32_1 = arith.constant 0 : i32
    return %c0_i32, %c0_i32_0 : i32, i32
  }
  func.func @transform_17(%arg0: i32) -> (i32, i32) {
    %c0_i32 = arith.constant 0 : i32
    %c0_i32_0 = arith.constant 0 : i32
    %c0_i32_1 = arith.constant 0 : i32
    return %c0_i32, %c0_i32_0 : i32, i32
  }
  func.func @transform_18(%arg0: i32) -> (i32, i32) {
    %c0_i32 = arith.constant 0 : i32
    %c0_i32_0 = arith.constant 0 : i32
    %c0_i32_1 = arith.constant 0 : i32
    return %c0_i32, %c0_i32_0 : i32, i32
  }
  func.func @transform_19(%arg0: i32) -> (i32, i32) {
    %c0_i32 = arith.constant 0 : i32
    %c0_i32_0 = arith.constant 0 : i32
    %c0_i32_1 = arith.constant 0 : i32
    return %c0_i32, %c0_i32_0 : i32, i32
  }
  func.func @transform_20(%arg0: i32) -> (i32, i32) {
    %c0_i32 = arith.constant 0 : i32
    %c0_i32_0 = arith.constant 0 : i32
    %c0_i32_1 = arith.constant 0 : i32
    return %c0_i32, %c0_i32_0 : i32, i32
  }
  func.func @transform_21(%arg0: i32) -> (i32, i32) {
    %c0_i32 = arith.constant 0 : i32
    %c0_i32_0 = arith.constant 0 : i32
    %c0_i32_1 = arith.constant 0 : i32
    return %c0_i32, %c0_i32_0 : i32, i32
  }
  func.func @transform_22(%arg0: i32) -> (i32, i32) {
    %c0_i32 = arith.constant 0 : i32
    %c0_i32_0 = arith.constant 0 : i32
    %c0_i32_1 = arith.constant 0 : i32
    return %c0_i32, %c0_i32_0 : i32, i32
  }
  func.func @transform_23(%arg0: i32) -> (i32, i32) {
    %c0_i32 = arith.constant 0 : i32
    %c0_i32_0 = arith.constant 0 : i32
    %c0_i32_1 = arith.constant 0 : i32
    return %c0_i32, %c0_i32_0 : i32, i32
  }
  func.func @transform_24(%arg0: i32) -> (i32, i32, i32) {
    %c0_i32 = arith.constant 0 : i32
    %c0_i32_0 = arith.constant 0 : i32
    %c0_i32_1 = arith.constant 0 : i32
    return %arg0, %c0_i32, %c0_i32_0 : i32, i32, i32
  }
  func.func @transform_25(%arg0: i32) -> (i32, i32, i32) {
    %c0_i32 = arith.constant 0 : i32
    %c0_i32_0 = arith.constant 0 : i32
    %c0_i32_1 = arith.constant 0 : i32
    return %arg0, %c0_i32, %c0_i32_0 : i32, i32, i32
  }
}

</mosaic_0001>

<bundles_post_ra>
// kernel: tpu_custom_call.1
= control target key start
LH: loop header
LB: loop body
LE: loop exit
PB: predicated region body
PF: predicated region fallthrough
CT: control target
= control target key end

     0   :  { %s18091_s0 = inlined_call_operand.hbm [shape: f32[8,16,128], index: 0, kind: input, shape index: {}]   ;;  %s18092_s1 = inlined_call_operand.hbm [shape: f32[8,16,128], index: 1, kind: input, shape index: {}]   ;;  %s18093_s2 = inlined_call_operand.hbm [shape: f32[1,128], index: 2, kind: input, shape index: {}]   ;;  %s18094_s3 = inlined_call_operand.hbm [shape: f32[1,128], index: 3, kind: input, shape index: {}]   ;;  %s18095_s4 = inlined_call_operand.hbm [shape: f32[1,128], index: 4, kind: input, shape index: {}]   ;;  %s18096_s5 = inlined_call_operand.hbm [shape: f32[1,128], index: 5, kind: input, shape index: {}]   ;;  %s18097_s6 = inlined_call_operand.hbm [shape: bf16[128,384], index: 6, kind: input, shape index: {}]   ;;  %s18098_s7 = inlined_call_operand.hbm [shape: f32[1,384], index: 7, kind: input, shape index: {}]   ;;  %s18099_s8 = inlined_call_operand.hbm [shape: bf16[128,384], index: 8, kind: input, shape index: {}]   ;;  %s18100_s9 = inlined_call_operand.hbm [shape: f32[1,384], index: 9, kind: input, shape index: {}]   ;;  %s18101_s10 = inlined_call_operand.hbm [shape: bf16[128,128], index: 10, kind: input, shape index: {}]   ;;  %s18102_s11 = inlined_call_operand.vmem [shape: f32[1,128], index: 11, kind: input, shape index: {}]   ;;  %s18103_s12 = inlined_call_operand.vmem [shape: f32[1,128], index: 12, kind: input, shape index: {}]   ;;  %s18104_s13 = inlined_call_operand.vmem [shape: f32[1,128], index: 13, kind: input, shape index: {}]   ;;  %s18105_s14 = inlined_call_operand.vmem [shape: f32[1,128], index: 14, kind: input, shape index: {}]   ;;  %s18106_s15 = inlined_call_operand.vmem [shape: f32[1,128], index: 15, kind: input, shape index: {}]   ;;  %s18107_s16 = inlined_call_operand.hbm [shape: bf16[128,512], index: 16, kind: input, shape index: {}]   ;;  %s18108_s17 = inlined_call_operand.vmem [shape: f32[1,512], index: 17, kind: input, shape index: {}]   ;;  %s18109_s18 = inlined_call_operand.hbm [shape: bf16[512,128], index: 18, kind: input, shape index: {}]   ;;  %s18110_s19 = inlined_call_operand.vmem [shape: f32[1,128], index: 19, kind: input, shape index: {}]   ;;  %s18111_s20 = inlined_call_operand.hbm [shape: bf16[128,512], index: 20, kind: input, shape index: {}]   ;;  %s18112_s21 = inlined_call_operand.vmem [shape: f32[1,512], index: 21, kind: input, shape index: {}]   ;;  %s18113_s22 = inlined_call_operand.hbm [shape: bf16[512,128], index: 22, kind: input, shape index: {}]   ;;  %s18114_s23 = inlined_call_operand.vmem [shape: f32[1,128], index: 23, kind: input, shape index: {}]   ;;  %s18115_s24 = inlined_call_operand.hbm [shape: f32[8,16,128], index: 24, kind: output, shape index: {0}]   ;;  %s18116_s25 = inlined_call_operand.hbm [shape: f32[8,16,128], index: 25, kind: output, shape index: {1}]  }
   0x1   :  { %18147 = sst [smem:[#allocation58_spill]] %s18091_s0 }
   0x2   :  { %18148 = sst [smem:[#allocation59_spill]] %s18092_s1 }
   0x3   :  { %18149 = sst [smem:[#allocation60_spill]] %s18093_s2 }
   0x4   :  { %18150 = sst [smem:[#allocation61_spill]] %s18094_s3 }
   0x5   :  { %18151 = sst [smem:[#allocation62_spill]] %s18095_s4 }
   0x6   :  { %18152 = sst [smem:[#allocation63_spill]] %s18096_s5 }
   0x7   :  { %18153 = sst [smem:[#allocation64_spill]] %s18097_s6 }
   0x8   :  { %18154 = sst [smem:[#allocation65_spill]] %s18098_s7 }
   0x9   :  { %18155 = sst [smem:[#allocation66_spill]] %s18099_s8 }
   0xa   :  { %18156 = sst [smem:[#allocation67_spill]] %s18100_s9 }
   0xb   :  { %18157 = sst [smem:[#allocation68_spill]] %s18101_s10 }
   0xc   :  { %18158 = sst [smem:[#allocation69_spill]] %s18105_s14 }
   0xd   :  { %18159 = sst [smem:[#allocation70_spill]] %s18106_s15 }
   0xe   :  { %18160 = sst [smem:[#allocation71_spill]] %s18107_s16 }
   0xf   :  { %18161 = sst [smem:[#allocation72_spill]] %s18108_s17 }
  0x10   :  { %18162 = sst [smem:[#allocation73_spill]] %s18109_s18 }
  0x11   :  { %18163 = sst [smem:[#allocation74_spill]] %s18110_s19 }
  0x12   :  { %18164 = sst [smem:[#allocation75_spill]] %s18111_s20 }
  0x13   :  { %18165 = sst [smem:[#allocation76_spill]] %s18112_s21 }
  0x14   :  { %18166 = sst [smem:[#allocation77_spill]] %s18113_s22 }
  0x15   :  { %18167 = sst [smem:[#allocation78_spill]] %s18114_s23 }
  0x16   :  { %18168 = sst [smem:[#allocation79_spill]] %s18115_s24 }
  0x17   :  { %18169 = sst [smem:[#allocation80_spill]] %s18116_s25 }
  0x18   :  { %31 = vsyncpa [#allocation3], 0 }
  0x19   :  { %33 = vsyncpa [#allocation3 + $0x1], 0 }
  0x1a   :  { %34 = vsyncpa [#allocation6], 0 }
  0x1b   :  { %36 = vsyncpa [#allocation6 + $0x1], 0 }
  0x1c   :  { %37 = vsyncpa [#allocation9], 0 }
  0x1d   :  { %38 = vsyncpa [#allocation12], 0 }
  0x1e   :  { %39 = vsyncpa [#allocation15], 0 }
  0x1f   :  { %40 = vsyncpa [#allocation18], 0 }
  0x20   :  { %41 = vsyncpa [#allocation21], 0 }
  0x21   :  { %42 = vsyncpa [#allocation24], 0 }
  0x22   :  { %43 = vsyncpa [#allocation4], 0 }
  0x23   :  { %45 = vsyncpa [#allocation4 + $0x1], 0 }
  0x24   :  { %46 = vsyncpa [#allocation28], 0 }
  0x25   :  { %48 = vsyncpa [#allocation28 + $0x1], 0  ;;  %s12478_s29 = smov 0   ;;  %s12480_s2 = smov 0  }
  0x26   :  { %s12482_s6 = smov 0   ;;  %s12484_s30 = smov 0  }
  0x27 LB: > { %18170 = sst [smem:[#allocation40_spill]] %s12315_s6  ;;  %s12502_s8 = sadd.s32 4294967295, %s12319_s30   ;;  %s12319_s30 = sphi %s12484_s30, %s18490_s30   ;;  %s12315_s6 = sphi %s12482_s6, %s18487_s6   ;;  %s12311_s2 = sphi %s12480_s2, %s18489_s2   ;;  %s12307_s29 = sphi %s12478_s29, %s18488_s29  }
  0x28   : > { %s18171_s26 = sld [smem:[#allocation60_spill]]  ;;  %p9815_p0 = scmp.ge.s32.totalorder %s12319_s30, 1 }
  0x29   : > { %p75_p1 = scmp.eq.s32.totalorder %s12502_s8, 0  ;;  %p625_p2 = scmp.lt.s32.totalorder %s12319_s30, 3 }
  0x2a   : > { %s12321_s4 = smov [#allocation7]   ;;  %s18173_s0 = sld [smem:[#allocation61_spill]] }
  0x2b   : > { %p12507_p3 = pnand %p9815_p0, %p625_p2  ;;  %s639_s28 = sshll.u32 %s12321_s4, 4  ;;  %s640_s28 = int_to_ptr.vmem [resolvable:$true] %s639_s28 }
  0x2c   : > { %s18175_s23 = sld [smem:[#allocation63_spill]]  ;;  %s12323_s15 = smov [#allocation11]  }
  0x2d   : > { %p10990_p5 = pneg %p12507_p3  ;;  %s675_s14 = sshll.u32 %s12323_s15, 4  ;;  %s676_s14 = int_to_ptr.vmem [resolvable:$true] %s675_s14 }
  0x2e   : > { %s637_s1 = sshll.u32 %s18171_s26, 4  ;;  %s12322_s26 = smov [#allocation8]   ;;  %s638_s1 = int_to_ptr.hbm [resolvable:$true] %s637_s1 }
  0x2f   : > { %p12519_p6 = pnand %p10990_p5, %p75_p1  ;;  %s651_s25 = sshll.u32 %s12322_s26, 4  ;;  %s652_s25 = int_to_ptr.vmem [resolvable:$true] %s651_s25 }
  0x30   : > { %s649_s7 = sshll.u32 %s18173_s0, 4  ;;  %s18176_s0 = sld [smem:[#allocation65_spill]]  ;;  %s650_s7 = int_to_ptr.hbm [resolvable:$true] %s649_s7 }
  0x31   : > { %10993 = dma.hbm_to_vmem [thread:$0]  (!%p12519_p6), %s638_s1, 16, %s640_s28, [#allocation6]  }
  0x32   : > { %s673_s21 = sshll.u32 %s18175_s23, 4  ;;  %s12324_s26 = smov [#allocation14]   ;;  %s674_s21 = int_to_ptr.hbm [resolvable:$true] %s673_s21 }
  0x33   : > { %10996 = dma.hbm_to_vmem [thread:$0]  (!%p12519_p6), %s650_s7, 16, %s652_s25, [#allocation9]  }
  0x34   : > { %11002 = dma.hbm_to_vmem [thread:$0]  (!%p12519_p6), %s674_s21, 16, %s676_s14, [#allocation12]  }
  0x35   : > { %s701_s24 = sshll.u32 %s12324_s26, 4  ;;  %s18177_s17 = sld [smem:[#allocation67_spill]]  ;;  %s702_s24 = int_to_ptr.vmem [resolvable:$true] %s701_s24 }
  0x36   : > { %s699_s19 = sshll.u32 %s18176_s0, 4  ;;  %s18178_s16 = sld [smem:[#allocation71_spill]]  ;;  %s700_s19 = int_to_ptr.hbm [resolvable:$true] %s699_s19 }
  0x37   : > { %11008 = dma.hbm_to_vmem [thread:$0]  (!%p12519_p6), %s700_s19, 48, %s702_s24, [#allocation15]  }
  0x38   : > { %s12325_s15 = smov [#allocation17]   ;;  %s12326_s14 = smov [#allocation20]  }
  0x39   : > { %s727_s9 = sshll.u32 %s12325_s15, 4  ;;  %s767_s21 = sshll.u32 %s12326_s14, 4  ;;  %s728_s9 = int_to_ptr.vmem [resolvable:$true] %s727_s9  ;;  %s768_s21 = int_to_ptr.vmem [resolvable:$true] %s767_s21 }
  0x3a   : > { %s12327_s5 = smov 256   ;;  %s18179_s20 = sld [smem:[#allocation75_spill]] }
  0x3b   : > { %s725_s1 = sshll.u32 %s18177_s17, 4  ;;  %s12328_s17 = smov 16   ;;  %s726_s1 = int_to_ptr.hbm [resolvable:$true] %s725_s1 }
  0x3c   : > { %s765_s7 = sshll.u32 %s18178_s16, 4  ;;  %s12329_s24 = smov [#allocation23]   ;;  %s766_s7 = int_to_ptr.hbm [resolvable:$true] %s765_s7 }
  0x3d   : > { %11014 = dma.hbm_to_vmem [thread:$0]  (!%p12519_p6), %s726_s1, 48, %s728_s9, [#allocation18]  }
  0x3e   : > { %11020 = dma.hbm_to_vmem [thread:$0]  (!%p12519_p6), %s766_s7, 4096, %s768_s21, [#allocation21], %s12327_s5, %s12327_s5, %s12328_s17  }
  0x3f   : > { %s801_s4 = sshll.u32 %s12329_s24, 4  ;;  %s18180_s28 = sld [smem:[#allocation62_spill]]  ;;  %s802_s4 = int_to_ptr.vmem [resolvable:$true] %s801_s4 }
  0x40   : > { %s799_s26 = sshll.u32 %s18179_s20, 4  ;;  %s12330_s15 = smov [#allocation10]   ;;  %s800_s26 = int_to_ptr.hbm [resolvable:$true] %s799_s26 }
  0x41   : > { %11026 = dma.hbm_to_vmem [thread:$0]  (!%p12519_p6), %s800_s26, 4096, %s802_s4, [#allocation24], %s12327_s5, %s12327_s5, %s12328_s17  }
  0x42   : > { %s663_s9 = sshll.u32 %s12330_s15, 4  ;;  %s18181_s21 = sld [smem:[#allocation64_spill]]  ;;  %s664_s9 = int_to_ptr.vmem [resolvable:$true] %s663_s9 }
  0x43   : > { %s12331_s19 = smov [#allocation13]   ;;  %s18182_s25 = sld [smem:[#allocation66_spill]] }
  0x44   : > { %s686_s0 = sshll.u32 %s12331_s19, 4  ;;  %s12332_s5 = smov 192   ;;  %s687_s0 = int_to_ptr.vmem [resolvable:$true] %s686_s0 }
  0x45   : > { %s661_s1 = sshll.u32 %s18180_s28, 4  ;;  %s12333_s17 = smov 12   ;;  %s662_s1 = int_to_ptr.hbm [resolvable:$true] %s661_s1 }
  0x46   : > { %10999 = dma.hbm_to_vmem [thread:$0]  (!%p12519_p6), %s662_s1, 16, %s664_s9, [#allocation9]  }
  0x47   : > { %s12334_s26 = smov [#allocation16]   ;;  %s18183_s10 = sld [smem:[#allocation68_spill]] }
  0x48   : > { %s684_s16 = sshll.u32 %s18181_s21, 4  ;;  %s712_s4 = sshll.u32 %s12334_s26, 4  ;;  %s685_s16 = int_to_ptr.hbm [resolvable:$true] %s684_s16  ;;  %s713_s4 = int_to_ptr.vmem [resolvable:$true] %s712_s4 }
  0x49   : > { %s710_s28 = sshll.u32 %s18182_s25, 4  ;;  %s12335_s1 = smov [#allocation19]   ;;  %s711_s28 = int_to_ptr.hbm [resolvable:$true] %s710_s28 }
  0x4a   : > { %11005 = dma.hbm_to_vmem [thread:$0]  (!%p12519_p6), %s685_s16, 3072, %s687_s0, [#allocation12], %s12332_s5, %s12332_s5, %s12333_s17  }
  0x4b   : > { %11011 = dma.hbm_to_vmem [thread:$0]  (!%p12519_p6), %s711_s28, 3072, %s713_s4, [#allocation15], %s12332_s5, %s12332_s5, %s12333_s17  }
  0x4c   : > { %s738_s9 = sshll.u32 %s12335_s1, 4  ;;  %s18184_s18 = sld [smem:[#allocation73_spill]]  ;;  %s739_s9 = int_to_ptr.vmem [resolvable:$true] %s738_s9 }
  0x4d   : > { %s736_s7 = sshll.u32 %s18183_s10, 4  ;;  %s12336_s0 = smov 64   ;;  %s737_s7 = int_to_ptr.hbm [resolvable:$true] %s736_s7 }
  0x4e   : > { %s12337_s24 = smov 4   ;;  %s12338_s23 = smov [#allocation22]  }
  0x4f   : > { %11017 = dma.hbm_to_vmem [thread:$0]  (!%p12519_p6), %s737_s7, 1024, %s739_s9, [#allocation18], %s12336_s0, %s12336_s0, %s12337_s24  }
  0x50   : > { %s784_s25 = sshll.u32 %s12338_s23, 4  ;;  %s18185_s22 = sld [smem:[#allocation77_spill]]  ;;  %s785_s25 = int_to_ptr.vmem [resolvable:$true] %s784_s25 }
  0x51   : > { %s12339_s26 = smov [#allocation25]   ;;  %s9814_s15 = sadd.s32 4294967294, %s12319_s30  }
  0x52   : > { %s782_s16 = sshll.u32 %s18184_s18, 4  ;;  %s818_s4 = sshll.u32 %s12339_s26, 4  ;;  %s783_s16 = int_to_ptr.hbm [resolvable:$true] %s782_s16  ;;  %s819_s4 = int_to_ptr.vmem [resolvable:$true] %s818_s4 }
  0x53   : > { %11023 = dma.hbm_to_vmem [thread:$0]  (!%p12519_p6), %s783_s16, 4096, %s785_s25, [#allocation21], %s12336_s0, %s12336_s0, %s12337_s24  }
  0x54   : > { %s12584_s14 = sadd.s32 1, %s12319_s30   ;;  %s61_s7 = sadd.s32 1, %s12315_s6 }
  0x55   : > { %s58_s1 = ssub.s32 %s12319_s30, %s12584_s14  ;;  %p68_p7 = scmp.ne.s32.totalorder %s12315_s6, %s12311_s2 }
  0x56   : > { %s816_s17 = sshll.u32 %s18185_s22, 4  ;;  %p59_p8 = scmp.eq.s32.totalorder %s58_s1, 0  ;;  %s817_s17 = int_to_ptr.hbm [resolvable:$true] %s816_s17 }
  0x57   : > { %11029 = dma.hbm_to_vmem [thread:$0]  (!%p12519_p6), %s817_s17, 4096, %s819_s4, [#allocation24], %s12336_s0, %s12336_s0, %s12337_s24  }
  0x58   : > { %p69_p9 = scmp.eq.s32.totalorder %s12319_s30, 0  ;;  %p74_p10 = scmp.ne.s32.totalorder %s12311_s2, %s12307_s29 }
  0x59   : > { %p586_p11 = scmp.eq.s32.totalorder %s12502_s8, 1  ;;  %p592_p2 = scmp.eq.s32.totalorder %s9814_s15, 1 }
  0x5a   : > { %s12596_s9 = scalar_select %p59_p8, %s12315_s6, %s61_s7  }
  0x5b   : > { %p12598_p12 = por %p69_p9, %p68_p7  ;;  %p12604_p13 = por %p75_p1, %p74_p10 }
  0x5c   : > { %18186 = sst [smem:[#allocation41_spill]] %s12596_s9  ;;  %p12608_p0 = por %p586_p11, %p68_p7 }
  0x5d   : > { %p11057_p5 = scmp.lt.s32.totalorder %s12319_s30, 2  ;;  %s835_s16 = sand.u32 1, %s12315_s6  }
  0x5e   : > { %p12614_p6 = por %p592_p2, %p74_p10  ;;  %s12618_s24 = sshll.u32 %s835_s16, 6 }
  0x5f   : > { %s10731_s23 = sshll.u32 %s12319_s30, 6  ;;  %s18191_s5 = sld [smem:[#allocation58_spill]] }
  0x60   : > { %s839_s4 = scalar_lea.vmem [#allocation2], %s12618_s24  ;;  %p12627_p7 = pnand %p11057_p5, %p12598_p12 }
  0x61   : > { %s848_s7 = sshll.u32 %s839_s4, 4  ;;  %s18193_s18 = sld [smem:[#allocation59_spill]]  ;;  %s849_s7 = int_to_ptr.vmem [resolvable:$true] %s848_s7 }
  0x62   : > { %s836_s22 = scalar_lea.sflag [#allocation3], %s835_s16  ;;  %p12133_p9 = pneg %p12627_p7 }
  0x65   : > { %s845_s17 = scalar_lea.hbm %s18191_s5, %s10731_s23 }
  0x66   : > { %s846_s26 = sshll.u32 %s845_s17, 4  ;;  %s12136_s17 = scalar_lea.hbm %s18191_s5, 128  ;;  %s847_s26 = int_to_ptr.hbm [resolvable:$true] %s846_s26 }
  0x67   : > { %s868_s20 = scalar_lea.hbm %s18193_s18, %s10731_s23  ;;  %s12129_s9 = sshra.s32 %s847_s26, 4  ;;  %s12130_s9 = int_to_ptr.hbm [resolvable:$true] %s12129_s9 }
  0x68   : > { %s12131_s25 = scalar_lea.hbm %s12130_s9, 64  ;;  %p12137_p12 = scmp.lt.s32.totalorder %s12130_s9, %s18191_s5 }
  0x69   : > { %p12132_p8 = scmp.ne.s32.totalorder %s12130_s9, %s12131_s25  ;;  %p12138_p2 = scmp.lt.s32.totalorder %s12136_s17, %s12131_s25 }
  0x6b   : > { %p12134_p10 = pnand %p12133_p9, %p12132_p8  ;;  %p12139_p5 = por %p12138_p2, %p12137_p12 }
  0x6d   : > { %p12135_p11 = pneg %p12134_p10 }
  0x6f   : > { %p12140_p4 = pnand %p12139_p5, %p12135_p11 }
  0x71   : > { %12143 = shalt.err (!%p12140_p4)
}
  0x72   : > { %s12340_s16 = smov 128   ;;  %s12341_s23 = smov 8  }
  0x73   : > { %11033 = dma.hbm_to_vmem [thread:$0]  (!%p12627_p7), %s847_s26, 1024, %s849_s7, %s836_s22, %s12340_s16, %s12340_s16, %s12341_s23  }
  0x74   : > { %s869_s1 = sshll.u32 %s868_s20, 4  ;;  %s862_s6 = scalar_lea.vmem [#allocation5], %s12618_s24  ;;  %s870_s1 = int_to_ptr.hbm [resolvable:$true] %s869_s1 }
  0x75   : > { %s871_s21 = sshll.u32 %s862_s6, 4  ;;  %s858_s28 = sand.u32 1, %s12319_s30   ;;  %s872_s21 = int_to_ptr.vmem [resolvable:$true] %s871_s21 }
  0x76   : > { %s859_s4 = scalar_lea.sflag [#allocation6], %s858_s28  ;;  %s12159_s9 = sshra.s32 %s870_s1, 4  ;;  %s12160_s9 = int_to_ptr.hbm [resolvable:$true] %s12159_s9 }
  0x77   : > { %s12161_s25 = scalar_lea.hbm %s12160_s9, 64  ;;  %s12166_s5 = scalar_lea.hbm %s18193_s18, 128 }
  0x78   : > { %p12162_p8 = scmp.ne.s32.totalorder %s12160_s9, %s12161_s25  ;;  %p12167_p11 = scmp.lt.s32.totalorder %s12160_s9, %s18193_s18 }
  0x79   : > { %p12168_p12 = scmp.lt.s32.totalorder %s12166_s5, %s12161_s25 }
  0x7a   : > { %p12164_p4 = pnand %p12162_p8, %p12133_p9 }
  0x7b   : > { %p12169_p2 = por %p12168_p12, %p12167_p11 }
  0x7c   : > { %p12165_p10 = pneg %p12164_p4 }
  0x7e   : > { %p12170_p5 = pnand %p12169_p2, %p12165_p10 }
  0x80   : > { %12173 = shalt.err (!%p12170_p5)
}
  0x81   : > { %11036 = dma.hbm_to_vmem [thread:$0]  (!%p12627_p7), %s870_s1, 1024, %s872_s21, %s859_s4, %s12340_s16, %s12340_s16, %s12341_s23  }
  0x82   : > { %883 = sbr.rel (%p12507_p3) target bundleno = 5964 (0x174c), region = 116 }
  0x87   : > { %s12663_s6 = sand.u32 1, %s12311_s2  }
  0x88   : > { %s12666_s24 = sshll.u32 %s12663_s6, 6  ;;  %s886_s26 = scalar_lea.sflag [#allocation3], %s12663_s6 }
  0x89   : > { %s12670_s5 = scalar_lea.vmem [#allocation2], %s12666_s24 }
  0x8a   : > { %12262 = dma.done.wait (%p12604_p13), %s886_s26, 1024  }
  0x8b   : > { %12264 = vsyncadd (%p12604_p13), %s886_s26, 4294966272  ;;  %s895_s27 = sand.u32 1, %s12502_s8   ;;  %s12678_s15 = scalar_lea.vmem [#allocation5], %s12666_s24 }
  0x8c   : > { %s896_s7 = scalar_lea.sflag [#allocation6], %s895_s27 }
  0x8d   : > { %12266 = dma.done.wait (%p12604_p13), %s896_s7, 1024  }
  0x8e   : > { %12268 = vsyncadd (%p12604_p13), %s896_s7, 4294966272 }
  0x8f   : > { %12270 = dma.done.wait (%p75_p1), [#allocation6], 16  }
  0x90   : > { %12272 = vsyncadd (%p75_p1), [#allocation6], 4294967280 }
  0x91   : > { %12274 = dma.done.wait (%p75_p1), [#allocation9], 32  }
  0x92   : > { %12276 = vsyncadd (%p75_p1), [#allocation9], 4294967264 }
  0x93   : > { %12278 = dma.done.wait (%p75_p1), [#allocation12], 3088  }
  0x94   : > { %12280 = vsyncadd (%p75_p1), [#allocation12], 4294964208 }
  0x95   : > { %12282 = dma.done.wait (%p75_p1), [#allocation15], 3120  }
  0x96   : > { %12284 = vsyncadd (%p75_p1), [#allocation15], 4294964176 }
  0x97   : > { %12286 = dma.done.wait (%p75_p1), [#allocation18], 1072  }
  0x98   : > { %12288 = vsyncadd (%p75_p1), [#allocation18], 4294966224 }
  0x99   : > { %12290 = dma.done.wait (%p75_p1), [#allocation21], 8192  }
  0x9a   : > { %12292 = vsyncadd (%p75_p1), [#allocation21], 4294959104 }
  0x9b   : > { %12294 = dma.done.wait (%p75_p1), [#allocation24], 8192  }
  0x9c   : > { %12296 = vsyncadd (%p75_p1), [#allocation24], 4294959104  ;;  %v1049_v0 = vld [vmem:[%s12670_s5 + $0x10] sm:$0xff]  ;;  %v1047_v1 = vld [vmem:[%s12670_s5] sm:$0xff]  ;;  %v12342_v7 = vmov 128.0   ;;  %s12343_s3 = smov 96  }
  0x9d   : > { %1069 = vadd.xlane.f32.xlu1 %v1049_v0  ;;  %1065 = vadd.xlane.f32.xlu0 %v1047_v1  ;;  %v1051_v2 = vld [vmem:[%s12670_s5 + $0x20] sm:$0xff]  ;;  %v1050_v3 = vld [vmem:[%s12670_s5 + $0x18] sm:$0xff]  ;;  %v1048_v4 = vld [vmem:[%s12670_s5 + $0x8] sm:$0xff]  ;;  %11262 = vrcp.f32 %v12342_v7  ;;  %s12344_s16 = smov 64   ;;  %s12345_s23 = smov 32  }
  0x9e   : > { %1073 = vadd.xlane.f32.xlu2 %v1051_v2  ;;  %v1052_v5 = vld [vmem:[%s12670_s5 + $0x28] sm:$0xff]  ;;  %v1053_v6 = vld [vmem:[%s12670_s5 + $0x30] sm:$0xff]  ;;  %v12735_v28 = vld [vmem:[%s12670_s5 + $0x38] sm:$0xff]  ;;  %s18237_s22 = sld [smem:[#allocation72_spill]]  ;;  %s16340_s9 = scalar_lea.vmem [#allocation26], %s12666_s24 }
  0x9f   : > { %v12750_v36 = vld [vmem:[%s12678_s15] sm:$0xff]  ;;  %v12761_v42 = vld [vmem:[%s12678_s15 + $0x18] sm:$0xff]  ;;  %v12764_v43 = vld [vmem:[%s12678_s15 + $0x8] sm:$0xff]  ;;  %s18371_s1 = sld [smem:[#allocation70_spill]]  ;;  %s18001_s27 = scalar_lea.vmem [#allocation27], %s12666_s24 }
  0xa0   : > { %v12773_v46 = vld [vmem:[%s12678_s15 + $0x20] sm:$0xff]  ;;  %v12776_v47 = vld [vmem:[%s12678_s15 + $0x10] sm:$0xff]  ;;  %v12781_v48 = vld [vmem:[%s12678_s15 + $0x28] sm:$0xff]  ;;  %s18372_s4 = sld [smem:[#allocation74_spill]]  ;;  %s9541_s24 = sshll.u32 %s16340_s9, 4  ;;  %s9542_s24 = int_to_ptr.vmem [resolvable:$true] %s9541_s24 }
  0xa1   : > { %v12785_v49 = vld [vmem:[%s12678_s15 + $0x30] sm:$0xff]  ;;  %v10756_v51 = vld [vmem:[#allocation13 + $0xb0] sm:$0xf0]  ;;  %v9944_v54 = vld [vmem:[#allocation13 + $0xb4] sm:$0xf0]  ;;  %s18379_s10 = sld [smem:[#allocation76_spill]] }
  0xa2   : > { %v9942_v50 = vld [vmem:[#allocation13 + $0xa8] sm:$0xf]  ;;  %v10755_v52 = vld [vmem:[#allocation13 + $0xac] sm:$0xf]  ;;  %v9930_v56 = vld [vmem:[#allocation13 + $0x90] sm:$0xf] }
  0xa3   : > { %v11263_v8 = vpop.eup %11262  ;;  %v9943_v53 = vor.u32 %v10756_v51, %v9942_v50  ;;  %v9947_v55 = vor.u32 %v10755_v52, %v9944_v54  ;;  %v10753_v57 = vld [vmem:[#allocation13 + $0x98] sm:$0xf0]  ;;  %v10752_v58 = vld [vmem:[#allocation13 + $0x94] sm:$0xf]  ;;  %v9932_v60 = vld [vmem:[#allocation13 + $0x9c] sm:$0xf0] }
  0xa4   : > { %v1082_v9 = vmul.f32 128.0, %v11263_v8  ;;  %vm1086_vm0 = vweird.f32 %v11263_v8  ;;  %v9931_v59 = vor.u32 %v10753_v57, %v9930_v56  ;;  %v9935_v61 = vor.u32 %v10752_v58, %v9932_v60  ;;  %v9918_v62 = vld [vmem:[#allocation13 + $0x78] sm:$0xf]  ;;  %v10750_v63 = vld [vmem:[#allocation13 + $0x80] sm:$0xf0]  ;;  %s10919_s7 = sshll.u32 %s12502_s8, 6 }
  0xa5   : > { %1071 = vadd.xlane.f32.xlu1 %v1050_v3  ;;  %1067 = vadd.xlane.f32.xlu0 %v1048_v4  ;;  %v10734_v50 = vld [vmem:[#allocation13 + $0x4] sm:$0xf]  ;;  %v9860_v51 = vld [vmem:[#allocation13 + $0xc] sm:$0xf0]  ;;  %s9523_s21 = scalar_lea.sflag [#allocation4], %s12663_s6 }
  0xa6   : > { %1075 = vadd.xlane.f32.xlu2 %v1052_v5  ;;  %v1083_v10 = vsub.f32 1.0, %v1082_v9  ;;  %1614 = vmatpush.bf16.msra.mxu0 %v9943_v53  ;;  %v9863_v52 = vor.u32 %v10734_v50, %v9860_v51 }
  0xa7   : > { %1643 = vmatpush.bf16.msra.mxu1 %v9947_v55  ;;  %10922 = vmatpush.bf16.msra.mxu2 %v9947_v55 }
  0xa8   : > { %v1084_v11 = vmul.f32 %v11263_v8, %v1083_v10  ;;  %v9894_v10 = vld [vmem:[#allocation13 + $0x48] sm:$0xf] }
  0xaa   : > { %v1085_v12 = vadd.f32 %v11263_v8, %v1084_v11  ;;  %1615 = vmatpush.bf16.msra.mxu0 %v9931_v59  ;;  %v10744_v11 = vld [vmem:[#allocation13 + $0x50] sm:$0xf0] }
  0xab   : > { %1644 = vmatpush.bf16.msra.mxu1 %v9935_v61  ;;  %10923 = vmatpush.bf16.msra.mxu2 %v9935_v61 }
  0xac   : > { %v12719_v13 = vsel %vm1086_vm0, %v11263_v8, %v1085_v12  ;;  %v9908_v8 = vld [vmem:[#allocation13 + $0x6c] sm:$0xf0]  ;;  %v10743_v12 = vld [vmem:[#allocation13 + $0x4c] sm:$0xf] }
  0xad   : > { %18194 = vst [vmem:[#allocation42_spill] sm:$0xff] %v12719_v13 }
  0xae   : > { %1077 = vadd.xlane.f32.xlu2 %v1053_v6 }
 0x110   : > { %v1070_v14 = vpop.xlane.xlu1 %1069  ;;  %v1066_v15 = vpop.xlane.xlu0 %1065 }
 0x111   : > { %v1088_v16 = vmul.f32 %v12719_v13, %v1066_v15  ;;  %v1074_v18 = vpop.xlane.xlu2 %1073  ;;  %v1090_v27 = vmul.f32 %v12719_v13, %v1070_v14  ;;  %v9895_v14 = vor.u32 %v10744_v11, %v9894_v10  ;;  %v9896_v15 = vld [vmem:[#allocation13 + $0x54] sm:$0xf0] }
 0x112   : > { %v1092_v26 = vmul.f32 %v12719_v13, %v1074_v18  ;;  %v9882_v18 = vld [vmem:[#allocation13 + $0x30] sm:$0xf] }
 0x113   : > { %v12722_v17 = vsub.f32 %v1047_v1, %v1088_v16  ;;  %v12744_v33 = vsub.f32 %v1049_v0, %v1090_v27  ;;  %v10749_v0 = vld [vmem:[#allocation13 + $0x7c] sm:$0xf]  ;;  %v9919_v1 = vor.u32 %v10750_v63, %v9918_v62  ;;  %v9899_v16 = vor.u32 %v10743_v12, %v9896_v15  ;;  %v10738_v27 = vld [vmem:[#allocation13 + $0x20] sm:$0xf0] }
 0x114   : > { %v12742_v32 = vsub.f32 %v1051_v2, %v1092_v26  ;;  %v9920_v2 = vld [vmem:[#allocation13 + $0x84] sm:$0xf0]  ;;  %v9870_v26 = vld [vmem:[#allocation13 + $0x18] sm:$0xf] }
 0x115   : > { %v1104_v19 = vmul.f32 %v12722_v17, %v12722_v17  ;;  %v1106_v37 = vmul.f32 %v12744_v33, %v12744_v33  ;;  %1616 = vmatpush.bf16.msra.mxu0 %v9919_v1 }
 0x116   : > { %v1108_v34 = vmul.f32 %v12742_v32, %v12742_v32 }
 0x117   : > { %1112 = vadd.xlane.f32.xlu0 %v1104_v19  ;;  %v10741_v19 = vld [vmem:[#allocation13 + $0x38] sm:$0xf0] }
 0x118   : > { %v1072_v20 = vpop.xlane.xlu1 %1071  ;;  %v1068_v21 = vpop.xlane.xlu0 %1067 }
 0x119   : > { %v1091_v22 = vmul.f32 %v12719_v13, %v1072_v20  ;;  %v1089_v23 = vmul.f32 %v12719_v13, %v1068_v21  ;;  %v1076_v31 = vpop.xlane.xlu2 %1075  ;;  %v10740_v20 = vld [vmem:[#allocation13 + $0x34] sm:$0xf]  ;;  %v9883_v21 = vor.u32 %v10741_v19, %v9882_v18 }
 0x11a   : > { %v1093_v35 = vmul.f32 %v12719_v13, %v1076_v31  ;;  %v9871_v31 = vor.u32 %v10738_v27, %v9870_v26  ;;  %v10046_v19 = vld [vmem:[#allocation16 + $0xb0] sm:$0xf] }
 0x11b   : > { %v12728_v24 = vsub.f32 %v1050_v3, %v1091_v22  ;;  %v12730_v25 = vsub.f32 %v1048_v4, %v1089_v23  ;;  %v9923_v3 = vor.u32 %v10749_v0, %v9920_v2  ;;  %v9906_v4 = vld [vmem:[#allocation13 + $0x60] sm:$0xf] }
 0x11c   : > { %v12755_v38 = vsub.f32 %v1052_v5, %v1093_v35  ;;  %v10747_v5 = vld [vmem:[#allocation13 + $0x68] sm:$0xf0]  ;;  %v9884_v22 = vld [vmem:[#allocation13 + $0x3c] sm:$0xf0] }
 0x11d   : > { %v1107_v29 = vmul.f32 %v12728_v24, %v12728_v24  ;;  %v1105_v30 = vmul.f32 %v12730_v25, %v12730_v25  ;;  %1645 = vmatpush.bf16.msra.mxu1 %v9923_v3  ;;  %10924 = vmatpush.bf16.msra.mxu2 %v9923_v3  ;;  %v9907_v7 = vor.u32 %v10747_v5, %v9906_v4 }
 0x11e   : > { %v1109_v40 = vmul.f32 %v12755_v38, %v12755_v38  ;;  %v9887_v23 = vor.u32 %v10740_v20, %v9884_v22 }
 0x11f   : > { %1118 = vadd.xlane.f32.xlu2 %v1107_v29  ;;  %1079 = vadd.xlane.f32.xlu0 %v12735_v28  ;;  %v10737_v29 = vld [vmem:[#allocation13 + $0x1c] sm:$0xf] }
 0x120   : > { %1114 = vadd.xlane.f32.xlu1 %v1105_v30  ;;  %1617 = vmatpush.bf16.msra.mxu0 %v9907_v7 }
 0x121   : > { %v1078_v39 = vpop.xlane.xlu2 %1077 }
 0x122   : > { %v1094_v41 = vmul.f32 %v12719_v13, %v1078_v39 }
 0x124   : > { %v12767_v44 = vsub.f32 %v1053_v6, %v1094_v41  ;;  %v10746_v6 = vld [vmem:[#allocation13 + $0x64] sm:$0xf]  ;;  %1618 = vmatpush.bf16.msra.mxu0 %v9895_v14  ;;  %v10735_v41 = vld [vmem:[#allocation13 + $0x8] sm:$0xf0] }
 0x125   : > { %v9911_v9 = vor.u32 %v10746_v6, %v9908_v8 }
 0x126   : > { %v1110_v45 = vmul.f32 %v12767_v44, %v12767_v44 }
 0x127   : > { %1120 = vadd.xlane.f32.xlu2 %v1108_v34  ;;  %1260 = vadd.xlane.f32.xlu0 %v12750_v36  ;;  %v9872_v34 = vld [vmem:[#allocation13 + $0x24] sm:$0xf0] }
 0x128   : > { %1116 = vadd.xlane.f32.xlu1 %v1106_v37  ;;  %1646 = vmatpush.bf16.msra.mxu1 %v9911_v9  ;;  %v9875_v37 = vor.u32 %v10737_v29, %v9872_v34 }
 0x129   : > { %10925 = vmatpush.bf16.msra.mxu2 %v9911_v9  ;;  %1619 = vmatpush.bf16.msra.mxu0 %v9883_v21 }
 0x12c   : > { %1647 = vmatpush.bf16.msra.mxu1 %v9899_v16 }
 0x12d   : > { %10926 = vmatpush.bf16.msra.mxu2 %v9899_v16  ;;  %1620 = vmatpush.bf16.msra.mxu0 %v9871_v31 }
 0x12f   : > { %1266 = vadd.xlane.f32.xlu2 %v12761_v42  ;;  %1122 = vadd.xlane.f32.xlu0 %v1109_v40  ;;  %v9858_v40 = vld [vmem:[#allocation13] sm:$0xf] }
 0x130   : > { %1262 = vadd.xlane.f32.xlu1 %v12764_v43  ;;  %1648 = vmatpush.bf16.msra.mxu1 %v9887_v23 }
 0x131   : > { %10927 = vmatpush.bf16.msra.mxu2 %v9887_v23 }
 0x134   : > { %1649 = vmatpush.bf16.msra.mxu1 %v9875_v37 }
 0x135   : > { %10928 = vmatpush.bf16.msra.mxu2 %v9875_v37 }
 0x137   : > { %1268 = vadd.xlane.f32.xlu2 %v12773_v46  ;;  %1124 = vadd.xlane.f32.xlu0 %v1110_v45  ;;  %v9859_v45 = vor.u32 %v10735_v41, %v9858_v40 }
 0x138   : > { %1264 = vadd.xlane.f32.xlu1 %v12776_v47  ;;  %1650 = vmatpush.bf16.msra.mxu1 %v9863_v52 }
 0x139   : > { %1621 = vmatpush.bf16.msra.mxu0 %v9859_v45  ;;  %10929 = vmatpush.bf16.msra.mxu2 %v9863_v52 }
 0x13f   : > { %1270 = vadd.xlane.f32.xlu0 %v12781_v48 }
 0x147   : > { %1272 = vadd.xlane.f32.xlu0 %v12785_v49 }
 0x18a   : > { %v1113_v30 = vpop.xlane.xlu0 %1112 }
 0x18b   : > { %v1128_v35 = vmul.f32 %v1113_v30, %v12719_v13 }
 0x18d   : > { %v1136_v39 = vadd.f32 1e-05, %v1128_v35 }
 0x18f   : > { %11264 = vrsqrt.f32 %v1136_v39  ;;  %vm1150_vm2 = vweird.f32 %v1136_v39 }
 0x192   : > { %v1119_v53 = vpop.xlane.xlu2 %1118  ;;  %v1080_v54 = vpop.xlane.xlu0 %1079 }
 0x193   : > { %v1131_v55 = vmul.f32 %v1119_v53, %v12719_v13  ;;  %v1115_v56 = vpop.xlane.xlu1 %1114  ;;  %v1095_v57 = vmul.f32 %v12719_v13, %v1080_v54  ;;  %v12849_v53 = vld [vmem:[#allocation7] ss:$0 sm:$0xff] }
 0x194   : > { %v1129_v58 = vmul.f32 %v1115_v56, %v12719_v13 }
 0x195   : > { %v11265_v59 = vpop.eup %11264  ;;  %v12792_v60 = vadd.f32 1e-05, %v1131_v55  ;;  %v12795_v61 = vsub.f32 %v12735_v28, %v1095_v57 }
 0x196   : > { %v1145_v62 = vmul.f32 %v11265_v59, %v1136_v39  ;;  %v1137_v63 = vadd.f32 1e-05, %v1129_v58  ;;  %vm1151_vm1 = vweird.f32 %v11265_v59  ;;  %v12858_v58 = vld [vmem:[%s12678_s15 + $0x38] sm:$0xff] }
 0x197   : > { %11266 = vrsqrt.f32 %v12792_v60  ;;  %v1111_v0 = vmul.f32 %v12795_v61, %v12795_v61  ;;  %vm12816_vm3 = vmor %vm1150_vm2, %vm1151_vm1  ;;  %vm1180_vm11 = vweird.f32 %v12792_v60 }
 0x198   : > { %v1146_v1 = vmul.f32 %v11265_v59, %v1145_v62  ;;  %11268 = vrsqrt.f32 %v1137_v63  ;;  %vm1160_vm4 = vweird.f32 %v1137_v63 }
 0x199   : > { %1126 = vadd.xlane.f32.xlu1 %v1111_v0 }
 0x19a   : > { %v1147_v2 = vmul.f32 0.5, %v1146_v1  ;;  %v1121_v3 = vpop.xlane.xlu2 %1120  ;;  %v1261_v4 = vpop.xlane.xlu0 %1260 }
 0x19b   : > { %v1132_v5 = vmul.f32 %v1121_v3, %v12719_v13  ;;  %v1117_v6 = vpop.xlane.xlu1 %1116  ;;  %v1276_v7 = vmul.f32 %v1261_v4, %v12719_v13 }
 0x19c   : > { %v1148_v28 = vsub.f32 1.5, %v1147_v2  ;;  %v1130_v8 = vmul.f32 %v1117_v6, %v12719_v13 }
 0x19d   : > { %v12803_v9 = vpop.eup %11266  ;;  %v12805_v10 = vadd.f32 1e-05, %v1132_v5  ;;  %v12808_v11 = vsub.f32 %v12750_v36, %v1276_v7  ;;  %v12874_v7 = vld [vmem:[#allocation8] ss:$0 sm:$0xff] }
 0x19e   : > { %v11269_v12 = vpop.eup %11268  ;;  %v1149_v14 = vmul.f32 %v11265_v59, %v1148_v28  ;;  %v12810_v15 = vadd.f32 1e-05, %v1130_v8  ;;  %v1175_v16 = vmul.f32 %v12803_v9, %v12792_v60  ;;  %vm1181_vm12 = vweird.f32 %v12803_v9 }
 0x19f   : > { %v1155_v18 = vmul.f32 %v11269_v12, %v1137_v63  ;;  %11270 = vrsqrt.f32 %v12805_v10  ;;  %v1292_v20 = vmul.f32 %v12808_v11, %v12808_v11  ;;  %vm1161_vm5 = vweird.f32 %v11269_v12  ;;  %vm12913_vm15 = vmor %vm1180_vm11, %vm1181_vm12 }
 0x1a0   : > { %11272 = vrsqrt.f32 %v12810_v15  ;;  %v1153_v21 = vsel %vm12816_vm3, %v11265_v59, %v1149_v14  ;;  %v1176_v26 = vmul.f32 %v12803_v9, %v1175_v16  ;;  %vm12839_vm6 = vmor %vm1160_vm4, %vm1161_vm5  ;;  %vm1190_vm7 = vweird.f32 %v12805_v10 }
 0x1a1   : > { %v1156_v36 = vmul.f32 %v11269_v12, %v1155_v18  ;;  %1300 = vadd.xlane.f32.xlu1 %v1292_v20  ;;  %v1224_v52 = vmul.f32 %v1153_v21, %v12722_v17  ;;  %vm1170_vm8 = vweird.f32 %v12810_v15  ;;  %v10754_v21 = vld [vmem:[#allocation13 + $0xa0] sm:$0xf0] }
 0x1a2   : > { %v1267_v22 = vpop.xlane.xlu2 %1266  ;;  %v1123_v23 = vpop.xlane.xlu0 %1122 }
 0x1a3   : > { %v1157_v27 = vmul.f32 0.5, %v1156_v36  ;;  %v1279_v29 = vmul.f32 %v1267_v22, %v12719_v13  ;;  %v1263_v30 = vpop.xlane.xlu1 %1262  ;;  %v1133_v31 = vmul.f32 %v1123_v23, %v12719_v13  ;;  %v1235_v2 = vmul.f32 %v12849_v53, %v1224_v52 }
 0x1a4   : > { %v1277_v34 = vmul.f32 %v1263_v30, %v12719_v13 }
 0x1a5   : > { %v12828_v35 = vpop.eup %11270  ;;  %v1158_v37 = vsub.f32 1.5, %v1157_v27  ;;  %v12830_v39 = vadd.f32 1e-05, %v1133_v31  ;;  %v12833_v40 = vsub.f32 %v12761_v42, %v1279_v29  ;;  %v1177_v42 = vmul.f32 0.5, %v1176_v26 }
 0x1a6   : > { %v12835_v41 = vpop.eup %11272  ;;  %v1185_v50 = vmul.f32 %v12828_v35, %v12805_v10  ;;  %v12846_v51 = vsub.f32 %v12764_v43, %v1277_v34  ;;  %vm1191_vm9 = vweird.f32 %v12828_v35  ;;  %v1246_v22 = vadd.f32 %v12874_v7, %v1235_v2 }
 0x1a7   : > { %v1159_v54 = vmul.f32 %v11269_v12, %v1158_v37  ;;  %v1165_v55 = vmul.f32 %v12835_v41, %v12810_v15  ;;  %11274 = vrsqrt.f32 %v12830_v39  ;;  %v1295_v57 = vmul.f32 %v12833_v40, %v12833_v40  ;;  %vm12889_vm13 = vmor %vm1190_vm7, %vm1191_vm9 }
 0x1a8   : > { %v1186_v56 = vmul.f32 %v12828_v35, %v1185_v50  ;;  %v1293_v59 = vmul.f32 %v12846_v51, %v12846_v51  ;;  %v1178_v3 = vsub.f32 1.5, %v1177_v42  ;;  %vm1171_vm10 = vweird.f32 %v12835_v41 }
 0x1a9   : > { %v1163_v43 = vsel %vm12839_vm6, %v11269_v12, %v1159_v54  ;;  %v1166_v17 = vmul.f32 %v12835_v41, %v1165_v55  ;;  %1306 = vadd.xlane.f32.xlu0 %v1295_v57  ;;  %1274 = vadd.xlane.f32.xlu1 %v12858_v58  ;;  %vm12900_vm14 = vmor %vm1170_vm8, %vm1171_vm10  ;;  %vm1200_vm0 = vweird.f32 %v12830_v39 }
 0x1aa   : > { %v1187_v62 = vmul.f32 0.5, %v1186_v56  ;;  %v1269_v63 = vpop.xlane.xlu2 %1268  ;;  %v12867_v0 = vpop.xlane.xlu0 %1124  ;;  %v1225_v1 = vmul.f32 %v1163_v43, %v12730_v25  ;;  %1302 = vadd.xlane.f32.xlu2 %v1293_v59  ;;  %v1179_v23 = vmul.f32 %v12803_v9, %v1178_v3 }
 0x1ab   : > { %v1167_v4 = vmul.f32 0.5, %v1166_v17  ;;  %v1280_v5 = vmul.f32 %v1269_v63, %v12719_v13  ;;  %v1265_v6 = vpop.xlane.xlu1 %1264 }
 0x1ac   : > { %v1188_v28 = vsub.f32 1.5, %v1187_v62  ;;  %v1278_v8 = vmul.f32 %v1265_v6, %v12719_v13  ;;  %v1236_v25 = vmul.f32 %v12849_v53, %v1225_v1  ;;  %v10038_v6 = vld [vmem:[#allocation16 + $0xa8] sm:$0xf] }
 0x1ad   : > { %v11275_v12 = vpop.eup %11274  ;;  %v1168_v14 = vsub.f32 1.5, %v1167_v4  ;;  %v12881_v16 = vsub.f32 %v12773_v46, %v1280_v5  ;;  %v9950_v4 = vld [vmem:[#allocation13 + $0xb0] sm:$0xf]  ;;  %v10757_v5 = vld [vmem:[#allocation13 + $0xb8] sm:$0xf0] }
 0x1ae   : > { %v1189_v18 = vmul.f32 %v12828_v35, %v1188_v28  ;;  %v1195_v36 = vmul.f32 %v11275_v12, %v12830_v39  ;;  %v12895_v20 = vsub.f32 %v12776_v47, %v1278_v8  ;;  %v1247_v10 = vadd.f32 %v12874_v7, %v1236_v25  ;;  %v10780_v8 = vld [vmem:[#allocation16 + $0xb0] sm:$0xf0]  ;;  %v10779_v25 = vld [vmem:[#allocation16 + $0xac] sm:$0xf] }
 0x1af   : > { %v1169_v46 = vmul.f32 %v12835_v41, %v1168_v14  ;;  %v1296_v47 = vmul.f32 %v12881_v16, %v12881_v16  ;;  %vm1201_vm1 = vweird.f32 %v11275_v12  ;;  %v1183_v39 = vsel %vm12913_vm15, %v12803_v9, %v1179_v23  ;;  %v10777_v23 = vld [vmem:[#allocation16 + $0x98] sm:$0xf0] }
 0x1b0   : > { %v1196_v26 = vmul.f32 %v11275_v12, %v1195_v36  ;;  %v1294_v27 = vmul.f32 %v12895_v20, %v12895_v20  ;;  %v12918_v29 = vpack.c.bf16 %v1247_v10, %v1246_v22  ;;  %v1193_v30 = vsel %vm12889_vm13, %v12828_v35, %v1189_v18  ;;  %vm1202_vm2 = vmor %vm1200_vm0, %vm1201_vm1  ;;  %v10781_v36 = vld [vmem:[#allocation16 + $0xb8] sm:$0xf0]  ;;  %v10026_v22 = vld [vmem:[#allocation16 + $0x90] sm:$0xf] }
 0x1b1   : > { %v1173_v31 = vsel %vm12900_vm14, %v12835_v41, %v1169_v46  ;;  %1308 = vadd.xlane.f32.xlu1 %v1296_v47  ;;  %v1228_v50 = vmul.f32 %v1193_v30, %v12742_v32  ;;  %v1227_v54 = vmul.f32 %v1183_v39, %v12728_v24  ;;  %v9951_v28 = vor.u32 %v10757_v5, %v9950_v4  ;;  %v10034_v30 = vld [vmem:[#allocation16 + $0x98] sm:$0xf]  ;;  %v10010_v4 = vld [vmem:[#allocation16 + $0x68] sm:$0xf]  ;;  %v10772_v5 = vld [vmem:[#allocation16 + $0x70] sm:$0xf0] }
 0x1b2   : > { %v1197_v34 = vmul.f32 0.5, %v1196_v26  ;;  %v1271_v37 = vpop.xlane.xlu0 %1270  ;;  %1304 = vadd.xlane.f32.xlu2 %v1294_v27  ;;  %1622 = vmatmul.bf16.vlgmr.msra.gmra.mxu0 %v12918_v29  ;;  %v1226_v41 = vmul.f32 %v1173_v31, %v12744_v33  ;;  %v10039_v14 = vor.u32 %v10780_v8, %v10038_v6  ;;  %v10047_v46 = vor.u32 %v10781_v36, %v10046_v19  ;;  %v10776_v26 = vld [vmem:[#allocation16 + $0x94] sm:$0xf]  ;;  %v10028_v27 = vld [vmem:[#allocation16 + $0x9c] sm:$0xf0] }
 0x1b3   : > { %v1281_v60 = vmul.f32 %v1271_v37, %v12719_v13  ;;  %1651 = vmatmul.bf16.vlgmr.msra.gmra.mxu1 %v12918_v29  ;;  %v1239_v57 = vmul.f32 %v12849_v53, %v1228_v50  ;;  %v1238_v33 = vmul.f32 %v12849_v53, %v1227_v54  ;;  %1672 = vmatpush.bf16.msrb.mxu2 %v9951_v28  ;;  %v10778_v31 = vld [vmem:[#allocation16 + $0xa0] sm:$0xf0]  ;;  %v9926_v37 = vld [vmem:[#allocation13 + $0x80] sm:$0xf]  ;;  %v10014_v39 = vld [vmem:[#allocation16 + $0x78] sm:$0xf] }
 0x1b4   : > { %v1198_v45 = vsub.f32 1.5, %v1197_v34  ;;  %v1237_v9 = vmul.f32 %v12849_v53, %v1226_v41  ;;  %1869 = vmatpush.bf16.msra.mxu3 %v10039_v14  ;;  %1927 = vmatpush.bf16.msrb.mxu1 %v10047_v46  ;;  %v10027_v47 = vor.u32 %v10777_v23, %v10026_v22  ;;  %v10031_v15 = vor.u32 %v10776_v26, %v10028_v27  ;;  %v10774_v50 = vld [vmem:[#allocation16 + $0x80] sm:$0xf0]  ;;  %v9990_v14 = vld [vmem:[#allocation16 + $0x48] sm:$0xf] }
 0x1b5   : > { %v12933_v35 = vsub.f32 %v12781_v48, %v1281_v60  ;;  %v1250_v59 = vadd.f32 %v12874_v7, %v1239_v57  ;;  %v10035_v34 = vor.u32 %v10778_v31, %v10034_v30  ;;  %v10751_v60 = vld [vmem:[#allocation13 + $0x88] sm:$0xf0]  ;;  %v10015_v54 = vor.u32 %v10774_v50, %v10014_v39  ;;  %v10768_v36 = vld [vmem:[#allocation16 + $0x50] sm:$0xf0]  ;;  %v10767_v46 = vld [vmem:[#allocation16 + $0x4c] sm:$0xf] }
 0x1b6   : > { %v1199_v52 = vmul.f32 %v11275_v12, %v1198_v45  ;;  %v1248_v17 = vadd.f32 %v12874_v7, %v1237_v9  ;;  %v9927_v41 = vor.u32 %v10751_v60, %v9926_v37  ;;  %v10022_v9 = vld [vmem:[#allocation16 + $0x80] sm:$0xf]  ;;  %v10011_v6 = vor.u32 %v10772_v5, %v10010_v4  ;;  %v10769_v23 = vld [vmem:[#allocation16 + $0x58] sm:$0xf0]  ;;  %v9978_v31 = vld [vmem:[#allocation16 + $0x30] sm:$0xf] }
 0x1b7   : > { %v1297_v42 = vmul.f32 %v12933_v35, %v12933_v35  ;;  %v10742_v30 = vld [vmem:[#allocation13 + $0x40] sm:$0xf0]  ;;  %v10765_v37 = vld [vmem:[#allocation16 + $0x38] sm:$0xf0]  ;;  %v10764_v60 = vld [vmem:[#allocation16 + $0x34] sm:$0xf] }
 0x1b8   : > { %v1203_v55 = vsel %vm1202_vm2, %v11275_v12, %v1199_v52  ;;  %v10040_v12 = vld [vmem:[#allocation16 + $0xb4] sm:$0xf0]  ;;  %1870 = vmatpush.bf16.msra.mxu3 %v10027_v47  ;;  %1928 = vmatpush.bf16.msrb.mxu1 %v10035_v34  ;;  %v10773_v52 = vld [vmem:[#allocation16 + $0x7c] sm:$0xf]  ;;  %v9980_v39 = vld [vmem:[#allocation16 + $0x3c] sm:$0xf0] }
 0x1b9   : > { %v1229_v56 = vmul.f32 %v1203_v55, %v12755_v38  ;;  %v1249_v38 = vadd.f32 %v12874_v7, %v1238_v33  ;;  %v10043_v18 = vor.u32 %v10779_v25, %v10040_v12  ;;  %v10748_v33 = vld [vmem:[#allocation13 + $0x70] sm:$0xf0]  ;;  %v9902_v25 = vld [vmem:[#allocation13 + $0x50] sm:$0xf]  ;;  %v10745_v12 = vld [vmem:[#allocation13 + $0x58] sm:$0xf0]  ;;  %v9983_v50 = vor.u32 %v10764_v60, %v9980_v39 }
 0x1ba   : > { %v1273_v43 = vpop.xlane.xlu0 %1272  ;;  %1310 = vadd.xlane.f32.xlu2 %v1297_v42  ;;  %v10016_v42 = vld [vmem:[#allocation16 + $0x84] sm:$0xf0]  ;;  %v9903_v19 = vor.u32 %v10745_v12, %v9902_v25  ;;  %v10763_v4 = vld [vmem:[#allocation16 + $0x28] sm:$0xf0]  ;;  %v9866_v25 = vld [vmem:[#allocation13 + $0x8] sm:$0xf] }
 0x1bb   : > { %v1282_v48 = vmul.f32 %v1273_v43, %v12719_v13  ;;  %v1240_v32 = vmul.f32 %v12849_v53, %v1229_v56  ;;  %v12957_v2 = vpack.c.bf16 %v1249_v38, %v1248_v17  ;;  %1898 = vmatpush.bf16.msrb.mxu0 %v10043_v18  ;;  %v10019_v55 = vor.u32 %v10773_v52, %v10016_v42  ;;  %v10775_v56 = vld [vmem:[#allocation16 + $0x88] sm:$0xf0]  ;;  %v10004_v38 = vld [vmem:[#allocation16 + $0x6c] sm:$0xf0]  ;;  %v9986_v52 = vld [vmem:[#allocation16 + $0x38] sm:$0xf] }
 0x1bc   : > { %v10023_v57 = vor.u32 %v10775_v56, %v10022_v9  ;;  %1871 = vmatpush.bf16.msra.mxu3 %v10015_v54  ;;  %v10766_v42 = vld [vmem:[#allocation16 + $0x40] sm:$0xf0]  ;;  %v9878_v9 = vld [vmem:[#allocation13 + $0x20] sm:$0xf]  ;;  %v10739_v56 = vld [vmem:[#allocation13 + $0x28] sm:$0xf0] }
 0x1bd   : > { %v1251_v24 = vadd.f32 %v12874_v7, %v1240_v32  ;;  %v12950_v62 = vsub.f32 %v12785_v49, %v1282_v48  ;;  %v1134_v49 = vmul.f32 %v12867_v0, %v12719_v13  ;;  %v9938_v0 = vld [vmem:[#allocation13 + $0x98] sm:$0xf]  ;;  %v9914_v48 = vld [vmem:[#allocation13 + $0x68] sm:$0xf]  ;;  %v10002_v32 = vld [vmem:[#allocation16 + $0x60] sm:$0xf] }
 0x1be   : > { %v9939_v10 = vor.u32 %v10754_v21, %v9938_v0  ;;  %1929 = vmatpush.bf16.msrb.mxu1 %v10023_v57  ;;  %v9915_v17 = vor.u32 %v10748_v33, %v9914_v48  ;;  %v9992_v0 = vld [vmem:[#allocation16 + $0x54] sm:$0xf0]  ;;  %v9991_v21 = vor.u32 %v10768_v36, %v9990_v14  ;;  %v9879_v48 = vor.u32 %v10739_v56, %v9878_v9  ;;  %v10762_v33 = vld [vmem:[#allocation16 + $0x20] sm:$0xf0]  ;;  %v10736_v12 = vld [vmem:[#allocation13 + $0x10] sm:$0xf0] }
 0x1bf   : > { %v12953_v63 = vpack.c.bf16 %v1251_v24, %v1250_v59  ;;  %v1298_v1 = vmul.f32 %v12950_v62, %v12950_v62  ;;  %v12965_v3 = vadd.f32 1e-05, %v1134_v49  ;;  %1899 = vmatpush.bf16.msrb.mxu0 %v10031_v15  ;;  %v10771_v59 = vld [vmem:[#allocation16 + $0x68] sm:$0xf0]  ;;  %v10770_v24 = vld [vmem:[#allocation16 + $0x64] sm:$0xf]  ;;  %v9995_v22 = vor.u32 %v10767_v46, %v9992_v0 }
 0x1c0   : > { %1673 = vmatpush.bf16.msrb.mxu2 %v9939_v10  ;;  %v10007_v49 = vor.u32 %v10770_v24, %v10004_v38  ;;  %v9998_v10 = vld [vmem:[#allocation16 + $0x50] sm:$0xf]  ;;  %v9890_v15 = vld [vmem:[#allocation13 + $0x38] sm:$0xf]  ;;  %v9966_v57 = vld [vmem:[#allocation16 + $0x18] sm:$0xf] }
 0x1c1   : > { %1661 = vmatmul.bf16.vlgmr.msra.gmra.mxu2 %v12953_v63  ;;  %1312 = vadd.xlane.f32.xlu0 %v1298_v1  ;;  %11276 = vrsqrt.f32 %v12965_v3  ;;  %v10003_v1 = vor.u32 %v10771_v59, %v10002_v32  ;;  %v9999_v27 = vor.u32 %v10769_v23, %v9998_v10  ;;  %v9891_v34 = vor.u32 %v10742_v30, %v9890_v15  ;;  %v10761_v32 = vld [vmem:[#allocation16 + $0x1c] sm:$0xf]  ;;  %v9954_v36 = vld [vmem:[#allocation16] sm:$0xf]  ;;  %v10759_v46 = vld [vmem:[#allocation16 + $0x8] sm:$0xf0] }
 0x1c2   : > { %1627 = vmatmul.bf16.gmra.mxu0 %v12957_v2  ;;  %1930 = vmatpush.bf16.msrb.mxu1 %v10011_v6  ;;  %vm1210_vm3 = vweird.f32 %v12965_v3  ;;  %v9967_v38 = vor.u32 %v10762_v33, %v9966_v57  ;;  %v10758_v0 = vld [vmem:[#allocation16 + $0x4] sm:$0xf]  ;;  %v10760_v10 = vld [vmem:[#allocation16 + $0x10] sm:$0xf0] }
 0x1c3   : > { %1656 = vmatmul.bf16.gmra.mxu1 %v12957_v2  ;;  %1900 = vmatpush.bf16.msrb.mxu0 %v10019_v55  ;;  %v9987_v55 = vor.u32 %v10766_v42, %v9986_v52 }
 0x1c4   : > { %1674 = vmatpush.bf16.msrb.mxu2 %v9927_v41  ;;  %1872 = vmatpush.bf16.msra.mxu3 %v10003_v1  ;;  %v9979_v41 = vor.u32 %v10765_v37, %v9978_v31 }
 0x1c6   : > { %1931 = vmatpush.bf16.msrb.mxu1 %v9999_v27 }
 0x1c7   : > { %v12968_v45 = vpop.eup %11276  ;;  %1901 = vmatpush.bf16.msrb.mxu0 %v10007_v49  ;;  %v9974_v49 = vld [vmem:[#allocation16 + $0x20] sm:$0xf] }
 0x1c8   : > { %v1205_v43 = vmul.f32 %v12968_v45, %v12965_v3  ;;  %1675 = vmatpush.bf16.msrb.mxu2 %v9915_v17  ;;  %1873 = vmatpush.bf16.msra.mxu3 %v9991_v21  ;;  %vm1211_vm4 = vweird.f32 %v12968_v45  ;;  %v9968_v17 = vld [vmem:[#allocation16 + $0x24] sm:$0xf0]  ;;  %v9975_v6 = vor.u32 %v10763_v4, %v9974_v49  ;;  %v9955_v3 = vor.u32 %v10759_v46, %v9954_v36  ;;  %v9956_v21 = vld [vmem:[#allocation16 + $0xc] sm:$0xf0] }
 0x1c9   : > { %v9971_v1 = vor.u32 %v10761_v32, %v9968_v17  ;;  %vm12985_vm5 = vmor %vm1210_vm3, %vm1211_vm4  ;;  %v9959_v27 = vor.u32 %v10758_v0, %v9956_v21 }
 0x1ca   : > { %v1206_v28 = vmul.f32 %v12968_v45, %v1205_v43  ;;  %1932 = vmatpush.bf16.msrb.mxu1 %v9987_v55 }
 0x1cb   : > { %1902 = vmatpush.bf16.msrb.mxu0 %v9995_v22  ;;  %v9962_v22 = vld [vmem:[#allocation16 + $0x8] sm:$0xf] }
 0x1cc   : > { %1676 = vmatpush.bf16.msrb.mxu2 %v9903_v19  ;;  %v1207_v47 = vmul.f32 0.5, %v1206_v28  ;;  %1874 = vmatpush.bf16.msra.mxu3 %v9979_v41  ;;  %v9867_v19 = vor.u32 %v10736_v12, %v9866_v25 }
 0x1ce   : > { %v1208_v54 = vsub.f32 1.5, %v1207_v47  ;;  %1933 = vmatpush.bf16.msrb.mxu1 %v9975_v6  ;;  %v9963_v47 = vor.u32 %v10760_v10, %v9962_v22  ;;  %v13032_v10 = vld [vmem:[#allocation10] ss:$0 sm:$0xff] }
 0x1cf   : > { %1903 = vmatpush.bf16.msrb.mxu0 %v9983_v50 }
 0x1d0   : > { %1677 = vmatpush.bf16.msrb.mxu2 %v9891_v34  ;;  %1875 = vmatpush.bf16.msra.mxu3 %v9967_v38  ;;  %v1209_v14 = vmul.f32 %v12968_v45, %v1208_v54 }
 0x1d2   : > { %1632 = vmatmul.bf16.gmra.mxu0 %v12953_v63  ;;  %v1213_v30 = vsel %vm12985_vm5, %v12968_v45, %v1209_v14  ;;  %1934 = vmatpush.bf16.msrb.mxu1 %v9963_v47 }
 0x1d3   : > { %1904 = vmatpush.bf16.msrb.mxu0 %v9971_v1  ;;  %v1230_v55 = vmul.f32 %v1213_v30, %v12767_v44 }
 0x1d4   : > { %1678 = vmatpush.bf16.msrb.mxu2 %v9879_v48  ;;  %1876 = vmatpush.bf16.msra.mxu3 %v9955_v3 }
 0x1d5   : > { %v1241_v48 = vmul.f32 %v12849_v53, %v1230_v55 }
 0x1d7   : > { %1905 = vmatpush.bf16.msrb.mxu0 %v9959_v27  ;;  %v1252_v4 = vadd.f32 %v12874_v7, %v1241_v48 }
 0x1d8   : > { %1679 = vmatpush.bf16.msrb.mxu2 %v9867_v19 }
 0x20c   : > { %v1127_v8 = vpop.xlane.xlu1 %1126 }
 0x20d   : > { %v1135_v18 = vmul.f32 %v1127_v8, %v12719_v13 }
 0x20f   : > { %v12974_v26 = vadd.f32 1e-05, %v1135_v18 }
 0x211   : > { %11278 = vrsqrt.f32 %v12974_v26  ;;  %vm1220_vm7 = vweird.f32 %v12974_v26 }
 0x214   : > { %v1301_v43 = vpop.xlane.xlu1 %1300 }
 0x215   : > { %v1316_v24 = vmul.f32 %v1301_v43, %v12719_v13 }
 0x217   : > { %v11279_v59 = vpop.eup %11278  ;;  %v12989_v8 = vadd.f32 1e-05, %v1316_v24 }
 0x218   : > { %v1215_v5 = vmul.f32 %v11279_v59, %v12974_v26  ;;  %vm1221_vm6 = vweird.f32 %v11279_v59 }
 0x219   : > { %11280 = vrsqrt.f32 %v12989_v8  ;;  %vm1222_vm8 = vmor %vm1220_vm7, %vm1221_vm6  ;;  %vm1338_vm10 = vweird.f32 %v12989_v8 }
 0x21a   : > { %v1216_v18 = vmul.f32 %v11279_v59, %v1215_v5 }
 0x21c   : > { %v1217_v23 = vmul.f32 0.5, %v1216_v18  ;;  %v1307_v15 = vpop.xlane.xlu0 %1306  ;;  %v1275_v37 = vpop.xlane.xlu1 %1274 }
 0x21d   : > { %v1303_v34 = vpop.xlane.xlu2 %1302  ;;  %v1319_v60 = vmul.f32 %v1307_v15, %v12719_v13  ;;  %v1283_v41 = vmul.f32 %v1275_v37, %v12719_v13  ;;  %v13037_v37 = vld [vmem:[#allocation11] ss:$0 sm:$0xff] }
 0x21e   : > { %v1218_v31 = vsub.f32 1.5, %v1217_v23  ;;  %v1317_v39 = vmul.f32 %v1303_v34, %v12719_v13 }
 0x21f   : > { %v13000_v52 = vadd.f32 1e-05, %v1319_v60  ;;  %v11281_v42 = vpop.eup %11280  ;;  %v13003_v54 = vsub.f32 %v12858_v58, %v1283_v41 }
 0x220   : > { %v1219_v50 = vmul.f32 %v11279_v59, %v1218_v31  ;;  %v1325_v45 = vadd.f32 1e-05, %v1317_v39  ;;  %v1333_v56 = vmul.f32 %v11281_v42, %v12989_v8  ;;  %vm1339_vm9 = vweird.f32 %v11281_v42 }
 0x221   : > { %11282 = vrsqrt.f32 %v13000_v52  ;;  %v1299_v57 = vmul.f32 %v13003_v54, %v13003_v54  ;;  %vm1340_vm13 = vmor %vm1338_vm10, %vm1339_vm9  ;;  %vm1368_vm1 = vweird.f32 %v13000_v52 }
 0x222   : > { %v1223_v9 = vsel %vm1222_vm8, %v11279_v59, %v1219_v50  ;;  %11284 = vrsqrt.f32 %v1325_v45  ;;  %v1334_v26 = vmul.f32 %v11281_v42, %v1333_v56  ;;  %vm1348_vm11 = vweird.f32 %v1325_v45 }
 0x223   : > { %v1231_v43 = vmul.f32 %v1223_v9, %v12795_v61  ;;  %1314 = vadd.xlane.f32.xlu1 %v1299_v57 }
 0x224   : > { %v1335_v33 = vmul.f32 0.5, %v1334_v26  ;;  %v1309_v17 = vpop.xlane.xlu1 %1308 }
 0x225   : > { %v1305_v58 = vpop.xlane.xlu2 %1304  ;;  %v1242_v32 = vmul.f32 %v12849_v53, %v1231_v43  ;;  %v1320_v5 = vmul.f32 %v1309_v17, %v12719_v13 }
 0x226   : > { %v1318_v44 = vmul.f32 %v1305_v58, %v12719_v13  ;;  %v1336_v24 = vsub.f32 1.5, %v1335_v33 }
 0x227   : > { %v13014_v59 = vpop.eup %11282  ;;  %v1253_v38 = vadd.f32 %v12874_v7, %v1242_v32  ;;  %v13026_v7 = vadd.f32 1e-05, %v1320_v5 }
 0x228   : > { %v11285_v1 = vpop.eup %11284  ;;  %v1326_v49 = vadd.f32 1e-05, %v1318_v44  ;;  %v1337_v28 = vmul.f32 %v11281_v42, %v1336_v24  ;;  %v1363_v25 = vmul.f32 %v13014_v59, %v13000_v52  ;;  %vm1369_vm2 = vweird.f32 %v13014_v59 }
 0x229   : > { %v1343_v61 = vmul.f32 %v11285_v1, %v1325_v45  ;;  %v13019_v6 = vpack.c.bf16 %v1253_v38, %v1252_v4  ;;  %vm1349_vm12 = vweird.f32 %v11285_v1  ;;  %vm1370_vm4 = vmor %vm1368_vm1, %vm1369_vm2  ;;  %vm1378_vm7 = vweird.f32 %v13026_v7 }
 0x22a   : > { %11286 = vrsqrt.f32 %v1326_v49  ;;  %v1341_v19 = vsel %vm1340_vm13, %v11281_v42, %v1337_v28  ;;  %v1364_v46 = vmul.f32 %v13014_v59, %v1363_v25  ;;  %vm1350_vm14 = vmor %vm1348_vm11, %vm1349_vm12  ;;  %vm1358_vm15 = vweird.f32 %v1326_v49 }
 0x22b   : > { %v1344_v53 = vmul.f32 %v11285_v1, %v1343_v61  ;;  %1637 = vmatmul.bf16.gmra.mxu0 %v13019_v6  ;;  %1666 = vmatmul.bf16.gmra.mxu2 %v13019_v6  ;;  %11288 = vrsqrt.f32 %v13026_v7  ;;  %v1412_v22 = vmul.f32 %v1341_v19, %v12808_v11  ;;  %vm2047_vm1 = vcmask 261120  }
 0x22c   : > { %v1365_v27 = vmul.f32 0.5, %v1364_v46  ;;  %vm2158_vm2 = vcmask 130048  }
 0x22d   : > { %v1345_v12 = vmul.f32 0.5, %v1344_v53  ;;  %v1311_v14 = vpop.xlane.xlu2 %1310  ;;  %v1423_v31 = vmul.f32 %v13032_v10, %v1412_v22 }
 0x22e   : > { %v1321_v18 = vmul.f32 %v1311_v14, %v12719_v13  ;;  %v1366_v39 = vsub.f32 1.5, %v1365_v27 }
 0x22f   : > { %v1346_v36 = vsub.f32 1.5, %v1345_v12 }
 0x230   : > { %v11287_v0 = vpop.eup %11286  ;;  %v1329_v8 = vadd.f32 1e-05, %v1321_v18  ;;  %v1367_v55 = vmul.f32 %v13014_v59, %v1366_v39 }
 0x231   : > { %v1347_v3 = vmul.f32 %v11285_v1, %v1346_v36  ;;  %v1353_v21 = vmul.f32 %v11287_v0, %v1326_v49  ;;  %v11289_v60 = vpop.eup %11288  ;;  %vm1359_vm0 = vweird.f32 %v11287_v0 }
 0x232   : > { %11290 = vrsqrt.f32 %v1329_v8  ;;  %vm1360_vm3 = vmor %vm1358_vm15, %vm1359_vm0  ;;  %v1373_v9 = vmul.f32 %v11289_v60, %v13026_v7  ;;  %v1371_v52 = vsel %vm1370_vm4, %v13014_v59, %v1367_v55  ;;  %vm1388_vm5 = vweird.f32 %v1329_v8  ;;  %v1623_v7 = vpop.f32.mrf.mxu0 }
 0x233   : > { %v1351_v23 = vsel %vm1350_vm14, %v11285_v1, %v1347_v3  ;;  %v1354_v47 = vmul.f32 %v11287_v0, %v1353_v21  ;;  %v1415_v58 = vmul.f32 %v1371_v52, %v12833_v40  ;;  %vm1379_vm8 = vweird.f32 %v11289_v60 }
 0x234   : > { %v1413_v15 = vmul.f32 %v1351_v23, %v12846_v51  ;;  %v1434_v51 = vadd.f32 %v13037_v37, %v1423_v31  ;;  %v1374_v43 = vmul.f32 %v11289_v60, %v1373_v9  ;;  %vm1380_vm10 = vmor %vm1378_vm7, %vm1379_vm8  ;;  %v1313_v14 = vpop.xlane.xlu0 %1312  ;;  %vm3356_vm4 = vcmask 785408  }
 0x235   : > { %v1355_v30 = vmul.f32 0.5, %v1354_v47 }
 0x236   : > { %v1424_v34 = vmul.f32 %v13032_v10, %v1413_v15  ;;  %v1375_v32 = vmul.f32 0.5, %v1374_v43 }
 0x237   : > { %v1356_v41 = vsub.f32 1.5, %v1355_v30 }
 0x238   : > { %v11291_v11 = vpop.eup %11290  ;;  %v1435_v45 = vadd.f32 %v13037_v37, %v1424_v34  ;;  %v1376_v24 = vsub.f32 1.5, %v1375_v32 }
 0x239   : > { %v1357_v50 = vmul.f32 %v11287_v0, %v1356_v41  ;;  %v1383_v42 = vmul.f32 %v11291_v11, %v1329_v8  ;;  %vm1389_vm6 = vweird.f32 %v11291_v11 }
 0x23a   : > { %v1442_v56 = vpack.c.bf16 %v1435_v45, %v1434_v51  ;;  %vm1390_vm9 = vmor %vm1388_vm5, %vm1389_vm6  ;;  %v1377_v1 = vmul.f32 %v11289_v60, %v1376_v24 }
 0x23b   : > { %1680 = vmatmul.bf16.vlgmr.msrb.gmra.mxu2 %v12918_v29  ;;  %v1361_v57 = vsel %vm1360_vm3, %v11287_v0, %v1357_v50  ;;  %v1384_v26 = vmul.f32 %v11291_v11, %v1383_v42  ;;  %v1426_v29 = vmul.f32 %v13032_v10, %v1415_v58  ;;  %vm3347_vm3 = vcmask 523264  }
 0x23c   : > { %1877 = vmatmul.bf16.vlgmr.msra.gmra.mxu3 %v1442_v56  ;;  %1906 = vmatmul.bf16.vlgmr.msrb.gmra.mxu0 %v1442_v56  ;;  %v1414_v48 = vmul.f32 %v1361_v57, %v12895_v20  ;;  %v1381_v4 = vsel %vm1380_vm10, %v11289_v60, %v1377_v1 }
 0x23d   : > { %1935 = vmatmul.bf16.vlgmr.msrb.gmra.mxu1 %v1442_v56  ;;  %v1385_v33 = vmul.f32 0.5, %v1384_v26  ;;  %v1437_v20 = vadd.f32 %v13037_v37, %v1426_v29  ;;  %v1416_v5 = vmul.f32 %v1381_v4, %v12881_v16  ;;  %v1322_v16 = vmul.f32 %v1313_v14, %v12719_v13 }
 0x23e   : > { %v1425_v44 = vmul.f32 %v13032_v10, %v1414_v48 }
 0x23f   : > { %v1386_v17 = vsub.f32 1.5, %v1385_v33  ;;  %v1427_v53 = vmul.f32 %v13032_v10, %v1416_v5  ;;  %v1330_v19 = vadd.f32 1e-05, %v1322_v16 }
 0x240   : > { %v1436_v38 = vadd.f32 %v13037_v37, %v1425_v44 }
 0x241   : > { %v1387_v59 = vmul.f32 %v11291_v11, %v1386_v17  ;;  %v1438_v12 = vadd.f32 %v13037_v37, %v1427_v53  ;;  %11292 = vrsqrt.f32 %v1330_v19  ;;  %vm1398_vm11 = vweird.f32 %v1330_v19 }
 0x242   : > { %v1443_v40 = vpack.c.bf16 %v1437_v20, %v1436_v38 }
 0x243   : > { %v1391_v49 = vsel %vm1390_vm9, %v11291_v11, %v1387_v59 }
 0x244   : > { %v1417_v61 = vmul.f32 %v1391_v49, %v12933_v35  ;;  %v1625_v35 = vpop.f32.mrf.mxu0 }
 0x246   : > { %v1428_v28 = vmul.f32 %v13032_v10, %v1417_v61 }
 0x247   : > { %v11293_v46 = vpop.eup %11292 }
 0x248   : > { %v1439_v25 = vadd.f32 %v13037_v37, %v1428_v28  ;;  %v1393_v0 = vmul.f32 %v11293_v46, %v1330_v19  ;;  %vm1399_vm12 = vweird.f32 %v11293_v46 }
 0x249   : > { %vm1400_vm13 = vmor %vm1398_vm11, %vm1399_vm12 }
 0x24a   : > { %v1394_v8 = vmul.f32 %v11293_v46, %v1393_v0 }
 0x24b   : > { %1685 = vmatmul.bf16.gmra.mxu2 %v12957_v2  ;;  %v1444_v2 = vpack.c.bf16 %v1439_v25, %v1438_v12 }
 0x24c   : > { %1882 = vmatmul.bf16.gmra.mxu3 %v1443_v40  ;;  %1911 = vmatmul.bf16.gmra.mxu0 %v1443_v40  ;;  %v13064_v18 = vpop.f32.mrf.mxu0  ;;  %v1395_v23 = vmul.f32 0.5, %v1394_v8 }
 0x24d   : > { %1940 = vmatmul.bf16.gmra.mxu1 %v1443_v40 }
 0x24e   : > { %v1396_v27 = vsub.f32 1.5, %v1395_v23 }
 0x250   : > { %v1397_v31 = vmul.f32 %v11293_v46, %v1396_v27 }
 0x252   : > { %v1401_v39 = vsel %vm1400_vm13, %v11293_v46, %v1397_v31 }
 0x253   : > { %v1418_v51 = vmul.f32 %v1401_v39, %v12950_v62  ;;  %v13091_v62 = vld [vmem:[#allocation17] sm:$0x7] }
 0x254   : > { %v13066_v36 = vpop.f32.mrf.mxu0  ;;  %v13099_v44 = vperm.slane %v13091_v62, 0 }
 0x255   : > { %v1429_v56 = vmul.f32 %v13032_v10, %v1418_v51 }
 0x257   : > { %v1440_v52 = vadd.f32 %v13037_v37, %v1429_v56 }
 0x25b   : > { %1690 = vmatmul.bf16.gmra.mxu2 %v12953_v63  ;;  %v13068_v63 = vpop.f32.mrf.mxu1 }
 0x25c   : > { %1887 = vmatmul.bf16.gmra.mxu3 %v1444_v2  ;;  %1916 = vmatmul.bf16.gmra.mxu0 %v1444_v2  ;;  %v13070_v3 = vpop.f32.mrf.mxu0 }
 0x25d   : > { %1945 = vmatmul.bf16.gmra.mxu1 %v1444_v2 }
 0x263   : > { %v13073_v47 = vpop.f32.mrf.mxu1 }
 0x264   : > { %v13075_v15 = vpop.f32.mrf.mxu0 }
 0x26b   : > { %1695 = vmatmul.bf16.gmra.mxu2 %v13019_v6  ;;  %v13079_v42 = vpop.f32.mrf.mxu1 }
 0x273   : > { %v13089_v48 = vpop.f32.mrf.mxu1 }
 0x296   : > { %v1315_v21 = vpop.xlane.xlu1 %1314 }
 0x297   : > { %v1323_v6 = vmul.f32 %v1315_v21, %v12719_v13 }
 0x299   : > { %v1331_v22 = vadd.f32 1e-05, %v1323_v6 }
 0x29b   : > { %11294 = vrsqrt.f32 %v1331_v22  ;;  %vm1408_vm15 = vweird.f32 %v1331_v22 }
 0x2a1   : > { %v11295_v30 = vpop.eup %11294 }
 0x2a2   : > { %v1403_v34 = vmul.f32 %v11295_v30, %v1331_v22  ;;  %vm1409_vm14 = vweird.f32 %v11295_v30 }
 0x2a3   : > { %vm1410_vm0 = vmor %vm1408_vm15, %vm1409_vm14 }
 0x2a4   : > { %v1404_v60 = vmul.f32 %v11295_v30, %v1403_v34 }
 0x2a6   : > { %v1405_v41 = vmul.f32 0.5, %v1404_v60 }
 0x2a8   : > { %v1406_v11 = vsub.f32 1.5, %v1405_v41  ;;  %v13077_v50 = vpop.f32.mrf.mxu0 }
 0x2aa   : > { %v1407_v45 = vmul.f32 %v11295_v30, %v1406_v11 }
 0x2ac   : > { %v1411_v55 = vsel %vm1410_vm0, %v11295_v30, %v1407_v45 }
 0x2ad   : > { %v1419_v9 = vmul.f32 %v1411_v55, %v13003_v54  ;;  %v13094_v54 = vperm.slane %v13091_v62, 1 }
 0x2af   : > { %v1430_v57 = vmul.f32 %v13032_v10, %v1419_v9  ;;  %v1478_v10 = vld [vmem:[#allocation14] sm:$0x7] }
 0x2b0   : > { %v13085_v26 = vpop.f32.mrf.mxu0  ;;  %v13101_v17 = vperm.slane %v1478_v10, 0 }
 0x2b1   : > { %v1441_v43 = vadd.f32 %v13037_v37, %v1430_v57 }
 0x2b2   : > { %v1626_v24 = vadd.f32 %v1625_v35, %v13101_v17  ;;  %v1624_v20 = vadd.f32 %v1623_v7, %v13101_v17  ;;  %v1631_v31 = vadd.f32 %v13066_v36, %v13101_v17  ;;  %v1629_v11 = vadd.f32 %v13064_v18, %v13101_v17 }
 0x2b3   : > { %v1445_v33 = vpack.c.bf16 %v1441_v43, %v1440_v52 }
 0x2b4   : > { %v1957_v4 = vmul.f32 0.17677669, %v1626_v24  ;;  %v1956_v5 = vmul.f32 0.17677669, %v1624_v20  ;;  %v1959_v36 = vmul.f32 0.17677669, %v1631_v31 }
 0x2b5   : > { %1892 = vmatmul.bf16.gmra.mxu3 %v1445_v33  ;;  %1921 = vmatmul.bf16.gmra.mxu0 %v1445_v33  ;;  %v1958_v57 = vmul.f32 0.17677669, %v1629_v11 }
 0x2b6   : > { %1950 = vmatmul.bf16.gmra.mxu1 %v1445_v33  ;;  %v1965_v2 = vpack.c.bf16 %v1957_v4, %v1957_v4  ;;  %v1964_v19 = vpack.c.bf16 %v1956_v5, %v1956_v5  ;;  %v13136_v4 = vperm.slane %v13091_v62, 2 }
 0x2b8   : > { %v2040_v21 = vunpack.c.l.b16 %v1965_v2  ;;  %v2039_v22 = vunpack.c.l.b16 %v1964_v19 }
 0x2b9   : > { %v1907_v58 = vpop.f32.mrf.mxu0 }
 0x2ba   : > { %v13096_v32 = vpop.f32.mrf.mxu1  ;;  %v1908_v37 = vadd.f32 %v1907_v58, %v13094_v54  ;;  %v13118_v60 = vpack.c.b16 %v2040_v21, %v2039_v22  ;;  %v1967_v58 = vpack.c.bf16 %v1959_v36, %v1959_v36 }
 0x2bb   : > { %v1937_v19 = vadd.f32 %v13096_v32, %v13136_v4 }
 0x2bc   : > { %v2004_v1 = vpack.c.bf16 %v1908_v37, %v1908_v37 }
 0x2bd   : > { %v2012_v32 = vpack.c.bf16 %v1937_v19, %v1937_v19 }
 0x2be   : > { %v2044_v28 = vunpack.c.l.b16 %v2004_v1 }
 0x2bf   : > { %v1878_v29 = vpop.f32.mrf.mxu3  ;;  %v2262_v36 = vunpack.c.l.b16 %v2012_v32  ;;  %v1641_v32 = vadd.f32 %v13085_v26, %v13101_v17 }
 0x2c0   : > { %v1879_v38 = vadd.f32 %v1878_v29, %v13099_v44  ;;  %v1966_v29 = vpack.c.bf16 %v1958_v57, %v1958_v57 }
 0x2c1   : > { %v1909_v59 = vpop.f32.mrf.mxu0 }
 0x2c2   : > { %v1910_v40 = vadd.f32 %v1909_v59, %v13094_v54  ;;  %v1938_v49 = vpop.f32.mrf.mxu1  ;;  %v1988_v53 = vmul.f32 0.17677669, %v1879_v38  ;;  %v2070_v5 = vunpack.c.l.b16 %v1966_v29 }
 0x2c4   : > { %v2005_v61 = vpack.c.bf16 %v1910_v40, %v1910_v40  ;;  %v1996_v7 = vpack.c.bf16 %v1988_v53, %v1988_v53  ;;  %v2071_v40 = vunpack.c.l.b16 %v1967_v58 }
 0x2c6   : > { %v2045_v25 = vunpack.c.l.b16 %v2005_v61  ;;  %v3487_v23 = vunpack.c.l.b16 %v1996_v7  ;;  %v13140_v2 = vpack.c.b16 %v2071_v40, %v2070_v5 }
 0x2c7   : > { %v1880_v12 = vpop.f32.mrf.mxu3 }
 0x2c8   : > { %v13108_v14 = vpack.c.b16 %v2045_v25, %v2044_v28  ;;  %v1881_v35 = vadd.f32 %v1880_v12, %v13099_v44  ;;  %v1939_v28 = vadd.f32 %v1938_v49, %v13136_v4  ;;  %v1634_v49 = vadd.f32 %v13070_v3, %v13101_v17 }
 0x2c9   : > { %v1912_v16 = vpop.f32.mrf.mxu0 }
 0x2ca   : > { %v1989_v46 = vmul.f32 0.17677669, %v1881_v35  ;;  %v13111_v0 = vpop.f32.mrf.mxu1  ;;  %v2052_v8 = vsel %vm2047_vm1, %v13108_v14, 0  ;;  %v1913_v30 = vadd.f32 %v1912_v16, %v13094_v54  ;;  %v1636_v16 = vadd.f32 %v13075_v15, %v13101_v17 }
 0x2cb   : > { %2061 = vmatpush.bf16.xpose.msra.mxu2 %v2052_v8  ;;  %v2013_v21 = vpack.c.bf16 %v1939_v28, %v1939_v28 }
 0x2cc   : > { %v1997_v6 = vpack.c.bf16 %v1989_v46, %v1989_v46  ;;  %v2006_v45 = vpack.c.bf16 %v1913_v30, %v1913_v30  ;;  %v13149_v46 = vpop.f32.mrf.mxu2  ;;  %v1961_v15 = vmul.f32 0.17677669, %v1636_v16  ;;  %v1960_v30 = vmul.f32 0.17677669, %v1634_v49 }
 0x2ce   : > { %v3488_v27 = vunpack.c.l.b16 %v1997_v6  ;;  %v2075_v52 = vunpack.c.l.b16 %v2006_v45 }
 0x2cf   : > { %v1883_v34 = vpop.f32.mrf.mxu3 }
 0x2d0   : > { %v13120_v39 = vpack.c.b16 %v3488_v27, %v3487_v23  ;;  %v1884_v41 = vadd.f32 %v1883_v34, %v13099_v44  ;;  %v2263_v34 = vunpack.c.l.b16 %v2013_v21 }
 0x2d1   : > { %v1914_v51 = vpop.f32.mrf.mxu0 }
 0x2d2   : > { %v1915_v55 = vadd.f32 %v1914_v51, %v13094_v54  ;;  %v13126_v9 = vpop.f32.mrf.mxu1  ;;  %10048 = vmatmul.msk.bf16.vlgmr.msra.gmra.mxu2 %vm2047_vm1, %v13118_v60  ;;  %v1990_v43 = vmul.f32 0.17677669, %v1884_v41 }
 0x2d4   : > { %v2007_v56 = vpack.c.bf16 %v1915_v55, %v1915_v55  ;;  %v1998_v38 = vpack.c.bf16 %v1990_v43, %v1990_v43  ;;  %v1969_v55 = vpack.c.bf16 %v1961_v15, %v1961_v15  ;;  %v13165_v29 = vpop.f32.mrf.mxu2 }
 0x2d6   : > { %v2076_v33 = vunpack.c.l.b16 %v2007_v56  ;;  %v3517_v53 = vunpack.c.l.b16 %v1998_v38  ;;  %v2101_v38 = vunpack.c.l.b16 %v1969_v55 }
 0x2d7   : > { %v1885_v10 = vpop.f32.mrf.mxu3 }
 0x2d8   : > { %v13130_v37 = vpack.c.b16 %v2076_v33, %v2075_v52  ;;  %v1886_v18 = vadd.f32 %v1885_v10, %v13099_v44  ;;  %v1968_v52 = vpack.c.bf16 %v1960_v30, %v1960_v30  ;;  %v13161_v33 = vpack.c.b16 %v2263_v34, %v2262_v36 }
 0x2d9   : > { %v1917_v24 = vpop.f32.mrf.mxu0 }
 0x2da   : > { %v1991_v59 = vmul.f32 0.17677669, %v1886_v18  ;;  %v1946_v20 = vpop.f32.mrf.mxu1  ;;  %v2082_v1 = vsel %vm2047_vm1, %v13130_v37, 0  ;;  %v1918_v12 = vadd.f32 %v1917_v24, %v13094_v54 }
 0x2db   : > { %2091 = vmatpush.bf16.xpose.msrb.mxu3 %v2082_v1  ;;  %v1947_v3 = vadd.f32 %v1946_v20, %v13136_v4  ;;  %v2100_v1 = vunpack.c.l.b16 %v1968_v52 }
 0x2dc   : > { %v1999_v61 = vpack.c.bf16 %v1991_v59, %v1991_v59  ;;  %v2008_v6 = vpack.c.bf16 %v1918_v12, %v1918_v12  ;;  %v13176_v12 = vpop.f32.mrf.mxu2 }
 0x2dd   : > { %v2016_v24 = vpack.c.bf16 %v1947_v3, %v1947_v3  ;;  %v13168_v28 = vpack.c.b16 %v2101_v38, %v2100_v1 }
 0x2de   : > { %v3518_v25 = vunpack.c.l.b16 %v1999_v61  ;;  %v2105_v41 = vunpack.c.l.b16 %v2008_v6 }
 0x2df   : > { %v1888_v35 = vpop.f32.mrf.mxu3  ;;  %v2318_v5 = vunpack.c.l.b16 %v2016_v24 }
 0x2e0   : > { %v13146_v7 = vpack.c.b16 %v3518_v25, %v3517_v53  ;;  %v1889_v62 = vadd.f32 %v1888_v35, %v13099_v44 }
 0x2e1   : > { %v1919_v8 = vpop.f32.mrf.mxu0 }
 0x2e2   : > { %v1920_v22 = vadd.f32 %v1919_v8, %v13094_v54  ;;  %v1948_v23 = vpop.f32.mrf.mxu1  ;;  %10049 = vmatmul.msk.bf16.vlgmr.msrb.gmra.mxu3 %vm2047_vm1, %v13140_v2  ;;  %v1992_v11 = vmul.f32 0.17677669, %v1889_v62 }
 0x2e3   : > { %v1949_v31 = vadd.f32 %v1948_v23, %v13136_v4 }
 0x2e4   : > { %v2009_v27 = vpack.c.bf16 %v1920_v22, %v1920_v22  ;;  %v2000_v58 = vpack.c.bf16 %v1992_v11, %v1992_v11  ;;  %v13179_v35 = vpop.f32.mrf.mxu2  ;;  %v1944_v22 = vadd.f32 %v13126_v9, %v13136_v4 }
 0x2e5   : > { %v2017_v43 = vpack.c.bf16 %v1949_v31, %v1949_v31  ;;  %v1639_v31 = vadd.f32 %v13077_v50, %v13101_v17 }
 0x2e6   : > { %v2106_v51 = vunpack.c.l.b16 %v2009_v27  ;;  %v3547_v40 = vunpack.c.l.b16 %v2000_v58  ;;  %v1942_v27 = vadd.f32 %v13111_v0, %v13136_v4  ;;  %v2015_v11 = vpack.c.bf16 %v1944_v22, %v1944_v22 }
 0x2e7   : > { %v1890_v45 = vpop.f32.mrf.mxu3  ;;  %v2319_v20 = vunpack.c.l.b16 %v2017_v43  ;;  %v1962_v26 = vmul.f32 0.17677669, %v1639_v31 }
 0x2e8   : > { %v13158_v56 = vpack.c.b16 %v2106_v51, %v2105_v41  ;;  %v1891_v57 = vadd.f32 %v1890_v45, %v13099_v44  ;;  %v1963_v45 = vmul.f32 0.17677669, %v1641_v32  ;;  %v2014_v55 = vpack.c.bf16 %v1942_v27, %v1942_v27 }
 0x2e9   : > { %v13172_v25 = vpack.c.b16 %v2319_v20, %v2318_v5  ;;  %v2291_v0 = vunpack.c.l.b16 %v2015_v11  ;;  %v1970_v38 = vpack.c.bf16 %v1962_v26, %v1962_v26 }
 0x2ea   : > { %v1993_v10 = vmul.f32 0.17677669, %v1891_v57  ;;  %v2112_v18 = vsel %vm2047_vm1, %v13158_v56, 0 }
 0x2eb   : > { %2121 = vmatpush.bf16.xpose.msrb.mxu2 %v2112_v18  ;;  %v2290_v18 = vunpack.c.l.b16 %v2014_v55 }
 0x2ec   : > { %v2001_v59 = vpack.c.bf16 %v1993_v10, %v1993_v10  ;;  %v13181_v16 = vpop.f32.mrf.mxu2  ;;  %v1971_v10 = vpack.c.bf16 %v1963_v45, %v1963_v45 }
 0x2ed   : > { %v13209_v20 = vpack.c.b16 %v2291_v0, %v2290_v18 }
 0x2ee   : > { %v3548_v61 = vunpack.c.l.b16 %v2001_v59 }
 0x2f0   : > { %v13170_v53 = vpack.c.b16 %v3548_v61, %v3547_v40 }
 0x2f2   : > { %10050 = vmatmul.msk.bf16.vlgmr.msrb.gmra.mxu2 %vm2047_vm1, %v13168_v28 }
 0x2f3   : > { %2276 = vmatpush.bf16.msra.mxu2 %v13161_v33 }
 0x2f4   : > { %v13183_v19 = vpop.f32.mrf.mxu2 }
 0x2f7   : > { %2332 = vmatpush.bf16.msrb.mxu2 %v13172_v25 }
 0x2fc   : > { %v13185_v62 = vpop.f32.mrf.mxu2 }
 0x304   : > { %v13187_v49 = vpop.f32.mrf.mxu2 }
 0x30c   : > { %v13189_v8 = vpop.f32.mrf.mxu2 }
 0x314   : > { %v13201_v34 = vpop.f32.mrf.mxu2 }
 0x31c   : > { %v13213_v5 = vpop.f32.mrf.mxu2 }
 0x332   : > { %v1922_v21 = vpop.f32.mrf.mxu0 }
 0x333   : > { %v1951_v6 = vpop.f32.mrf.mxu1  ;;  %v1923_v23 = vadd.f32 %v1922_v21, %v13094_v54 }
 0x334   : > { %v1952_v50 = vadd.f32 %v1951_v6, %v13136_v4 }
 0x335   : > { %v2010_v51 = vpack.c.bf16 %v1923_v23, %v1923_v23  ;;  %v2130_v23 = vunpack.c.l.b16 %v1970_v38 }
 0x336   : > { %v2018_v21 = vpack.c.bf16 %v1952_v50, %v1952_v50 }
 0x337   : > { %v2135_v52 = vunpack.c.l.b16 %v2010_v51 }
 0x338   : > { %v1893_v15 = vpop.f32.mrf.mxu3  ;;  %v2346_v32 = vunpack.c.l.b16 %v2018_v21 }
 0x339   : > { %v1894_v30 = vadd.f32 %v1893_v15, %v13099_v44 }
 0x33a   : > { %v1924_v41 = vpop.f32.mrf.mxu0 }
 0x33b   : > { %v1925_v9 = vadd.f32 %v1924_v41, %v13094_v54  ;;  %v1953_v3 = vpop.f32.mrf.mxu1  ;;  %v1994_v43 = vmul.f32 0.17677669, %v1894_v30  ;;  %v13225_v41 = vpop.f32.mrf.mxu2 }
 0x33c   : > { %v1954_v57 = vadd.f32 %v1953_v3, %v13136_v4  ;;  %v2131_v4 = vunpack.c.l.b16 %v1971_v10 }
 0x33d   : > { %v2011_v36 = vpack.c.bf16 %v1925_v9, %v1925_v9  ;;  %v2002_v1 = vpack.c.bf16 %v1994_v43, %v1994_v43 }
 0x33e   : > { %v2019_v59 = vpack.c.bf16 %v1954_v57, %v1954_v57  ;;  %v13216_v27 = vpack.c.b16 %v2131_v4, %v2130_v23 }
 0x33f   : > { %v2136_v58 = vunpack.c.l.b16 %v2011_v36 }
 0x340   : > { %v1895_v17 = vpop.f32.mrf.mxu3  ;;  %v2347_v22 = vunpack.c.l.b16 %v2019_v59 }
 0x341   : > { %v13206_v24 = vpack.c.b16 %v2136_v58, %v2135_v52  ;;  %v1896_v54 = vadd.f32 %v1895_v17, %v13099_v44  ;;  %v3577_v44 = vunpack.c.l.b16 %v2002_v1 }
 0x342   : > { %v13220_v31 = vpack.c.b16 %v2347_v22, %v2346_v32 }
 0x343   : > { %v1995_v40 = vmul.f32 0.17677669, %v1896_v54  ;;  %v2142_v61 = vsel %vm2047_vm1, %v13206_v24, 0 }
 0x344   : > { %2151 = vmatpush.bf16.xpose.msra.mxu3 %v2142_v61 }
 0x345   : > { %v2003_v6 = vpack.c.bf16 %v1995_v40, %v1995_v40 }
 0x347   : > { %v3578_v15 = vunpack.c.l.b16 %v2003_v6 }
 0x349   : > { %v13218_v30 = vpack.c.b16 %v3578_v15, %v3577_v44 }
 0x34b   : > { %10051 = vmatmul.msk.bf16.vlgmr.msra.gmra.mxu3 %vm2047_vm1, %v13216_v27 }
 0x34c   : > { %2304 = vmatpush.bf16.msrb.mxu3 %v13209_v20 }
 0x350   : > { %2360 = vmatpush.bf16.msra.mxu3 %v13220_v31 }
 0x355   : > { %v2063_v11 = vpop.f32.mrf.mxu2 }
 0x356   : > { %v2159_v51 = vsel %vm2158_vm2, %v2063_v11, -inf }
 0x357   : > { %2160 = vmax.xlane.f32.xlu1 %v2159_v51 }
 0x35d   : > { %v2065_v45 = vpop.f32.mrf.mxu2 }
 0x35e   : > { %v2162_v36 = vsel %vm2158_vm2, %v2065_v45, -inf }
 0x365   : > { %v2093_v9 = vpop.f32.mrf.mxu3 }
 0x366   : > { %v2165_v3 = vsel %vm2158_vm2, %v2093_v9, -inf }
 0x367   : > { %2166 = vmax.xlane.f32.xlu2 %v2165_v3 }
 0x36d   : > { %v2095_v55 = vpop.f32.mrf.mxu3 }
 0x36e   : > { %v2168_v26 = vsel %vm2158_vm2, %v2095_v55, -inf }
 0x36f   : > { %2163 = vmax.xlane.f32.xlu2 %v2162_v36  ;;  %2169 = vmax.xlane.f32.xlu0 %v2168_v26 }
 0x375   : > { %v2123_v57 = vpop.f32.mrf.mxu2 }
 0x376   : > { %v2171_v0 = vsel %vm2158_vm2, %v2123_v57, -inf }
 0x377   : > { %2172 = vmax.xlane.f32.xlu2 %v2171_v0 }
 0x37d   : > { %v2125_v52 = vpop.f32.mrf.mxu2 }
 0x37e   : > { %v2174_v43 = vsel %vm2158_vm2, %v2125_v52, -inf }
 0x37f   : > { %2175 = vmax.xlane.f32.xlu0 %v2174_v43 }
 0x3ce   : > { %v2153_v58 = vpop.f32.mrf.mxu3 }
 0x3cf   : > { %v2177_v50 = vsel %vm2158_vm2, %v2153_v58, -inf }
 0x3d0   : > { %2178 = vmax.xlane.f32.xlu0 %v2177_v50 }
 0x3d6   : > { %v2155_v17 = vpop.f32.mrf.mxu3 }
 0x3d7   : > { %v2180_v10 = vsel %vm2158_vm2, %v2155_v17, -inf }
 0x3d8   : > { %2181 = vmax.xlane.f32.xlu1 %v2180_v10 }
 0x3da   : > { %v2167_v18 = vpop.xlane.xlu2 %2166 }
 0x3db   : > { %v2185_v40 = vsub.f32 %v2093_v9, %v2167_v18 }
 0x3dd   : > { %v2195_v4 = vmul.f32 1.442695, %v2185_v40 }
 0x3e2   : > { %v2164_v54 = vpop.xlane.xlu2 %2163  ;;  %v2170_v38 = vpop.xlane.xlu0 %2169 }
 0x3e3   : > { %v2184_v59 = vsub.f32 %v2065_v45, %v2164_v54  ;;  %v2186_v1 = vsub.f32 %v2095_v55, %v2170_v38  ;;  %v2161_v45 = vpop.xlane.xlu1 %2160 }
 0x3e4   : > { %2393 = vrot.lane.b32.xlu0 %v13130_v37, %s12343_s3  ;;  %v2183_v55 = vsub.f32 %v2063_v11, %v2161_v45 }
 0x3e5   : > { %v2193_v61 = vmul.f32 1.442695, %v2184_v59  ;;  %v2197_v21 = vmul.f32 1.442695, %v2186_v1 }
 0x3e6   : > { %v2191_v0 = vmul.f32 1.442695, %v2183_v55 }
 0x3e7   : > { %11296 = vpow2.f32 %v2193_v61 }
 0x3e8   : > { %11298 = vpow2.f32 %v2197_v21 }
 0x3e9   : > { %11300 = vpow2.f32 %v2195_v4 }
 0x3ed   : > { %v13237_v6 = vpop.eup %11296 }
 0x3ee   : > { %v11299_v22 = vpop.eup %11298  ;;  %v2210_v23 = vsel %vm2158_vm2, %v13237_v6, 0.0 }
 0x3ef   : > { %v2216_v44 = vsel %vm2158_vm2, %v11299_v22, 0.0  ;;  %2211 = vadd.xlane.f32.xlu1 %v2210_v23  ;;  %v11301_v32 = vpop.eup %11300 }
 0x3f0   : > { %2217 = vadd.xlane.f32.xlu2 %v2216_v44  ;;  %v2213_v3 = vsel %vm2158_vm2, %v11301_v32, 0.0 }
 0x3f2   : > { %v2176_v15 = vpop.xlane.xlu0 %2175 }
 0x3f3   : > { %v2188_v51 = vsub.f32 %v2125_v52, %v2176_v15  ;;  %v2173_v52 = vpop.xlane.xlu2 %2172 }
 0x3f4   : > { %v2187_v10 = vsub.f32 %v2123_v57, %v2173_v52 }
 0x3f5   : > { %v2201_v9 = vmul.f32 1.442695, %v2188_v51 }
 0x3f6   : > { %v2199_v18 = vmul.f32 1.442695, %v2187_v10 }
 0x3f7   : > { %11302 = vpow2.f32 %v2201_v9  ;;  %2214 = vadd.xlane.f32.xlu1 %v2213_v3 }
 0x3f8   : > { %11304 = vpow2.f32 %v2191_v0 }
 0x3f9   : > { %11306 = vpow2.f32 %v2199_v18 }
 0x3fd   : > { %v13243_v36 = vpop.eup %11302 }
 0x3fe   : > { %v2222_v26 = vsel %vm2158_vm2, %v13243_v36, 0.0  ;;  %v11305_v43 = vpop.eup %11304 }
 0x3ff   : > { %2223 = vadd.xlane.f32.xlu2 %v2222_v26  ;;  %v2207_v50 = vsel %vm2158_vm2, %v11305_v43, 0.0  ;;  %v11307_v11 = vpop.eup %11306 }
 0x400   : > { %v2219_v54 = vsel %vm2158_vm2, %v11307_v11, 0.0 }
 0x40e   : > { %2208 = vadd.xlane.f32.xlu0 %v2207_v50 }
 0x410   : > { %2391 = vrot.lane.b32.xlu1 %v13140_v2, %s12343_s3 }
 0x43a   : > { %2220 = vadd.xlane.f32.xlu1 %v2219_v54 }
 0x443   : > { %v2179_v38 = vpop.xlane.xlu0 %2178 }
 0x444   : > { %v2189_v59 = vsub.f32 %v2153_v58, %v2179_v38 }
 0x446   : > { %v2203_v1 = vmul.f32 1.442695, %v2189_v59 }
 0x448   : > { %11308 = vpow2.f32 %v2203_v1 }
 0x44b   : > { %v2182_v40 = vpop.xlane.xlu1 %2181 }
 0x44c   : > { %v2190_v61 = vsub.f32 %v2155_v17, %v2182_v40 }
 0x44e   : > { %v13251_v21 = vpop.eup %11308  ;;  %v2205_v4 = vmul.f32 1.442695, %v2190_v61 }
 0x44f   : > { %v2225_v23 = vsel %vm2158_vm2, %v13251_v21, 0.0 }
 0x450   : > { %11310 = vpow2.f32 %v2205_v4  ;;  %2226 = vadd.xlane.f32.xlu2 %v2225_v23 }
 0x453   : > { %2439 = vrot.lane.b32.xlu1 %v13216_v27, %s12343_s3 }
 0x456   : > { %v13257_v57 = vpop.eup %11310  ;;  %v2394_v52 = vpop.permute.xlu0 %2393 }
 0x457   : > { %v2228_v58 = vsel %vm2158_vm2, %v13257_v57, 0.0  ;;  %v2399_v18 = vsel %vm2047_vm1, %v2394_v52, 0 }
 0x458   : > { %2229 = vadd.xlane.f32.xlu0 %v2228_v58 }
 0x462   : > { %v2212_v44 = vpop.xlane.xlu1 %2211 }
 0x463   : > { %v2218_v15 = vpop.xlane.xlu2 %2217 }
 0x464   : > { %11312 = vrcp.f32 %v2218_v15 }
 0x468   : > { %2417 = vrot.lane.b32.xlu2 %v13158_v56, %s12343_s3 }
 0x46a   : > { %v2215_v17 = vpop.xlane.xlu1 %2214  ;;  %v11313_v51 = vpop.eup %11312 }
 0x46b   : > { %11314 = vrcp.f32 %v2215_v17  ;;  %v2242_v9 = vmul.f32 %v11313_v51, %v11299_v22 }
 0x46c   : > { %2441 = vrot.lane.b32.xlu0 %v13206_v24, %s12343_s3  ;;  %11316 = vrcp.f32 %v2212_v44 }
 0x46d   : > { %v2250_v45 = vpack.c.bf16 %v2242_v9, %v2242_v9 }
 0x46f   : > { %v2286_v0 = vunpack.c.l.b16 %v2250_v45 }
 0x470   : > { %2415 = vrot.lane.b32.xlu2 %v13168_v28, %s12343_s3 }
 0x471   : > { %v11315_v3 = vpop.eup %11314 }
 0x472   : > { %v2241_v55 = vmul.f32 %v11315_v3, %v11301_v32  ;;  %v11317_v54 = vpop.eup %11316  ;;  %v2224_v58 = vpop.xlane.xlu2 %2223 }
 0x473   : > { %v2240_v38 = vmul.f32 %v11317_v54, %v13237_v6 }
 0x474   : > { %v2249_v26 = vpack.c.bf16 %v2241_v55, %v2241_v55 }
 0x475   : > { %v2248_v59 = vpack.c.bf16 %v2240_v38, %v2240_v38 }
 0x476   : > { %v2285_v50 = vunpack.c.l.b16 %v2249_v26 }
 0x477   : > { %v2258_v61 = vunpack.c.l.b16 %v2248_v59 }
 0x478   : > { %2614 = vrot.lane.b32.xlu2 %v13172_v25, %s12343_s3  ;;  %v2287_v10 = vpack.c.b16 %v2286_v0, %v2285_v50 }
 0x47a   : > { %10053 = vmatmul.msk.bf16.vlgmr.msrb.gmra.mxu3 %vm2158_vm2, %v2287_v10 }
 0x47b   : > { %2408 = vmatpush.bf16.xpose.msrb.mxu3 %v2399_v18 }
 0x481   : > { %v2209_v22 = vpop.xlane.xlu0 %2208 }
 0x482   : > { %11318 = vrcp.f32 %v2209_v22  ;;  %v2392_v15 = vpop.permute.xlu1 %2391 }
 0x483   : > { %11320 = vrcp.f32 %v2224_v58 }
 0x488   : > { %v11319_v32 = vpop.eup %11318 }
 0x489   : > { %v2239_v1 = vmul.f32 %v11319_v32, %v11305_v43  ;;  %v11321_v44 = vpop.eup %11320 }
 0x48a   : > { %v2244_v51 = vmul.f32 %v11321_v44, %v13243_v36 }
 0x48b   : > { %v2247_v40 = vpack.c.bf16 %v2239_v1, %v2239_v1 }
 0x48c   : > { %v2252_v3 = vpack.c.bf16 %v2244_v51, %v2244_v51 }
 0x48d   : > { %v2257_v4 = vunpack.c.l.b16 %v2247_v40 }
 0x48e   : > { %v2314_v55 = vunpack.c.l.b16 %v2252_v3 }
 0x48f   : > { %v2259_v23 = vpack.c.b16 %v2258_v61, %v2257_v4 }
 0x491   : > { %10052 = vmatmul.msk.bf16.vlgmr.msra.gmra.mxu2 %vm2158_vm2, %v2259_v23 }
 0x4ad   : > { %v2221_v17 = vpop.xlane.xlu1 %2220 }
 0x4ae   : > { %11322 = vrcp.f32 %v2221_v17 }
 0x4b4   : > { %v11323_v9 = vpop.eup %11322 }
 0x4b5   : > { %v2243_v6 = vmul.f32 %v11323_v9, %v11307_v11 }
 0x4b7   : > { %v2251_v45 = vpack.c.bf16 %v2243_v6, %v2243_v6 }
 0x4b9   : > { %v2313_v43 = vunpack.c.l.b16 %v2251_v45 }
 0x4bb   : > { %v2315_v26 = vpack.c.b16 %v2314_v55, %v2313_v43 }
 0x4bd   : > { %10054 = vmatmul.msk.bf16.vlgmr.msrb.gmra.mxu2 %vm2158_vm2, %v2315_v26 }
 0x4c3   : > { %v2227_v0 = vpop.xlane.xlu2 %2226 }
 0x4c4   : > { %11324 = vrcp.f32 %v2227_v0 }
 0x4ca   : > { %v11325_v10 = vpop.eup %11324 }
 0x4cb   : > { %v2418_v50 = vpop.permute.xlu2 %2417  ;;  %v2230_v52 = vpop.xlane.xlu0 %2229  ;;  %v2245_v36 = vmul.f32 %v11325_v10, %v13251_v21 }
 0x4cc   : > { %v2423_v18 = vsel %vm2047_vm1, %v2418_v50, 0  ;;  %11326 = vrcp.f32 %v2230_v52  ;;  %v2440_v21 = vpop.permute.xlu1 %2439 }
 0x4cd   : > { %2432 = vmatpush.bf16.xpose.msra.mxu2 %v2423_v18  ;;  %v2253_v54 = vpack.c.bf16 %v2245_v36, %v2245_v36 }
 0x4cf   : > { %v2341_v59 = vunpack.c.l.b16 %v2253_v54 }
 0x4d2   : > { %v11327_v22 = vpop.eup %11326 }
 0x4d3   : > { %v2246_v11 = vmul.f32 %v11327_v22, %v13257_v57  ;;  %v2416_v38 = vpop.permute.xlu2 %2415 }
 0x4d4   : > { %10058 = vmatmul.msk.bf16.vlgmr.msra.gmra.mxu2 %vm2047_vm1, %v2416_v38 }
 0x4d5   : > { %v2254_v32 = vpack.c.bf16 %v2246_v11, %v2246_v11 }
 0x4d7   : > { %v2342_v1 = vunpack.c.l.b16 %v2254_v32 }
 0x4d9   : > { %v2343_v40 = vpack.c.b16 %v2342_v1, %v2341_v59 }
 0x4db   : > { %v2615_v61 = vpop.permute.xlu2 %2614  ;;  %10055 = vmatmul.msk.bf16.vlgmr.msra.gmra.mxu3 %vm2158_vm2, %v2343_v40 }
 0x4dc   : > { %2627 = vmatpush.bf16.msrb.mxu2 %v2615_v61 }
 0x4de   : > { %v2442_v4 = vpop.permute.xlu0 %2441 }
 0x4df   : > { %v2447_v23 = vsel %vm2047_vm1, %v2442_v4, 0 }
 0x4e0   : > { %2456 = vmatpush.bf16.xpose.msra.mxu3 %v2447_v23 }
 0x4eb   : > { %10057 = vmatmul.msk.bf16.vlgmr.msrb.gmra.mxu3 %vm2047_vm1, %v2392_v15 }
 0x4fb   : > { %10059 = vmatmul.msk.bf16.vlgmr.msra.gmra.mxu3 %vm2047_vm1, %v2440_v21 }
 0x4fd   : > { %v13289_v44 = vpop.f32.mrf.mxu3 }
 0x4fe   : > { %18208 = vst [vmem:[#allocation44_spill] sm:$0xff] %v13289_v44 }
 0x505   : > { %v13293_v9 = vpop.f32.mrf.mxu3 }
 0x506   : > { %18210 = vst [vmem:[#allocation46_spill] sm:$0xff] %v13293_v9 }
 0x514   : > { %v13283_v57 = vpop.f32.mrf.mxu2 }
 0x51c   : > { %v13285_v58 = vpop.f32.mrf.mxu2 }
 0x540   : > { %v13287_v17 = vpop.f32.mrf.mxu2 }
 0x541   : > { %18207 = vst [vmem:[#allocation43_spill] sm:$0xff] %v13287_v17 }
 0x548   : > { %v13291_v51 = vpop.f32.mrf.mxu2 }
 0x549   : > { %18209 = vst [vmem:[#allocation45_spill] sm:$0xff] %v13291_v51 }
 0x557   : > { %v2434_v3 = vpop.f32.mrf.mxu2 }
 0x558   : > { %v2475_v6 = vsel %vm2158_vm2, %v2434_v3, -inf }
 0x559   : > { %2476 = vmax.xlane.f32.xlu0 %v2475_v6 }
 0x55e   : > { %v13296_v15 = vpop.f32.mrf.mxu3 }
 0x55f   : > { %18211 = vst [vmem:[#allocation47_spill] sm:$0xff] %v13296_v15  ;;  %v2436_v45 = vpop.f32.mrf.mxu2 }
 0x560   : > { %v2478_v55 = vsel %vm2158_vm2, %v2436_v45, -inf }
 0x561   : > { %2479 = vmax.xlane.f32.xlu2 %v2478_v55 }
 0x566   : > { %v13299_v43 = vpop.f32.mrf.mxu3 }
 0x567   : > { %18212 = vst [vmem:[#allocation48_spill] sm:$0xff] %v13299_v43 }
 0x56e   : > { %v2410_v26 = vpop.f32.mrf.mxu3 }
 0x56f   : > { %v2469_v0 = vsel %vm2158_vm2, %v2410_v26, -inf }
 0x570   : > { %2470 = vmax.xlane.f32.xlu2 %v2469_v0 }
 0x576   : > { %v2412_v50 = vpop.f32.mrf.mxu3 }
 0x577   : > { %v2472_v52 = vsel %vm2158_vm2, %v2412_v50, -inf }
 0x578   : > { %2473 = vmax.xlane.f32.xlu1 %v2472_v52 }
 0x57e   : > { %v2458_v10 = vpop.f32.mrf.mxu3 }
 0x57f   : > { %v2481_v18 = vsel %vm2158_vm2, %v2458_v10, -inf }
 0x580   : > { %2482 = vmax.xlane.f32.xlu1 %v2481_v18 }
 0x586   : > { %v2460_v36 = vpop.f32.mrf.mxu3 }
 0x587   : > { %v2484_v22 = vsel %vm2158_vm2, %v2460_v36, -inf }
 0x588   : > { %2733 = vrot.lane.b32.xlu2 %v13206_v24, %s12344_s16  ;;  %2485 = vmax.xlane.f32.xlu0 %v2484_v22 }
 0x590   : > { %2589 = vrot.lane.b32.xlu2 %v13209_v20, %s12343_s3 }
 0x599   : > { %2639 = vrot.lane.b32.xlu1 %v13220_v31, %s12343_s3 }
 0x59c   : > { %2709 = vrot.lane.b32.xlu0 %v13158_v56, %s12344_s16 }
 0x5cc   : > { %v2477_v54 = vpop.xlane.xlu0 %2476 }
 0x5cd   : > { %v2491_v11 = vsub.f32 %v2434_v3, %v2477_v54 }
 0x5cf   : > { %v2503_v38 = vmul.f32 1.442695, %v2491_v11 }
 0x5d1   : > { %11328 = vpow2.f32 %v2503_v38 }
 0x5d4   : > { %v2480_v32 = vpop.xlane.xlu2 %2479 }
 0x5d5   : > { %v2492_v59 = vsub.f32 %v2436_v45, %v2480_v32 }
 0x5d7   : > { %v11329_v1 = vpop.eup %11328  ;;  %v2505_v40 = vmul.f32 1.442695, %v2492_v59 }
 0x5d8   : > { %v2523_v61 = vsel %vm2158_vm2, %v11329_v1, 0.0 }
 0x5d9   : > { %11330 = vpow2.f32 %v2505_v40  ;;  %2524 = vadd.xlane.f32.xlu0 %v2523_v61 }
 0x5df   : > { %v11331_v4 = vpop.eup %11330 }
 0x5e0   : > { %v2526_v23 = vsel %vm2158_vm2, %v11331_v4, 0.0 }
 0x5e1   : > { %2527 = vadd.xlane.f32.xlu2 %v2526_v23 }
 0x5e3   : > { %v2471_v21 = vpop.xlane.xlu2 %2470 }
 0x5e4   : > { %v2489_v6 = vsub.f32 %v2410_v26, %v2471_v21 }
 0x5e6   : > { %v2499_v55 = vmul.f32 1.442695, %v2489_v6 }
 0x5e8   : > { %11332 = vpow2.f32 %v2499_v55 }
 0x5eb   : > { %v2734_v0 = vpop.permute.xlu2 %2733  ;;  %v2474_v3 = vpop.xlane.xlu1 %2473 }
 0x5ec   : > { %v2490_v52 = vsub.f32 %v2412_v50, %v2474_v3  ;;  %v2739_v3 = vsel %vm2047_vm1, %v2734_v0, 0 }
 0x5ee   : > { %v11333_v18 = vpop.eup %11332  ;;  %v2501_v22 = vmul.f32 1.442695, %v2490_v52 }
 0x5ef   : > { %v2517_v45 = vsel %vm2158_vm2, %v11333_v18, 0.0 }
 0x5f0   : > { %11334 = vpow2.f32 %v2501_v22  ;;  %2518 = vadd.xlane.f32.xlu1 %v2517_v45 }
 0x5f3   : > { %v2590_v54 = vpop.permute.xlu2 %2589  ;;  %v2483_v11 = vpop.xlane.xlu1 %2482 }
 0x5f4   : > { %v2493_v38 = vsub.f32 %v2458_v10, %v2483_v11  ;;  %2602 = vmatpush.bf16.msra.mxu1 %v2590_v54 }
 0x5f6   : > { %v11335_v32 = vpop.eup %11334  ;;  %v2507_v59 = vmul.f32 1.442695, %v2493_v38 }
 0x5f7   : > { %v2520_v40 = vsel %vm2158_vm2, %v11335_v32, 0.0 }
 0x5f8   : > { %11336 = vpow2.f32 %v2507_v59  ;;  %2521 = vadd.xlane.f32.xlu0 %v2520_v40 }
 0x5f9   : > { %2685 = vrot.lane.b32.xlu2 %v13130_v37, %s12344_s16 }
 0x5fb   : > { %v2486_v26 = vpop.xlane.xlu0 %2485 }
 0x5fc   : > { %v2494_v50 = vsub.f32 %v2460_v36, %v2486_v26 }
 0x5fe   : > { %v11337_v61 = vpop.eup %11336  ;;  %v2509_v23 = vmul.f32 1.442695, %v2494_v50 }
 0x5ff   : > { %v2529_v21 = vsel %vm2158_vm2, %v11337_v61, 0.0 }
 0x600   : > { %11338 = vpow2.f32 %v2509_v23  ;;  %2530 = vadd.xlane.f32.xlu1 %v2529_v21 }
 0x601   : > { %2367 = vrot.lane.b32.xlu2 %v13118_v60, %s12343_s3 }
 0x606   : > { %v11339_v10 = vpop.eup %11338 }
 0x607   : > { %v2532_v6 = vsel %vm2158_vm2, %v11339_v10, 0.0 }
 0x608   : > { %2533 = vadd.xlane.f32.xlu0 %v2532_v6 }
 0x60b   : > { %v2640_v55 = vpop.permute.xlu1 %2639 }
 0x60c   : > { %2652 = vmatpush.bf16.msrb.mxu3 %v2640_v55 }
 0x60e   : > { %v2710_v52 = vpop.permute.xlu0 %2709 }
 0x60f   : > { %v2715_v36 = vsel %vm2047_vm1, %v2710_v52, 0 }
 0x610   : > { %2748 = vmatpush.bf16.xpose.msra.mxu3 %v2739_v3  ;;  %2724 = vmatpush.bf16.xpose.msra.mxu2 %v2715_v36 }
 0x619   : > { %2731 = vrot.lane.b32.xlu1 %v13216_v27, %s12344_s16 }
 0x61c   : > { %2707 = vrot.lane.b32.xlu0 %v13168_v28, %s12344_s16 }
 0x621   : > { %2369 = vrot.lane.b32.xlu1 %v13108_v14, %s12343_s3 }
 0x624   : > { %2683 = vrot.lane.b32.xlu0 %v13140_v2, %s12344_s16 }
 0x62c   : > { %2906 = vrot.lane.b32.xlu0 %v13172_v25, %s12344_s16 }
 0x64c   : > { %v2525_v0 = vpop.xlane.xlu0 %2524 }
 0x64d   : > { %11340 = vrcp.f32 %v2525_v0 }
 0x653   : > { %v11341_v45 = vpop.eup %11340 }
 0x654   : > { %v2528_v22 = vpop.xlane.xlu2 %2527  ;;  %v2547_v54 = vmul.f32 %v11341_v45, %v11329_v1 }
 0x655   : > { %11342 = vrcp.f32 %v2528_v22 }
 0x656   : > { %v2555_v38 = vpack.c.bf16 %v2547_v54, %v2547_v54 }
 0x658   : > { %v2611_v23 = vunpack.c.l.b16 %v2555_v38 }
 0x65b   : > { %v11343_v11 = vpop.eup %11342 }
 0x65c   : > { %v2548_v59 = vmul.f32 %v11343_v11, %v11331_v4  ;;  %v2686_v40 = vpop.permute.xlu2 %2685 }
 0x65d   : > { %v2691_v26 = vsel %vm2047_vm1, %v2686_v40, 0 }
 0x65e   : > { %v2556_v50 = vpack.c.bf16 %v2548_v59, %v2548_v59  ;;  %2700 = vmatpush.bf16.xpose.msrb.mxu1 %v2691_v26 }
 0x660   : > { %v2612_v21 = vunpack.c.l.b16 %v2556_v50 }
 0x662   : > { %v2613_v6 = vpack.c.b16 %v2612_v21, %v2611_v23 }
 0x663   : > { %v2519_v55 = vpop.xlane.xlu1 %2518 }
 0x664   : > { %10062 = vmatmul.msk.bf16.vlgmr.msrb.gmra.mxu2 %vm2158_vm2, %v2613_v6  ;;  %11344 = vrcp.f32 %v2519_v55 }
 0x66a   : > { %v11345_v52 = vpop.eup %11344 }
 0x66b   : > { %v2522_v3 = vpop.xlane.xlu0 %2521  ;;  %v2545_v36 = vmul.f32 %v11345_v52, %v11333_v18 }
 0x66c   : > { %11346 = vrcp.f32 %v2522_v3 }
 0x66d   : > { %v2553_v0 = vpack.c.bf16 %v2545_v36, %v2545_v36 }
 0x66f   : > { %v2586_v54 = vunpack.c.l.b16 %v2553_v0 }
 0x672   : > { %v11347_v1 = vpop.eup %11346 }
 0x673   : > { %v2546_v22 = vmul.f32 %v11347_v1, %v11335_v32  ;;  %v2531_v4 = vpop.xlane.xlu1 %2530 }
 0x674   : > { %11348 = vrcp.f32 %v2531_v4 }
 0x675   : > { %v2554_v45 = vpack.c.bf16 %v2546_v22, %v2546_v22 }
 0x677   : > { %v2587_v11 = vunpack.c.l.b16 %v2554_v45 }
 0x679   : > { %v2588_v59 = vpack.c.b16 %v2587_v11, %v2586_v54 }
 0x67a   : > { %v11349_v40 = vpop.eup %11348 }
 0x67b   : > { %v2534_v38 = vpop.xlane.xlu0 %2533  ;;  %10061 = vmatmul.msk.bf16.vlgmr.msra.gmra.mxu1 %vm2158_vm2, %v2588_v59  ;;  %v2549_v26 = vmul.f32 %v11349_v40, %v11337_v61  ;;  %v2368_v61 = vpop.permute.xlu2 %2367 }
 0x67c   : > { %11350 = vrcp.f32 %v2534_v38 }
 0x67d   : > { %v2557_v23 = vpack.c.bf16 %v2549_v26, %v2549_v26 }
 0x67f   : > { %v2636_v18 = vunpack.c.l.b16 %v2557_v23 }
 0x682   : > { %v11351_v50 = vpop.eup %11350 }
 0x683   : > { %v2550_v21 = vmul.f32 %v11351_v50, %v11339_v10 }
 0x685   : > { %v2558_v6 = vpack.c.bf16 %v2550_v21, %v2550_v21 }
 0x687   : > { %v2637_v55 = vunpack.c.l.b16 %v2558_v6 }
 0x689   : > { %v2638_v3 = vpack.c.b16 %v2637_v55, %v2636_v18 }
 0x68b   : > { %10063 = vmatmul.msk.bf16.vlgmr.msrb.gmra.mxu3 %vm2158_vm2, %v2638_v3  ;;  %v2732_v32 = vpop.permute.xlu1 %2731 }
 0x68e   : > { %v2708_v52 = vpop.permute.xlu0 %2707 }
 0x68f   : > { %10066 = vmatmul.msk.bf16.vlgmr.msra.gmra.mxu2 %vm2047_vm1, %v2708_v52 }
 0x693   : > { %v2370_v36 = vpop.permute.xlu1 %2369 }
 0x694   : > { %v2375_v1 = vsel %vm2047_vm1, %v2370_v36, 0 }
 0x695   : > { %2384 = vmatpush.bf16.xpose.msra.mxu0 %v2375_v1 }
 0x696   : > { %v2684_v0 = vpop.permute.xlu0 %2683 }
 0x697   : > { %10065 = vmatmul.msk.bf16.vlgmr.msrb.gmra.mxu1 %vm2047_vm1, %v2684_v0 }
 0x69b   : > { %10067 = vmatmul.msk.bf16.vlgmr.msra.gmra.mxu3 %vm2047_vm1, %v2732_v32 }
 0x69c   : > { %10056 = vmatmul.msk.bf16.vlgmr.msra.gmra.mxu0 %vm2047_vm1, %v2368_v61 }
 0x69e   : > { %v2907_v10 = vpop.permute.xlu0 %2906 }
 0x69f   : > { %2919 = vmatpush.bf16.msrb.mxu2 %v2907_v10 }
 0x6e7   : > { %v13344_v22 = vpop.f32.mrf.mxu2 }
 0x6ef   : > { %v13348_v45 = vpop.f32.mrf.mxu2 }
 0x6f8   : > { %v13346_v4 = vpop.f32.mrf.mxu1 }
 0x700   : > { %v13350_v54 = vpop.f32.mrf.mxu1 }
 0x70e   : > { %v13352_v11 = vpop.f32.mrf.mxu3 }
 0x70f   : > { %18213 = vst [vmem:[#allocation49_spill] sm:$0xff] %v13352_v11 }
 0x712   : > { %v2726_v59 = vpop.f32.mrf.mxu2 }
 0x713   : > { %v2767_v38 = vsel %vm2158_vm2, %v2726_v59, -inf }
 0x714   : > { %2768 = vmax.xlane.f32.xlu0 %v2767_v38  ;;  %v2702_v40 = vpop.f32.mrf.mxu1 }
 0x715   : > { %v2761_v55 = vsel %vm2158_vm2, %v2702_v40, -inf }
 0x716   : > { %v13355_v26 = vpop.f32.mrf.mxu3 }
 0x717   : > { %18214 = vst [vmem:[#allocation50_spill] sm:$0xff] %v13355_v26 }
 0x71a   : > { %v2728_v50 = vpop.f32.mrf.mxu2 }
 0x71b   : > { %v2770_v23 = vsel %vm2158_vm2, %v2728_v50, -inf }
 0x71c   : > { %2771 = vmax.xlane.f32.xlu1 %v2770_v23  ;;  %v2704_v21 = vpop.f32.mrf.mxu1 }
 0x71d   : > { %v2764_v6 = vsel %vm2158_vm2, %v2704_v21, -inf }
 0x71e   : > { %2765 = vmax.xlane.f32.xlu2 %v2764_v6  ;;  %v2750_v18 = vpop.f32.mrf.mxu3 }
 0x71f   : > { %v2773_v3 = vsel %vm2158_vm2, %v2750_v18, -inf }
 0x724   : > { %2762 = vmax.xlane.f32.xlu1 %v2761_v55 }
 0x726   : > { %2774 = vmax.xlane.f32.xlu2 %v2773_v3  ;;  %v2752_v32 = vpop.f32.mrf.mxu3 }
 0x727   : > { %v2776_v52 = vsel %vm2158_vm2, %v2752_v32, -inf }
 0x728   : > { %2777 = vmax.xlane.f32.xlu0 %v2776_v52 }
 0x73e   : > { %2881 = vrot.lane.b32.xlu2 %v13209_v20, %s12344_s16 }
 0x787   : > { %v2769_v36 = vpop.xlane.xlu0 %2768 }
 0x788   : > { %v2783_v1 = vsub.f32 %v2726_v59, %v2769_v36 }
 0x78a   : > { %v2795_v0 = vmul.f32 1.442695, %v2783_v1 }
 0x78c   : > { %11352 = vpow2.f32 %v2795_v0 }
 0x78f   : > { %v2772_v61 = vpop.xlane.xlu1 %2771 }
 0x790   : > { %v2784_v10 = vsub.f32 %v2728_v50, %v2772_v61 }
 0x791   : > { %v2766_v38 = vpop.xlane.xlu2 %2765 }
 0x792   : > { %v11353_v23 = vpop.eup %11352  ;;  %v2797_v6 = vmul.f32 1.442695, %v2784_v10  ;;  %v2782_v55 = vsub.f32 %v2704_v21, %v2766_v38 }
 0x793   : > { %v2815_v13 = vsel %vm2158_vm2, %v11353_v23, 0.0 }
 0x794   : > { %11354 = vpow2.f32 %v2797_v6  ;;  %v2793_v3 = vmul.f32 1.442695, %v2782_v55  ;;  %2816 = vadd.xlane.f32.xlu0 %v2815_v13 }
 0x796   : > { %11356 = vpow2.f32 %v2793_v3 }
 0x797   : > { %v2763_v52 = vpop.xlane.xlu1 %2762 }
 0x798   : > { %v2781_v15 = vsub.f32 %v2702_v40, %v2763_v52 }
 0x799   : > { %v2775_v43 = vpop.xlane.xlu2 %2774 }
 0x79a   : > { %v11355_v17 = vpop.eup %11354  ;;  %v2791_v51 = vmul.f32 1.442695, %v2781_v15  ;;  %v2785_v59 = vsub.f32 %v2750_v18, %v2775_v43 }
 0x79b   : > { %v2778_v36 = vpop.xlane.xlu0 %2777  ;;  %v2818_v1 = vsel %vm2158_vm2, %v11355_v17, 0.0 }
 0x79c   : > { %v11357_v50 = vpop.eup %11356  ;;  %11358 = vpow2.f32 %v2791_v51  ;;  %v2799_v0 = vmul.f32 1.442695, %v2785_v59  ;;  %v2786_v61 = vsub.f32 %v2752_v32, %v2778_v36  ;;  %2819 = vadd.xlane.f32.xlu1 %v2818_v1  ;;  %v13382_v32 = vpop.f32.mrf.mxu0 }
 0x79d   : > { %v2812_v21 = vsel %vm2158_vm2, %v11357_v50, 0.0 }
 0x79e   : > { %11360 = vpow2.f32 %v2799_v0  ;;  %v2801_v10 = vmul.f32 1.442695, %v2786_v61  ;;  %2813 = vadd.xlane.f32.xlu2 %v2812_v21 }
 0x7a0   : > { %11362 = vpow2.f32 %v2801_v10 }
 0x7a1   : > { %v2882_v13 = vpop.permute.xlu2 %2881 }
 0x7a2   : > { %v11359_v40 = vpop.eup %11358  ;;  %2894 = vmatpush.bf16.msra.mxu1 %v2882_v13 }
 0x7a3   : > { %v2809_v15 = vsel %vm2158_vm2, %v11359_v40, 0.0 }
 0x7a4   : > { %v11361_v43 = vpop.eup %11360  ;;  %2810 = vadd.xlane.f32.xlu1 %v2809_v15 }
 0x7a5   : > { %v2821_v18 = vsel %vm2158_vm2, %v11361_v43, 0.0 }
 0x7a6   : > { %v11363_v38 = vpop.eup %11362  ;;  %2822 = vadd.xlane.f32.xlu2 %v2821_v18 }
 0x7a7   : > { %v2824_v51 = vsel %vm2158_vm2, %v11363_v38, 0.0 }
 0x7a8   : > { %2825 = vadd.xlane.f32.xlu0 %v2824_v51 }
 0x7bc   : > { %3001 = vrot.lane.b32.xlu0 %v13158_v56, %s12345_s23  ;;  %v13386_v56 = vpop.f32.mrf.mxu0 }
 0x7bd   : > { %2931 = vrot.lane.b32.xlu1 %v13220_v31, %s12344_s16  ;;  %v2466_v6 = vsel %vm2158_vm2, %v13386_v56, -inf }
 0x7be   : > { %3025 = vrot.lane.b32.xlu2 %v13206_v24, %s12345_s23 }
 0x7c6   : > { %2999 = vrot.lane.b32.xlu2 %v13168_v28, %s12345_s23 }
 0x7ce   : > { %2977 = vrot.lane.b32.xlu2 %v13130_v37, %s12345_s23  ;;  %v2463_v37 = vsel %vm2158_vm2, %v13382_v32, -inf }
 0x7d6   : > { %3023 = vrot.lane.b32.xlu2 %v13216_v27, %s12345_s23 }
 0x7de   : > { %2975 = vrot.lane.b32.xlu2 %v13140_v2, %s12345_s23 }
 0x7e6   : > { %2564 = vrot.lane.b32.xlu2 %v13161_v33, %s12343_s3  ;;  %2467 = vmax.xlane.f32.xlu0 %v2466_v6 }
 0x7e7   : > { %2464 = vmax.xlane.f32.xlu1 %v2463_v37 }
 0x807   : > { %v2817_v28 = vpop.xlane.xlu0 %2816 }
 0x808   : > { %11364 = vrcp.f32 %v2817_v28 }
 0x80e   : > { %v11365_v27 = vpop.eup %11364 }
 0x80f   : > { %v2820_v24 = vpop.xlane.xlu1 %2819  ;;  %v2839_v2 = vmul.f32 %v11365_v27, %v11353_v23 }
 0x810   : > { %11366 = vrcp.f32 %v2820_v24 }
 0x811   : > { %v2814_v55 = vpop.xlane.xlu2 %2813  ;;  %v2847_v52 = vpack.c.bf16 %v2839_v2, %v2839_v2 }
 0x812   : > { %11368 = vrcp.f32 %v2814_v55 }
 0x813   : > { %v2903_v21 = vunpack.c.l.b16 %v2847_v52 }
 0x816   : > { %v11367_v3 = vpop.eup %11366 }
 0x817   : > { %v2840_v59 = vmul.f32 %v11367_v3, %v11355_v17  ;;  %v2811_v36 = vpop.xlane.xlu1 %2810 }
 0x818   : > { %v11369_v1 = vpop.eup %11368  ;;  %11370 = vrcp.f32 %v2811_v36 }
 0x819   : > { %v2848_v0 = vpack.c.bf16 %v2840_v59, %v2840_v59  ;;  %v2823_v61 = vpop.xlane.xlu2 %2822  ;;  %v2838_v13 = vmul.f32 %v11369_v1, %v11357_v50 }
 0x81b   : > { %v2904_v10 = vunpack.c.l.b16 %v2848_v0  ;;  %v2826_v15 = vpop.xlane.xlu0 %2825  ;;  %v2846_v6 = vpack.c.bf16 %v2838_v13, %v2838_v13 }
 0x81c   : > { %11372 = vrcp.f32 %v2826_v15 }
 0x81d   : > { %v2905_v18 = vpack.c.b16 %v2904_v10, %v2903_v21  ;;  %11374 = vrcp.f32 %v2823_v61  ;;  %v2879_v24 = vunpack.c.l.b16 %v2846_v6 }
 0x81e   : > { %v11371_v51 = vpop.eup %11370 }
 0x81f   : > { %v2837_v37 = vmul.f32 %v11371_v51, %v11359_v40  ;;  %10070 = vmatmul.msk.bf16.vlgmr.msrb.gmra.mxu2 %vm2158_vm2, %v2905_v18 }
 0x821   : > { %v2845_v23 = vpack.c.bf16 %v2837_v37, %v2837_v37  ;;  %v3026_v28 = vpop.permute.xlu2 %3025 }
 0x822   : > { %v11373_v17 = vpop.eup %11372  ;;  %v3031_v10 = vsel %vm2047_vm1, %v3026_v28, 0 }
 0x823   : > { %v2878_v27 = vunpack.c.l.b16 %v2845_v23  ;;  %v11375_v55 = vpop.eup %11374  ;;  %v2842_v3 = vmul.f32 %v11373_v17, %v11363_v38 }
 0x824   : > { %v2841_v52 = vmul.f32 %v11375_v55, %v11361_v43 }
 0x825   : > { %v2880_v2 = vpack.c.b16 %v2879_v24, %v2878_v27  ;;  %v2850_v50 = vpack.c.bf16 %v2842_v3, %v2842_v3 }
 0x826   : > { %v2849_v36 = vpack.c.bf16 %v2841_v52, %v2841_v52 }
 0x827   : > { %10069 = vmatmul.msk.bf16.vlgmr.msra.gmra.mxu1 %vm2158_vm2, %v2880_v2  ;;  %v2929_v1 = vunpack.c.l.b16 %v2850_v50 }
 0x828   : > { %v2928_v61 = vunpack.c.l.b16 %v2849_v36 }
 0x829   : > { %v3000_v59 = vpop.permute.xlu2 %2999 }
 0x82a   : > { %v2930_v13 = vpack.c.b16 %v2929_v1, %v2928_v61 }
 0x82e   : > { %v3002_v0 = vpop.permute.xlu0 %3001 }
 0x82f   : > { %v3007_v40 = vsel %vm2047_vm1, %v3002_v0, 0  ;;  %v2932_v21 = vpop.permute.xlu1 %2931 }
 0x830   : > { %2944 = vmatpush.bf16.msrb.mxu3 %v2932_v21  ;;  %3016 = vmatpush.bf16.xpose.msra.mxu2 %v3007_v40 }
 0x831   : > { %v2978_v15 = vpop.permute.xlu2 %2977 }
 0x832   : > { %v2983_v43 = vsel %vm2047_vm1, %v2978_v15, 0 }
 0x833   : > { %10071 = vmatmul.msk.bf16.vlgmr.msrb.gmra.mxu3 %vm2158_vm2, %v2930_v13  ;;  %2992 = vmatpush.bf16.xpose.msrb.mxu1 %v2983_v43 }
 0x834   : > { %3040 = vmatpush.bf16.xpose.msra.mxu3 %v3031_v10 }
 0x837   : > { %10074 = vmatmul.msk.bf16.vlgmr.msra.gmra.mxu2 %vm2047_vm1, %v3000_v59 }
 0x839   : > { %v3024_v38 = vpop.permute.xlu2 %3023 }
 0x841   : > { %v2976_v18 = vpop.permute.xlu2 %2975 }
 0x842   : > { %10073 = vmatmul.msk.bf16.vlgmr.msrb.gmra.mxu1 %vm2047_vm1, %v2976_v18 }
 0x843   : > { %10075 = vmatmul.msk.bf16.vlgmr.msra.gmra.mxu3 %vm2047_vm1, %v3024_v38 }
 0x849   : > { %v2565_v51 = vpop.permute.xlu2 %2564 }
 0x84a   : > { %2577 = vmatpush.bf16.msrb.mxu0 %v2565_v51 }
 0x859   : > { %v2468_v6 = vpop.xlane.xlu0 %2467 }
 0x85a   : > { %v2488_v37 = vsub.f32 %v13386_v56, %v2468_v6  ;;  %v2465_v23 = vpop.xlane.xlu1 %2464 }
 0x85b   : > { %v2487_v28 = vsub.f32 %v13382_v32, %v2465_v23 }
 0x85c   : > { %v2497_v17 = vmul.f32 1.442695, %v2488_v37 }
 0x85d   : > { %v2495_v24 = vmul.f32 1.442695, %v2487_v28 }
 0x85e   : > { %11376 = vpow2.f32 %v2497_v17 }
 0x85f   : > { %11378 = vpow2.f32 %v2495_v24 }
 0x864   : > { %v11377_v27 = vpop.eup %11376 }
 0x865   : > { %v11379_v55 = vpop.eup %11378  ;;  %v2514_v2 = vsel %vm2158_vm2, %v11377_v27, 0.0 }
 0x866   : > { %2515 = vadd.xlane.f32.xlu0 %v2514_v2  ;;  %v2511_v3 = vsel %vm2158_vm2, %v11379_v55, 0.0 }
 0x867   : > { %2512 = vadd.xlane.f32.xlu1 %v2511_v3 }
 0x87a   : > { %2659 = vrot.lane.b32.xlu0 %v13118_v60, %s12344_s16 }
 0x880   : > { %2661 = vrot.lane.b32.xlu1 %v13108_v14, %s12344_s16 }
 0x8a2   : > { %v13411_v56 = vpop.f32.mrf.mxu2 }
 0x8a4   : > { %v13413_v32 = vpop.f32.mrf.mxu1 }
 0x8aa   : > { %v13415_v52 = vpop.f32.mrf.mxu2 }
 0x8ac   : > { %v13417_v50 = vpop.f32.mrf.mxu1 }
 0x8b6   : > { %v13419_v59 = vpop.f32.mrf.mxu3 }
 0x8b7   : > { %18215 = vst [vmem:[#allocation51_spill] sm:$0xff] %v13419_v59 }
 0x8ba   : > { %v3018_v36 = vpop.f32.mrf.mxu2 }
 0x8bb   : > { %v3059_v1 = vsel %vm2158_vm2, %v3018_v36, -inf }
 0x8bc   : > { %3060 = vmax.xlane.f32.xlu2 %v3059_v1 }
 0x8be   : > { %v13423_v40 = vpop.f32.mrf.mxu3 }
 0x8bf   : > { %v2994_v0 = vpop.f32.mrf.mxu1  ;;  %18216 = vst [vmem:[#allocation52_spill] sm:$0xff] %v13423_v40 }
 0x8c0   : > { %v3053_v61 = vsel %vm2158_vm2, %v2994_v0, -inf }
 0x8c1   : > { %3054 = vmax.xlane.f32.xlu1 %v3053_v61 }
 0x8c2   : > { %v3020_v21 = vpop.f32.mrf.mxu2 }
 0x8c3   : > { %v3062_v10 = vsel %vm2158_vm2, %v3020_v21, -inf }
 0x8c4   : > { %3063 = vmax.xlane.f32.xlu0 %v3062_v10 }
 0x8c6   : > { %v3042_v43 = vpop.f32.mrf.mxu3 }
 0x8c7   : > { %v2996_v13 = vpop.f32.mrf.mxu1  ;;  %v3065_v38 = vsel %vm2158_vm2, %v3042_v43, -inf }
 0x8c8   : > { %v3056_v15 = vsel %vm2158_vm2, %v2996_v13, -inf }
 0x8c9   : > { %3057 = vmax.xlane.f32.xlu2 %v3056_v15 }
 0x8ce   : > { %v3044_v18 = vpop.f32.mrf.mxu3 }
 0x8cf   : > { %v3068_v51 = vsel %vm2158_vm2, %v3044_v18, -inf }
 0x8d1   : > { %3066 = vmax.xlane.f32.xlu2 %v3065_v38 }
 0x8d9   : > { %v2516_v6 = vpop.xlane.xlu0 %2515  ;;  %3069 = vmax.xlane.f32.xlu2 %v3068_v51 }
 0x8da   : > { %11380 = vrcp.f32 %v2516_v6  ;;  %v2513_v37 = vpop.xlane.xlu1 %2512 }
 0x8db   : > { %11382 = vrcp.f32 %v2513_v37 }
 0x8e0   : > { %v11381_v23 = vpop.eup %11380 }
 0x8e1   : > { %v11383_v28 = vpop.eup %11382  ;;  %v2544_v17 = vmul.f32 %v11381_v23, %v11377_v27 }
 0x8e2   : > { %v2543_v24 = vmul.f32 %v11383_v28, %v11379_v55 }
 0x8e3   : > { %v2552_v2 = vpack.c.bf16 %v2544_v17, %v2544_v17 }
 0x8e4   : > { %v2551_v3 = vpack.c.bf16 %v2543_v24, %v2543_v24 }
 0x8e5   : > { %v2562_v1 = vunpack.c.l.b16 %v2552_v2 }
 0x8e6   : > { %v2561_v61 = vunpack.c.l.b16 %v2551_v3 }
 0x8e8   : > { %v2563_v10 = vpack.c.b16 %v2562_v1, %v2561_v61 }
 0x8ea   : > { %10060 = vmatmul.msk.bf16.vlgmr.msrb.gmra.mxu0 %vm2158_vm2, %v2563_v10 }
 0x8ec   : > { %v2660_v26 = vpop.permute.xlu0 %2659 }
 0x8f2   : > { %v2662_v15 = vpop.permute.xlu1 %2661 }
 0x8f3   : > { %v2667_v38 = vsel %vm2047_vm1, %v2662_v15, 0 }
 0x8f4   : > { %2676 = vmatpush.bf16.xpose.msra.mxu0 %v2667_v38 }
 0x8fb   : > { %10064 = vmatmul.msk.bf16.vlgmr.msra.gmra.mxu0 %vm2047_vm1, %v2660_v26 }
 0x92f   : > { %v3061_v51 = vpop.xlane.xlu2 %3060 }
 0x930   : > { %v3075_v6 = vsub.f32 %v3018_v36, %v3061_v51 }
 0x932   : > { %v3087_v37 = vmul.f32 1.442695, %v3075_v6 }
 0x934   : > { %11384 = vpow2.f32 %v3087_v37  ;;  %v3055_v27 = vpop.xlane.xlu1 %3054 }
 0x935   : > { %v3073_v55 = vsub.f32 %v2994_v0, %v3055_v27 }
 0x937   : > { %v3083_v23 = vmul.f32 1.442695, %v3073_v55  ;;  %v3064_v28 = vpop.xlane.xlu0 %3063 }
 0x938   : > { %v3076_v17 = vsub.f32 %v3020_v21, %v3064_v28 }
 0x939   : > { %11386 = vpow2.f32 %v3083_v23 }
 0x93a   : > { %v13432_v24 = vpop.eup %11384  ;;  %v3089_v2 = vmul.f32 1.442695, %v3076_v17 }
 0x93b   : > { %v3107_v3 = vsel %vm2158_vm2, %v13432_v24, 0.0 }
 0x93c   : > { %11388 = vpow2.f32 %v3089_v2  ;;  %3108 = vadd.xlane.f32.xlu0 %v3107_v3  ;;  %v3058_v1 = vpop.xlane.xlu2 %3057 }
 0x93d   : > { %v3074_v26 = vsub.f32 %v2996_v13, %v3058_v1 }
 0x93f   : > { %v11387_v61 = vpop.eup %11386  ;;  %v3085_v36 = vmul.f32 1.442695, %v3074_v26 }
 0x940   : > { %v3101_v10 = vsel %vm2158_vm2, %v11387_v61, 0.0 }
 0x941   : > { %11390 = vpow2.f32 %v3085_v36  ;;  %3102 = vadd.xlane.f32.xlu1 %v3101_v10  ;;  %v11712_v10 = vld [vmem:[#allocation14] sm:$0x7] }
 0x942   : > { %v11389_v0 = vpop.eup %11388 }
 0x943   : > { %v3110_v21 = vsel %vm2158_vm2, %v11389_v0, 0.0 }
 0x944   : > { %v3067_v15 = vpop.xlane.xlu2 %3066  ;;  %3111 = vadd.xlane.f32.xlu2 %v3110_v21  ;;  %v13467_v21 = vperm.slane %v11712_v10, 1 }
 0x945   : > { %v3077_v38 = vsub.f32 %v3042_v43, %v3067_v15 }
 0x947   : > { %v11391_v51 = vpop.eup %11390  ;;  %v3091_v6 = vmul.f32 1.442695, %v3077_v38  ;;  %v1655_v38 = vadd.f32 %v13073_v47, %v13467_v21  ;;  %v1668_v47 = vadd.f32 %v13176_v12, %v13467_v21 }
 0x948   : > { %v3104_v37 = vsel %vm2158_vm2, %v11391_v51, 0.0 }
 0x949   : > { %11392 = vpow2.f32 %v3091_v6  ;;  %3105 = vadd.xlane.f32.xlu0 %v3104_v37  ;;  %v1653_v6 = vadd.f32 %v13068_v63, %v13467_v21  ;;  %v1660_v37 = vadd.f32 %v13089_v48, %v13467_v21  ;;  %v1978_v9 = vpack.c.bf16 %v1668_v47, %v1668_v47 }
 0x94c   : > { %v3070_v27 = vpop.xlane.xlu2 %3069 }
 0x94d   : > { %v3078_v13 = vsub.f32 %v3044_v18, %v3070_v27  ;;  %v1670_v27 = vadd.f32 %v13179_v35, %v13467_v21 }
 0x94f   : > { %v13439_v55 = vpop.eup %11392  ;;  %v3093_v23 = vmul.f32 1.442695, %v3078_v13  ;;  %v1979_v63 = vpack.c.bf16 %v1670_v27, %v1670_v27 }
 0x950   : > { %v3113_v28 = vsel %vm2158_vm2, %v13439_v55, 0.0 }
 0x951   : > { %11394 = vpow2.f32 %v3093_v23  ;;  %3114 = vadd.xlane.f32.xlu2 %v3113_v28  ;;  %v1973_v23 = vpack.c.bf16 %v1655_v38, %v1655_v38 }
 0x953   : > { %v3493_v35 = vunpack.c.l.b16 %v1973_v23 }
 0x957   : > { %v13443_v17 = vpop.eup %11394 }
 0x958   : > { %v3116_v43 = vsel %vm2158_vm2, %v13443_v17, 0.0 }
 0x959   : > { %3117 = vadd.xlane.f32.xlu1 %v3116_v43  ;;  %v1658_v43 = vadd.f32 %v13079_v42, %v13467_v21 }
 0x95b   : > { %v1974_v38 = vpack.c.bf16 %v1658_v43, %v1658_v43 }
 0x95d   : > { %3198 = vrot.lane.b32.xlu0 %v13172_v25, %s12345_s23 }
 0x967   : > { %v13451_v18 = vpop.f32.mrf.mxu0 }
 0x969   : > { %3173 = vrot.lane.b32.xlu2 %v13209_v20, %s12345_s23 }
 0x96f   : > { %v13455_v2 = vpop.f32.mrf.mxu0 }
 0x972   : > { %3223 = vrot.lane.b32.xlu1 %v13220_v31, %s12345_s23 }
 0x978   : > { %v13457_v3 = vpop.f32.mrf.mxu0 }
 0x979   : > { %v2755_v1 = vsel %vm2158_vm2, %v13457_v3, -inf }
 0x980   : > { %v13461_v26 = vpop.f32.mrf.mxu0 }
 0x981   : > { %v2758_v25 = vsel %vm2158_vm2, %v13461_v26, -inf }
 0x987   : > { %2756 = vmax.xlane.f32.xlu0 %v2755_v1 }
 0x992   : > { %2759 = vmax.xlane.f32.xlu2 %v2758_v25  ;;  %v1972_v25 = vpack.c.bf16 %v1653_v6, %v1653_v6 }
 0x994   : > { %v3492_v59 = vunpack.c.l.b16 %v1972_v25 }
 0x9aa   : > { %2856 = vrot.lane.b32.xlu2 %v13161_v33, %s12344_s16 }
 0x9af   : > { %v3109_v20 = vpop.xlane.xlu0 %3108 }
 0x9b4   : > { %v3103_v36 = vpop.xlane.xlu1 %3102 }
 0x9b5   : > { %11396 = vrcp.f32 %v3103_v36 }
 0x9b7   : > { %v3112_v31 = vpop.xlane.xlu2 %3111 }
 0x9b8   : > { %11398 = vrcp.f32 %v3112_v31  ;;  %v13481_v31 = vperm.slane %v11712_v10, 2 }
 0x9ba   : > { %v1684_v42 = vadd.f32 %v13183_v19, %v13481_v31  ;;  %v1682_v10 = vadd.f32 %v13181_v16, %v13481_v31 }
 0x9bb   : > { %v11397_v13 = vpop.eup %11396 }
 0x9bc   : > { %v3106_v15 = vpop.xlane.xlu0 %3105  ;;  %v3129_v48 = vmul.f32 %v11397_v13, %v11387_v61  ;;  %v13488_v61 = vpack.c.b16 %v3493_v35, %v3492_v59  ;;  %v3522_v13 = vunpack.c.l.b16 %v1974_v38  ;;  %v1981_v23 = vpack.c.bf16 %v1684_v42, %v1684_v42 }
 0x9bd   : > { %11400 = vrcp.f32 %v3106_v15  ;;  %v1694_v42 = vadd.f32 %v13201_v34, %v13481_v31  ;;  %v1697_v34 = vadd.f32 %v13213_v5, %v13481_v31 }
 0x9be   : > { %11402 = vrcp.f32 %v3109_v20  ;;  %v11399_v28 = vpop.eup %11398  ;;  %v1975_v20 = vpack.c.bf16 %v1660_v37, %v1660_v37  ;;  %v3583_v37 = vunpack.c.l.b16 %v1979_v63  ;;  %v3137_v27 = vpack.c.bf16 %v3129_v48, %v3129_v48 }
 0x9bf   : > { %v3132_v44 = vmul.f32 %v11399_v28, %v11389_v0  ;;  %v3582_v0 = vunpack.c.l.b16 %v1978_v9  ;;  %v3499_v16 = vsel %vm2047_vm1, %v13488_v61, 0  ;;  %v3709_v59 = vunpack.c.l.b16 %v1981_v23 }
 0x9c0   : > { %v3523_v6 = vunpack.c.l.b16 %v1975_v20 }
 0x9c1   : > { %v13492_v19 = vpack.c.b16 %v3583_v37, %v3582_v0  ;;  %v1699_v37 = vadd.f32 %v13225_v41, %v13481_v31  ;;  %v1986_v41 = vpack.c.bf16 %v1697_v34, %v1697_v34 }
 0x9c2   : > { %v13490_v47 = vpack.c.b16 %v3523_v6, %v3522_v13  ;;  %v1692_v6 = vadd.f32 %v13189_v8, %v13481_v31  ;;  %v1689_v8 = vadd.f32 %v13187_v49, %v13481_v31 }
 0x9c3   : > { %v11401_v1 = vpop.eup %11400  ;;  %v1987_v23 = vpack.c.bf16 %v1699_v37, %v1699_v37 }
 0x9c4   : > { %v11403_v36 = vpop.eup %11402  ;;  %v3130_v15 = vmul.f32 %v11401_v1, %v11391_v51  ;;  %v3115_v11 = vpop.xlane.xlu2 %3114  ;;  %v3140_v51 = vpack.c.bf16 %v3132_v44, %v3132_v44  ;;  %v1980_v1 = vpack.c.bf16 %v1682_v10, %v1682_v10  ;;  %v3529_v48 = vsel %vm2047_vm1, %v13490_v47, 0 }
 0x9c5   : > { %v3131_v12 = vmul.f32 %v11403_v36, %v13432_v24  ;;  %v3170_v24 = vunpack.c.l.b16 %v3137_v27  ;;  %v1663_v27 = vadd.f32 %v13149_v46, %v13467_v21  ;;  %v1984_v0 = vpack.c.bf16 %v1692_v6, %v1692_v6 }
 0x9c6   : > { %v3138_v40 = vpack.c.bf16 %v3130_v15, %v3130_v15  ;;  %v3196_v20 = vunpack.c.l.b16 %v3140_v51  ;;  %v3589_v15 = vsel %vm2047_vm1, %v13492_v19, 0  ;;  %v1985_v51 = vpack.c.bf16 %v1694_v42, %v1694_v42 }
 0x9c7   : > { %v3139_v43 = vpack.c.bf16 %v3131_v12, %v3131_v12  ;;  %v1665_v12 = vadd.f32 %v13165_v29, %v13467_v21  ;;  %v1687_v46 = vadd.f32 %v13185_v62, %v13481_v31  ;;  %v3764_v21 = vunpack.c.l.b16 %v1984_v0 }
 0x9c8   : > { %v3171_v28 = vunpack.c.l.b16 %v3138_v40  ;;  %v3708_v40 = vunpack.c.l.b16 %v1980_v1  ;;  %v3793_v5 = vunpack.c.l.b16 %v1987_v23 }
 0x9c9   : > { %v3195_v9 = vunpack.c.l.b16 %v3139_v43  ;;  %v1977_v13 = vpack.c.bf16 %v1665_v12, %v1665_v12  ;;  %v3765_v43 = vunpack.c.l.b16 %v1985_v51 }
 0x9ca   : > { %v3172_v36 = vpack.c.b16 %v3171_v28, %v3170_v24  ;;  %v13501_v38 = vpack.c.b16 %v3709_v59, %v3708_v40  ;;  %v1976_v28 = vpack.c.bf16 %v1663_v27, %v1663_v27 }
 0x9cb   : > { %v3197_v35 = vpack.c.b16 %v3196_v20, %v3195_v9  ;;  %v3553_v24 = vunpack.c.l.b16 %v1977_v13  ;;  %v13523_v59 = vpack.c.b16 %v3765_v43, %v3764_v21 }
 0x9cc   : > { %v3174_v25 = vpop.permute.xlu2 %3173  ;;  %v3118_v44 = vpop.xlane.xlu1 %3117  ;;  %v3552_v20 = vunpack.c.l.b16 %v1976_v28 }
 0x9cd   : > { %3186 = vmatpush.bf16.msra.mxu1 %v3174_v25  ;;  %11404 = vrcp.f32 %v3118_v44  ;;  %v1982_v44 = vpack.c.bf16 %v1687_v46, %v1687_v46 }
 0x9ce   : > { %11406 = vrcp.f32 %v3115_v11  ;;  %v13527_v49 = vpack.c.b16 %v3553_v24, %v3552_v20 }
 0x9cf   : > { %v3199_v63 = vpop.permute.xlu0 %3198  ;;  %v3736_v40 = vunpack.c.l.b16 %v1982_v44 }
 0x9d0   : > { %10077 = vmatmul.msk.bf16.vlgmr.msra.gmra.mxu1 %vm2158_vm2, %v3172_v36  ;;  %3211 = vmatpush.bf16.msrb.mxu2 %v3199_v63 }
 0x9d1   : > { %3508 = vmatpush.bf16.xpose.msrb.mxu1 %v3499_v16  ;;  %v1983_v16 = vpack.c.bf16 %v1689_v8, %v1689_v8 }
 0x9d3   : > { %10078 = vmatmul.msk.bf16.vlgmr.msrb.gmra.mxu2 %vm2158_vm2, %v3197_v35  ;;  %v11405_v10 = vpop.eup %11404  ;;  %v3737_v31 = vunpack.c.l.b16 %v1983_v16 }
 0x9d4   : > { %3538 = vmatpush.bf16.xpose.msra.mxu2 %v3529_v48  ;;  %v11407_v11 = vpop.eup %11406  ;;  %v3134_v29 = vmul.f32 %v11405_v10, %v13443_v17  ;;  %v3792_v17 = vunpack.c.l.b16 %v1986_v41  ;;  %v3559_v48 = vsel %vm2047_vm1, %v13527_v49, 0 }
 0x9d5   : > { %v3133_v1 = vmul.f32 %v11407_v11, %v13439_v55  ;;  %v13537_v35 = vpack.c.b16 %v3737_v31, %v3736_v40 }
 0x9d6   : > { %v3142_v25 = vpack.c.bf16 %v3134_v29, %v3134_v29  ;;  %v13530_v55 = vpack.c.b16 %v3793_v5, %v3792_v17 }
 0x9d7   : > { %v3141_v36 = vpack.c.bf16 %v3133_v1, %v3133_v1 }
 0x9d8   : > { %v3221_v62 = vunpack.c.l.b16 %v3142_v25 }
 0x9d9   : > { %3598 = vmatpush.bf16.xpose.msra.mxu1 %v3589_v15  ;;  %v3220_v9 = vunpack.c.l.b16 %v3141_v36 }
 0x9db   : > { %v3222_v15 = vpack.c.b16 %v3221_v62, %v3220_v9 }
 0x9dc   : > { %3722 = vmatpush.bf16.msrb.mxu2 %v13501_v38 }
 0x9e0   : > { %10112 = vmatmul.msk.bf16.vlgmr.msrb.gmra.mxu1 %vm2047_vm1, %v13120_v39 }
 0x9e1   : > { %3778 = vmatpush.bf16.msrb.mxu1 %v13523_v59 }
 0x9e3   : > { %10113 = vmatmul.msk.bf16.vlgmr.msra.gmra.mxu2 %vm2047_vm1, %v13146_v7 }
 0x9e4   : > { %3806 = vmatpush.bf16.msra.mxu2 %v13530_v55  ;;  %v3224_v63 = vpop.permute.xlu1 %3223 }
 0x9e5   : > { %3236 = vmatpush.bf16.msrb.mxu3 %v3224_v63 }
 0x9e8   : > { %10079 = vmatmul.msk.bf16.vlgmr.msrb.gmra.mxu3 %vm2158_vm2, %v3222_v15 }
 0x9e9   : > { %3568 = vmatpush.bf16.xpose.msra.mxu3 %v3559_v48 }
 0x9f0   : > { %10115 = vmatmul.msk.bf16.vlgmr.msra.gmra.mxu1 %vm2047_vm1, %v13218_v30 }
 0x9f1   : > { %3750 = vmatpush.bf16.msrb.mxu3 %v13537_v35 }
 0x9f8   : > { %10114 = vmatmul.msk.bf16.vlgmr.msra.gmra.mxu3 %vm2047_vm1, %v13170_v53 }
 0x9fa   : > { %v2757_v42 = vpop.xlane.xlu0 %2756 }
 0x9fb   : > { %v2779_v12 = vsub.f32 %v13457_v3, %v2757_v42 }
 0x9fd   : > { %v2787_v6 = vmul.f32 1.442695, %v2779_v12 }
 0x9ff   : > { %11408 = vpow2.f32 %v2787_v6 }
 0xa05   : > { %v11409_v37 = vpop.eup %11408  ;;  %v2760_v10 = vpop.xlane.xlu2 %2759 }
 0xa06   : > { %v2780_v27 = vsub.f32 %v13461_v26, %v2760_v10  ;;  %v2803_v51 = vsel %vm2158_vm2, %v11409_v37, 0.0 }
 0xa07   : > { %2804 = vadd.xlane.f32.xlu1 %v2803_v51 }
 0xa08   : > { %v2789_v34 = vmul.f32 1.442695, %v2780_v27 }
 0xa0a   : > { %11410 = vpow2.f32 %v2789_v34 }
 0xa0d   : > { %v2857_v11 = vpop.permute.xlu2 %2856 }
 0xa0e   : > { %2869 = vmatpush.bf16.msrb.mxu0 %v2857_v11 }
 0xa10   : > { %v11411_v13 = vpop.eup %11410 }
 0xa11   : > { %v2806_v0 = vsel %vm2158_vm2, %v11411_v13, 0.0 }
 0xa12   : > { %2807 = vadd.xlane.f32.xlu0 %v2806_v0 }
 0xa20   : > { %2951 = vrot.lane.b32.xlu1 %v13118_v60, %s12345_s23 }
 0xa26   : > { %2953 = vrot.lane.b32.xlu0 %v13108_v14, %s12345_s23 }
 0xa4d   : > { %v13553_v3 = vpop.f32.mrf.mxu1 }
 0xa55   : > { %v13555_v26 = vpop.f32.mrf.mxu1 }
 0xa56   : > { %v13557_v23 = vpop.f32.mrf.mxu2 }
 0xa5d   : > { %v13559_v29 = vpop.f32.mrf.mxu1 }
 0xa5e   : > { %v13561_v28 = vpop.f32.mrf.mxu2  ;;  %v3605_v8 = vsel %vm2158_vm2, %v13559_v29, -inf }
 0xa5f   : > { %3606 = vmax.xlane.f32.xlu0 %v3605_v8 }
 0xa65   : > { %v3512_v43 = vpop.f32.mrf.mxu1 }
 0xa66   : > { %v13565_v41 = vpop.f32.mrf.mxu2  ;;  %v3608_v60 = vsel %vm2158_vm2, %v3512_v43, -inf }
 0xa67   : > { %3609 = vmax.xlane.f32.xlu2 %v3608_v60  ;;  %v3611_v14 = vsel %vm2158_vm2, %v13565_v41, -inf }
 0xa68   : > { %3612 = vmax.xlane.f32.xlu1 %v3611_v14 }
 0xa6b   : > { %v13570_v1 = vpop.f32.mrf.mxu3 }
 0xa6d   : > { %v13578_v5 = vpop.f32.mrf.mxu1 }
 0xa6e   : > { %v13572_v24 = vpop.f32.mrf.mxu2  ;;  %v3623_v25 = vsel %vm2158_vm2, %v13578_v5, -inf }
 0xa6f   : > { %v3614_v46 = vsel %vm2158_vm2, %v13572_v24, -inf }
 0xa70   : > { %3615 = vmax.xlane.f32.xlu0 %v3614_v46 }
 0xa73   : > { %v13576_v21 = vpop.f32.mrf.mxu3 }
 0xa75   : > { %v3602_v36 = vpop.f32.mrf.mxu1 }
 0xa76   : > { %v3626_v31 = vsel %vm2158_vm2, %v3602_v36, -inf }
 0xa78   : > { %3624 = vmax.xlane.f32.xlu0 %v3623_v25 }
 0xa7a   : > { %v2805_v17 = vpop.xlane.xlu1 %2804 }
 0xa7b   : > { %v3570_v20 = vpop.f32.mrf.mxu3  ;;  %11412 = vrcp.f32 %v2805_v17 }
 0xa7c   : > { %v3617_v16 = vsel %vm2158_vm2, %v3570_v20, -inf }
 0xa7d   : > { %3618 = vmax.xlane.f32.xlu2 %v3617_v16 }
 0xa81   : > { %v11413_v63 = vpop.eup %11412 }
 0xa82   : > { %v2835_v40 = vmul.f32 %v11413_v63, %v11409_v37 }
 0xa83   : > { %v13583_v44 = vpop.f32.mrf.mxu3 }
 0xa84   : > { %v3620_v62 = vsel %vm2158_vm2, %v13583_v44, -inf  ;;  %v2843_v15 = vpack.c.bf16 %v2835_v40, %v2835_v40 }
 0xa85   : > { %v2808_v9 = vpop.xlane.xlu0 %2807  ;;  %3621 = vmax.xlane.f32.xlu1 %v3620_v62  ;;  %3627 = vmax.xlane.f32.xlu2 %v3626_v31 }
 0xa86   : > { %11414 = vrcp.f32 %v2808_v9  ;;  %v2853_v6 = vunpack.c.l.b16 %v2843_v15 }
 0xa8c   : > { %v11415_v48 = vpop.eup %11414  ;;  %3815 = vrot.lane.b32.xlu0 %v13488_v61, %s12343_s3 }
 0xa8d   : > { %v2836_v42 = vmul.f32 %v11415_v48, %v11411_v13 }
 0xa8f   : > { %v2844_v12 = vpack.c.bf16 %v2836_v42, %v2836_v42 }
 0xa91   : > { %v2854_v10 = vunpack.c.l.b16 %v2844_v12 }
 0xa92   : > { %v2952_v11 = vpop.permute.xlu1 %2951 }
 0xa93   : > { %v2855_v27 = vpack.c.b16 %v2854_v10, %v2853_v6 }
 0xa95   : > { %10068 = vmatmul.msk.bf16.vlgmr.msrb.gmra.mxu0 %vm2158_vm2, %v2855_v27 }
 0xa98   : > { %v2954_v51 = vpop.permute.xlu0 %2953 }
 0xa99   : > { %v2959_v34 = vsel %vm2047_vm1, %v2954_v51, 0 }
 0xa9a   : > { %2968 = vmatpush.bf16.xpose.msra.mxu0 %v2959_v34 }
 0xaa5   : > { %10072 = vmatmul.msk.bf16.vlgmr.msra.gmra.mxu0 %vm2047_vm1, %v2952_v11 }
 0xad2   : > { %v3607_v60 = vpop.xlane.xlu0 %3606 }
 0xad3   : > { %v3629_v12 = vsub.f32 %v13559_v29, %v3607_v60 }
 0xada   : > { %v3610_v37 = vpop.xlane.xlu2 %3609 }
 0xadb   : > { %v3630_v0 = vsub.f32 %v3512_v43, %v3610_v37 }
 0xadd   : > { %v3639_v8 = vmul.f32 1.442695, %v3630_v0 }
 0xadf   : > { %11416 = vpow2.f32 %v3639_v8 }
 0xae3   : > { %v3616_v46 = vpop.xlane.xlu0 %3615 }
 0xae5   : > { %v13593_v14 = vpop.eup %11416 }
 0xae6   : > { %v3656_v13 = vsel %vm2158_vm2, %v13593_v14, 0.0 }
 0xae7   : > { %3657 = vadd.xlane.f32.xlu0 %v3656_v13 }
 0xaeb   : > { %v3625_v25 = vpop.xlane.xlu0 %3624 }
 0xaec   : > { %v3635_v8 = vsub.f32 %v13578_v5, %v3625_v25  ;;  %v3613_v25 = vpop.xlane.xlu1 %3612 }
 0xaee   : > { %v3649_v13 = vmul.f32 1.442695, %v3635_v8 }
 0xaf0   : > { %v3619_v62 = vpop.xlane.xlu2 %3618 }
 0xaf1   : > { %v3633_v48 = vsub.f32 %v3570_v20, %v3619_v62  ;;  %v3632_v20 = vsub.f32 %v13572_v24, %v3616_v46 }
 0xaf3   : > { %v3645_v15 = vmul.f32 1.442695, %v3633_v48  ;;  %v3643_v37 = vmul.f32 1.442695, %v3632_v20 }
 0xaf8   : > { %v3628_v43 = vpop.xlane.xlu2 %3627 }
 0xaf9   : > { %v3636_v9 = vsub.f32 %v3602_v36, %v3628_v43  ;;  %v3637_v36 = vmul.f32 1.442695, %v3629_v12  ;;  %v3622_v43 = vpop.xlane.xlu1 %3621 }
 0xafb   : > { %3837 = vrot.lane.b32.xlu0 %v13146_v7, %s12343_s3  ;;  %v3651_v63 = vmul.f32 1.442695, %v3636_v9  ;;  %v3634_v9 = vsub.f32 %v13583_v44, %v3622_v43 }
 0xafd   : > { %11418 = vpow2.f32 %v3651_v63  ;;  %v3647_v63 = vmul.f32 1.442695, %v3634_v9 }
 0xafe   : > { %v3816_v16 = vpop.permute.xlu0 %3815  ;;  %11420 = vpow2.f32 %v3645_v15 }
 0xaff   : > { %v3821_v17 = vsel %vm2047_vm1, %v3816_v16, 0  ;;  %11422 = vpow2.f32 %v3637_v36 }
 0xb00   : > { %3830 = vmatpush.bf16.xpose.msra.mxu3 %v3821_v17  ;;  %11424 = vpow2.f32 %v3643_v37  ;;  %v3631_v17 = vsub.f32 %v13565_v41, %v3613_v25 }
 0xb01   : > { %11426 = vpow2.f32 %v3649_v13 }
 0xb02   : > { %v3641_v62 = vmul.f32 1.442695, %v3631_v17 }
 0xb03   : > { %v13604_v42 = vpop.eup %11418 }
 0xb04   : > { %v3674_v27 = vsel %vm2158_vm2, %v13604_v42, 0.0  ;;  %v13610_v51 = vpop.eup %11420  ;;  %11428 = vpow2.f32 %v3641_v62 }
 0xb05   : > { %v3665_v29 = vsel %vm2158_vm2, %v13610_v51, 0.0  ;;  %v11423_v0 = vpop.eup %11422  ;;  %11430 = vpow2.f32 %v3647_v63 }
 0xb06   : > { %v3653_v60 = vsel %vm2158_vm2, %v11423_v0, 0.0  ;;  %v13618_v16 = vpop.eup %11424 }
 0xb07   : > { %v3662_v24 = vsel %vm2158_vm2, %v13618_v16, 0.0  ;;  %v13624_v46 = vpop.eup %11426 }
 0xb08   : > { %v3671_v5 = vsel %vm2158_vm2, %v13624_v46, 0.0 }
 0xb0a   : > { %v13640_v48 = vpop.eup %11428 }
 0xb0b   : > { %v3659_v15 = vsel %vm2158_vm2, %v13640_v48, 0.0  ;;  %v13644_v41 = vpop.eup %11430 }
 0xb0c   : > { %v3668_v12 = vsel %vm2158_vm2, %v13644_v41, 0.0 }
 0xb12   : > { %v13600_v31 = vpop.f32.mrf.mxu0 }
 0xb1a   : > { %v13602_v40 = vpop.f32.mrf.mxu0 }
 0xb22   : > { %v2970_v6 = vpop.f32.mrf.mxu0 }
 0xb23   : > { %v3047_v10 = vsel %vm2158_vm2, %v2970_v6, -inf }
 0xb24   : > { %3048 = vmax.xlane.f32.xlu2 %v3047_v10 }
 0xb25   : > { %3675 = vadd.xlane.f32.xlu0 %v3674_v27 }
 0xb2a   : > { %v2972_v34 = vpop.f32.mrf.mxu0 }
 0xb2b   : > { %v3050_v11 = vsel %vm2158_vm2, %v2972_v34, -inf }
 0xb2c   : > { %3051 = vmax.xlane.f32.xlu1 %v3050_v11 }
 0xb2d   : > { %3666 = vadd.xlane.f32.xlu0 %v3665_v29 }
 0xb34   : > { %3654 = vadd.xlane.f32.xlu1 %v3653_v60 }
 0xb3c   : > { %3663 = vadd.xlane.f32.xlu1 %v3662_v24  ;;  %3839 = vrot.lane.b32.xlu2 %v13490_v47, %s12343_s3 }
 0xb41   : > { %3861 = vrot.lane.b32.xlu0 %v13170_v53, %s12343_s3 }
 0xb44   : > { %3672 = vadd.xlane.f32.xlu1 %v3671_v5 }
 0xb49   : > { %3887 = vrot.lane.b32.xlu0 %v13492_v19, %s12343_s3 }
 0xb51   : > { %3885 = vrot.lane.b32.xlu0 %v13218_v30, %s12343_s3 }
 0xb59   : > { %3148 = vrot.lane.b32.xlu0 %v13161_v33, %s12345_s23 }
 0xb5a   : > { %v3658_v33 = vpop.xlane.xlu0 %3657 }
 0xb5d   : > { %3813 = vrot.lane.b32.xlu1 %v13120_v39, %s12343_s3 }
 0xb65   : > { %3660 = vadd.xlane.f32.xlu2 %v3659_v15 }
 0xb6d   : > { %3669 = vadd.xlane.f32.xlu2 %v3668_v12  ;;  %v13650_v27 = vpop.permute.xlu0 %3837 }
 0xb85   : > { %3863 = vrot.lane.b32.xlu2 %v13527_v49, %s12343_s3 }
 0xb97   : > { %v3049_v44 = vpop.xlane.xlu2 %3048 }
 0xb98   : > { %v3071_v10 = vsub.f32 %v2970_v6, %v3049_v44  ;;  %v3676_v8 = vpop.xlane.xlu0 %3675 }
 0xb9a   : > { %v3079_v36 = vmul.f32 1.442695, %v3071_v10 }
 0xb9c   : > { %11432 = vpow2.f32 %v3079_v36 }
 0xb9d   : > { %11434 = vrcp.f32 %v3658_v33 }
 0xb9f   : > { %v3052_v20 = vpop.xlane.xlu1 %3051  ;;  %v3840_v11 = vpop.permute.xlu2 %3839 }
 0xba0   : > { %v3072_v29 = vsub.f32 %v2972_v34, %v3052_v20  ;;  %v3845_v37 = vsel %vm2047_vm1, %v3840_v11, 0  ;;  %v3667_v17 = vpop.xlane.xlu0 %3666 }
 0xba1   : > { %3854 = vmatpush.bf16.xpose.msra.mxu1 %v3845_v37 }
 0xba2   : > { %v13653_v60 = vpop.eup %11432  ;;  %v3081_v13 = vmul.f32 1.442695, %v3072_v29 }
 0xba3   : > { %v3095_v24 = vsel %vm2158_vm2, %v13653_v60, 0.0  ;;  %v11435_v5 = vpop.eup %11434 }
 0xba4   : > { %11436 = vpow2.f32 %v3081_v13  ;;  %3096 = vadd.xlane.f32.xlu1 %v3095_v24  ;;  %v3686_v34 = vmul.f32 %v11435_v5, %v13593_v14  ;;  %v11136_v14 = vpack.i.bf16 %v13602_v40, %v13600_v31 }
 0xba6   : > { %v3694_v9 = vpack.c.bf16 %v3686_v34, %v3686_v34 }
 0xba7   : > { %v3655_v6 = vpop.xlane.xlu1 %3654 }
 0xba8   : > { %11438 = vrcp.f32 %v3655_v6  ;;  %v3704_v33 = vunpack.c.l.b16 %v3694_v9  ;;  %v11146_v6 = vpack.i.bf16 %v13350_v54, %v13346_v4 }
 0xba9   : > { %11440 = vrcp.f32 %v3676_v8 }
 0xbaa   : > { %v13657_v25 = vpop.eup %11436 }
 0xbab   : > { %v3098_v62 = vsel %vm2158_vm2, %v13657_v25, 0.0 }
 0xbae   : > { %v11439_v43 = vpop.eup %11438  ;;  %3099 = vadd.xlane.f32.xlu2 %v3098_v62 }
 0xbaf   : > { %v3685_v63 = vmul.f32 %v11439_v43, %v11423_v0  ;;  %v3664_v15 = vpop.xlane.xlu1 %3663  ;;  %v11441_v11 = vpop.eup %11440  ;;  %v11131_v43 = vpack.i.bf16 %v13455_v2, %v13451_v18 }
 0xbb0   : > { %v3692_v29 = vmul.f32 %v11441_v11, %v13604_v42  ;;  %v11151_v42 = vpack.i.bf16 %v13417_v50, %v13413_v32 }
 0xbb1   : > { %v3693_v12 = vpack.c.bf16 %v3685_v63, %v3685_v63 }
 0xbb2   : > { %v3700_v13 = vpack.c.bf16 %v3692_v29, %v3692_v29 }
 0xbb3   : > { %v3703_v44 = vunpack.c.l.b16 %v3693_v12  ;;  %v3862_v10 = vpop.permute.xlu0 %3861 }
 0xbb4   : > { %v3788_v5 = vunpack.c.l.b16 %v3700_v13 }
 0xbb5   : > { %v3705_v36 = vpack.c.b16 %v3704_v33, %v3703_v44 }
 0xbb7   : > { %v3673_v20 = vpop.xlane.xlu1 %3672  ;;  %10116 = vmatmul.msk.bf16.vlgmr.msrb.gmra.mxu2 %vm2158_vm2, %v3705_v36 }
 0xbb8   : > { %11442 = vrcp.f32 %v3673_v20 }
 0xbb9   : > { %11444 = vrcp.f32 %v3664_v15 }
 0xbbb   : > { %v3888_v37 = vpop.permute.xlu0 %3887 }
 0xbbc   : > { %v3893_v11 = vsel %vm2047_vm1, %v3888_v37, 0 }
 0xbbd   : > { %11137 = vrot.lane.b32.xlu1 %v11136_v14, %s12344_s16 }
 0xbbe   : > { %v11443_v0 = vpop.eup %11442 }
 0xbbf   : > { %v3691_v8 = vmul.f32 %v11443_v0, %v13624_v46  ;;  %v11445_v54 = vpop.eup %11444 }
 0xbc0   : > { %v3688_v18 = vmul.f32 %v11445_v54, %v13618_v16 }
 0xbc1   : > { %v3699_v24 = vpack.c.bf16 %v3691_v8, %v3691_v8 }
 0xbc2   : > { %v3696_v46 = vpack.c.bf16 %v3688_v18, %v3688_v18 }
 0xbc3   : > { %v3787_v34 = vunpack.c.l.b16 %v3699_v24  ;;  %v3886_v62 = vpop.permute.xlu0 %3885 }
 0xbc4   : > { %v3732_v50 = vunpack.c.l.b16 %v3696_v46 }
 0xbc5   : > { %v3789_v31 = vpack.c.b16 %v3788_v5, %v3787_v34  ;;  %11147 = vrot.lane.b32.xlu1 %v11146_v6, %s12345_s23 }
 0xbc6   : > { %11132 = vrot.lane.b32.xlu2 %v11131_v43, %s12345_s23 }
 0xbc7   : > { %10119 = vmatmul.msk.bf16.vlgmr.msra.gmra.mxu2 %vm2158_vm2, %v3789_v31 }
 0xbcb   : > { %v3149_v40 = vpop.permute.xlu0 %3148 }
 0xbcc   : > { %3161 = vmatpush.bf16.msrb.mxu0 %v3149_v40 }
 0xbce   : > { %11152 = vrot.lane.b32.xlu2 %v11151_v42, %s12344_s16 }
 0xbcf   : > { %v3814_v13 = vpop.permute.xlu1 %3813 }
 0xbd8   : > { %v3661_v4 = vpop.xlane.xlu2 %3660 }
 0xbd9   : > { %11446 = vrcp.f32 %v3661_v4 }
 0xbda   : > { %11448 = vrcp.f32 %v3667_v17 }
 0xbdf   : > { %v11447_v2 = vpop.eup %11446 }
 0xbe0   : > { %v3687_v9 = vmul.f32 %v11447_v2, %v13640_v48  ;;  %v3670_v63 = vpop.xlane.xlu2 %3669  ;;  %v11449_v12 = vpop.eup %11448 }
 0xbe1   : > { %11450 = vrcp.f32 %v3670_v63  ;;  %v3689_v32 = vmul.f32 %v11449_v12, %v13610_v51 }
 0xbe2   : > { %v3695_v33 = vpack.c.bf16 %v3687_v9, %v3687_v9 }
 0xbe3   : > { %v3697_v20 = vpack.c.bf16 %v3689_v32, %v3689_v32 }
 0xbe4   : > { %v3731_v44 = vunpack.c.l.b16 %v3695_v33 }
 0xbe5   : > { %v3759_v29 = vunpack.c.l.b16 %v3697_v20 }
 0xbe6   : > { %v3733_v36 = vpack.c.b16 %v3732_v50, %v3731_v44 }
 0xbe7   : > { %v11451_v15 = vpop.eup %11450 }
 0xbe8   : > { %v3690_v17 = vmul.f32 %v11451_v15, %v13644_v41  ;;  %10117 = vmatmul.msk.bf16.vlgmr.msrb.gmra.mxu3 %vm2158_vm2, %v3733_v36  ;;  %v3864_v16 = vpop.permute.xlu2 %3863 }
 0xbe9   : > { %3902 = vmatpush.bf16.xpose.msrb.mxu3 %v3893_v11  ;;  %v3869_v48 = vsel %vm2047_vm1, %v3864_v16, 0 }
 0xbea   : > { %v3698_v14 = vpack.c.bf16 %v3690_v17, %v3690_v17  ;;  %3878 = vmatpush.bf16.xpose.msrb.mxu2 %v3869_v48 }
 0xbec   : > { %v3760_v0 = vunpack.c.l.b16 %v3698_v14 }
 0xbee   : > { %v3761_v51 = vpack.c.b16 %v3760_v0, %v3759_v29 }
 0xbf0   : > { %10118 = vmatmul.msk.bf16.vlgmr.msrb.gmra.mxu1 %vm2158_vm2, %v3761_v51 }
 0xbf1   : > { %10122 = vmatmul.msk.bf16.vlgmr.msrb.gmra.mxu2 %vm2047_vm1, %v3862_v10 }
 0xbf8   : > { %10120 = vmatmul.msk.bf16.vlgmr.msra.gmra.mxu3 %vm2047_vm1, %v3814_v13 }
 0xc00   : > { %10121 = vmatmul.msk.bf16.vlgmr.msra.gmra.mxu1 %vm2047_vm1, %v13650_v27 }
 0xc08   : > { %10123 = vmatmul.msk.bf16.vlgmr.msrb.gmra.mxu3 %vm2047_vm1, %v3886_v62 }
 0xc17   : > { %v3097_v41 = vpop.xlane.xlu1 %3096 }
 0xc18   : > { %11452 = vrcp.f32 %v3097_v41 }
 0xc1e   : > { %v11453_v8 = vpop.eup %11452 }
 0xc1f   : > { %v3127_v24 = vmul.f32 %v11453_v8, %v13653_v60 }
 0xc21   : > { %v3100_v37 = vpop.xlane.xlu2 %3099  ;;  %v3135_v5 = vpack.c.bf16 %v3127_v24, %v3127_v24  ;;  %v11156_v24 = vpack.i.bf16 %v13555_v26, %v13553_v3  ;;  %v10789_v3 = vld [vmem:[#allocation19 + $0x38] sm:$0xff]  ;;  %v10788_v26 = vld [vmem:[#allocation19 + $0x30] sm:$0xff] }
 0xc22   : > { %11454 = vrcp.f32 %v3100_v37  ;;  %3448 = vmatpush.bf16.msra.mxu0 %v10789_v3  ;;  %v11161_v3 = vpack.i.bf16 %v13348_v45, %v13344_v22 }
 0xc23   : > { %v3145_v31 = vunpack.c.l.b16 %v3135_v5 }
 0xc26   : > { %3449 = vmatpush.bf16.msra.mxu0 %v10788_v26  ;;  %v11166_v26 = vpack.i.bf16 %v13415_v52, %v13411_v56 }
 0xc28   : > { %v11455_v6 = vpop.eup %11454 }
 0xc29   : > { %v3128_v34 = vmul.f32 %v11455_v6, %v13657_v25  ;;  %v11133_v10 = vpop.permute.xlu2 %11132 }
 0xc2a   : > { %v11135_v42 = vunpack.i.h.bf16 %v11133_v10  ;;  %v11134_v4 = vunpack.i.l.bf16 %v11133_v10 }
 0xc2b   : > { %v3136_v43 = vpack.c.bf16 %v3128_v34, %v3128_v34 }
 0xc2c   : > { %v3340_v2 = vsel %vm2047_vm1, %v13285_v58, %v11135_v42  ;;  %v3339_v60 = vsel %vm2047_vm1, %v13283_v57, %v11134_v4 }
 0xc2d   : > { %v3146_v40 = vunpack.c.l.b16 %v3136_v43 }
 0xc2f   : > { %v3147_v27 = vpack.c.b16 %v3146_v40, %v3145_v31  ;;  %v11138_v62 = vpop.permute.xlu1 %11137 }
 0xc30   : > { %v11140_v54 = vunpack.i.h.bf16 %v11138_v62  ;;  %v11139_v18 = vunpack.i.l.bf16 %v11138_v62 }
 0xc31   : > { %10076 = vmatmul.msk.bf16.vlgmr.msrb.gmra.mxu0 %vm2158_vm2, %v3147_v27  ;;  %v13744_v5 = vpop.permute.xlu2 %11152 }
 0xc32   : > { %v13699_v25 = vsel %vm3347_vm3, %v3339_v60, %v11139_v18  ;;  %v13702_v46 = vsel %vm3347_vm3, %v3340_v2, %v11140_v54  ;;  %v10787_v2 = vld [vmem:[#allocation19 + $0x28] sm:$0xff] }
 0xc33   : > { %3450 = vmatpush.bf16.msra.mxu0 %v10787_v2 }
 0xc37   : > { %v13748_v10 = vpop.permute.xlu1 %11147 }
 0xc3a   : > { %v13704_v9 = vpop.f32.mrf.mxu2 }
 0xc42   : > { %v13706_v63 = vpop.f32.mrf.mxu2 }
 0xc4a   : > { %v13710_v33 = vpop.f32.mrf.mxu2 }
 0xc52   : > { %v13716_v57 = vpop.f32.mrf.mxu2 }
 0xc6b   : > { %v13708_v12 = vpop.f32.mrf.mxu3 }
 0xc6d   : > { %v13712_v58 = vpop.f32.mrf.mxu1 }
 0xc73   : > { %v13714_v32 = vpop.f32.mrf.mxu3 }
 0xc74   : > { %v3880_v15 = vpop.f32.mrf.mxu2 }
 0xc75   : > { %v13719_v36 = vpop.f32.mrf.mxu1  ;;  %v3921_v17 = vsel %vm2158_vm2, %v3880_v15, -inf }
 0xc7b   : > { %v3832_v50 = vpop.f32.mrf.mxu3 }
 0xc7c   : > { %v3909_v44 = vsel %vm2158_vm2, %v3832_v50, -inf  ;;  %v3882_v48 = vpop.f32.mrf.mxu2 }
 0xc7d   : > { %3910 = vmax.xlane.f32.xlu2 %v3909_v44  ;;  %v13726_v16 = vpop.f32.mrf.mxu1  ;;  %v3924_v0 = vsel %vm2158_vm2, %v3882_v48, -inf }
 0xc7e   : > { %v3915_v40 = vsel %vm2158_vm2, %v13726_v16, -inf }
 0xc83   : > { %v13721_v20 = vpop.f32.mrf.mxu3 }
 0xc84   : > { %v3912_v11 = vsel %vm2158_vm2, %v13721_v20, -inf }
 0xc85   : > { %3913 = vmax.xlane.f32.xlu1 %v3912_v11  ;;  %3922 = vmax.xlane.f32.xlu2 %v3921_v17  ;;  %v3858_v51 = vpop.f32.mrf.mxu1  ;;  %v10786_v17 = vld [vmem:[#allocation19 + $0x20] sm:$0xff] }
 0xc86   : > { %v3918_v13 = vsel %vm2158_vm2, %v3858_v51, -inf  ;;  %3451 = vmatpush.bf16.msra.mxu0 %v10786_v17 }
 0xc8b   : > { %v13728_v14 = vpop.f32.mrf.mxu3 }
 0xc8c   : > { %v3927_v29 = vsel %vm2158_vm2, %v13728_v14, -inf }
 0xc8d   : > { %3928 = vmax.xlane.f32.xlu2 %v3927_v29  ;;  %3925 = vmax.xlane.f32.xlu1 %v3924_v0  ;;  %v10785_v0 = vld [vmem:[#allocation19 + $0x18] sm:$0xff] }
 0xc8e   : > { %3452 = vmatpush.bf16.msra.mxu0 %v10785_v0  ;;  %v11149_v0 = vunpack.i.l.bf16 %v13748_v10 }
 0xc93   : > { %v13742_v6 = vpop.f32.mrf.mxu3 }
 0xc94   : > { %v3930_v34 = vsel %vm2158_vm2, %v13742_v6, -inf }
 0xc95   : > { %3919 = vmax.xlane.f32.xlu1 %v3918_v13 }
 0xca5   : > { %4060 = vrot.lane.b32.xlu2 %v13523_v59, %s12343_s3 }
 0xcae   : > { %4035 = vrot.lane.b32.xlu1 %v13537_v35, %s12343_s3  ;;  %v3163_v41 = vpop.f32.mrf.mxu0 }
 0xcb6   : > { %v3165_v37 = vpop.f32.mrf.mxu0 }
 0xcb7   : > { %v11141_v8 = vpack.i.bf16 %v3165_v37, %v3163_v41  ;;  %v10784_v41 = vld [vmem:[#allocation19 + $0x10] sm:$0xff] }
 0xcb8   : > { %3453 = vmatpush.bf16.msra.mxu0 %v10784_v41 }
 0xcb9   : > { %11142 = vrot.lane.b32.xlu0 %v11141_v8, %s12343_s3 }
 0xcc1   : > { %11157 = vrot.lane.b32.xlu0 %v11156_v24, %s12343_s3 }
 0xceb   : > { %3931 = vmax.xlane.f32.xlu0 %v3930_v34 }
 0xcf0   : > { %v3911_v43 = vpop.xlane.xlu2 %3910 }
 0xcf1   : > { %v3933_v31 = vsub.f32 %v3832_v50, %v3911_v43 }
 0xcf3   : > { %v3941_v42 = vmul.f32 1.442695, %v3933_v31  ;;  %3916 = vmax.xlane.f32.xlu0 %v3915_v40  ;;  %v10783_v31 = vld [vmem:[#allocation19 + $0x8] sm:$0xff] }
 0xcf4   : > { %3454 = vmatpush.bf16.msra.mxu0 %v10783_v31  ;;  %v11154_v31 = vunpack.i.l.bf16 %v13744_v5 }
 0xcf5   : > { %11456 = vpow2.f32 %v3941_v42  ;;  %v10782_v42 = vld [vmem:[#allocation19] sm:$0xff] }
 0xcf8   : > { %v13752_v4 = vpop.xlane.xlu1 %3913  ;;  %v3923_v27 = vpop.xlane.xlu2 %3922  ;;  %3455 = vmatpush.bf16.msra.mxu0 %v10782_v42 }
 0xcf9   : > { %v3937_v62 = vsub.f32 %v3880_v15, %v3923_v27 }
 0xcfb   : > { %v13754_v54 = vpop.eup %11456  ;;  %v3949_v18 = vmul.f32 1.442695, %v3937_v62  ;;  %v18217_v62 = vld [vmem:[#allocation51_spill] sm:$0xff] }
 0xcfc   : > { %v3957_v60 = vsel %vm2158_vm2, %v13754_v54, 0.0 }
 0xcfd   : > { %3958 = vadd.xlane.f32.xlu2 %v3957_v60  ;;  %11458 = vpow2.f32 %v3949_v18  ;;  %v18218_v18 = vld [vmem:[#allocation52_spill] sm:$0xff] }
 0xcfe   : > { %v11181_v2 = vpack.i.bf16 %v18218_v18, %v18217_v62 }
 0xd00   : > { %v3926_v50 = vpop.xlane.xlu1 %3925  ;;  %v13758_v44 = vpop.xlane.xlu2 %3928 }
 0xd01   : > { %v3938_v11 = vsub.f32 %v3882_v48, %v3926_v50  ;;  %v11171_v50 = vpack.i.bf16 %v13561_v28, %v13557_v23  ;;  %v18219_v28 = vld [vmem:[#allocation46_spill] sm:$0xff] }
 0xd03   : > { %v3951_v29 = vmul.f32 1.442695, %v3938_v11  ;;  %v13760_v15 = vpop.eup %11458 }
 0xd04   : > { %v3969_v13 = vsel %vm2158_vm2, %v13760_v15, 0.0 }
 0xd05   : > { %11460 = vpow2.f32 %v3951_v29  ;;  %3970 = vadd.xlane.f32.xlu2 %v3969_v13  ;;  %v11150_v29 = vunpack.i.h.bf16 %v13748_v10 }
 0xd07   : > { %4010 = vrot.lane.b32.xlu0 %v13501_v38, %s12343_s3 }
 0xd08   : > { %v3920_v37 = vpop.xlane.xlu1 %3919  ;;  %v4061_v8 = vpop.permute.xlu2 %4060 }
 0xd09   : > { %v3936_v24 = vsub.f32 %v3858_v51, %v3920_v37  ;;  %4073 = vmatpush.bf16.msra.mxu3 %v4061_v8  ;;  %v3342_v8 = vsel %vm2047_vm1, %v18219_v28, %v11150_v29 }
 0xd0b   : > { %v13766_v48 = vpop.eup %11460  ;;  %v3947_v34 = vmul.f32 1.442695, %v3936_v24  ;;  %v18220_v24 = vld [vmem:[#allocation44_spill] sm:$0xff] }
 0xd0c   : > { %v3972_v43 = vsel %vm2158_vm2, %v13766_v48, 0.0 }
 0xd0d   : > { %11462 = vpow2.f32 %v3947_v34  ;;  %3973 = vadd.xlane.f32.xlu1 %v3972_v43  ;;  %v11155_v43 = vunpack.i.h.bf16 %v13744_v5  ;;  %v3934_v5 = vsub.f32 %v13721_v20, %v13752_v4 }
 0xd0f   : > { %4131 = vrot.lane.b32.xlu0 %v13490_v47, %s12344_s16  ;;  %v3351_v10 = vsel %vm3347_vm3, %v3342_v8, %v11155_v43 }
 0xd13   : > { %v13772_v40 = vpop.eup %11462 }
 0xd14   : > { %v3966_v51 = vsel %vm2158_vm2, %v13772_v40, 0.0 }
 0xd15   : > { %3967 = vadd.xlane.f32.xlu2 %v3966_v51 }
 0xd17   : > { %11162 = vrot.lane.b32.xlu0 %v11161_v3, %s12345_s23 }
 0xd1f   : > { %11167 = vrot.lane.b32.xlu0 %v11166_v26, %s12344_s16 }
 0xd20   : > { %v4036_v27 = vpop.permute.xlu1 %4035 }
 0xd21   : > { %4048 = vmatpush.bf16.msra.mxu2 %v4036_v27 }
 0xd27   : > { %4107 = vrot.lane.b32.xlu0 %v13488_v61, %s12344_s16 }
 0xd2b   : > { %v11143_v60 = vpop.permute.xlu0 %11142 }
 0xd2c   : > { %v11145_v22 = vunpack.i.h.bf16 %v11143_v60  ;;  %v11144_v45 = vunpack.i.l.bf16 %v11143_v60  ;;  %v3939_v60 = vsub.f32 %v13728_v14, %v13758_v44 }
 0xd2d   : > { %11182 = vrot.lane.b32.xlu2 %v11181_v2, %s12344_s16 }
 0xd2e   : > { %v3357_v56 = vsel %vm3356_vm4, %v13699_v25, %v11144_v45  ;;  %v3358_v52 = vsel %vm3356_vm4, %v13702_v46, %v11145_v22  ;;  %v3341_v25 = vsel %vm2047_vm1, %v18220_v24, %v11149_v0  ;;  %v3953_v22 = vmul.f32 1.442695, %v3939_v60 }
 0xd2f   : > { %v3365_v11 = vpack.c.bf16 %v3357_v56, %v3357_v56  ;;  %v3366_v17 = vpack.c.bf16 %v3358_v52, %v3358_v52  ;;  %11172 = vrot.lane.b32.xlu0 %v11171_v50, %s12343_s3  ;;  %v3350_v42 = vsel %vm3347_vm3, %v3341_v25, %v11154_v31  ;;  %v3943_v45 = vmul.f32 1.442695, %v3934_v5 }
 0xd30   : > { %11464 = vpow2.f32 %v3953_v22 }
 0xd31   : > { %v3384_v13 = vunpack.c.l.b16 %v3365_v11  ;;  %v3385_v41 = vunpack.c.l.b16 %v3366_v17  ;;  %11466 = vpow2.f32 %v3943_v45  ;;  %v18223_v45 = vld [vmem:[#allocation45_spill] sm:$0xff] }
 0xd33   : > { %v3392_v37 = vpack.c.b16 %v3385_v41, %v3384_v13  ;;  %v11158_v23 = vpop.permute.xlu0 %11157 }
 0xd34   : > { %v11160_v34 = vunpack.i.h.bf16 %v11158_v23  ;;  %v11159_v46 = vunpack.i.l.bf16 %v11158_v23 }
 0xd35   : > { %3456 = vmatmul.bf16.vlgmr.msra.gmra.mxu0 %v3392_v37  ;;  %v18221_v37 = vld [vmem:[#allocation49_spill] sm:$0xff] }
 0xd36   : > { %v3359_v51 = vsel %vm3356_vm4, %v3350_v42, %v11159_v46  ;;  %v3360_v3 = vsel %vm3356_vm4, %v3351_v10, %v11160_v34  ;;  %v13810_v50 = vpop.eup %11464  ;;  %v11186_v34 = vpack.i.bf16 %v13576_v21, %v13570_v1 }
 0xd37   : > { %v3367_v26 = vpack.c.bf16 %v3359_v51, %v3359_v51  ;;  %v3368_v27 = vpack.c.bf16 %v3360_v3, %v3360_v3  ;;  %v13812_v56 = vpop.eup %11466  ;;  %v3975_v52 = vsel %vm2158_vm2, %v13810_v50, 0.0 }
 0xd38   : > { %v3960_v11 = vsel %vm2158_vm2, %v13812_v56, 0.0 }
 0xd39   : > { %v3386_v62 = vunpack.c.l.b16 %v3367_v26  ;;  %v3387_v18 = vunpack.c.l.b16 %v3368_v27 }
 0xd3b   : > { %v3393_v2 = vpack.c.b16 %v3387_v18, %v3386_v62 }
 0xd45   : > { %3461 = vmatmul.bf16.gmra.mxu0 %v3393_v2 }
 0xd56   : > { %3976 = vadd.xlane.f32.xlu2 %v3975_v52 }
 0xd59   : > { %3961 = vadd.xlane.f32.xlu0 %v3960_v11  ;;  %v18224_v11 = vld [vmem:[#allocation43_spill] sm:$0xff] }
 0xd5e   : > { %v3932_v14 = vpop.xlane.xlu0 %3931 }
 0xd66   : > { %v3917_v44 = vpop.xlane.xlu0 %3916 }
 0xd67   : > { %v3935_v20 = vsub.f32 %v13726_v16, %v3917_v44  ;;  %v18222_v16 = vld [vmem:[#allocation50_spill] sm:$0xff] }
 0xd68   : > { %v11176_v23 = vpack.i.bf16 %v18222_v16, %v18221_v37 }
 0xd69   : > { %v3945_v4 = vmul.f32 1.442695, %v3935_v20 }
 0xd6b   : > { %11468 = vpow2.f32 %v3945_v4 }
 0xd6d   : > { %4105 = vrot.lane.b32.xlu0 %v13120_v39, %s12344_s16 }
 0xd70   : > { %v3959_v17 = vpop.xlane.xlu2 %3958 }
 0xd71   : > { %v13821_v29 = vpop.eup %11468 }
 0xd72   : > { %v3963_v0 = vsel %vm2158_vm2, %v13821_v29, 0.0 }
 0xd73   : > { %3964 = vadd.xlane.f32.xlu1 %v3963_v0 }
 0xd75   : > { %4155 = vrot.lane.b32.xlu0 %v13527_v49, %s12344_s16 }
 0xd78   : > { %v3971_v13 = vpop.xlane.xlu2 %3970 }
 0xd79   : > { %v4011_v41 = vpop.permute.xlu0 %4010  ;;  %11470 = vrcp.f32 %v3971_v13 }
 0xd7a   : > { %4023 = vmatpush.bf16.msrb.mxu1 %v4011_v41 }
 0xd7d   : > { %11177 = vrot.lane.b32.xlu0 %v11176_v23, %s12345_s23 }
 0xd7f   : > { %v11471_v8 = vpop.eup %11470 }
 0xd80   : > { %v3974_v28 = vpop.xlane.xlu1 %3973  ;;  %v3993_v46 = vmul.f32 %v11471_v8, %v13760_v15 }
 0xd81   : > { %11472 = vrcp.f32 %v3974_v28  ;;  %v4132_v24 = vpop.permute.xlu0 %4131 }
 0xd82   : > { %v4137_v25 = vsel %vm2047_vm1, %v4132_v24, 0  ;;  %v4001_v31 = vpack.c.bf16 %v3993_v46, %v3993_v46 }
 0xd83   : > { %4146 = vmatpush.bf16.xpose.msrb.mxu2 %v4137_v25 }
 0xd84   : > { %v4057_v3 = vunpack.c.l.b16 %v4001_v31 }
 0xd85   : > { %11187 = vrot.lane.b32.xlu0 %v11186_v34, %s12343_s3 }
 0xd87   : > { %v11473_v43 = vpop.eup %11472 }
 0xd88   : > { %v3994_v42 = vmul.f32 %v11473_v43, %v13766_v48  ;;  %v3940_v48 = vsub.f32 %v13742_v6, %v3932_v14 }
 0xd89   : > { %v11163_v10 = vpop.permute.xlu0 %11162 }
 0xd8a   : > { %v4002_v51 = vpack.c.bf16 %v3994_v42, %v3994_v42  ;;  %v11165_v62 = vunpack.i.h.bf16 %v11163_v10  ;;  %v11164_v18 = vunpack.i.l.bf16 %v11163_v10  ;;  %v3955_v5 = vmul.f32 1.442695, %v3940_v48 }
 0xd8c   : > { %v4058_v26 = vunpack.c.l.b16 %v4002_v51  ;;  %4129 = vrot.lane.b32.xlu1 %v13146_v7, %s12344_s16  ;;  %v3344_v52 = vsel %vm2047_vm1, %v18223_v45, %v11165_v62  ;;  %v3343_v44 = vsel %vm2047_vm1, %v18224_v11, %v11164_v18  ;;  %11474 = vpow2.f32 %v3955_v5 }
 0xd8d   : > { %11476 = vrcp.f32 %v3959_v17 }
 0xd8e   : > { %v4059_v27 = vpack.c.b16 %v4058_v26, %v4057_v3 }
 0xd90   : > { %10126 = vmatmul.msk.bf16.vlgmr.msra.gmra.mxu3 %vm2158_vm2, %v4059_v27  ;;  %v3968_v27 = vpop.xlane.xlu2 %3967 }
 0xd91   : > { %v11168_v1 = vpop.permute.xlu0 %11167 }
 0xd92   : > { %v11170_v2 = vunpack.i.h.bf16 %v11168_v1  ;;  %v11169_v60 = vunpack.i.l.bf16 %v11168_v1  ;;  %v13855_v8 = vpop.eup %11474 }
 0xd93   : > { %v3978_v24 = vsel %vm2158_vm2, %v13855_v8, 0.0  ;;  %v11477_v34 = vpop.eup %11476 }
 0xd94   : > { %4153 = vrot.lane.b32.xlu1 %v13170_v53, %s12344_s16  ;;  %v3352_v0 = vsel %vm3347_vm3, %v3343_v44, %v11169_v60  ;;  %v3353_v13 = vsel %vm3347_vm3, %v3344_v52, %v11170_v2  ;;  %v3989_v46 = vmul.f32 %v11477_v34, %v13754_v54 }
 0xd96   : > { %v3997_v31 = vpack.c.bf16 %v3989_v46, %v3989_v46 }
 0xd98   : > { %v4007_v51 = vunpack.c.l.b16 %v3997_v31  ;;  %v11183_v11 = vpop.permute.xlu2 %11182 }
 0xd99   : > { %v4108_v21 = vpop.permute.xlu0 %4107 }
 0xd9a   : > { %v4113_v15 = vsel %vm2047_vm1, %v4108_v21, 0 }
 0xd9b   : > { %4122 = vmatpush.bf16.xpose.msra.mxu1 %v4113_v15 }
 0xd9c   : > { %4085 = vrot.lane.b32.xlu1 %v13530_v55, %s12343_s3 }
 0xda1   : > { %v11173_v22 = vpop.permute.xlu0 %11172 }
 0xda2   : > { %v11175_v20 = vunpack.i.h.bf16 %v11173_v22  ;;  %v11174_v4 = vunpack.i.l.bf16 %v11173_v22 }
 0xda4   : > { %v3361_v6 = vsel %vm3356_vm4, %v3352_v0, %v11174_v4  ;;  %v3362_v14 = vsel %vm3356_vm4, %v3353_v13, %v11175_v20  ;;  %4179 = vrot.lane.b32.xlu1 %v13492_v19, %s12344_s16  ;;  %v18225_v20 = vld [vmem:[#allocation48_spill] sm:$0xff]  ;;  %v18226_v0 = vld [vmem:[#allocation47_spill] sm:$0xff]  ;;  %v11185_v13 = vunpack.i.h.bf16 %v11183_v11 }
 0xda5   : > { %v3369_v41 = vpack.c.bf16 %v3361_v6, %v3361_v6  ;;  %v3370_v37 = vpack.c.bf16 %v3362_v14, %v3362_v14  ;;  %v11184_v6 = vunpack.i.l.bf16 %v11183_v11 }
 0xda7   : > { %v3388_v16 = vunpack.c.l.b16 %v3369_v41  ;;  %v3389_v23 = vunpack.c.l.b16 %v3370_v37 }
 0xda9   : > { %v3394_v28 = vpack.c.b16 %v3389_v23, %v3388_v16 }
 0xdab   : > { %3466 = vmatmul.bf16.gmra.mxu0 %v3394_v28 }
 0xdac   : > { %4177 = vrot.lane.b32.xlu1 %v13218_v30, %s12344_s16 }
 0xdaf   : > { %3979 = vadd.xlane.f32.xlu0 %v3978_v24 }
 0xdcc   : > { %v3962_v25 = vpop.xlane.xlu0 %3961 }
 0xdcd   : > { %11478 = vrcp.f32 %v3962_v25 }
 0xdce   : > { %11480 = vrcp.f32 %v3968_v27 }
 0xdd3   : > { %v11479_v43 = vpop.eup %11478 }
 0xdd4   : > { %v3990_v42 = vmul.f32 %v11479_v43, %v13812_v56  ;;  %v11481_v17 = vpop.eup %11480 }
 0xdd5   : > { %v3992_v54 = vmul.f32 %v11481_v17, %v13772_v40 }
 0xdd6   : > { %v3998_v10 = vpack.c.bf16 %v3990_v42, %v3990_v42 }
 0xdd7   : > { %v4000_v62 = vpack.c.bf16 %v3992_v54, %v3992_v54 }
 0xdd8   : > { %v4008_v3 = vunpack.c.l.b16 %v3998_v10 }
 0xdd9   : > { %v4033_v5 = vunpack.c.l.b16 %v4000_v62 }
 0xdda   : > { %v4009_v26 = vpack.c.b16 %v4008_v3, %v4007_v51 }
 0xddc   : > { %10124 = vmatmul.msk.bf16.vlgmr.msrb.gmra.mxu1 %vm2158_vm2, %v4009_v26  ;;  %v3977_v26 = vpop.xlane.xlu2 %3976 }
 0xddf   : > { %v4106_v1 = vpop.permute.xlu0 %4105 }
 0xde6   : > { %v3965_v21 = vpop.xlane.xlu1 %3964 }
 0xde7   : > { %11482 = vrcp.f32 %v3965_v21  ;;  %v4156_v15 = vpop.permute.xlu0 %4155 }
 0xde8   : > { %v4161_v48 = vsel %vm2047_vm1, %v4156_v15, 0  ;;  %11484 = vrcp.f32 %v3977_v26 }
 0xde9   : > { %4170 = vmatpush.bf16.xpose.msrb.mxu3 %v4161_v48 }
 0xdec   : > { %10128 = vmatmul.msk.bf16.vlgmr.msra.gmra.mxu1 %vm2047_vm1, %v4106_v1 }
 0xded   : > { %v11483_v56 = vpop.eup %11482 }
 0xdee   : > { %v3991_v18 = vmul.f32 %v11483_v56, %v13821_v29  ;;  %v11485_v1 = vpop.eup %11484 }
 0xdef   : > { %v11178_v2 = vpop.permute.xlu0 %11177  ;;  %v3995_v21 = vmul.f32 %v11485_v1, %v13810_v50 }
 0xdf0   : > { %v3999_v60 = vpack.c.bf16 %v3991_v18, %v3991_v18  ;;  %v11180_v45 = vunpack.i.h.bf16 %v11178_v2  ;;  %v11179_v52 = vunpack.i.l.bf16 %v11178_v2 }
 0xdf1   : > { %v4003_v15 = vpack.c.bf16 %v3995_v21, %v3995_v21 }
 0xdf2   : > { %v4032_v22 = vunpack.c.l.b16 %v3999_v60  ;;  %v3346_v4 = vsel %vm2047_vm1, %v18225_v20, %v11180_v45  ;;  %v3345_v40 = vsel %vm2047_vm1, %v18226_v0, %v11179_v52 }
 0xdf3   : > { %v3354_v37 = vsel %vm3347_vm3, %v3345_v40, %v11184_v6  ;;  %v3355_v16 = vsel %vm3347_vm3, %v3346_v4, %v11185_v13  ;;  %v4082_v56 = vunpack.c.l.b16 %v4003_v15 }
 0xdf4   : > { %v4034_v44 = vpack.c.b16 %v4033_v5, %v4032_v22  ;;  %v13888_v22 = vpop.f32.mrf.mxu0 }
 0xdf6   : > { %10125 = vmatmul.msk.bf16.vlgmr.msra.gmra.mxu2 %vm2158_vm2, %v4034_v44 }
 0xdf7   : > { %v11188_v14 = vpop.permute.xlu0 %11187 }
 0xdf8   : > { %v11190_v29 = vunpack.i.h.bf16 %v11188_v14  ;;  %v11189_v41 = vunpack.i.l.bf16 %v11188_v14 }
 0xdfa   : > { %v3363_v23 = vsel %vm3356_vm4, %v3354_v37, %v11189_v41  ;;  %v3364_v28 = vsel %vm3356_vm4, %v3355_v16, %v11190_v29 }
 0xdfb   : > { %v3371_v24 = vpack.c.bf16 %v3363_v23, %v3363_v23  ;;  %v3372_v25 = vpack.c.bf16 %v3364_v28, %v3364_v28 }
 0xdfd   : > { %v3390_v34 = vunpack.c.l.b16 %v3371_v24  ;;  %v3391_v46 = vunpack.c.l.b16 %v3372_v25 }
 0xdfe   : > { %v4130_v43 = vpop.permute.xlu1 %4129 }
 0xdff   : > { %v3395_v31 = vpack.c.b16 %v3391_v46, %v3390_v34 }
 0xe01   : > { %3471 = vmatmul.bf16.gmra.mxu0 %v3395_v31 }
 0xe06   : > { %v4154_v42 = vpop.permute.xlu1 %4153  ;;  %10129 = vmatmul.msk.bf16.vlgmr.msrb.gmra.mxu2 %vm2047_vm1, %v4130_v43 }
 0xe07   : > { %10130 = vmatmul.msk.bf16.vlgmr.msrb.gmra.mxu3 %vm2047_vm1, %v4154_v42 }
 0xe0e   : > { %v4086_v10 = vpop.permute.xlu1 %4085 }
 0xe0f   : > { %4098 = vmatpush.bf16.msrb.mxu0 %v4086_v10 }
 0xe13   : > { %v13910_v14 = vpop.f32.mrf.mxu3 }
 0xe16   : > { %v4180_v51 = vpop.permute.xlu1 %4179 }
 0xe17   : > { %v4185_v3 = vsel %vm2047_vm1, %v4180_v51, 0 }
 0xe18   : > { %4194 = vmatpush.bf16.xpose.msra.mxu0 %v4185_v3 }
 0xe1b   : > { %v13916_v37 = vpop.f32.mrf.mxu3 }
 0xe1e   : > { %v4178_v2 = vpop.permute.xlu1 %4177 }
 0xe22   : > { %v3980_v27 = vpop.xlane.xlu0 %3979 }
 0xe23   : > { %11486 = vrcp.f32 %v3980_v27 }
 0xe29   : > { %v11487_v17 = vpop.eup %11486 }
 0xe2a   : > { %v3996_v48 = vmul.f32 %v11487_v17, %v13855_v8  ;;  %v13891_v8 = vpop.f32.mrf.mxu0 }
 0xe2c   : > { %v4004_v54 = vpack.c.bf16 %v3996_v48, %v3996_v48 }
 0xe2e   : > { %v4083_v62 = vunpack.c.l.b16 %v4004_v54 }
 0xe30   : > { %v4084_v18 = vpack.c.b16 %v4083_v62, %v4082_v56 }
 0xe32   : > { %10127 = vmatmul.msk.bf16.vlgmr.msrb.gmra.mxu0 %vm2158_vm2, %v4084_v18  ;;  %v13894_v44 = vpop.f32.mrf.mxu0 }
 0xe3a   : > { %v13896_v20 = vpop.f32.mrf.mxu0 }
 0xe42   : > { %10131 = vmatmul.msk.bf16.vlgmr.msra.gmra.mxu0 %vm2047_vm1, %v4178_v2  ;;  %v13900_v4 = vpop.f32.mrf.mxu0 }
 0xe4a   : > { %v13902_v0 = vpop.f32.mrf.mxu0 }
 0xe59   : > { %v13884_v60 = vpop.f32.mrf.mxu1 }
 0xe61   : > { %v13886_v5 = vpop.f32.mrf.mxu1 }
 0xe69   : > { %v4124_v50 = vpop.f32.mrf.mxu1 }
 0xe6a   : > { %v4201_v45 = vsel %vm2158_vm2, %v4124_v50, -inf }
 0xe6b   : > { %4202 = vmax.xlane.f32.xlu1 %v4201_v45 }
 0xe71   : > { %v4126_v52 = vpop.f32.mrf.mxu1 }
 0xe72   : > { %v4204_v11 = vsel %vm2158_vm2, %v4126_v52, -inf }
 0xe73   : > { %4205 = vmax.xlane.f32.xlu2 %v4204_v11 }
 0xe79   : > { %v13912_v29 = vpop.f32.mrf.mxu2 }
 0xe7e   : > { %v13904_v40 = vpop.f32.mrf.mxu0 }
 0xe81   : > { %v13922_v28 = vpop.f32.mrf.mxu2 }
 0xe84   : > { %4302 = vrot.lane.b32.xlu1 %v13501_v38, %s12344_s16 }
 0xe86   : > { %v13906_v13 = vpop.f32.mrf.mxu0 }
 0xe89   : > { %v4148_v43 = vpop.f32.mrf.mxu2 }
 0xe8a   : > { %v4172_v24 = vpop.f32.mrf.mxu3  ;;  %v4207_v42 = vsel %vm2158_vm2, %v4148_v43, -inf }
 0xe8b   : > { %v4213_v34 = vsel %vm2158_vm2, %v4172_v24, -inf }
 0xe91   : > { %v4150_v51 = vpop.f32.mrf.mxu2 }
 0xe92   : > { %v4174_v31 = vpop.f32.mrf.mxu3  ;;  %v4210_v3 = vsel %vm2158_vm2, %v4150_v51, -inf }
 0xe93   : > { %v4216_v10 = vsel %vm2158_vm2, %v4174_v31, -inf }
 0xeaf   : > { %v13908_v6 = vpop.f32.mrf.mxu0 }
 0xeb7   : > { %v13914_v41 = vpop.f32.mrf.mxu0 }
 0xebf   : > { %v13918_v16 = vpop.f32.mrf.mxu0 }
 0xec0   : > { %v4219_v23 = vsel %vm2158_vm2, %v13918_v16, -inf }
 0xec1   : > { %4220 = vmax.xlane.f32.xlu0 %v4219_v23 }
 0xec7   : > { %v13924_v25 = vpop.f32.mrf.mxu0 }
 0xec8   : > { %v4222_v46 = vsel %vm2158_vm2, %v13924_v25, -inf }
 0xec9   : > { %4214 = vmax.xlane.f32.xlu0 %v4213_v34  ;;  %4223 = vmax.xlane.f32.xlu2 %v4222_v46 }
 0xed1   : > { %4208 = vmax.xlane.f32.xlu0 %v4207_v42  ;;  %4217 = vmax.xlane.f32.xlu2 %v4216_v10 }
 0xed9   : > { %4211 = vmax.xlane.f32.xlu2 %v4210_v3 }
 0xede   : > { %v4203_v26 = vpop.xlane.xlu1 %4202 }
 0xedf   : > { %v4225_v27 = vsub.f32 %v4124_v50, %v4203_v26 }
 0xee1   : > { %v4233_v1 = vmul.f32 1.442695, %v4225_v27 }
 0xee3   : > { %11488 = vpow2.f32 %v4233_v1 }
 0xee6   : > { %v4206_v21 = vpop.xlane.xlu2 %4205 }
 0xee7   : > { %v4226_v17 = vsub.f32 %v4126_v52, %v4206_v21 }
 0xee9   : > { %v11489_v15 = vpop.eup %11488  ;;  %v4235_v48 = vmul.f32 1.442695, %v4226_v17 }
 0xeea   : > { %v4249_v54 = vsel %vm2158_vm2, %v11489_v15, 0.0 }
 0xeeb   : > { %11490 = vpow2.f32 %v4235_v48  ;;  %4250 = vadd.xlane.f32.xlu0 %v4249_v54 }
 0xef1   : > { %v11491_v56 = vpop.eup %11490  ;;  %4327 = vrot.lane.b32.xlu2 %v13537_v35, %s12344_s16 }
 0xef2   : > { %v4252_v62 = vsel %vm2158_vm2, %v11491_v56, 0.0 }
 0xef3   : > { %4253 = vadd.xlane.f32.xlu1 %v4252_v62 }
 0xef6   : > { %v4303_v18 = vpop.permute.xlu1 %4302 }
 0xef7   : > { %4315 = vmatpush.bf16.msrb.mxu1 %v4303_v18 }
 0xf0c   : > { %4423 = vrot.lane.b32.xlu1 %v13490_v47, %s12345_s23 }
 0xf14   : > { %4352 = vrot.lane.b32.xlu1 %v13523_v59, %s12344_s16 }
 0xf1c   : > { %4447 = vrot.lane.b32.xlu1 %v13527_v49, %s12345_s23 }
 0xf24   : > { %4445 = vrot.lane.b32.xlu1 %v13170_v53, %s12345_s23 }
 0xf2c   : > { %4377 = vrot.lane.b32.xlu1 %v13530_v55, %s12344_s16 }
 0xf34   : > { %4471 = vrot.lane.b32.xlu1 %v13492_v19, %s12345_s23  ;;  %v4221_v2 = vpop.xlane.xlu0 %4220 }
 0xf3c   : > { %4469 = vrot.lane.b32.xlu1 %v13218_v30, %s12345_s23  ;;  %v4215_v47 = vpop.xlane.xlu0 %4214  ;;  %v4224_v50 = vpop.xlane.xlu2 %4223 }
 0xf3d   : > { %v4229_v45 = vsub.f32 %v4172_v24, %v4215_v47 }
 0xf3f   : > { %v4241_v52 = vmul.f32 1.442695, %v4229_v45 }
 0xf41   : > { %11492 = vpow2.f32 %v4241_v52 }
 0xf44   : > { %v4209_v11 = vpop.xlane.xlu0 %4208  ;;  %v4218_v49 = vpop.xlane.xlu2 %4217 }
 0xf45   : > { %v4227_v23 = vsub.f32 %v4148_v43, %v4209_v11  ;;  %v4230_v34 = vsub.f32 %v4174_v31, %v4218_v49 }
 0xf47   : > { %v13950_v53 = vpop.eup %11492  ;;  %v4237_v46 = vmul.f32 1.442695, %v4227_v23  ;;  %v4243_v42 = vmul.f32 1.442695, %v4230_v34 }
 0xf48   : > { %v4261_v19 = vsel %vm2158_vm2, %v13950_v53, 0.0 }
 0xf49   : > { %11494 = vpow2.f32 %v4237_v46  ;;  %4262 = vadd.xlane.f32.xlu0 %v4261_v19 }
 0xf4a   : > { %11496 = vpow2.f32 %v4243_v42 }
 0xf4c   : > { %v4212_v30 = vpop.xlane.xlu2 %4211 }
 0xf4d   : > { %v4228_v10 = vsub.f32 %v4150_v51, %v4212_v30 }
 0xf4f   : > { %v13954_v3 = vpop.eup %11494  ;;  %v4239_v24 = vmul.f32 1.442695, %v4228_v10 }
 0xf50   : > { %v13956_v26 = vpop.eup %11496  ;;  %v4255_v43 = vsel %vm2158_vm2, %v13954_v3, 0.0 }
 0xf51   : > { %11498 = vpow2.f32 %v4239_v24  ;;  %4256 = vadd.xlane.f32.xlu2 %v4255_v43  ;;  %v4264_v31 = vsel %vm2158_vm2, %v13956_v26, 0.0 }
 0xf52   : > { %4265 = vadd.xlane.f32.xlu0 %v4264_v31 }
 0xf54   : > { %v4328_v27 = vpop.permute.xlu2 %4327 }
 0xf55   : > { %4340 = vmatpush.bf16.msra.mxu2 %v4328_v27 }
 0xf57   : > { %v13962_v1 = vpop.eup %11498 }
 0xf58   : > { %v4258_v51 = vsel %vm2158_vm2, %v13962_v1, 0.0 }
 0xf5a   : > { %4259 = vadd.xlane.f32.xlu0 %v4258_v51 }
 0xf5e   : > { %v4251_v21 = vpop.xlane.xlu0 %4250 }
 0xf5f   : > { %11500 = vrcp.f32 %v4251_v21 }
 0xf65   : > { %v11501_v48 = vpop.eup %11500 }
 0xf66   : > { %v4254_v17 = vpop.xlane.xlu1 %4253  ;;  %v4281_v54 = vmul.f32 %v11501_v48, %v11489_v15 }
 0xf67   : > { %11502 = vrcp.f32 %v4254_v17 }
 0xf68   : > { %v4289_v18 = vpack.c.bf16 %v4281_v54, %v4281_v54 }
 0xf69   : > { %4397 = vrot.lane.b32.xlu2 %v13120_v39, %s12345_s23  ;;  %v4232_v39 = vsub.f32 %v13924_v25, %v4224_v50 }
 0xf6a   : > { %v4299_v52 = vunpack.c.l.b16 %v4289_v18 }
 0xf6d   : > { %v11503_v62 = vpop.eup %11502 }
 0xf6e   : > { %v4282_v47 = vmul.f32 %v11503_v62, %v11491_v56  ;;  %4399 = vrot.lane.b32.xlu0 %v13488_v61, %s12345_s23  ;;  %v4231_v56 = vsub.f32 %v13918_v16, %v4221_v2  ;;  %v4247_v61 = vmul.f32 1.442695, %v4232_v39 }
 0xf70   : > { %v4290_v45 = vpack.c.bf16 %v4282_v47, %v4282_v47  ;;  %v4245_v46 = vmul.f32 1.442695, %v4231_v56  ;;  %11504 = vpow2.f32 %v4247_v61 }
 0xf71   : > { %4421 = vrot.lane.b32.xlu2 %v13146_v7, %s12345_s23 }
 0xf72   : > { %v4300_v11 = vunpack.c.l.b16 %v4290_v45  ;;  %11506 = vpow2.f32 %v4245_v46 }
 0xf74   : > { %v4301_v49 = vpack.c.b16 %v4300_v11, %v4299_v52 }
 0xf76   : > { %10132 = vmatmul.msk.bf16.vlgmr.msrb.gmra.mxu1 %vm2158_vm2, %v4301_v49  ;;  %v11505_v19 = vpop.eup %11504 }
 0xf77   : > { %v4270_v24 = vsel %vm2158_vm2, %v11505_v19, 0.0 }
 0xf78   : > { %v11507_v30 = vpop.eup %11506 }
 0xf79   : > { %v4267_v25 = vsel %vm2158_vm2, %v11507_v30, 0.0 }
 0xf7e   : > { %v4424_v23 = vpop.permute.xlu1 %4423 }
 0xf7f   : > { %v4429_v34 = vsel %vm2047_vm1, %v4424_v23, 0 }
 0xf80   : > { %4438 = vmatpush.bf16.xpose.msrb.mxu2 %v4429_v34 }
 0xf86   : > { %v4353_v15 = vpop.permute.xlu1 %4352 }
 0xf87   : > { %4365 = vmatpush.bf16.msra.mxu3 %v4353_v15 }
 0xf8e   : > { %v4448_v42 = vpop.permute.xlu1 %4447 }
 0xf8f   : > { %v4453_v7 = vsel %vm2047_vm1, %v4448_v42, 0 }
 0xf90   : > { %4462 = vmatpush.bf16.xpose.msrb.mxu3 %v4453_v7 }
 0xf96   : > { %v4446_v10 = vpop.permute.xlu1 %4445 }
 0xf98   : > { %4271 = vadd.xlane.f32.xlu0 %v4270_v24 }
 0xf9a   : > { %4268 = vadd.xlane.f32.xlu2 %v4267_v25 }
 0xf9e   : > { %v4378_v50 = vpop.permute.xlu1 %4377 }
 0xf9f   : > { %4390 = vmatpush.bf16.msrb.mxu0 %v4378_v50 }
 0xfa6   : > { %v4472_v16 = vpop.permute.xlu1 %4471 }
 0xfa7   : > { %v4477_v2 = vsel %vm2047_vm1, %v4472_v16, 0 }
 0xfa8   : > { %4486 = vmatpush.bf16.xpose.msra.mxu0 %v4477_v2 }
 0xfbc   : > { %v4263_v43 = vpop.xlane.xlu0 %4262 }
 0xfbd   : > { %11508 = vrcp.f32 %v4263_v43 }
 0xfc3   : > { %v11509_v51 = vpop.eup %11508 }
 0xfc4   : > { %v4257_v27 = vpop.xlane.xlu2 %4256  ;;  %v4285_v21 = vmul.f32 %v11509_v51, %v13950_v53 }
 0xfc5   : > { %v4266_v31 = vpop.xlane.xlu0 %4265 }
 0xfc6   : > { %11510 = vrcp.f32 %v4266_v31  ;;  %v4293_v48 = vpack.c.bf16 %v4285_v21, %v4285_v21 }
 0xfc7   : > { %11512 = vrcp.f32 %v4257_v27 }
 0xfc8   : > { %v4349_v45 = vunpack.c.l.b16 %v4293_v48 }
 0xfcc   : > { %v11511_v17 = vpop.eup %11510  ;;  %v4398_v42 = vpop.permute.xlu2 %4397 }
 0xfcd   : > { %v4286_v54 = vmul.f32 %v11511_v17, %v13956_v26  ;;  %v4260_v62 = vpop.xlane.xlu0 %4259  ;;  %v11513_v18 = vpop.eup %11512 }
 0xfce   : > { %11514 = vrcp.f32 %v4260_v62  ;;  %v4283_v11 = vmul.f32 %v11513_v18, %v13954_v3 }
 0xfcf   : > { %v4294_v47 = vpack.c.bf16 %v4286_v54, %v4286_v54 }
 0xfd0   : > { %v4291_v34 = vpack.c.bf16 %v4283_v11, %v4283_v11 }
 0xfd1   : > { %v4350_v52 = vunpack.c.l.b16 %v4294_v47 }
 0xfd2   : > { %v4324_v15 = vunpack.c.l.b16 %v4291_v34 }
 0xfd3   : > { %v4351_v49 = vpack.c.b16 %v4350_v52, %v4349_v45 }
 0xfd4   : > { %v11515_v23 = vpop.eup %11514  ;;  %v4422_v3 = vpop.permute.xlu2 %4421 }
 0xfd5   : > { %v4284_v39 = vmul.f32 %v11515_v23, %v13962_v1  ;;  %10134 = vmatmul.msk.bf16.vlgmr.msra.gmra.mxu3 %vm2158_vm2, %v4351_v49 }
 0xfd7   : > { %v4292_v53 = vpack.c.bf16 %v4284_v39, %v4284_v39 }
 0xfd9   : > { %v4325_v56 = vunpack.c.l.b16 %v4292_v53 }
 0xfdb   : > { %v4326_v61 = vpack.c.b16 %v4325_v56, %v4324_v15 }
 0xfdd   : > { %10133 = vmatmul.msk.bf16.vlgmr.msra.gmra.mxu2 %vm2158_vm2, %v4326_v61 }
 0xfe0   : > { %v4400_v26 = vpop.permute.xlu0 %4399 }
 0xfe1   : > { %v4405_v46 = vsel %vm2047_vm1, %v4400_v26, 0 }
 0xfe2   : > { %4414 = vmatpush.bf16.xpose.msra.mxu1 %v4405_v46 }
 0xfe5   : > { %10138 = vmatmul.msk.bf16.vlgmr.msrb.gmra.mxu3 %vm2047_vm1, %v4446_v10  ;;  %v4470_v10 = vpop.permute.xlu1 %4469 }
 0xfe9   : > { %10136 = vmatmul.msk.bf16.vlgmr.msra.gmra.mxu1 %vm2047_vm1, %v4398_v42 }
 0xfed   : > { %10137 = vmatmul.msk.bf16.vlgmr.msrb.gmra.mxu2 %vm2047_vm1, %v4422_v3 }
 0xff3   : > { %v13992_v21 = vpop.f32.mrf.mxu1 }
 0xffb   : > { %v13996_v48 = vpop.f32.mrf.mxu1 }
0x100b   : > { %v4272_v1 = vpop.xlane.xlu0 %4271 }
0x100c   : > { %11516 = vrcp.f32 %v4272_v1 }
0x100d   : > { %v4269_v7 = vpop.xlane.xlu2 %4268 }
0x100e   : > { %11518 = vrcp.f32 %v4269_v7 }
0x1012   : > { %v11517_v24 = vpop.eup %11516 }
0x1013   : > { %v4288_v25 = vmul.f32 %v11517_v24, %v11505_v19 }
0x1014   : > { %v11519_v50 = vpop.eup %11518 }
0x1015   : > { %v4296_v16 = vpack.c.bf16 %v4288_v25, %v4288_v25  ;;  %v4287_v2 = vmul.f32 %v11519_v50, %v11507_v30 }
0x1017   : > { %v4295_v43 = vpack.c.bf16 %v4287_v2, %v4287_v2  ;;  %v4375_v31 = vunpack.c.l.b16 %v4296_v16 }
0x1019   : > { %v4374_v27 = vunpack.c.l.b16 %v4295_v43 }
0x101b   : > { %v4376_v51 = vpack.c.b16 %v4375_v31, %v4374_v27 }
0x101d   : > { %10135 = vmatmul.msk.bf16.vlgmr.msrb.gmra.mxu0 %vm2158_vm2, %v4376_v51 }
0x102d   : > { %10139 = vmatmul.msk.bf16.vlgmr.msra.gmra.mxu0 %vm2047_vm1, %v4470_v10 }
0x1058   : > { %v13994_v17 = vpop.f32.mrf.mxu3 }
0x1060   : > { %v13998_v54 = vpop.f32.mrf.mxu2  ;;  %v14000_v19 = vpop.f32.mrf.mxu3 }
0x1066   : > { %v4416_v30 = vpop.f32.mrf.mxu1 }
0x1067   : > { %v4493_v62 = vsel %vm2158_vm2, %v4416_v30, -inf }
0x1068   : > { %v14003_v18 = vpop.f32.mrf.mxu2  ;;  %4494 = vmax.xlane.f32.xlu1 %v4493_v62  ;;  %v4464_v47 = vpop.f32.mrf.mxu3 }
0x1069   : > { %v4505_v46 = vsel %vm2158_vm2, %v4464_v47, -inf }
0x106e   : > { %v4418_v45 = vpop.f32.mrf.mxu1 }
0x106f   : > { %v4496_v52 = vsel %vm2158_vm2, %v4418_v45, -inf }
0x1070   : > { %4497 = vmax.xlane.f32.xlu2 %v4496_v52  ;;  %v4440_v11 = vpop.f32.mrf.mxu2  ;;  %v4466_v49 = vpop.f32.mrf.mxu3 }
0x1071   : > { %v4508_v23 = vsel %vm2158_vm2, %v4466_v49, -inf  ;;  %v4499_v3 = vsel %vm2158_vm2, %v4440_v11, -inf }
0x1078   : > { %4509 = vmax.xlane.f32.xlu2 %v4508_v23  ;;  %v4442_v34 = vpop.f32.mrf.mxu2 }
0x1079   : > { %v4502_v39 = vsel %vm2158_vm2, %v4442_v34, -inf }
0x1080   : > { %4503 = vmax.xlane.f32.xlu2 %v4502_v39 }
0x109a   : > { %v14008_v53 = vpop.f32.mrf.mxu0 }
0x10a2   : > { %v14010_v15 = vpop.f32.mrf.mxu0 }
0x10aa   : > { %v4488_v56 = vpop.f32.mrf.mxu0 }
0x10ab   : > { %v4511_v61 = vsel %vm2158_vm2, %v4488_v56, -inf }
0x10ac   : > { %4512 = vmax.xlane.f32.xlu0 %v4511_v61 }
0x10b2   : > { %v4490_v26 = vpop.f32.mrf.mxu0 }
0x10b3   : > { %v4514_v42 = vsel %vm2158_vm2, %v4490_v26, -inf }
0x10b4   : > { %4506 = vmax.xlane.f32.xlu0 %v4505_v46  ;;  %4515 = vmax.xlane.f32.xlu2 %v4514_v42 }
0x10bc   : > { %4500 = vmax.xlane.f32.xlu0 %v4499_v3 }
0x10db   : > { %v4495_v1 = vpop.xlane.xlu1 %4494 }
0x10dc   : > { %v4517_v7 = vsub.f32 %v4416_v30, %v4495_v1 }
0x10de   : > { %v4525_v24 = vmul.f32 1.442695, %v4517_v7 }
0x10e0   : > { %11520 = vpow2.f32 %v4525_v24 }
0x10e3   : > { %v4498_v25 = vpop.xlane.xlu2 %4497 }
0x10e4   : > { %v4518_v50 = vsub.f32 %v4418_v45, %v4498_v25 }
0x10e6   : > { %v14016_v16 = vpop.eup %11520  ;;  %v4527_v2 = vmul.f32 1.442695, %v4518_v50 }
0x10e7   : > { %v4541_v43 = vsel %vm2158_vm2, %v14016_v16, 0.0 }
0x10e8   : > { %11522 = vpow2.f32 %v4527_v2  ;;  %4542 = vadd.xlane.f32.xlu0 %v4541_v43 }
0x10eb   : > { %v4510_v31 = vpop.xlane.xlu2 %4509 }
0x10ee   : > { %v14020_v27 = vpop.eup %11522 }
0x10ef   : > { %v4544_v51 = vsel %vm2158_vm2, %v14020_v27, 0.0 }
0x10f0   : > { %4545 = vadd.xlane.f32.xlu2 %v4544_v51 }
0x10f3   : > { %v4504_v10 = vpop.xlane.xlu2 %4503 }
0x10f4   : > { %v4520_v30 = vsub.f32 %v4442_v34, %v4504_v10  ;;  %v4522_v34 = vsub.f32 %v4466_v49, %v4510_v31  ;;  %v14053_v10 = vld [vmem:[%s18102_s11] ss:$0 sm:$0xff] }
0x10f6   : > { %v4531_v62 = vmul.f32 1.442695, %v4520_v30 }
0x10f8   : > { %11524 = vpow2.f32 %v4531_v62  ;;  %v3458_v62 = vadd.f32 %v14053_v10, %v13888_v22  ;;  %v3465_v22 = vadd.f32 %v14053_v10, %v13896_v20 }
0x10fc   : > { %4619 = vrot.lane.b32.xlu0 %v13537_v35, %s12345_s23  ;;  %v4535_v35 = vmul.f32 1.442695, %v4522_v34 }
0x10fe   : > { %v14026_v45 = vpop.eup %11524 }
0x10ff   : > { %v4550_v52 = vsel %vm2158_vm2, %v14026_v45, 0.0 }
0x1100   : > { %4551 = vadd.xlane.f32.xlu1 %v4550_v52  ;;  %v11713_v52 = vld [vmem:[%s12670_s5] sm:$0xff] }
0x1108   : > { %4594 = vrot.lane.b32.xlu2 %v13501_v38, %s12345_s23 }
0x111f   : > { %v4513_v23 = vpop.xlane.xlu0 %4512 }
0x1120   : > { %v4523_v50 = vsub.f32 %v4488_v56, %v4513_v23  ;;  %v14060_v23 = vadd.f32 %v11713_v52, %v3458_v62  ;;  %v11720_v62 = vld [vmem:[#allocation19 + $0x20] sm:$0xff] }
0x1122   : > { %v4537_v49 = vmul.f32 1.442695, %v4523_v50  ;;  %18227 = vst [vmem:[#allocation51_spill] sm:$0xff] %v14060_v23 }
0x1127   : > { %v4507_v39 = vpop.xlane.xlu0 %4506  ;;  %v4516_v61 = vpop.xlane.xlu2 %4515 }
0x1128   : > { %v4521_v46 = vsub.f32 %v4464_v47, %v4507_v39  ;;  %v4524_v42 = vsub.f32 %v4490_v26, %v4516_v61  ;;  %v11196_v39 = vpack.i.bf16 %v13996_v48, %v13992_v21  ;;  %v3463_v61 = vadd.f32 %v14053_v10, %v13894_v44  ;;  %v11715_v21 = vld [vmem:[%s12670_s5 + $0x18] sm:$0xff] }
0x1129   : > { %v14079_v48 = vadd.f32 %v11715_v21, %v3465_v22  ;;  %v11724_v22 = vld [vmem:[#allocation19 + $0x10] sm:$0xff]  ;;  %v11726_v21 = vld [vmem:[#allocation19] sm:$0xff] }
0x112a   : > { %v4533_v3 = vmul.f32 1.442695, %v4521_v46  ;;  %v4539_v1 = vmul.f32 1.442695, %v4524_v42  ;;  %v11714_v46 = vld [vmem:[%s12670_s5 + $0x10] sm:$0xff] }
0x112b   : > { %v14071_v42 = vadd.f32 %v11714_v46, %v3463_v61  ;;  %18229 = vst [vmem:[#allocation46_spill] sm:$0xff] %v14079_v48  ;;  %v11723_v61 = vld [vmem:[%s12670_s5 + $0x8] sm:$0xff] }
0x112c   : > { %11526 = vpow2.f32 %v4533_v3 }
0x112d   : > { %11528 = vpow2.f32 %v4539_v1  ;;  %18228 = vst [vmem:[#allocation52_spill] sm:$0xff] %v14071_v42 }
0x112e   : > { %11530 = vpow2.f32 %v4535_v35 }
0x112f   : > { %v4501_v7 = vpop.xlane.xlu0 %4500 }
0x1130   : > { %v4519_v24 = vsub.f32 %v4440_v11, %v4501_v7 }
0x1132   : > { %v14032_v25 = vpop.eup %11526  ;;  %v4529_v2 = vmul.f32 1.442695, %v4519_v24  ;;  %v11716_v24 = vld [vmem:[#allocation19 + $0x38] sm:$0xff] }
0x1133   : > { %v14034_v43 = vpop.eup %11528  ;;  %v4553_v38 = vsel %vm2158_vm2, %v14032_v25, 0.0 }
0x1134   : > { %11532 = vpow2.f32 %v4529_v2  ;;  %4554 = vadd.xlane.f32.xlu1 %v4553_v38  ;;  %v4562_v47 = vsel %vm2158_vm2, %v14034_v43, 0.0  ;;  %v14040_v26 = vpop.eup %11530 }
0x1135   : > { %4563 = vadd.xlane.f32.xlu2 %v4562_v47  ;;  %11534 = vpow2.f32 %v4537_v49  ;;  %v4556_v31 = vsel %vm2158_vm2, %v14040_v26, 0.0  ;;  %v3470_v47 = vadd.f32 %v14053_v10, %v13902_v0  ;;  %v3475_v0 = vadd.f32 %v14053_v10, %v13906_v13  ;;  %v11725_v13 = vld [vmem:[#allocation19 + $0x8] sm:$0xff] }
0x113a   : > { %v14042_v11 = vpop.eup %11532 }
0x113b   : > { %v4547_v56 = vsel %vm2158_vm2, %v14042_v11, 0.0  ;;  %v14048_v51 = vpop.eup %11534 }
0x113c   : > { %4548 = vadd.xlane.f32.xlu0 %v4547_v56  ;;  %4557 = vadd.xlane.f32.xlu1 %v4556_v31  ;;  %v4559_v30 = vsel %vm2158_vm2, %v14048_v51, 0.0  ;;  %v11718_v56 = vld [vmem:[%s12670_s5 + $0x28] sm:$0xff] }
0x113d   : > { %v14090_v31 = vadd.f32 %v11718_v56, %v3470_v47 }
0x113f   : > { %18230 = vst [vmem:[#allocation44_spill] sm:$0xff] %v14090_v31 }
0x1144   : > { %4560 = vadd.xlane.f32.xlu1 %v4559_v30  ;;  %v11719_v30 = vld [vmem:[#allocation19 + $0x28] sm:$0xff] }
0x114c   : > { %4880 = vadd.xlane.f32.xlu1 %v14060_v23 }
0x114d   : > { %11197 = vrot.lane.b32.xlu2 %v11196_v39, %s12344_s16  ;;  %v11722_v39 = vld [vmem:[#allocation19 + $0x18] sm:$0xff] }
0x1150   : > { %4644 = vrot.lane.b32.xlu0 %v13523_v59, %s12345_s23 }
0x1154   : > { %4884 = vadd.xlane.f32.xlu1 %v14071_v42 }
0x1158   : > { %4669 = vrot.lane.b32.xlu0 %v13530_v55, %s12345_s23 }
0x115b   : > { %v4543_v34 = vpop.xlane.xlu0 %4542 }
0x115c   : > { %4886 = vadd.xlane.f32.xlu1 %v14079_v48  ;;  %11536 = vrcp.f32 %v4543_v34  ;;  %v11216_v34 = vpack.i.bf16 %v14000_v19, %v13994_v17 }
0x1162   : > { %v11537_v59 = vpop.eup %11536 }
0x1163   : > { %v4546_v44 = vpop.xlane.xlu2 %4545  ;;  %v4573_v3 = vmul.f32 %v11537_v59, %v14016_v16  ;;  %v11717_v16 = vld [vmem:[#allocation19 + $0x30] sm:$0xff]  ;;  %v11206_v59 = vpack.i.bf16 %v14003_v18, %v13998_v54 }
0x1164   : > { %11538 = vrcp.f32 %v4546_v44  ;;  %v3468_v44 = vadd.f32 %v14053_v10, %v13900_v4 }
0x1165   : > { %v4581_v35 = vpack.c.bf16 %v4573_v3, %v4573_v3  ;;  %v11727_v3 = vld [vmem:[%s12670_s5 + $0x20] sm:$0xff] }
0x1167   : > { %v4591_v2 = vunpack.c.l.b16 %v4581_v35 }
0x116a   : > { %v11539_v1 = vpop.eup %11538 }
0x116b   : > { %v4574_v7 = vmul.f32 %v11539_v1, %v14020_v27  ;;  %v4595_v20 = vpop.permute.xlu2 %4594  ;;  %v11191_v27 = vpack.i.bf16 %v13886_v5, %v13884_v60  ;;  %v3460_v60 = vadd.f32 %v14053_v10, %v13891_v8  ;;  %v11721_v5 = vld [vmem:[%s12670_s5 + $0x38] sm:$0xff]  ;;  %v11201_v8 = vpack.i.bf16 %v13922_v28, %v13912_v29 }
0x116c   : > { %4607 = vmatpush.bf16.msrb.mxu1 %v4595_v20  ;;  %v14099_v52 = vadd.f32 %v11721_v5, %v3475_v0  ;;  %v14117_v1 = vadd.f32 %v11727_v3, %v3468_v44  ;;  %v18234_v5 = vld [vmem:[#allocation42_spill] sm:$0xff] }
0x116d   : > { %v4582_v55 = vpack.c.bf16 %v4574_v7, %v4574_v7  ;;  %v14103_v46 = vadd.f32 %v11723_v61, %v3460_v60  ;;  %v11728_v3 = vld [vmem:[%s12670_s5 + $0x30] sm:$0xff]  ;;  %s18471_s5 = sld [smem:[#allocation78_spill]] }
0x116e   : > { %v4620_v50 = vpop.permute.xlu0 %4619  ;;  %18231 = vst [vmem:[#allocation49_spill] sm:$0xff] %v14099_v52 }
0x116f   : > { %v4592_v38 = vunpack.c.l.b16 %v4582_v55  ;;  %4632 = vmatpush.bf16.msra.mxu2 %v4620_v50  ;;  %18232 = vst [vmem:[#allocation50_spill] sm:$0xff] %v14103_v46 }
0x1170   : > { %4841 = vmatpush.bf16.msra.mxu1 %v11716_v24  ;;  %18233 = vst [vmem:[#allocation45_spill] sm:$0xff] %v14117_v1 }
0x1171   : > { %v4593_v49 = vpack.c.b16 %v4592_v38, %v4591_v2 }
0x1173   : > { %10140 = vmatmul.msk.bf16.vlgmr.msrb.gmra.mxu1 %vm2158_vm2, %v4593_v49  ;;  %v4552_v35 = vpop.xlane.xlu1 %4551 }
0x1174   : > { %4842 = vmatpush.bf16.msra.mxu1 %v11717_v16  ;;  %11540 = vrcp.f32 %v4552_v35 }
0x1175   : > { %11192 = vrot.lane.b32.xlu1 %v11191_v27, %s12345_s23 }
0x1176   : > { %4890 = vadd.xlane.f32.xlu2 %v14090_v31 }
0x1178   : > { %4843 = vmatpush.bf16.msra.mxu1 %v11719_v30 }
0x117a   : > { %v11541_v19 = vpop.eup %11540 }
0x117b   : > { %v4576_v4 = vmul.f32 %v11541_v19, %v14026_v45  ;;  %v11211_v19 = vpack.i.bf16 %v13916_v37, %v13910_v14 }
0x117c   : > { %4844 = vmatpush.bf16.msra.mxu1 %v11720_v62 }
0x117d   : > { %v4584_v55 = vpack.c.bf16 %v4576_v4, %v4576_v4 }
0x117e   : > { %4894 = vadd.xlane.f32.xlu2 %v14099_v52 }
0x117f   : > { %v4617_v49 = vunpack.c.l.b16 %v4584_v55 }
0x1180   : > { %4845 = vmatpush.bf16.msra.mxu1 %v11722_v39 }
0x1182   : > { %4882 = vadd.xlane.f32.xlu0 %v14103_v46 }
0x1184   : > { %4846 = vmatpush.bf16.msra.mxu1 %v11724_v22 }
0x1188   : > { %4847 = vmatpush.bf16.msra.mxu1 %v11725_v13 }
0x118c   : > { %4848 = vmatpush.bf16.msra.mxu1 %v11726_v21 }
0x1196   : > { %11217 = vrot.lane.b32.xlu2 %v11216_v34, %s12344_s16  ;;  %11202 = vrot.lane.b32.xlu0 %v11201_v8, %s12345_s23 }
0x119e   : > { %11207 = vrot.lane.b32.xlu0 %v11206_v59, %s12344_s16 }
0x119f   : > { %4888 = vadd.xlane.f32.xlu1 %v14117_v1 }
0x11a7   : > { %v4555_v29 = vpop.xlane.xlu1 %4554 }
0x11a8   : > { %11542 = vrcp.f32 %v4555_v29  ;;  %v4564_v18 = vpop.xlane.xlu2 %4563 }
0x11ae   : > { %v11543_v7 = vpop.eup %11542 }
0x11af   : > { %v4549_v28 = vpop.xlane.xlu0 %4548  ;;  %v4558_v17 = vpop.xlane.xlu1 %4557  ;;  %v4577_v47 = vmul.f32 %v11543_v7, %v14032_v25 }
0x11b0   : > { %11544 = vrcp.f32 %v4549_v28  ;;  %v11198_v4 = vpop.permute.xlu2 %11197 }
0x11b1   : > { %11546 = vrcp.f32 %v4558_v17  ;;  %v4585_v30 = vpack.c.bf16 %v4577_v47, %v4577_v47 }
0x11b3   : > { %v4641_v39 = vunpack.c.l.b16 %v4585_v30 }
0x11b6   : > { %v11545_v54 = vpop.eup %11544 }
0x11b7   : > { %v11547_v20 = vpop.eup %11546  ;;  %v4575_v24 = vmul.f32 %v11545_v54, %v14042_v11  ;;  %v4561_v50 = vpop.xlane.xlu1 %4560 }
0x11b8   : > { %v4578_v2 = vmul.f32 %v11547_v20, %v14040_v26  ;;  %11548 = vrcp.f32 %v4561_v50  ;;  %v11199_v20 = vunpack.i.l.bf16 %v11198_v4 }
0x11b9   : > { %11550 = vrcp.f32 %v4564_v18  ;;  %v4583_v38 = vpack.c.bf16 %v4575_v24, %v4575_v24  ;;  %v11200_v18 = vunpack.i.h.bf16 %v11198_v4 }
0x11ba   : > { %v4586_v27 = vpack.c.bf16 %v4578_v2, %v4578_v2 }
0x11bb   : > { %v4616_v16 = vunpack.c.l.b16 %v4583_v38 }
0x11bc   : > { %v4642_v60 = vunpack.c.l.b16 %v4586_v27 }
0x11bd   : > { %v4618_v56 = vpack.c.b16 %v4617_v49, %v4616_v16 }
0x11be   : > { %v11549_v45 = vpop.eup %11548  ;;  %v4643_v13 = vpack.c.b16 %v4642_v60, %v4641_v39 }
0x11bf   : > { %v11551_v0 = vpop.eup %11550  ;;  %10141 = vmatmul.msk.bf16.vlgmr.msra.gmra.mxu2 %vm2158_vm2, %v4618_v56  ;;  %v4881_v62 = vpop.xlane.xlu1 %4880  ;;  %v4579_v11 = vmul.f32 %v11549_v45, %v14048_v51  ;;  %v3473_v51 = vadd.f32 %v14053_v10, %v13904_v40 }
0x11c0   : > { %v4896_v26 = vmul.f32 %v4881_v62, %v18234_v5  ;;  %v4580_v61 = vmul.f32 %v11551_v0, %v14034_v43 }
0x11c1   : > { %v4587_v21 = vpack.c.bf16 %v4579_v11, %v4579_v11  ;;  %v14138_v35 = vadd.f32 %v11728_v3, %v3473_v51  ;;  %v10821_v51 = vld [vmem:[#allocation20 + $0xf4] sm:$0xf0] }
0x11c2   : > { %v14130_v25 = vsub.f32 %v14060_v23, %v4896_v26  ;;  %v4645_v22 = vpop.permute.xlu0 %4644  ;;  %v4588_v34 = vpack.c.bf16 %v4580_v61, %v4580_v61  ;;  %v10258_v61 = vld [vmem:[#allocation20 + $0xe0] sm:$0xf] }
0x11c3   : > { %4657 = vmatpush.bf16.msra.mxu3 %v4645_v22  ;;  %v4666_v44 = vunpack.c.l.b16 %v4587_v21  ;;  %18235 = vst [vmem:[#allocation43_spill] sm:$0xff] %v14138_v35  ;;  %v10820_v22 = vld [vmem:[#allocation20 + $0xec] sm:$0xf0] }
0x11c4   : > { %v4912_v8 = vmul.f32 %v14130_v25, %v14130_v25  ;;  %v4667_v59 = vunpack.c.l.b16 %v4588_v34  ;;  %v10259_v21 = vor.u32 %v10820_v22, %v10258_v61  ;;  %v10266_v34 = vld [vmem:[#allocation20 + $0xe8] sm:$0xf]  ;;  %v10813_v61 = vld [vmem:[#allocation20 + $0xb4] sm:$0xf0] }
0x11c5   : > { %v10267_v3 = vor.u32 %v10821_v51, %v10266_v34  ;;  %v10210_v34 = vld [vmem:[#allocation20 + $0x80] sm:$0xf]  ;;  %v10808_v51 = vld [vmem:[#allocation20 + $0x8c] sm:$0xf0] }
0x11c6   : > { %10142 = vmatmul.msk.bf16.vlgmr.msra.gmra.mxu3 %vm2158_vm2, %v4643_v13  ;;  %4920 = vadd.xlane.f32.xlu1 %v4912_v8  ;;  %v4668_v29 = vpack.c.b16 %v4667_v59, %v4666_v44  ;;  %v10818_v13 = vld [vmem:[#allocation20 + $0xe4] sm:$0xf]  ;;  %v10260_v8 = vld [vmem:[#allocation20 + $0xf0] sm:$0xf0] }
0x11c7   : > { %v4885_v28 = vpop.xlane.xlu1 %4884  ;;  %5333 = vmatpush.bf16.msrb.mxu2 %v10259_v21  ;;  %v11236_v21 = vpack.i.bf16 %v13914_v41, %v13908_v6  ;;  %v10194_v41 = vld [vmem:[#allocation20 + $0x60] sm:$0xf] }
0x11c8   : > { %v4898_v49 = vmul.f32 %v4885_v28, %v18234_v5 }
0x11ca   : > { %v4670_v43 = vpop.permute.xlu0 %4669 }
0x11cb   : > { %4682 = vmatpush.bf16.msrb.mxu0 %v4670_v43  ;;  %v10263_v43 = vor.u32 %v10818_v13, %v10260_v8 }
0x11cd   : > { %5362 = vmatpush.bf16.msrb.mxu3 %v10263_v43  ;;  %v10212_v43 = vld [vmem:[#allocation20 + $0x90] sm:$0xf0] }
0x11ce   : > { %10143 = vmatmul.msk.bf16.vlgmr.msrb.gmra.mxu0 %vm2158_vm2, %v4668_v29  ;;  %4892 = vadd.xlane.f32.xlu1 %v14138_v35 }
0x11cf   : > { %v14142_v17 = vpop.xlane.xlu1 %4886  ;;  %5391 = vmatpush.bf16.msra.mxu0 %v10267_v3  ;;  %v10218_v3 = vld [vmem:[#allocation20 + $0x88] sm:$0xf] }
0x11e7   : > { %11212 = vrot.lane.b32.xlu1 %v11211_v19, %s12345_s23  ;;  %v11193_v40 = vpop.permute.xlu1 %11192 }
0x11e8   : > { %v11195_v7 = vunpack.i.h.bf16 %v11193_v40  ;;  %v11194_v54 = vunpack.i.l.bf16 %v11193_v40 }
0x11e9   : > { %v14172_v30 = vpop.xlane.xlu2 %4890 }
0x11ea   : > { %v4786_v55 = vsel %vm2047_vm1, %v13706_v63, %v11195_v7  ;;  %v4785_v24 = vsel %vm2047_vm1, %v13704_v9, %v11194_v54  ;;  %v14165_v9 = vsub.f32 %v14071_v42, %v4898_v49 }
0x11eb   : > { %v14152_v50 = vsel %vm3347_vm3, %v4785_v24, %v11199_v20  ;;  %v14155_v2 = vsel %vm3347_vm3, %v4786_v55, %v11200_v18  ;;  %v10242_v18 = vld [vmem:[#allocation20 + $0xc0] sm:$0xf]  ;;  %v10816_v20 = vld [vmem:[#allocation20 + $0xcc] sm:$0xf0]  ;;  %v10814_v55 = vld [vmem:[#allocation20 + $0xc4] sm:$0xf] }
0x11ec   : > { %v4914_v56 = vmul.f32 %v14165_v9, %v14165_v9  ;;  %v10243_v24 = vor.u32 %v10816_v20, %v10242_v18  ;;  %v10196_v20 = vld [vmem:[#allocation20 + $0x70] sm:$0xf0] }
0x11ee   : > { %5334 = vmatpush.bf16.msrb.mxu2 %v10243_v24  ;;  %v10805_v24 = vld [vmem:[#allocation20 + $0x74] sm:$0xf0] }
0x11f0   : > { %v4609_v63 = vpop.f32.mrf.mxu1 }
0x11f1   : > { %v4895_v26 = vpop.xlane.xlu2 %4894 }
0x11f2   : > { %v4903_v44 = vmul.f32 %v4895_v26, %v18234_v5  ;;  %v10234_v26 = vld [vmem:[#allocation20 + $0xa8] sm:$0xf] }
0x11f3   : > { %v10235_v13 = vor.u32 %v10813_v61, %v10234_v26 }
0x11f4   : > { %v14182_v28 = vsub.f32 %v14099_v52, %v4903_v44  ;;  %v10806_v44 = vld [vmem:[#allocation20 + $0x84] sm:$0xf]  ;;  %v10837_v52 = vld [vmem:[#allocation22 + $0x78] sm:$0xff] }
0x11f5   : > { %v4883_v14 = vpop.xlane.xlu0 %4882 }
0x11f6   : > { %v4897_v37 = vmul.f32 %v4883_v14, %v18234_v5  ;;  %v4919_v40 = vmul.f32 %v14182_v28, %v14182_v28  ;;  %v10244_v14 = vld [vmem:[#allocation20 + $0xd0] sm:$0xf0] }
0x11f7   : > { %v10247_v49 = vor.u32 %v10814_v55, %v10244_v14  ;;  %v10202_v55 = vld [vmem:[#allocation20 + $0x68] sm:$0xf] }
0x11f8   : > { %v14159_v38 = vsub.f32 %v14103_v46, %v4897_v37  ;;  %v4611_v16 = vpop.f32.mrf.mxu1  ;;  %v10250_v37 = vld [vmem:[#allocation20 + $0xc8] sm:$0xf] }
0x11f9   : > { %v11221_v27 = vpack.i.bf16 %v4611_v16, %v4609_v63  ;;  %5363 = vmatpush.bf16.msrb.mxu3 %v10247_v49  ;;  %v10178_v49 = vld [vmem:[#allocation20 + $0x40] sm:$0xf] }
0x11fa   : > { %v4913_v47 = vmul.f32 %v14159_v38, %v14159_v38 }
0x11fc   : > { %4922 = vadd.xlane.f32.xlu0 %v4913_v47  ;;  %v10817_v47 = vld [vmem:[#allocation20 + $0xd4] sm:$0xf0] }
0x11fd   : > { %v10251_v16 = vor.u32 %v10817_v47, %v10250_v37  ;;  %v10203_v37 = vor.u32 %v10805_v24, %v10202_v55 }
0x11ff   : > { %5392 = vmatpush.bf16.msra.mxu0 %v10251_v16  ;;  %v10800_v16 = vld [vmem:[#allocation20 + $0x4c] sm:$0xf0] }
0x1203   : > { %5393 = vmatpush.bf16.msra.mxu0 %v10235_v13  ;;  %v10796_v13 = vld [vmem:[#allocation20 + $0x2c] sm:$0xf0] }
0x1210   : > { %11222 = vrot.lane.b32.xlu0 %v11221_v27, %s12343_s3  ;;  %v10226_v27 = vld [vmem:[#allocation20 + $0xa0] sm:$0xf] }
0x1211   : > { %4924 = vadd.xlane.f32.xlu1 %v4914_v56  ;;  %v10812_v56 = vld [vmem:[#allocation20 + $0xac] sm:$0xf0] }
0x1212   : > { %v14170_v45 = vpop.xlane.xlu1 %4888 }
0x1239   : > { %v4921_v0 = vpop.xlane.xlu1 %4920 }
0x123a   : > { %v4936_v8 = vmul.f32 %v4921_v0, %v18234_v5  ;;  %v10804_v0 = vld [vmem:[#allocation20 + $0x6c] sm:$0xf0] }
0x123b   : > { %v10195_v18 = vor.u32 %v10804_v0, %v10194_v41  ;;  %v10148_v0 = vld [vmem:[#allocation20 + $0x10] sm:$0xf0] }
0x1241   : > { %v4893_v62 = vpop.xlane.xlu1 %4892 }
0x1242   : > { %v4902_v60 = vmul.f32 %v4893_v62, %v18234_v5  ;;  %v4634_v11 = vpop.f32.mrf.mxu2  ;;  %v10810_v62 = vld [vmem:[#allocation20 + $0xa4] sm:$0xf] }
0x1244   : > { %v14176_v39 = vsub.f32 %v14138_v35, %v4902_v60  ;;  %v10227_v60 = vor.u32 %v10812_v56, %v10226_v27  ;;  %v10798_v27 = vld [vmem:[#allocation20 + $0x44] sm:$0xf]  ;;  %v10179_v56 = vor.u32 %v10800_v16, %v10178_v49 }
0x1246   : > { %v4918_v59 = vmul.f32 %v14176_v39, %v14176_v39  ;;  %5335 = vmatpush.bf16.msrb.mxu2 %v10227_v60  ;;  %v10186_v60 = vld [vmem:[#allocation20 + $0x48] sm:$0xf] }
0x1248   : > { %4932 = vadd.xlane.f32.xlu1 %v4918_v59  ;;  %v10211_v59 = vor.u32 %v10808_v51, %v10210_v34  ;;  %v10164_v51 = vld [vmem:[#allocation20 + $0x30] sm:$0xf0] }
0x1249   : > { %v4659_v29 = vpop.f32.mrf.mxu3 }
0x124a   : > { %v4636_v19 = vpop.f32.mrf.mxu2  ;;  %5336 = vmatpush.bf16.msrb.mxu2 %v10211_v59  ;;  %v10797_v59 = vld [vmem:[#allocation20 + $0x34] sm:$0xf0] }
0x124b   : > { %v11231_v4 = vpack.i.bf16 %v4636_v19, %v4634_v11  ;;  %v4684_v63 = vpop.f32.mrf.mxu0  ;;  %v10228_v11 = vld [vmem:[#allocation20 + $0xb0] sm:$0xf0]  ;;  %v14192_v19 = vpop.permute.xlu0 %11202 }
0x124c   : > { %v10231_v22 = vor.u32 %v10810_v62, %v10228_v11  ;;  %v10180_v62 = vld [vmem:[#allocation20 + $0x50] sm:$0xf0]  ;;  %v10801_v11 = vld [vmem:[#allocation20 + $0x54] sm:$0xf0] }
0x124d   : > { %11232 = vrot.lane.b32.xlu0 %v11231_v4, %s12343_s3  ;;  %v10215_v4 = vor.u32 %v10806_v44, %v10212_v43  ;;  %v10183_v26 = vor.u32 %v10798_v27, %v10180_v62  ;;  %v10187_v61 = vor.u32 %v10801_v11, %v10186_v60  ;;  %v10170_v44 = vld [vmem:[#allocation20 + $0x28] sm:$0xf] }
0x124e   : > { %5364 = vmatpush.bf16.msrb.mxu3 %v10231_v22  ;;  %5337 = vmatpush.bf16.msrb.mxu2 %v10195_v18  ;;  %v10793_v18 = vld [vmem:[#allocation20 + $0x14] sm:$0xf0] }
0x1250   : > { %4934 = vadd.xlane.f32.xlu1 %v4919_v40 }
0x1251   : > { %v4661_v7 = vpop.f32.mrf.mxu3 }
0x1252   : > { %v11226_v54 = vpack.i.bf16 %v4661_v7, %v4659_v29  ;;  %v10809_v29 = vld [vmem:[#allocation20 + $0x94] sm:$0xf0]  ;;  %v14194_v7 = vadd.f32 1e-05, %v4936_v8  ;;  %5365 = vmatpush.bf16.msrb.mxu3 %v10215_v4  ;;  %5338 = vmatpush.bf16.msrb.mxu2 %v10179_v56  ;;  %v10146_v4 = vld [vmem:[#allocation20] sm:$0xf] }
0x1253   : > { %v10219_v40 = vor.u32 %v10809_v29, %v10218_v3  ;;  %v4686_v6 = vpop.f32.mrf.mxu0  ;;  %v14198_v22 = vpop.permute.xlu0 %11207  ;;  %v10171_v3 = vor.u32 %v10797_v59, %v10170_v44 }
0x1254   : > { %11227 = vrot.lane.b32.xlu2 %v11226_v54, %s12343_s3  ;;  %v10802_v54 = vld [vmem:[#allocation20 + $0x64] sm:$0xf]  ;;  %11552 = vrsqrt.f32 %v14194_v7  ;;  %v11246_v47 = vpack.i.bf16 %v4686_v6, %v4684_v63  ;;  %v10162_v63 = vld [vmem:[#allocation20 + $0x20] sm:$0xf]  ;;  %vm4958_vm6 = vweird.f32 %v14194_v7 }
0x1255   : > { %5394 = vmatpush.bf16.msra.mxu0 %v10219_v40  ;;  %v10199_v14 = vor.u32 %v10802_v54, %v10196_v20  ;;  %v10163_v34 = vor.u32 %v10796_v13, %v10162_v63  ;;  %v10792_v40 = vld [vmem:[#allocation20 + $0xc] sm:$0xf0]  ;;  %v10790_v6 = vld [vmem:[#allocation20 + $0x4] sm:$0xf]  ;;  %v10154_v54 = vld [vmem:[#allocation20 + $0x8] sm:$0xf]  ;;  %v4899_v20 = vmul.f32 %v14142_v17, %v18234_v5 }
0x1256   : > { %v10147_v41 = vor.u32 %v10792_v40, %v10146_v4  ;;  %v10151_v55 = vor.u32 %v10790_v6, %v10148_v0  ;;  %v10155_v24 = vor.u32 %v10793_v18, %v10154_v54 }
0x1257   : > { %5366 = vmatpush.bf16.msrb.mxu3 %v10199_v14  ;;  %5339 = vmatpush.bf16.msrb.mxu2 %v10163_v34  ;;  %v14205_v49 = vsub.f32 %v14079_v48, %v4899_v20  ;;  %v14215_v34 = vld [vmem:[%s18103_s12] ss:$0 sm:$0xff] }
0x1259   : > { %5395 = vmatpush.bf16.msra.mxu0 %v10203_v37  ;;  %v4915_v56 = vmul.f32 %v14205_v49, %v14205_v49 }
0x125a   : > { %v11553_v8 = vpop.eup %11552 }
0x125b   : > { %5367 = vmatpush.bf16.msrb.mxu3 %v10183_v26  ;;  %v4953_v29 = vmul.f32 %v11553_v8, %v14194_v7  ;;  %5340 = vmatpush.bf16.msrb.mxu2 %v10147_v41  ;;  %vm4959_vm5 = vweird.f32 %v11553_v8 }
0x125c   : > { %11237 = vrot.lane.b32.xlu2 %v11236_v21, %s12345_s23  ;;  %v10794_v21 = vld [vmem:[#allocation20 + $0x24] sm:$0xf]  ;;  %vm4960_vm7 = vmor %vm4958_vm6, %vm4959_vm5 }
0x125d   : > { %5396 = vmatpush.bf16.msra.mxu0 %v10187_v61  ;;  %v10167_v43 = vor.u32 %v10794_v21, %v10164_v51  ;;  %v4954_v14 = vmul.f32 %v11553_v8, %v4953_v29  ;;  %v4900_v21 = vmul.f32 %v14170_v45, %v18234_v5  ;;  %v14225_v29 = vld [vmem:[%s18104_s13] ss:$0 sm:$0xff] }
0x125f   : > { %5368 = vmatpush.bf16.msrb.mxu3 %v10167_v43  ;;  %v4955_v27 = vmul.f32 0.5, %v4954_v14  ;;  %v14230_v41 = vsub.f32 %v14117_v1, %v4900_v21 }
0x1261   : > { %5397 = vmatpush.bf16.msra.mxu0 %v10171_v3  ;;  %v4956_v62 = vsub.f32 1.5, %v4955_v27  ;;  %v11210_v27 = vunpack.i.h.bf16 %v14198_v22 }
0x1263   : > { %5369 = vmatpush.bf16.msrb.mxu3 %v10151_v55  ;;  %v4957_v60 = vmul.f32 %v11553_v8, %v4956_v62 }
0x1264   : > { %11247 = vrot.lane.b32.xlu2 %v11246_v47, %s12343_s3  ;;  %s18370_s3 = sld [smem:[#allocation69_spill]] }
0x1265   : > { %5398 = vmatpush.bf16.msra.mxu0 %v10155_v24  ;;  %v4961_v61 = vsel %vm4960_vm7, %v11553_v8, %v4957_v60 }
0x1266   : > { %v5032_v51 = vmul.f32 %v4961_v61, %v14130_v25 }
0x1267   : > { %7097 = vmatpush.bf16.msra.mxu3 %v10837_v52  ;;  %v10836_v52 = vld [vmem:[#allocation22 + $0x70] sm:$0xff] }
0x1268   : > { %v5043_v25 = vmul.f32 %v14215_v34, %v5032_v51 }
0x126a   : > { %v5054_v18 = vadd.f32 %v14225_v29, %v5043_v25 }
0x126b   : > { %7098 = vmatpush.bf16.msra.mxu3 %v10836_v52 }
0x126f   : > { %v4923_v37 = vpop.xlane.xlu0 %4922 }
0x1270   : > { %v4937_v47 = vmul.f32 %v4923_v37, %v18234_v5  ;;  %v11205_v37 = vunpack.i.h.bf16 %v14192_v19 }
0x1272   : > { %v4945_v16 = vadd.f32 1e-05, %v4937_v47  ;;  %v11204_v47 = vunpack.i.l.bf16 %v14192_v19 }
0x1274   : > { %11554 = vrsqrt.f32 %v4945_v16  ;;  %vm4968_vm9 = vweird.f32 %v4945_v16 }
0x1277   : > { %4926 = vadd.xlane.f32.xlu0 %v4915_v56  ;;  %v11209_v56 = vunpack.i.l.bf16 %v14198_v22 }
0x127a   : > { %v11555_v17 = vpop.eup %11554 }
0x127b   : > { %v4963_v11 = vmul.f32 %v11555_v17, %v4945_v16  ;;  %vm4969_vm8 = vweird.f32 %v11555_v17  ;;  %v11218_v16 = vpop.permute.xlu2 %11217 }
0x127c   : > { %vm4970_vm10 = vmor %vm4968_vm9, %vm4969_vm8  ;;  %v11220_v25 = vunpack.i.h.bf16 %v11218_v16 }
0x127d   : > { %v4964_v26 = vmul.f32 %v11555_v17, %v4963_v11 }
0x127f   : > { %v4965_v63 = vmul.f32 0.5, %v4964_v26 }
0x1281   : > { %v4966_v13 = vsub.f32 1.5, %v4965_v63  ;;  %v11213_v63 = vpop.permute.xlu1 %11212 }
0x1282   : > { %v11223_v44 = vpop.permute.xlu0 %11222  ;;  %v11215_v51 = vunpack.i.h.bf16 %v11213_v63 }
0x1283   : > { %v4967_v59 = vmul.f32 %v11555_v17, %v4966_v13  ;;  %v11225_v7 = vunpack.i.h.bf16 %v11223_v44  ;;  %v11224_v43 = vunpack.i.l.bf16 %v11223_v44  ;;  %v11214_v44 = vunpack.i.l.bf16 %v11213_v63  ;;  %v10803_v63 = vld [vmem:[#allocation20 + $0x6c] sm:$0xf] }
0x1285   : > { %v4971_v8 = vsel %vm4970_vm10, %v11555_v17, %v4967_v59  ;;  %v4801_v3 = vsel %vm3356_vm4, %v14152_v50, %v11224_v43  ;;  %v4802_v45 = vsel %vm3356_vm4, %v14155_v2, %v11225_v7  ;;  %v11241_v2 = vpack.i.bf16 %v14010_v15, %v14008_v53 }
0x1286   : > { %v5033_v4 = vmul.f32 %v4971_v8, %v14159_v38  ;;  %v4809_v40 = vpack.c.bf16 %v4801_v3, %v4801_v3  ;;  %v4810_v6 = vpack.c.bf16 %v4802_v45, %v4802_v45  ;;  %v4916_v38 = vmul.f32 %v14230_v41, %v14230_v41 }
0x1287   : > { %v4901_v53 = vmul.f32 %v14172_v30, %v18234_v5  ;;  %v4788_v30 = vsel %vm2047_vm1, %v13714_v32, %v11205_v37  ;;  %v4787_v17 = vsel %vm2047_vm1, %v13708_v12, %v11204_v47  ;;  %v4790_v12 = vsel %vm2047_vm1, %v13719_v36, %v11215_v51  ;;  %v10815_v47 = vld [vmem:[#allocation20 + $0xcc] sm:$0xf] }
0x1288   : > { %v5044_v0 = vmul.f32 %v14215_v34, %v5033_v4  ;;  %v4825_v50 = vunpack.c.l.b16 %v4809_v40  ;;  %v4826_v54 = vunpack.c.l.b16 %v4810_v6  ;;  %v4795_v26 = vsel %vm3347_vm3, %v4787_v17, %v11209_v56  ;;  %v10811_v56 = vld [vmem:[#allocation20 + $0xac] sm:$0xf] }
0x1289   : > { %v14248_v15 = vsub.f32 %v14090_v31, %v4901_v53  ;;  %v4796_v61 = vsel %vm3347_vm3, %v4788_v30, %v11210_v27  ;;  %v4789_v8 = vsel %vm2047_vm1, %v13712_v58, %v11214_v44  ;;  %v11219_v4 = vunpack.i.l.bf16 %v11218_v16  ;;  %v10819_v53 = vld [vmem:[#allocation20 + $0xec] sm:$0xf]  ;;  %v10252_v16 = vld [vmem:[#allocation20 + $0xd8] sm:$0xf0] }
0x128a   : > { %v5055_v20 = vadd.f32 %v14225_v29, %v5044_v0  ;;  %v4833_v55 = vpack.c.b16 %v4826_v54, %v4825_v50  ;;  %v4798_v6 = vsel %vm3347_vm3, %v4790_v12, %v11220_v25  ;;  %v10255_v27 = vor.u32 %v10815_v47, %v10252_v16 }
0x128b   : > { %11242 = vrot.lane.b32.xlu0 %v11241_v2, %s12344_s16  ;;  %v4917_v14 = vmul.f32 %v14248_v15, %v14248_v15  ;;  %v4797_v40 = vsel %vm3347_vm3, %v4789_v8, %v11219_v4  ;;  %s18478_s16 = sld [smem:[#allocation79_spill]] }
0x128c   : > { %4849 = vmatmul.bf16.vlgmr.msra.gmra.mxu1 %v4833_v55  ;;  %v14240_v24 = vpack.c.bf16 %v5055_v20, %v5054_v18  ;;  %v4925_v18 = vpop.xlane.xlu1 %4924 }
0x128d   : > { %4928 = vadd.xlane.f32.xlu2 %v4916_v38  ;;  %v4938_v58 = vmul.f32 %v4925_v18, %v18234_v5 }
0x128e   : > { %5341 = vmatmul.bf16.vlgmr.msrb.gmra.mxu2 %v14240_v24  ;;  %5370 = vmatmul.bf16.vlgmr.msrb.gmra.mxu3 %v14240_v24 }
0x128f   : > { %5399 = vmatmul.bf16.vlgmr.msra.gmra.mxu0 %v14240_v24  ;;  %v4946_v38 = vadd.f32 1e-05, %v4938_v58 }
0x1291   : > { %11556 = vrsqrt.f32 %v4946_v38  ;;  %vm4978_vm12 = vweird.f32 %v4946_v38  ;;  %s9540_s23 = scalar_lea.hbm %s18478_s16, %s10919_s7 }
0x1297   : > { %v11557_v17 = vpop.eup %11556 }
0x1298   : > { %vm4979_vm11 = vweird.f32 %v11557_v17 }
0x1299   : > { %vm4980_vm13 = vmor %vm4978_vm12, %vm4979_vm11 }
0x12ae   : > { %v11228_v59 = vpop.permute.xlu2 %11227 }
0x12af   : > { %v11230_v3 = vunpack.i.h.bf16 %v11228_v59  ;;  %v11229_v45 = vunpack.i.l.bf16 %v11228_v59  ;;  %v10799_v59 = vld [vmem:[#allocation20 + $0x4c] sm:$0xf] }
0x12b1   : > { %v4805_v0 = vsel %vm3356_vm4, %v4797_v40, %v11229_v45  ;;  %v4806_v50 = vsel %vm3356_vm4, %v4798_v6, %v11230_v3  ;;  %v10795_v3 = vld [vmem:[#allocation20 + $0x2c] sm:$0xf]  ;;  %v10172_v45 = vld [vmem:[#allocation20 + $0x38] sm:$0xf0] }
0x12b2   : > { %v4813_v54 = vpack.c.bf16 %v4805_v0, %v4805_v0  ;;  %v4814_v2 = vpack.c.bf16 %v4806_v50, %v4806_v50  ;;  %v10175_v25 = vor.u32 %v10795_v3, %v10172_v45 }
0x12b4   : > { %v4829_v36 = vunpack.c.l.b16 %v4813_v54  ;;  %v4830_v20 = vunpack.c.l.b16 %v4814_v2 }
0x12b5   : > { %4930 = vadd.xlane.f32.xlu0 %v4917_v14  ;;  %v10268_v14 = vld [vmem:[#allocation20 + $0xf8] sm:$0xf0] }
0x12b6   : > { %v4835_v55 = vpack.c.b16 %v4830_v20, %v4829_v36  ;;  %v10271_v37 = vor.u32 %v10819_v53, %v10268_v14  ;;  %v11238_v8 = vpop.permute.xlu2 %11237  ;;  %v10791_v53 = vld [vmem:[#allocation20 + $0xc] sm:$0xf]  ;;  %v10156_v14 = vld [vmem:[#allocation20 + $0x18] sm:$0xf0] }
0x12b7   : > { %v11240_v2 = vunpack.i.h.bf16 %v11238_v8  ;;  %v11239_v18 = vunpack.i.l.bf16 %v11238_v8 }
0x12b8   : > { %5420 = vmatpush.bf16.msrb.mxu1 %v10271_v37 }
0x12bc   : > { %5421 = vmatpush.bf16.msrb.mxu1 %v10255_v27  ;;  %v10159_v27 = vor.u32 %v10791_v53, %v10156_v14 }
0x12be   : > { %v11248_v36 = vpop.permute.xlu2 %11247 }
0x12bf   : > { %v11233_v62 = vpop.permute.xlu0 %11232 }
0x12c0   : > { %v11235_v60 = vunpack.i.h.bf16 %v11233_v62  ;;  %v11234_v11 = vunpack.i.l.bf16 %v11233_v62  ;;  %v10236_v62 = vld [vmem:[#allocation20 + $0xb8] sm:$0xf0] }
0x12c1   : > { %v10239_v30 = vor.u32 %v10811_v56, %v10236_v62  ;;  %v4791_v56 = vsel %vm2047_vm1, %v13710_v33, %v11239_v18  ;;  %v11250_v62 = vunpack.i.h.bf16 %v11248_v36  ;;  %v11730_v18 = vld [vmem:[%s12678_s15 + $0x8] sm:$0xff] }
0x12c2   : > { %v4803_v19 = vsel %vm3356_vm4, %v4795_v26, %v11234_v11  ;;  %v4804_v13 = vsel %vm3356_vm4, %v4796_v61, %v11235_v60  ;;  %v10807_v60 = vld [vmem:[#allocation20 + $0x8c] sm:$0xf]  ;;  %v10220_v11 = vld [vmem:[#allocation20 + $0x98] sm:$0xf0]  ;;  %v4973_v26 = vmul.f32 %v11557_v17, %v4946_v38  ;;  %v4792_v38 = vsel %vm2047_vm1, %v13716_v57, %v11240_v2 }
0x12c3   : > { %v4811_v21 = vpack.c.bf16 %v4803_v19, %v4803_v19  ;;  %v4812_v22 = vpack.c.bf16 %v4804_v13, %v4804_v13  ;;  %5422 = vmatpush.bf16.msrb.mxu1 %v10239_v30  ;;  %v10223_v61 = vor.u32 %v10807_v60, %v10220_v11  ;;  %v10204_v19 = vld [vmem:[#allocation20 + $0x78] sm:$0xf0]  ;;  %v11249_v30 = vunpack.i.l.bf16 %v11248_v36 }
0x12c4   : > { %v4974_v13 = vmul.f32 %v11557_v17, %v4973_v26 }
0x12c5   : > { %v4827_v32 = vunpack.c.l.b16 %v4811_v21  ;;  %v4828_v7 = vunpack.c.l.b16 %v4812_v22  ;;  %v10207_v22 = vor.u32 %v10803_v63, %v10204_v19 }
0x12c7   : > { %v4834_v43 = vpack.c.b16 %v4828_v7, %v4827_v32  ;;  %5423 = vmatpush.bf16.msrb.mxu1 %v10223_v61  ;;  %v4975_v32 = vmul.f32 0.5, %v4974_v13  ;;  %v10188_v7 = vld [vmem:[#allocation20 + $0x58] sm:$0xf0]  ;;  %v4933_v13 = vpop.xlane.xlu1 %4932 }
0x12c8   : > { %v4942_v3 = vmul.f32 %v4933_v13, %v18234_v5 }
0x12c9   : > { %4854 = vmatmul.bf16.gmra.mxu1 %v4834_v43  ;;  %v10191_v43 = vor.u32 %v10799_v59, %v10188_v7  ;;  %v4976_v12 = vsub.f32 1.5, %v4975_v32 }
0x12cb   : > { %5424 = vmatpush.bf16.msrb.mxu1 %v10207_v22  ;;  %v4977_v40 = vmul.f32 %v11557_v17, %v4976_v12 }
0x12cd   : > { %v4981_v50 = vsel %vm4980_vm13, %v11557_v17, %v4977_v40 }
0x12ce   : > { %v5034_v58 = vmul.f32 %v4981_v50, %v14165_v9 }
0x12cf   : > { %5425 = vmatpush.bf16.msrb.mxu1 %v10191_v43  ;;  %v11729_v43 = vld [vmem:[%s12678_s15] sm:$0xff]  ;;  %v4935_v45 = vpop.xlane.xlu1 %4934 }
0x12d0   : > { %v5045_v57 = vmul.f32 %v14215_v34, %v5034_v58 }
0x12d3   : > { %5426 = vmatpush.bf16.msrb.mxu1 %v10175_v25  ;;  %v5098_v25 = vld [vmem:[%s18237_s22] sm:$0xf] }
0x12d4   : > { %v14302_v50 = vperm.slane %v5098_v25, 2 }
0x12d7   : > { %5427 = vmatpush.bf16.msrb.mxu1 %v10159_v27 }
0x12d9   : > { %4859 = vmatmul.bf16.gmra.mxu1 %v4835_v55 }
0x12ea   : > { %v4927_v21 = vpop.xlane.xlu0 %4926 }
0x12eb   : > { %v4939_v51 = vmul.f32 %v4927_v21, %v18234_v5 }
0x12ed   : > { %v4947_v44 = vadd.f32 1e-05, %v4939_v51  ;;  %v5056_v51 = vadd.f32 %v14225_v29, %v5045_v57 }
0x12ef   : > { %11558 = vrsqrt.f32 %v4947_v44  ;;  %vm4988_vm15 = vweird.f32 %v4947_v44 }
0x12f5   : > { %v11559_v4 = vpop.eup %11558 }
0x12f6   : > { %v4983_v6 = vmul.f32 %v11559_v4, %v4947_v44  ;;  %vm4989_vm14 = vweird.f32 %v11559_v4 }
0x12f7   : > { %vm4990_vm0 = vmor %vm4988_vm15, %vm4989_vm14 }
0x12f8   : > { %v4984_v0 = vmul.f32 %v11559_v4, %v4983_v6  ;;  %v14298_v6 = vperm.slane %v5098_v25, 0 }
0x12fa   : > { %v4985_v54 = vmul.f32 0.5, %v4984_v0  ;;  %v14300_v0 = vadd.f32 1e-05, %v4942_v3 }
0x12fc   : > { %v4986_v20 = vsub.f32 1.5, %v4985_v54  ;;  %11560 = vrsqrt.f32 %v14300_v0  ;;  %vm5018_vm2 = vweird.f32 %v14300_v0 }
0x12fd   : > { %v11243_v55 = vpop.permute.xlu0 %11242 }
0x12fe   : > { %v4987_v37 = vmul.f32 %v11559_v4, %v4986_v20  ;;  %v11245_v47 = vunpack.i.h.bf16 %v11243_v55  ;;  %v11244_v16 = vunpack.i.l.bf16 %v11243_v55  ;;  %v14313_v55 = vperm.slane %v5098_v25, 1 }
0x1300   : > { %v4991_v17 = vsel %vm4990_vm0, %v11559_v4, %v4987_v37  ;;  %v4800_v9 = vsel %vm3347_vm3, %v4792_v38, %v11245_v47  ;;  %v4799_v60 = vsel %vm3347_vm3, %v4791_v56, %v11244_v16  ;;  %v4943_v4 = vmul.f32 %v4935_v45, %v18234_v5  ;;  %18239 = vst [vmem:[#allocation42_spill] sm:$0xff] %v14313_v55 }
0x1301   : > { %v5035_v11 = vmul.f32 %v4991_v17, %v14205_v49  ;;  %v4807_v26 = vsel %vm3356_vm4, %v4799_v60, %v11249_v30  ;;  %v4808_v61 = vsel %vm3356_vm4, %v4800_v9, %v11250_v62  ;;  %v4929_v60 = vpop.xlane.xlu2 %4928 }
0x1302   : > { %v4815_v63 = vpack.c.bf16 %v4807_v26, %v4807_v26  ;;  %v4816_v33 = vpack.c.bf16 %v4808_v61, %v4808_v61  ;;  %v14308_v20 = vadd.f32 1e-05, %v4943_v4  ;;  %v14334_v38 = vpop.eup %11560 }
0x1303   : > { %v5046_v19 = vmul.f32 %v14215_v34, %v5035_v11  ;;  %v5013_v9 = vmul.f32 %v14334_v38, %v14300_v0  ;;  %vm5019_vm1 = vweird.f32 %v14334_v38 }
0x1304   : > { %v4831_v21 = vunpack.c.l.b16 %v4815_v63  ;;  %v4832_v22 = vunpack.c.l.b16 %v4816_v33  ;;  %11562 = vrsqrt.f32 %v14308_v20  ;;  %v4940_v63 = vmul.f32 %v4929_v60, %v18234_v5  ;;  %vm5020_vm4 = vmor %vm5018_vm2, %vm5019_vm1 }
0x1305   : > { %v5057_v44 = vadd.f32 %v14225_v29, %v5046_v19  ;;  %v5014_v19 = vmul.f32 %v14334_v38, %v5013_v9  ;;  %vm5028_vm5 = vweird.f32 %v14308_v20 }
0x1306   : > { %v4836_v59 = vpack.c.b16 %v4832_v22, %v4831_v21 }
0x1307   : > { %v5063_v49 = vpack.c.bf16 %v5057_v44, %v5056_v51  ;;  %v14368_v44 = vadd.f32 1e-05, %v4940_v63 }
0x1308   : > { %4864 = vmatmul.bf16.gmra.mxu1 %v4836_v59 }
0x1309   : > { %v4850_v32 = vpop.f32.mrf.mxu1  ;;  %5346 = vmatmul.bf16.gmra.mxu2 %v5063_v49  ;;  %5375 = vmatmul.bf16.gmra.mxu3 %v5063_v49  ;;  %11564 = vrsqrt.f32 %v14368_v44  ;;  %vm4998_vm7 = vweird.f32 %v14368_v44 }
0x130a   : > { %v4851_v7 = vadd.f32 %v14053_v10, %v4850_v32  ;;  %5404 = vmatmul.bf16.gmra.mxu0 %v5063_v49  ;;  %v14346_v17 = vpop.eup %11562  ;;  %v5015_v32 = vmul.f32 0.5, %v5014_v19 }
0x130b   : > { %v5023_v57 = vmul.f32 %v14346_v17, %v14308_v20  ;;  %vm5029_vm3 = vweird.f32 %v14346_v17 }
0x130c   : > { %v14290_v12 = vadd.f32 %v11729_v43, %v4851_v7  ;;  %v5400_v8 = vpop.f32.mrf.mxu0  ;;  %vm14406_vm6 = vmor %vm5028_vm5, %vm5029_vm3 }
0x130d   : > { %v14317_v14 = vadd.f32 %v5400_v8, %v14302_v50  ;;  %v5024_v51 = vmul.f32 %v14346_v17, %v5023_v57 }
0x130e   : > { %18236 = vst [vmem:[#allocation48_spill] sm:$0xff] %v14290_v12  ;;  %7194 = vadd.xlane.f32.xlu1 %v14290_v12 }
0x130f   : > { %v14332_v27 = vmul.f32 0.70710677, %v14317_v14  ;;  %v5025_v45 = vmul.f32 0.5, %v5024_v51 }
0x1311   : > { %v4852_v40 = vpop.f32.mrf.mxu1  ;;  %v5342_v2 = vpop.f32.mrf.mxu2  ;;  %v5593_v30 = vmul.f32 %v14332_v27, %v14332_v27 }
0x1312   : > { %v4853_v54 = vadd.f32 %v14053_v10, %v4852_v40  ;;  %v14311_v58 = vadd.f32 %v5342_v2, %v14298_v6  ;;  %v5371_v37 = vpop.f32.mrf.mxu3  ;;  %v5016_v40 = vsub.f32 1.5, %v5015_v32 }
0x1313   : > { %v14329_v16 = vadd.f32 %v5371_v37, %v14313_v55  ;;  %v14359_v33 = vmin.f32 %v5593_v30, 16.0  ;;  %v14384_v30 = vpop.eup %11564 }
0x1314   : > { %v14306_v36 = vadd.f32 %v11730_v18, %v4853_v54  ;;  %v5402_v53 = vpop.f32.mrf.mxu0  ;;  %v14326_v47 = vmul.f32 0.70710677, %v14311_v58  ;;  %vm4999_vm8 = vweird.f32 %v14384_v30 }
0x1315   : > { %v14321_v10 = vadd.f32 %v5402_v53, %v14302_v50  ;;  %v5606_v59 = vmul.f32 3.8918573e-05, %v14359_v33  ;;  %v5026_v53 = vsub.f32 1.5, %v5025_v45  ;;  %v5595_v63 = vmul.f32 2.1237322e-06, %v14359_v33  ;;  %vm14463_vm9 = vmor %vm4998_vm7, %vm4999_vm8 }
0x1316   : > { %18238 = vst [vmem:[#allocation47_spill] sm:$0xff] %v14306_v36  ;;  %7196 = vadd.xlane.f32.xlu2 %v14306_v36  ;;  %v5513_v62 = vmul.f32 %v14326_v47, %v14326_v47 }
0x1317   : > { %v14337_v56 = vmul.f32 0.70710677, %v14321_v10  ;;  %v5607_v25 = vadd.f32 0.001143296, %v5606_v59  ;;  %v5027_v57 = vmul.f32 %v14346_v17, %v5026_v53  ;;  %v4993_v59 = vmul.f32 %v14384_v30, %v14368_v44  ;;  %v10829_v44 = vld [vmem:[#allocation22 + $0x38] sm:$0xff] }
0x1318   : > { %5428 = vmatmul.bf16.vlgmr.msrb.gmra.mxu1 %v14240_v24  ;;  %v14342_v24 = vmul.f32 0.70710677, %v14329_v16  ;;  %v14352_v26 = vmin.f32 %v5513_v62, 16.0  ;;  %v5017_v62 = vmul.f32 %v14334_v38, %v5016_v40  ;;  %7068 = vmatpush.bf16.msra.mxu2 %v10829_v44  ;;  %v10844_v44 = vld [vmem:[#allocation22 + $0xb0] sm:$0xff] }
0x1319   : > { %v5753_v11 = vmul.f32 %v14337_v56, %v14337_v56  ;;  %v5344_v7 = vpop.f32.mrf.mxu2  ;;  %v5608_v37 = vmul.f32 %v5607_v25, %v14359_v33  ;;  %v5031_v20 = vsel %vm14406_vm6, %v14346_v17, %v5027_v57  ;;  %v5596_v25 = vadd.f32 0.00028619796, %v5595_v63 }
0x131a   : > { %v5553_v61 = vmul.f32 %v14342_v24, %v14342_v24  ;;  %v5526_v21 = vmul.f32 3.8918573e-05, %v14352_v26  ;;  %v14375_v4 = vadd.f32 %v5344_v7, %v14298_v6  ;;  %v5373_v60 = vpop.f32.mrf.mxu3  ;;  %v5021_v51 = vsel %vm5020_vm4, %v14334_v38, %v5017_v62 }
0x131b   : > { %v14362_v13 = vmin.f32 %v5753_v11, 16.0  ;;  %v5609_v19 = vadd.f32 0.014752088, %v5608_v37  ;;  %v14398_v0 = vadd.f32 %v5373_v60, %v14313_v55  ;;  %v5515_v32 = vmul.f32 2.1237322e-06, %v14352_v26 }
0x131c   : > { %v14365_v22 = vmin.f32 %v5553_v61, 16.0  ;;  %v5527_v8 = vadd.f32 0.001143296, %v5526_v21  ;;  %v5038_v45 = vmul.f32 %v5021_v51, %v14176_v39 }
0x131d   : > { %v5766_v43 = vmul.f32 3.8918573e-05, %v14362_v13  ;;  %v5610_v40 = vmul.f32 %v5609_v19, %v14359_v33  ;;  %v14420_v53 = vmul.f32 0.70710677, %v14398_v0  ;;  %v5516_v37 = vadd.f32 0.00028619796, %v5515_v32 }
0x131e   : > { %v5566_v3 = vmul.f32 3.8918573e-05, %v14365_v22  ;;  %v5528_v2 = vmul.f32 %v5527_v8, %v14352_v26  ;;  %v5049_v19 = vmul.f32 %v14215_v34, %v5038_v45  ;;  %v5755_v32 = vmul.f32 2.1237322e-06, %v14362_v13 }
0x131f   : > { %v5767_v54 = vadd.f32 0.001143296, %v5766_v43  ;;  %v5713_v17 = vmul.f32 %v14420_v53, %v14420_v53  ;;  %v5611_v57 = vadd.f32 0.112945676, %v5610_v40 }
0x1320   : > { %v5567_v18 = vadd.f32 0.001143296, %v5566_v3  ;;  %v5529_v11 = vadd.f32 0.014752088, %v5528_v2  ;;  %v5555_v2 = vmul.f32 2.1237322e-06, %v14365_v22  ;;  %v14441_v40 = vadd.f32 %v14225_v29, %v5049_v19 }
0x1321   : > { %v5768_v9 = vmul.f32 %v5767_v54, %v14362_v13  ;;  %v4994_v54 = vmul.f32 %v14384_v30, %v4993_v59  ;;  %v5517_v59 = vmul.f32 %v5516_v37, %v14352_v26 }
0x1322   : > { %v5568_v61 = vmul.f32 %v5567_v18, %v14365_v22  ;;  %v5530_v38 = vmul.f32 %v5529_v11, %v14352_v26  ;;  %v5039_v11 = vmul.f32 %v5031_v20, %v14182_v28  ;;  %v5556_v51 = vadd.f32 0.00028619796, %v5555_v2 }
0x1323   : > { %v5769_v7 = vadd.f32 0.014752088, %v5768_v9 }
0x1324   : > { %v5569_v3 = vadd.f32 0.014752088, %v5568_v61  ;;  %v5531_v39 = vadd.f32 0.112945676, %v5530_v38  ;;  %v5597_v61 = vmul.f32 %v5596_v25, %v14359_v33  ;;  %v5612_v25 = vmul.f32 %v5611_v57, %v14359_v33 }
0x1325   : > { %v5770_v62 = vmul.f32 %v5769_v7, %v14362_v13  ;;  %v14438_v45 = vmul.f32 %v14215_v34, %v5039_v11  ;;  %v5557_v2 = vmul.f32 %v5556_v51, %v14365_v22 }
0x1326   : > { %v5570_v9 = vmul.f32 %v5569_v3, %v14365_v22  ;;  %v5532_v38 = vmul.f32 %v5531_v39, %v14352_v26  ;;  %v5598_v20 = vadd.f32 0.0036580483, %v5597_v61  ;;  %v5518_v39 = vadd.f32 0.0036580483, %v5517_v59 }
0x1327   : > { %v5771_v7 = vadd.f32 0.112945676, %v5770_v62  ;;  %v5613_v19 = vadd.f32 0.4994258, %v5612_v25  ;;  %v5558_v59 = vadd.f32 0.0036580483, %v5557_v2 }
0x1328   : > { %5433 = vmatmul.bf16.gmra.mxu1 %v5063_v49  ;;  %v14380_v49 = vmul.f32 0.70710677, %v14375_v4  ;;  %v4931_v63 = vpop.xlane.xlu0 %4930  ;;  %v5571_v3 = vadd.f32 0.112945676, %v5570_v9  ;;  %v5756_v9 = vadd.f32 0.00028619796, %v5755_v32 }
0x1329   : > { %v4941_v28 = vmul.f32 %v4931_v63, %v18234_v5  ;;  %v5599_v63 = vmul.f32 %v5598_v20, %v14359_v33 }
0x132a   : > { %v5673_v21 = vmul.f32 %v14380_v49, %v14380_v49  ;;  %v5572_v61 = vmul.f32 %v5571_v3, %v14365_v22 }
0x132b   : > { %v14449_v57 = vadd.f32 1e-05, %v4941_v28  ;;  %v5600_v2 = vadd.f32 0.05243302, %v5599_v63 }
0x132c   : > { %v14402_v43 = vmin.f32 %v5673_v21, 16.0  ;;  %v4995_v21 = vmul.f32 0.5, %v4994_v54  ;;  %v5573_v20 = vadd.f32 0.4994258, %v5572_v61  ;;  %v5559_v61 = vmul.f32 %v5558_v59, %v14365_v22 }
0x132d   : > { %11566 = vrsqrt.f32 %v14449_v57  ;;  %vm5008_vm11 = vweird.f32 %v14449_v57 }
0x132e   : > { %v5686_v18 = vmul.f32 3.8918573e-05, %v14402_v43  ;;  %v4996_v54 = vsub.f32 1.5, %v4995_v21  ;;  %v5675_v21 = vmul.f32 2.1237322e-06, %v14402_v43 }
0x1330   : > { %v5687_v60 = vadd.f32 0.001143296, %v5686_v18  ;;  %v14433_v18 = vmin.f32 %v5713_v17, 16.0  ;;  %v5533_v17 = vadd.f32 0.4994258, %v5532_v38 }
0x1332   : > { %v5688_v8 = vmul.f32 %v5687_v60, %v14402_v43  ;;  %v5726_v62 = vmul.f32 3.8918573e-05, %v14433_v18  ;;  %v5772_v60 = vmul.f32 %v5771_v7, %v14362_v13  ;;  %v5757_v7 = vmul.f32 %v5756_v9, %v14362_v13 }
0x1333   : > { %v5715_v3 = vmul.f32 2.1237322e-06, %v14433_v18  ;;  %v5519_v9 = vmul.f32 %v5518_v39, %v14352_v26  ;;  %v14477_v39 = vld [vmem:[%s18102_s11] ss:$0 sm:$0xff] }
0x1334   : > { %v5689_v37 = vadd.f32 0.014752088, %v5688_v8  ;;  %v5727_v51 = vadd.f32 0.001143296, %v5726_v62  ;;  %v4997_v8 = vmul.f32 %v14384_v30, %v4996_v54  ;;  %v5773_v38 = vadd.f32 0.4994258, %v5772_v60  ;;  %v14489_v54 = vpop.eup %11566 }
0x1335   : > { %v5614_v62 = vmul.f32 %v5613_v19, %v14359_v33  ;;  %v5676_v60 = vadd.f32 0.00028619796, %v5675_v21  ;;  %v5758_v35 = vadd.f32 0.0036580483, %v5757_v7  ;;  %v5716_v63 = vadd.f32 0.00028619796, %v5715_v3 }
0x1336   : > { %v5690_v11 = vmul.f32 %v5689_v37, %v14402_v43  ;;  %v5728_v28 = vmul.f32 %v5727_v51, %v14433_v18  ;;  %v5534_v37 = vmul.f32 %v5533_v17, %v14352_v26  ;;  %v5001_v17 = vsel %vm14463_vm9, %v14384_v30, %v4997_v8  ;;  %v10845_v21 = vld [vmem:[#allocation22 + $0xb8] sm:$0xff] }
0x1337   : > { %v5774_v31 = vmul.f32 %v5773_v38, %v14362_v13  ;;  %v5574_v8 = vmul.f32 %v5573_v20, %v14365_v22  ;;  %v5036_v38 = vmul.f32 %v5001_v17, %v14230_v41  ;;  %v5601_v3 = vmul.f32 %v5600_v2, %v14359_v33  ;;  %7126 = vmatpush.bf16.msrb.mxu0 %v10845_v21 }
0x1338   : > { %v5691_v32 = vadd.f32 0.112945676, %v5690_v11  ;;  %v5729_v51 = vadd.f32 0.014752088, %v5728_v28  ;;  %v14480_v30 = vadd.f32 1.0, %v5534_v37  ;;  %v14487_v28 = vadd.f32 1.0, %v5614_v62 }
0x1339   : > { %v5677_v37 = vmul.f32 %v5676_v60, %v14402_v43  ;;  %v14497_v41 = vadd.f32 1.0, %v5774_v31  ;;  %v5717_v2 = vmul.f32 %v5716_v63, %v14433_v18  ;;  %v5003_v62 = vmul.f32 %v14489_v54, %v14449_v57  ;;  %v10841_v57 = vld [vmem:[#allocation22 + $0x98] sm:$0xff] }
0x133a   : > { %v5692_v25 = vmul.f32 %v5691_v32, %v14402_v43  ;;  %v5730_v7 = vmul.f32 %v5729_v51, %v14433_v18  ;;  %v10828_v51 = vld [vmem:[#allocation22 + $0x30] sm:$0xff]  ;;  %11568 = vrcp.f32 %v14480_v30  ;;  %v5560_v60 = vadd.f32 0.05243302, %v5559_v61 }
0x133b   : > { %v14505_v17 = vadd.f32 1.0, %v5574_v8  ;;  %7069 = vmatpush.bf16.msra.mxu2 %v10828_v51  ;;  %v5602_v31 = vadd.f32 0.18741608, %v5601_v3  ;;  %11570 = vrcp.f32 %v14487_v28  ;;  %v5004_v21 = vmul.f32 %v14489_v54, %v5003_v62  ;;  %7127 = vmatpush.bf16.msrb.mxu0 %v10844_v44  ;;  %v10827_v8 = vld [vmem:[#allocation22 + $0x28] sm:$0xff] }
0x133c   : > { %v5693_v11 = vadd.f32 0.4994258, %v5692_v25  ;;  %v5520_v25 = vadd.f32 0.05243302, %v5519_v9  ;;  %v5731_v20 = vadd.f32 0.112945676, %v5730_v7  ;;  %v5061_v9 = vadd.f32 %v14225_v29, %v14438_v45 }
0x133d   : > { %v5047_v61 = vmul.f32 %v14215_v34, %v5036_v38  ;;  %v10835_v7 = vld [vmem:[#allocation22 + $0x68] sm:$0xff]  ;;  %v5718_v3 = vadd.f32 0.0036580483, %v5717_v2  ;;  %v5561_v62 = vmul.f32 %v5560_v60, %v14365_v22  ;;  %v5603_v38 = vmul.f32 %v5602_v31, %v14359_v33  ;;  %v10834_v2 = vld [vmem:[#allocation22 + $0x60] sm:$0xff] }
0x133e   : > { %v5694_v59 = vmul.f32 %v5693_v11, %v14402_v43  ;;  %v11732_v11 = vld [vmem:[%s12678_s15 + $0x10] sm:$0xff]  ;;  %v5732_v63 = vmul.f32 %v5731_v20, %v14433_v18  ;;  %v5521_v45 = vmul.f32 %v5520_v25, %v14352_v26  ;;  %v5005_v20 = vmul.f32 0.5, %v5004_v21  ;;  %7099 = vmatpush.bf16.msra.mxu3 %v10835_v7 }
0x133f   : > { %7070 = vmatpush.bf16.msra.mxu2 %v10827_v8  ;;  %v14522_v21 = vpack.c.bf16 %v5061_v9, %v14441_v40  ;;  %vm5009_vm10 = vweird.f32 %v14489_v54  ;;  %v5627_v31 = vand.u32 2147483648, %v14487_v28  ;;  %v5719_v7 = vmul.f32 %v5718_v3, %v14433_v18 }
0x1340   : > { %v5733_v51 = vadd.f32 0.4994258, %v5732_v63  ;;  %v5006_v48 = vsub.f32 1.5, %v5005_v20  ;;  %v10842_v63 = vld [vmem:[#allocation22 + $0xa0] sm:$0xff]  ;;  %v14524_v60 = vpop.eup %11568  ;;  %v14538_v40 = vadd.f32 %v14225_v29, %v5047_v61  ;;  %v10825_v20 = vld [vmem:[#allocation22 + $0x18] sm:$0xff]  ;;  %vm5010_vm12 = vmor %vm5008_vm11, %vm5009_vm10  ;;  %vm5541_vm13 = vweird.f32 %v14480_v30 }
0x1341   : > { %v14531_v33 = vpop.eup %11570  ;;  %v14548_v3 = vadd.f32 1.1283791, %v5603_v38  ;;  %v5720_v23 = vadd.f32 0.05243302, %v5719_v7  ;;  %vm5581_vm15 = vweird.f32 %v14505_v17  ;;  %vm5621_vm0 = vweird.f32 %v14487_v28 }
0x1342   : > { %v5734_v44 = vmul.f32 %v5733_v51, %v14433_v18  ;;  %v5007_v51 = vmul.f32 %v14489_v54, %v5006_v48  ;;  %7100 = vmatpush.bf16.msra.mxu3 %v10834_v2  ;;  %v10833_v48 = vld [vmem:[#allocation22 + $0x58] sm:$0xff]  ;;  %vm5622_vm14 = vweird.f32 %v14531_v33  ;;  %vm5542_vm1 = vweird.f32 %v14524_v60 }
0x1343   : > { %vm14641_vm8 = vmor %vm5541_vm13, %vm5542_vm1 }
0x1346   : > { %v4855_v32 = vpop.f32.mrf.mxu1  ;;  %7101 = vmatpush.bf16.msra.mxu3 %v10833_v48 }
0x1347   : > { %v4856_v19 = vadd.f32 %v14477_v39, %v4855_v32  ;;  %v14492_v32 = vadd.f32 1.0, %v5694_v59  ;;  %v5678_v59 = vadd.f32 0.0036580483, %v5677_v37  ;;  %v10826_v37 = vld [vmem:[#allocation22 + $0x20] sm:$0xff] }
0x1348   : > { %7071 = vmatpush.bf16.msra.mxu2 %v10826_v37 }
0x1349   : > { %v14495_v1 = vadd.f32 %v11732_v11, %v4856_v19  ;;  %v5759_v19 = vmul.f32 %v5758_v35, %v14362_v13  ;;  %11572 = vrcp.f32 %v14492_v32  ;;  %v10843_v11 = vld [vmem:[#allocation22 + $0xa8] sm:$0xff]  ;;  %v5679_v42 = vmul.f32 %v5678_v59, %v14402_v43 }
0x134a   : > { %11574 = vrcp.f32 %v14497_v41  ;;  %7128 = vmatpush.bf16.msrb.mxu0 %v10843_v11  ;;  %v14535_v11 = vadd.f32 1.0, %v5734_v44  ;;  %v5537_v44 = vmul.f32 %v14524_v60, %v14480_v30  ;;  %vm5701_vm9 = vweird.f32 %v14492_v32 }
0x134b   : > { %18244 = vst [vmem:[#allocation53_spill] sm:$0xff] %v14495_v1  ;;  %7198 = vadd.xlane.f32.xlu1 %v14495_v1  ;;  %11576 = vrcp.f32 %v14505_v17  ;;  %v5760_v52 = vadd.f32 0.05243302, %v5759_v19  ;;  %v5522_v19 = vadd.f32 0.18741608, %v5521_v45 }
0x134c   : > { %v5562_v45 = vadd.f32 0.18741608, %v5561_v62  ;;  %11578 = vrcp.f32 %v14535_v11  ;;  %v5680_v38 = vadd.f32 0.05243302, %v5679_v42  ;;  %7072 = vmatpush.bf16.msra.mxu2 %v10825_v20  ;;  %vm5741_vm11 = vweird.f32 %v14535_v11 }
0x134d   : > { %v5761_v59 = vmul.f32 %v5760_v52, %v14362_v13  ;;  %v5617_v52 = vmul.f32 %v14531_v33, %v14487_v28  ;;  %v5523_v37 = vmul.f32 %v5522_v19, %v14352_v26  ;;  %v10824_v26 = vld [vmem:[#allocation22 + $0x10] sm:$0xff] }
0x134e   : > { %v4857_v35 = vpop.f32.mrf.mxu1  ;;  %7129 = vmatpush.bf16.msrb.mxu0 %v10842_v63  ;;  %v5563_v1 = vmul.f32 %v5562_v45, %v14365_v22  ;;  %v5545_v45 = vand.u32 2147483647, %v14480_v30  ;;  %v5681_v20 = vmul.f32 %v5680_v38, %v14402_v43 }
0x134f   : > { %v4858_v25 = vadd.f32 %v14477_v39, %v4857_v35  ;;  %v11733_v35 = vld [vmem:[%s12678_s15 + $0x18] sm:$0xff]  ;;  %v14540_v9 = vpop.eup %11572  ;;  %v5762_v55 = vadd.f32 0.18741608, %v5761_v59  ;;  %v14577_v22 = vadd.f32 1.1283791, %v5523_v37  ;;  %v5547_v59 = vand.u32 2147483648, %v14480_v30 }
0x1350   : > { %v5697_v46 = vmul.f32 %v14540_v9, %v14492_v32  ;;  %7073 = vmatpush.bf16.msra.mxu2 %v10824_v26  ;;  %vm5702_vm4 = vweird.f32 %v14540_v9  ;;  %vm14622_vm5 = vcmp.eq.f32.partialorder %v5545_v45, 8.507059e+37  ;;  %v5707_v45 = vand.u32 2147483648, %v14492_v32 }
0x1351   : > { %v14529_v8 = vadd.f32 %v11733_v35, %v4858_v25  ;;  %v14546_v25 = vpop.eup %11574  ;;  %v5011_v35 = vsel %vm5010_vm12, %v14489_v54, %v5007_v51  ;;  %v5538_v54 = vsub.f32 1.0, %v5537_v44  ;;  %v11734_v51 = vld [vmem:[%s12678_s15 + $0x20] sm:$0xff]  ;;  %v5763_v37 = vmul.f32 %v5762_v55, %v14362_v13  ;;  %vm14652_vm10 = vmor %vm5701_vm9, %vm5702_vm4 }
0x1352   : > { %v14556_v62 = vpop.eup %11576  ;;  %v5037_v2 = vmul.f32 %v5011_v35, %v14248_v15  ;;  %v5777_v42 = vmul.f32 %v14546_v25, %v14497_v41  ;;  %7130 = vmatpush.bf16.msrb.mxu0 %v10841_v57  ;;  %v5618_v35 = vsub.f32 1.0, %v5617_v52  ;;  %v14588_v57 = vadd.f32 1.1283791, %v5563_v1  ;;  %vm14699_vm4 = vmor %vm5621_vm0, %vm5622_vm14 }
0x1353   : > { %18245 = vst [vmem:[#allocation54_spill] sm:$0xff] %v14529_v8  ;;  %7200 = vadd.xlane.f32.xlu2 %v14529_v8  ;;  %v14566_v8 = vor.u32 1.1754944e-38, %v5627_v31  ;;  %v5577_v19 = vmul.f32 %v14556_v62, %v14505_v17  ;;  %v10832_v31 = vld [vmem:[#allocation22 + $0x50] sm:$0xff]  ;;  %v14582_v44 = vpop.eup %11578  ;;  %v5539_v52 = vmul.f32 %v14524_v60, %v5538_v54  ;;  %v14597_v1 = vor.u32 1.1754944e-38, %v5547_v59 }
0x1354   : > { %v5048_v7 = vmul.f32 %v14215_v34, %v5037_v2  ;;  %v5698_v34 = vsub.f32 1.0, %v5697_v46  ;;  %v5721_v2 = vmul.f32 %v5720_v23, %v14433_v18  ;;  %v5737_v38 = vmul.f32 %v14582_v44, %v14535_v11  ;;  %7102 = vmatpush.bf16.msra.mxu3 %v10832_v31 }
0x1355   : > { %v5585_v46 = vand.u32 2147483647, %v14505_v17  ;;  %v5587_v55 = vand.u32 2147483648, %v14505_v17  ;;  %v5682_v13 = vadd.f32 0.18741608, %v5681_v20  ;;  %v5619_v54 = vmul.f32 %v14531_v33, %v5618_v35 }
0x1356   : > { %v4860_v61 = vpop.f32.mrf.mxu1  ;;  %v5059_v48 = vadd.f32 %v14225_v29, %v5048_v7  ;;  %v10823_v29 = vld [vmem:[#allocation22 + $0x8] sm:$0xff]  ;;  %v14611_v35 = vadd.f32 %v14524_v60, %v5539_v52  ;;  %vm5582_vm2 = vweird.f32 %v14556_v62  ;;  %vm5782_vm3 = vweird.f32 %v14546_v25  ;;  %v10838_v52 = vld [vmem:[#allocation22 + $0x80] sm:$0xff] }
0x1357   : > { %v4861_v63 = vadd.f32 %v14477_v39, %v4860_v61  ;;  %v10840_v61 = vld [vmem:[#allocation22 + $0x90] sm:$0xff]  ;;  %v10831_v7 = vld [vmem:[#allocation22 + $0x48] sm:$0xff]  ;;  %7074 = vmatpush.bf16.msra.mxu2 %v10823_v29  ;;  %vm5742_vm6 = vweird.f32 %v14582_v44  ;;  %v5705_v30 = vand.u32 2147483647, %v14492_v32  ;;  %vm5781_vm12 = vweird.f32 %v14497_v41 }
0x1358   : > { %v5064_v23 = vpack.c.bf16 %v5059_v48, %v14538_v40  ;;  %7131 = vmatpush.bf16.msrb.mxu0 %v10840_v61  ;;  %v5699_v40 = vmul.f32 %v14540_v9, %v5698_v34  ;;  %v14606_v61 = vadd.f32 1.1283791, %v5763_v37  ;;  %7103 = vmatpush.bf16.msra.mxu3 %v10831_v7  ;;  %v10822_v37 = vld [vmem:[#allocation22] sm:$0xff]  ;;  %vm14664_vm13 = vmor %vm5741_vm11, %vm5742_vm6  ;;  %vm5586_vm14 = vcmp.eq.f32.partialorder %v5585_v46, 8.507059e+37 }
0x1359   : > { %v14575_v15 = vadd.f32 %v11734_v51, %v4861_v63  ;;  %v5778_v63 = vsub.f32 1.0, %v5777_v42  ;;  %v5578_v51 = vsub.f32 1.0, %v5577_v19  ;;  %v5738_v42 = vsub.f32 1.0, %v5737_v38  ;;  %v10830_v38 = vld [vmem:[#allocation22 + $0x40] sm:$0xff]  ;;  %vm14670_vm1 = vmor %vm5781_vm12, %vm5782_vm3 }
0x135a   : > { %v5722_v19 = vadd.f32 0.18741608, %v5721_v2  ;;  %5351 = vmatmul.bf16.gmra.mxu2 %v5064_v23  ;;  %5380 = vmatmul.bf16.gmra.mxu3 %v5064_v23  ;;  %v11735_v2 = vld [vmem:[%s12678_s15 + $0x28] sm:$0xff]  ;;  %vm14688_vm3 = vmor %vm5581_vm15, %vm5582_vm2  ;;  %vm5706_vm15 = vcmp.eq.f32.partialorder %v5705_v30, 8.507059e+37  ;;  %v5454_v30 = vmul.f32 0.5, %v14398_v0  ;;  %v5451_v32 = vmul.f32 0.5, %v14317_v14 }
0x135b   : > { %18246 = vst [vmem:[#allocation55_spill] sm:$0xff] %v14575_v15  ;;  %7202 = vadd.xlane.f32.xlu0 %v14575_v15  ;;  %v10839_v15 = vld [vmem:[#allocation22 + $0x88] sm:$0xff]  ;;  %v5779_v59 = vmul.f32 %v14546_v25, %v5778_v63  ;;  %v5739_v20 = vmul.f32 %v14582_v44, %v5738_v42  ;;  %5409 = vmatmul.bf16.gmra.mxu0 %v5064_v23  ;;  %v5787_v63 = vand.u32 2147483648, %v14497_v41 }
0x135c   : > { %5438 = vmatmul.bf16.gmra.mxu1 %v5064_v23  ;;  %v5579_v34 = vmul.f32 %v14556_v62, %v5578_v51  ;;  %v5683_v23 = vmul.f32 %v5682_v13, %v14402_v43  ;;  %7132 = vmatpush.bf16.msrb.mxu0 %v10839_v15  ;;  %v5700_v42 = vadd.f32 %v14540_v9, %v5699_v40  ;;  %v18249_v43 = vand.u32 2147483647, %v14487_v28 }
0x135d   : > { %v5723_v29 = vmul.f32 %v5722_v19, %v14433_v18  ;;  %v5740_v7 = vadd.f32 %v14582_v44, %v5739_v20  ;;  %v5780_v18 = vadd.f32 %v14546_v25, %v5779_v59  ;;  %7075 = vmatpush.bf16.msra.mxu2 %v10822_v37  ;;  %7104 = vmatpush.bf16.msra.mxu3 %v10830_v38  ;;  %v5588_v20 = vor.u32 1.1754944e-38, %v5587_v55 }
0x135e   : > { %v4862_v26 = vpop.f32.mrf.mxu1  ;;  %vm14633_vm7 = vcmp.eq.f32.partialorder %v18249_v43, 8.507059e+37  ;;  %v5580_v40 = vadd.f32 %v14556_v62, %v5579_v34  ;;  %v5620_v59 = vadd.f32 %v14531_v33, %v5619_v54  ;;  %v5785_v34 = vand.u32 2147483647, %v14497_v41 }
0x135f   : > { %v4863_v31 = vadd.f32 %v14477_v39, %v4862_v26  ;;  %v5747_v26 = vand.u32 2147483648, %v14535_v11  ;;  %v5704_v55 = vsel %vm14652_vm10, %v14540_v9, %v5700_v42  ;;  %v5724_v54 = vadd.f32 1.1283791, %v5723_v29 }
0x1360   : > { %7133 = vmatpush.bf16.msrb.mxu0 %v10838_v52  ;;  %v5744_v41 = vsel %vm14664_vm13, %v14582_v44, %v5740_v7  ;;  %v5544_v37 = vsel %vm14641_vm8, %v14524_v60, %v14611_v35  ;;  %v5784_v9 = vsel %vm14670_vm1, %v14546_v25, %v5780_v18  ;;  %v5584_v44 = vsel %vm14688_vm3, %v14556_v62, %v5580_v40 }
0x1361   : > { %v14616_v48 = vadd.f32 %v11735_v2, %v4863_v31  ;;  %v5745_v31 = vand.u32 2147483647, %v14535_v11  ;;  %v5684_v11 = vadd.f32 1.1283791, %v5683_v23  ;;  %v5708_v23 = vor.u32 1.1754944e-38, %v5707_v45 }
0x1362   : > { %v5748_v52 = vor.u32 1.1754944e-38, %v5747_v26  ;;  %v5788_v35 = vor.u32 1.1754944e-38, %v5787_v63  ;;  %v5624_v25 = vsel %vm14699_vm4, %v14531_v33, %v5620_v59  ;;  %vm5786_vm6 = vcmp.eq.f32.partialorder %v5785_v34, 8.507059e+37 }
0x1363   : > { %7204 = vadd.xlane.f32.xlu1 %v14616_v48  ;;  %vm5746_vm2 = vcmp.eq.f32.partialorder %v5745_v31, 8.507059e+37  ;;  %v5709_v42 = vsel %vm5706_vm15, %v5708_v23, %v5704_v55  ;;  %v5685_v7 = vmul.f32 %v5684_v11, %v14380_v49  ;;  %v5725_v43 = vmul.f32 %v5724_v54, %v14420_v53 }
0x1364   : > { %v5749_v29 = vsel %vm5746_vm2, %v5748_v52, %v5744_v41  ;;  %v5789_v28 = vsel %vm5786_vm6, %v5788_v35, %v5784_v9  ;;  %v5525_v62 = vmul.f32 %v14577_v22, %v14326_v47  ;;  %v5549_v63 = vsel %vm14622_vm5, %v14597_v1, %v5544_v37  ;;  %v11736_v52 = vld [vmem:[%s12678_s15 + $0x30] sm:$0xff] }
0x1365   : > { %v5589_v15 = vsel %vm5586_vm14, %v5588_v20, %v5584_v44  ;;  %v5765_v33 = vmul.f32 %v14606_v61, %v14337_v56  ;;  %v5629_v17 = vsel %vm14633_vm7, %v14566_v8, %v5624_v25  ;;  %v5565_v49 = vmul.f32 %v14588_v57, %v14342_v24 }
0x1366   : > { %v5710_v46 = vmul.f32 %v5709_v42, %v5685_v7  ;;  %v5750_v53 = vmul.f32 %v5749_v29, %v5725_v43  ;;  %v5605_v47 = vmul.f32 %v14548_v3, %v14332_v27  ;;  %v5550_v18 = vmul.f32 %v5549_v63, %v5525_v62 }
0x1367   : > { %v5790_v22 = vmul.f32 %v5789_v28, %v5765_v33  ;;  %v5590_v51 = vmul.f32 %v5589_v15, %v5565_v49  ;;  %v5453_v19 = vmul.f32 0.5, %v14375_v4  ;;  %v5455_v59 = vmul.f32 0.5, %v14321_v10  ;;  %v18265_v15 = vld [vmem:[#allocation42_spill] sm:$0xff] }
0x1368   : > { %v5630_v56 = vmul.f32 %v5629_v17, %v5605_v47  ;;  %v10276_v8 = vclamps-f32 %v5710_v46, 1.0  ;;  %v10277_v1 = vclamps-f32 %v5750_v53, 1.0  ;;  %v10272_v57 = vclamps-f32 %v5550_v18, 1.0 }
0x1369   : > { %v10278_v24 = vclamps-f32 %v5790_v22, 1.0  ;;  %v10273_v61 = vclamps-f32 %v5590_v51, 1.0  ;;  %v5450_v20 = vmul.f32 0.5, %v14329_v16 }
0x136a   : > { %5356 = vmatmul.bf16.gmra.mxu2 %v14522_v21  ;;  %5385 = vmatmul.bf16.gmra.mxu3 %v14522_v21  ;;  %v10274_v13 = vclamps-f32 %v5630_v56, 1.0  ;;  %v6797_v45 = vadd.f32 1.0, %v10276_v8  ;;  %v6798_v27 = vadd.f32 1.0, %v10277_v1  ;;  %v6793_v26 = vadd.f32 1.0, %v10272_v57  ;;  %v11737_v56 = vld [vmem:[%s12678_s15 + $0x38] sm:$0xff] }
0x136b   : > { %5414 = vmatmul.bf16.gmra.mxu0 %v14522_v21  ;;  %v6799_v3 = vadd.f32 1.0, %v10278_v24  ;;  %v6794_v40 = vadd.f32 1.0, %v10273_v61 }
0x136c   : > { %5443 = vmatmul.bf16.gmra.mxu1 %v14522_v21  ;;  %v6795_v31 = vadd.f32 1.0, %v10274_v13  ;;  %v5449_v21 = vmul.f32 0.5, %v14311_v58  ;;  %v6829_v34 = vmul.f32 %v6797_v45, %v5453_v19  ;;  %v6830_v2 = vmul.f32 %v6798_v27, %v5454_v30 }
0x136d   : > { %v6831_v11 = vmul.f32 %v6799_v3, %v5455_v59  ;;  %v6826_v54 = vmul.f32 %v6794_v40, %v5450_v20 }
0x136e   : > { %v6825_v55 = vmul.f32 %v6793_v26, %v5449_v21  ;;  %v6827_v41 = vmul.f32 %v6795_v31, %v5451_v32 }
0x136f   : > { %v6858_v4 = vpack.c.bf16 %v6830_v2, %v6826_v54 }
0x1370   : > { %v6857_v37 = vpack.c.bf16 %v6829_v34, %v6825_v55  ;;  %v6859_v38 = vpack.c.bf16 %v6831_v11, %v6827_v41 }
0x137a   : > { %7076 = vmatmul.bf16.vlgmr.msra.gmra.mxu2 %v6857_v37  ;;  %7105 = vmatmul.bf16.vlgmr.msra.gmra.mxu3 %v6858_v4 }
0x137b   : > { %7134 = vmatmul.bf16.vlgmr.msrb.gmra.mxu0 %v6859_v38 }
0x1381   : > { %v7195_v10 = vpop.xlane.xlu1 %7194 }
0x1382   : > { %v7210_v58 = vmul.f32 %v7195_v10, %v18234_v5 }
0x1384   : > { %v14739_v16 = vsub.f32 %v14290_v12, %v7210_v58 }
0x1385   : > { %v4865_v0 = vpop.f32.mrf.mxu1 }
0x1386   : > { %v4866_v14 = vadd.f32 %v14477_v39, %v4865_v0  ;;  %v7226_v23 = vmul.f32 %v14739_v16, %v14739_v16 }
0x1387   : > { %v5405_v9 = vpop.f32.mrf.mxu0 }
0x1388   : > { %v14745_v60 = vadd.f32 %v11736_v52, %v4866_v14  ;;  %v14748_v44 = vadd.f32 %v5405_v9, %v14302_v50  ;;  %7234 = vadd.xlane.f32.xlu2 %v7226_v23 }
0x1389   : > { %v7197_v25 = vpop.xlane.xlu2 %7196 }
0x138a   : > { %18264 = vst [vmem:[#allocation56_spill] sm:$0xff] %v14745_v60  ;;  %v14751_v35 = vmul.f32 0.70710677, %v14748_v44  ;;  %7206 = vadd.xlane.f32.xlu1 %v14745_v60  ;;  %v7211_v42 = vmul.f32 %v7197_v25, %v18234_v5 }
0x138c   : > { %v5913_v29 = vmul.f32 %v14751_v35, %v14751_v35  ;;  %v14758_v28 = vsub.f32 %v14306_v36, %v7211_v42  ;;  %v5347_v7 = vpop.f32.mrf.mxu2  ;;  %v5376_v43 = vpop.f32.mrf.mxu3 }
0x138d   : > { %v14763_v63 = vadd.f32 %v5347_v7, %v14298_v6  ;;  %v14766_v33 = vadd.f32 %v5376_v43, %v18265_v15  ;;  %v4867_v17 = vpop.f32.mrf.mxu1 }
0x138e   : > { %v14760_v62 = vmin.f32 %v5913_v29, 16.0  ;;  %v4868_v49 = vadd.f32 %v14477_v39, %v4867_v17  ;;  %v7227_v53 = vmul.f32 %v14758_v28, %v14758_v28 }
0x138f   : > { %v5407_v46 = vpop.f32.mrf.mxu0  ;;  %v14774_v18 = vmul.f32 0.70710677, %v14763_v63  ;;  %v14777_v51 = vmul.f32 0.70710677, %v14766_v33 }
0x1390   : > { %v5915_v47 = vmul.f32 2.1237322e-06, %v14760_v62  ;;  %v5926_v22 = vmul.f32 3.8918573e-05, %v14760_v62  ;;  %v14780_v8 = vadd.f32 %v11737_v56, %v4868_v49  ;;  %v14783_v1 = vadd.f32 %v5407_v46, %v14302_v50  ;;  %7236 = vadd.xlane.f32.xlu0 %v7227_v53 }
0x1391   : > { %v5833_v57 = vmul.f32 %v14774_v18, %v14774_v18  ;;  %v5873_v61 = vmul.f32 %v14777_v51, %v14777_v51 }
0x1392   : > { %18266 = vst [vmem:[#allocation42_spill] sm:$0xff] %v14780_v8  ;;  %v5916_v39 = vadd.f32 0.00028619796, %v5915_v47  ;;  %v5927_v24 = vadd.f32 0.001143296, %v5926_v22  ;;  %7208 = vadd.xlane.f32.xlu2 %v14780_v8 }
0x1393   : > { %v14790_v13 = vmul.f32 0.70710677, %v14783_v1  ;;  %v14795_v3 = vmin.f32 %v5833_v57, 16.0  ;;  %v14797_v26 = vmin.f32 %v5873_v61, 16.0 }
0x1394   : > { %v5917_v45 = vmul.f32 %v5916_v39, %v14760_v62  ;;  %v5928_v27 = vmul.f32 %v5927_v24, %v14760_v62 }
0x1395   : > { %v6073_v40 = vmul.f32 %v14790_v13, %v14790_v13  ;;  %v5835_v31 = vmul.f32 2.1237322e-06, %v14795_v3  ;;  %v5846_v59 = vmul.f32 3.8918573e-05, %v14795_v3  ;;  %v5875_v21 = vmul.f32 2.1237322e-06, %v14797_v26 }
0x1396   : > { %v5918_v19 = vadd.f32 0.0036580483, %v5917_v45  ;;  %v5929_v30 = vadd.f32 0.014752088, %v5928_v27  ;;  %v5886_v34 = vmul.f32 3.8918573e-05, %v14797_v26  ;;  %v5349_v45 = vpop.f32.mrf.mxu2 }
0x1397   : > { %v14806_v2 = vmin.f32 %v6073_v40, 16.0  ;;  %v5836_v32 = vadd.f32 0.00028619796, %v5835_v31  ;;  %v5847_v11 = vadd.f32 0.001143296, %v5846_v59 }
0x1398   : > { %v5930_v20 = vmul.f32 %v5929_v30, %v14760_v62  ;;  %v5876_v55 = vadd.f32 0.00028619796, %v5875_v21  ;;  %v5919_v54 = vmul.f32 %v5918_v19, %v14760_v62  ;;  %v5887_v37 = vadd.f32 0.001143296, %v5886_v34 }
0x1399   : > { %v5837_v4 = vmul.f32 %v5836_v32, %v14795_v3  ;;  %v5848_v38 = vmul.f32 %v5847_v11, %v14795_v3  ;;  %v6086_v14 = vmul.f32 3.8918573e-05, %v14806_v2  ;;  %v6075_v7 = vmul.f32 2.1237322e-06, %v14806_v2  ;;  %v5378_v11 = vpop.f32.mrf.mxu3 }
0x139a   : > { %v5931_v41 = vadd.f32 0.112945676, %v5930_v20  ;;  %v5877_v58 = vmul.f32 %v5876_v55, %v14797_v26  ;;  %v5888_v0 = vmul.f32 %v5887_v37, %v14797_v26  ;;  %v5920_v52 = vadd.f32 0.05243302, %v5919_v54 }
0x139b   : > { %v5838_v9 = vadd.f32 0.0036580483, %v5837_v4  ;;  %v5849_v23 = vadd.f32 0.014752088, %v5848_v38  ;;  %v6087_v46 = vadd.f32 0.001143296, %v6086_v14  ;;  %v14829_v21 = vadd.f32 %v5349_v45, %v14298_v6 }
0x139c   : > { %v5932_v10 = vmul.f32 %v5931_v41, %v14760_v62  ;;  %v5889_v42 = vadd.f32 0.014752088, %v5888_v0  ;;  %v5878_v17 = vadd.f32 0.0036580483, %v5877_v58  ;;  %v5921_v22 = vmul.f32 %v5920_v52, %v14760_v62 }
0x139d   : > { %v5850_v29 = vmul.f32 %v5849_v23, %v14795_v3  ;;  %v5839_v53 = vmul.f32 %v5838_v9, %v14795_v3  ;;  %v6088_v24 = vmul.f32 %v6087_v46, %v14806_v2  ;;  %v6076_v61 = vadd.f32 0.00028619796, %v6075_v7 }
0x139e   : > { %v5933_v25 = vadd.f32 0.4994258, %v5932_v10  ;;  %v5890_v49 = vmul.f32 %v5889_v42, %v14797_v26  ;;  %v5879_v27 = vmul.f32 %v5878_v17, %v14797_v26  ;;  %v5922_v31 = vadd.f32 0.18741608, %v5921_v22 }
0x139f   : > { %v5851_v47 = vadd.f32 0.112945676, %v5850_v29  ;;  %v5840_v40 = vadd.f32 0.05243302, %v5839_v53  ;;  %v6089_v59 = vadd.f32 0.014752088, %v6088_v24  ;;  %v6077_v32 = vmul.f32 %v6076_v61, %v14806_v2 }
0x13a0   : > { %v5934_v43 = vmul.f32 %v5933_v25, %v14760_v62  ;;  %v5891_v39 = vadd.f32 0.112945676, %v5890_v49  ;;  %v5880_v55 = vadd.f32 0.05243302, %v5879_v27  ;;  %v5923_v10 = vmul.f32 %v5922_v31, %v14760_v62 }
0x13a1   : > { %v5852_v57 = vmul.f32 %v5851_v47, %v14795_v3  ;;  %v6090_v54 = vmul.f32 %v6089_v59, %v14806_v2  ;;  %v5841_v41 = vmul.f32 %v5840_v40, %v14795_v3  ;;  %v14842_v0 = vmul.f32 0.70710677, %v14829_v21 }
0x13a2   : > { %v14821_v56 = vadd.f32 1.0, %v5934_v43  ;;  %v5892_v30 = vmul.f32 %v5891_v39, %v14797_v26  ;;  %v5379_v14 = vadd.f32 %v5378_v11, %v18265_v15  ;;  %v6078_v23 = vadd.f32 0.0036580483, %v6077_v32 }
0x13a3   : > { %v5853_v19 = vadd.f32 0.4994258, %v5852_v57  ;;  %v6091_v58 = vadd.f32 0.112945676, %v6090_v54  ;;  %v5881_v52 = vmul.f32 %v5880_v55, %v14797_v26  ;;  %v5842_v25 = vadd.f32 0.18741608, %v5841_v41  ;;  %v5429_v55 = vpop.f32.mrf.mxu1 }
0x13a4   : > { %11580 = vrcp.f32 %v14821_v56  ;;  %v5893_v34 = vadd.f32 0.4994258, %v5892_v30  ;;  %v5924_v62 = vadd.f32 1.1283791, %v5923_v10  ;;  %v5993_v43 = vmul.f32 %v14842_v0, %v14842_v0 }
0x13a5   : > { %v5854_v20 = vmul.f32 %v5853_v19, %v14795_v3  ;;  %v6092_v29 = vmul.f32 %v6091_v58, %v14806_v2  ;;  %v14854_v17 = vmul.f32 0.70710677, %v5379_v14  ;;  %v14857_v49 = vmul.f32 0.5, %v14748_v44 }
0x13a6   : > { %v5894_v4 = vmul.f32 %v5893_v34, %v14797_v26  ;;  %v6079_v46 = vmul.f32 %v6078_v23, %v14806_v2  ;;  %v14862_v53 = vmul.f32 0.5, %v14763_v63  ;;  %v5882_v47 = vadd.f32 0.18741608, %v5881_v52 }
0x13a7   : > { %v14835_v37 = vadd.f32 1.0, %v5854_v20  ;;  %v6093_v22 = vadd.f32 0.4994258, %v6092_v29  ;;  %v14864_v39 = vmin.f32 %v5993_v43, 16.0  ;;  %v5843_v57 = vmul.f32 %v5842_v25, %v14795_v3 }
0x13a8   : > { %v14849_v42 = vadd.f32 1.0, %v5894_v4  ;;  %v14870_v61 = vmul.f32 0.5, %v14766_v33  ;;  %v14873_v44 = vmul.f32 0.5, %v14783_v1  ;;  %v6033_v45 = vmul.f32 %v14854_v17, %v14854_v17 }
0x13a9   : > { %11582 = vrcp.f32 %v14835_v37  ;;  %v14878_v63 = vmul.f32 %v5924_v62, %v14751_v35  ;;  %v5945_v40 = vand.u32 2147483647, %v14821_v56  ;;  %v5947_v19 = vand.u32 2147483648, %v14821_v56 }
0x13aa   : > { %v14838_v38 = vpop.eup %11580  ;;  %11584 = vrcp.f32 %v14849_v42  ;;  %v6080_v30 = vadd.f32 0.05243302, %v6079_v46  ;;  %v6094_v3 = vmul.f32 %v6093_v22, %v14806_v2  ;;  %v5995_v33 = vmul.f32 2.1237322e-06, %v14864_v39 }
0x13ab   : > { %v5937_v9 = vmul.f32 %v14838_v38, %v14821_v56  ;;  %v6006_v1 = vmul.f32 3.8918573e-05, %v14864_v39  ;;  %vm5941_vm0 = vweird.f32 %v14821_v56  ;;  %v5883_v35 = vmul.f32 %v5882_v47, %v14797_v26 }
0x13ac   : > { %v14890_v59 = vmin.f32 %v6033_v45, 16.0  ;;  %vm5942_vm5 = vweird.f32 %v14838_v38  ;;  %v5844_v34 = vadd.f32 1.1283791, %v5843_v57  ;;  %v14895_v32 = vadd.f32 1.0, %v6094_v3 }
0x13ad   : > { %v5938_v7 = vsub.f32 1.0, %v5937_v9  ;;  %v6007_v11 = vadd.f32 0.001143296, %v6006_v1  ;;  %v5996_v4 = vadd.f32 0.00028619796, %v5995_v33  ;;  %vm14901_vm7 = vcmp.eq.f32.partialorder %v5945_v40, 8.507059e+37  ;;  %vm14916_vm8 = vmor %vm5941_vm0, %vm5942_vm5 }
0x13ae   : > { %v6035_v10 = vmul.f32 2.1237322e-06, %v14890_v59  ;;  %v5948_v58 = vor.u32 1.1754944e-38, %v5947_v19  ;;  %v6081_v9 = vmul.f32 %v6080_v30, %v14806_v2  ;;  %11586 = vrcp.f32 %v14895_v32 }
0x13af   : > { %v14866_v24 = vpop.eup %11582  ;;  %v5939_v27 = vmul.f32 %v14838_v38, %v5938_v7  ;;  %v5884_v52 = vadd.f32 1.1283791, %v5883_v35  ;;  %v14908_v25 = vmul.f32 0.5, %v14829_v21  ;;  %v14910_v29 = vmul.f32 0.5, %v5379_v14 }
0x13b0   : > { %v5857_v31 = vmul.f32 %v14866_v24, %v14835_v37  ;;  %v14892_v20 = vpop.eup %11584  ;;  %v14921_v7 = vmul.f32 %v5844_v34, %v14774_v18  ;;  %v5865_v43 = vand.u32 2147483647, %v14835_v37  ;;  %v6008_v47 = vmul.f32 %v6007_v11, %v14864_v39  ;;  %v11738_v18 = vld [vmem:[%s18237_s22] sm:$0xf]  ;;  %v10853_v34 = vld [vmem:[#allocation22 + $0xf8] sm:$0xff] }
0x13b1   : > { %v5940_v54 = vadd.f32 %v14838_v38, %v5939_v27  ;;  %v5897_v41 = vmul.f32 %v14892_v20, %v14849_v42  ;;  %v5867_v14 = vand.u32 2147483648, %v14835_v37  ;;  %v5997_v56 = vmul.f32 %v5996_v4, %v14864_v39  ;;  %7155 = vmatpush.bf16.msra.mxu1 %v10853_v34 }
0x13b2   : > { %v5858_v23 = vsub.f32 1.0, %v5857_v31  ;;  %v6036_v22 = vadd.f32 0.00028619796, %v6035_v10  ;;  %vm5861_vm9 = vweird.f32 %v14835_v37  ;;  %v6082_v57 = vadd.f32 0.18741608, %v6081_v9 }
0x13b3   : > { %v5898_v46 = vsub.f32 1.0, %v5897_v41  ;;  %v5944_v21 = vsel %vm14916_vm8, %v14838_v38, %v5940_v54  ;;  %v6009_v45 = vadd.f32 0.014752088, %v6008_v47  ;;  %v14934_v27 = vperm.slane %v11738_v18, 3 }
0x13b4   : > { %v5859_v40 = vmul.f32 %v14866_v24, %v5858_v23  ;;  %v14938_v19 = vmul.f32 %v5884_v52, %v14777_v51  ;;  %v5905_v38 = vand.u32 2147483647, %v14849_v42  ;;  %v6046_v30 = vmul.f32 3.8918573e-05, %v14890_v59  ;;  %v14942_v3 = vpop.eup %11586  ;;  %v10851_v52 = vld [vmem:[#allocation22 + $0xe8] sm:$0xff] }
0x13b5   : > { %v5949_v33 = vsel %vm14901_vm7, %v5948_v58, %v5944_v21  ;;  %v5899_v1 = vmul.f32 %v14892_v20, %v5898_v46  ;;  %v5907_v31 = vand.u32 2147483648, %v14849_v42  ;;  %v6010_v35 = vmul.f32 %v6009_v45, %v14864_v39  ;;  %v5431_v58 = vpop.f32.mrf.mxu1 }
0x13b6   : > { %vm14949_vm10 = vcmp.eq.f32.partialorder %v5865_v43, 8.507059e+37  ;;  %v5868_v51 = vor.u32 1.1754944e-38, %v5867_v14  ;;  %v6097_v11 = vmul.f32 %v14942_v3, %v14895_v32  ;;  %v5998_v54 = vadd.f32 0.0036580483, %v5997_v56 }
0x13b7   : > { %v6037_v41 = vmul.f32 %v6036_v22, %v14890_v59  ;;  %vm5862_vm11 = vweird.f32 %v14866_v24  ;;  %v6083_v4 = vmul.f32 %v6082_v57, %v14806_v2  ;;  %v6011_v10 = vadd.f32 0.112945676, %v6010_v35 }
0x13b8   : > { %v14959_v26 = vadd.f32 %v5429_v55, %v14934_v27  ;;  %v5950_v9 = vmul.f32 %v5949_v33, %v14878_v63  ;;  %v5860_v23 = vadd.f32 %v14866_v24, %v5859_v40  ;;  %vm14963_vm12 = vcmp.eq.f32.partialorder %v5905_v38, 8.507059e+37  ;;  %vm14979_vm1 = vmor %vm5861_vm9, %vm5862_vm11 }
0x13b9   : > { %v6098_v62 = vsub.f32 1.0, %v6097_v11  ;;  %v6047_v43 = vadd.f32 0.001143296, %v6046_v30  ;;  %v5900_v46 = vadd.f32 %v14892_v20, %v5899_v1  ;;  %vm5902_vm13 = vweird.f32 %v14892_v20 }
0x13ba   : > { %v5908_v2 = vor.u32 1.1754944e-38, %v5907_v31  ;;  %v6012_v47 = vmul.f32 %v6011_v10, %v14864_v39  ;;  %v5999_v55 = vmul.f32 %v5998_v54, %v14864_v39  ;;  %v6038_v21 = vadd.f32 0.0036580483, %v6037_v41 }
0x13bb   : > { %v6048_v63 = vmul.f32 %v6047_v43, %v14890_v59  ;;  %v14973_v14 = vadd.f32 %v5431_v58, %v14934_v27  ;;  %vm5901_vm3 = vweird.f32 %v14849_v42  ;;  %v14984_v22 = vadd.f32 1.1283791, %v6083_v4 }
0x13bc   : > { %v6013_v57 = vadd.f32 0.4994258, %v6012_v47  ;;  %v14987_v45 = vmul.f32 0.70710677, %v14959_v26  ;;  %v10282_v18 = vclamps-f32 %v5950_v9, 1.0  ;;  %v5864_v40 = vsel %vm14979_vm1, %v14866_v24, %v5860_v23  ;;  %vm14992_vm4 = vmor %vm5901_vm3, %vm5902_vm13 }
0x13bd   : > { %v6099_v37 = vmul.f32 %v14942_v3, %v6098_v62  ;;  %v6049_v30 = vadd.f32 0.014752088, %v6048_v63  ;;  %v5904_v42 = vsel %vm14992_vm4, %v14892_v20, %v5900_v46  ;;  %v6105_v33 = vand.u32 2147483647, %v14895_v32 }
0x13be   : > { %v6014_v1 = vmul.f32 %v6013_v57, %v14864_v39  ;;  %v5633_v31 = vmul.f32 %v14987_v45, %v14987_v45  ;;  %v6000_v35 = vadd.f32 0.05243302, %v5999_v55  ;;  %v6039_v24 = vmul.f32 %v6038_v21, %v14890_v59  ;;  %v5434_v21 = vpop.f32.mrf.mxu1 }
0x13bf   : > { %v6050_v11 = vmul.f32 %v6049_v30, %v14890_v59  ;;  %v15007_v54 = vmul.f32 0.70710677, %v14973_v14  ;;  %v5869_v41 = vsel %vm14949_vm10, %v5868_v51, %v5864_v40  ;;  %vm6102_vm15 = vweird.f32 %v14942_v3 }
0x13c0   : > { %v6107_v20 = vand.u32 2147483648, %v14895_v32  ;;  %v15013_v4 = vadd.f32 1.0, %v6014_v1  ;;  %v6100_v10 = vadd.f32 %v14942_v3, %v6099_v37  ;;  %v15016_v9 = vmin.f32 %v5633_v31, 16.0 }
0x13c1   : > { %v6051_v58 = vadd.f32 0.112945676, %v6050_v11  ;;  %v5793_v23 = vmul.f32 %v15007_v54, %v15007_v54  ;;  %v6803_v62 = vadd.f32 1.0, %v10282_v18  ;;  %v5909_v43 = vsel %vm14963_vm12, %v5908_v2, %v5904_v42 }
0x13c2   : > { %vm6101_vm2 = vweird.f32 %v14895_v32  ;;  %11588 = vrcp.f32 %v15013_v4  ;;  %vm15024_vm6 = vcmp.eq.f32.partialorder %v6105_v33, 8.507059e+37  ;;  %v6001_v46 = vmul.f32 %v6000_v35, %v14864_v39  ;;  %v10852_v35 = vld [vmem:[#allocation22 + $0xf0] sm:$0xff] }
0x13c3   : > { %v6040_v47 = vadd.f32 0.05243302, %v6039_v24  ;;  %v6052_v55 = vmul.f32 %v6051_v58, %v14890_v59  ;;  %v5870_v63 = vmul.f32 %v5869_v41, %v14921_v7  ;;  %vm15033_vm14 = vmor %vm6101_vm2, %vm6102_vm15  ;;  %v5635_v32 = vmul.f32 2.1237322e-06, %v15016_v9  ;;  %7156 = vmatpush.bf16.msra.mxu1 %v10852_v35 }
0x13c4   : > { %v5646_v2 = vmul.f32 3.8918573e-05, %v15016_v9  ;;  %v15039_v56 = vmin.f32 %v5793_v23, 16.0  ;;  %v5910_v57 = vmul.f32 %v5909_v43, %v14938_v19  ;;  %v6104_v18 = vsel %vm15033_vm14, %v14942_v3, %v6100_v10 }
0x13c5   : > { %v6108_v7 = vor.u32 1.1754944e-38, %v6107_v20  ;;  %v6053_v40 = vadd.f32 0.4994258, %v6052_v55  ;;  %v5636_v38 = vadd.f32 0.00028619796, %v5635_v32  ;;  %v15047_v42 = vadd.f32 %v5434_v21, %v14934_v27 }
0x13c6   : > { %v5647_v37 = vadd.f32 0.001143296, %v5646_v2  ;;  %v5795_v30 = vmul.f32 2.1237322e-06, %v15039_v56  ;;  %v6002_v33 = vadd.f32 0.18741608, %v6001_v46  ;;  %v6041_v1 = vmul.f32 %v6040_v47, %v14890_v59 }
0x13c7   : > { %v6054_v31 = vmul.f32 %v6053_v40, %v14890_v59  ;;  %v5806_v19 = vmul.f32 3.8918573e-05, %v15039_v56  ;;  %v10280_v3 = vclamps-f32 %v5870_v63, 1.0  ;;  %v6109_v11 = vsel %vm15024_vm6, %v6108_v7, %v6104_v18  ;;  %7157 = vmatpush.bf16.msra.mxu1 %v10851_v52 }
0x13c8   : > { %v15052_v24 = vpop.eup %11588  ;;  %v5637_v41 = vmul.f32 %v5636_v38, %v15016_v9  ;;  %v5648_v20 = vmul.f32 %v5647_v37, %v15016_v9  ;;  %v5796_v23 = vadd.f32 0.00028619796, %v5795_v30  ;;  %v10281_v34 = vclamps-f32 %v5910_v57, 1.0 }
0x13c9   : > { %v6017_v10 = vmul.f32 %v15052_v24, %v15013_v4  ;;  %v15060_v58 = vadd.f32 1.0, %v6054_v31  ;;  %v5807_v43 = vadd.f32 0.001143296, %v5806_v19  ;;  %v6085_v46 = vmul.f32 %v14984_v22, %v14790_v13 }
0x13ca   : > { %v5649_v47 = vadd.f32 0.014752088, %v5648_v20  ;;  %v15065_v51 = vmul.f32 0.70710677, %v15047_v42  ;;  %v6003_v55 = vmul.f32 %v6002_v33, %v14864_v39  ;;  %v6042_v63 = vadd.f32 0.18741608, %v6041_v1 }
0x13cb   : > { %v6018_v21 = vsub.f32 1.0, %v6017_v10  ;;  %11590 = vrcp.f32 %v15060_v58  ;;  %v15070_v32 = vmul.f32 %v6803_v62, %v14857_v49  ;;  %v6110_v2 = vmul.f32 %v6109_v11, %v6085_v46  ;;  %v10850_v62 = vld [vmem:[#allocation22 + $0xe0] sm:$0xff]  ;;  %v5436_v46 = vpop.f32.mrf.mxu1 }
0x13cc   : > { %v5638_v18 = vadd.f32 0.0036580483, %v5637_v41  ;;  %v5650_v57 = vmul.f32 %v5649_v47, %v15016_v9  ;;  %v6801_v7 = vadd.f32 1.0, %v10280_v3  ;;  %v5797_v13 = vmul.f32 %v5796_v23, %v15039_v56  ;;  %7158 = vmatpush.bf16.msra.mxu1 %v10850_v62  ;;  %v10849_v47 = vld [vmem:[#allocation22 + $0xd8] sm:$0xff] }
0x13cd   : > { %v5808_v22 = vmul.f32 %v5807_v43, %v15039_v56  ;;  %v5953_v39 = vmul.f32 %v15065_v51, %v15065_v51  ;;  %v6802_v40 = vadd.f32 1.0, %v10281_v34  ;;  %v6019_v38 = vmul.f32 %v15052_v24, %v6018_v21 }
0x13ce   : > { %v15079_v37 = vmul.f32 0.5, %v14959_v26  ;;  %v5651_v49 = vadd.f32 0.112945676, %v5650_v57  ;;  %v6004_v30 = vadd.f32 1.1283791, %v6003_v55  ;;  %v6043_v33 = vmul.f32 %v6042_v63, %v14890_v59 }
0x13cf   : > { %v5809_v1 = vadd.f32 0.014752088, %v5808_v22  ;;  %v15082_v31 = vmin.f32 %v5953_v39, 16.0  ;;  %v10286_v19 = vclamps-f32 %v6110_v2, 1.0  ;;  %v6025_v35 = vand.u32 2147483647, %v15013_v4 }
0x13d0   : > { %v5639_v3 = vmul.f32 %v5638_v18, %v15016_v9  ;;  %v5652_v11 = vmul.f32 %v5651_v49, %v15016_v9  ;;  %v5798_v20 = vadd.f32 0.0036580483, %v5797_v13  ;;  %v6020_v59 = vadd.f32 %v15052_v24, %v6019_v38  ;;  %7159 = vmatpush.bf16.msra.mxu1 %v10849_v47 }
0x13d1   : > { %v15087_v41 = vpop.eup %11590  ;;  %v5810_v26 = vmul.f32 %v5809_v1, %v15039_v56  ;;  %v5955_v10 = vmul.f32 2.1237322e-06, %v15082_v31  ;;  %v5966_v23 = vmul.f32 3.8918573e-05, %v15082_v31  ;;  %vm6022_vm0 = vweird.f32 %v15052_v24 }
0x13d2   : > { %v6027_v43 = vand.u32 2147483648, %v15013_v4  ;;  %v6057_v34 = vmul.f32 %v15087_v41, %v15060_v58  ;;  %v15098_v55 = vmul.f32 %v6801_v7, %v14862_v53  ;;  %v6044_v21 = vadd.f32 1.1283791, %v6043_v33 }
0x13d3   : > { %v5653_v63 = vadd.f32 0.4994258, %v5652_v11  ;;  %v5811_v52 = vadd.f32 0.112945676, %v5810_v26  ;;  %vm6021_vm5 = vweird.f32 %v15013_v4  ;;  %v5640_v2 = vadd.f32 0.05243302, %v5639_v3 }
0x13d4   : > { %v5956_v18 = vadd.f32 0.00028619796, %v5955_v10  ;;  %v5967_v57 = vadd.f32 0.001143296, %v5966_v23  ;;  %vm15101_vm7 = vmor %vm6021_vm5, %vm6022_vm0  ;;  %v5799_v39 = vmul.f32 %v5798_v20, %v15039_v56  ;;  %v5437_v53 = vadd.f32 %v5436_v46, %v14934_v27  ;;  %v7199_v46 = vpop.xlane.xlu1 %7198 }
0x13d5   : > { %v5654_v22 = vmul.f32 %v5653_v63, %v15016_v9  ;;  %v5812_v38 = vmul.f32 %v5811_v52, %v15039_v56  ;;  %v6807_v7 = vadd.f32 1.0, %v10286_v19  ;;  %v6024_v4 = vsel %vm15101_vm7, %v15052_v24, %v6020_v59 }
0x13d6   : > { %v6058_v49 = vsub.f32 1.0, %v6057_v34  ;;  %v5968_v62 = vmul.f32 %v5967_v57, %v15082_v31  ;;  %v6028_v33 = vor.u32 1.1754944e-38, %v6027_v43  ;;  %v5957_v11 = vmul.f32 %v5956_v18, %v15082_v31 }
0x13d7   : > { %v15113_v1 = vadd.f32 1.0, %v5654_v22  ;;  %v5813_v3 = vadd.f32 0.4994258, %v5812_v38  ;;  %vm6026_vm8 = vcmp.eq.f32.partialorder %v6025_v35, 8.507059e+37  ;;  %v5641_v20 = vmul.f32 %v5640_v2, %v15016_v9 }
0x13d8   : > { %v15118_v26 = vmul.f32 0.5, %v14973_v14  ;;  %v5969_v19 = vadd.f32 0.014752088, %v5968_v62  ;;  %v6029_v10 = vsel %vm6026_vm8, %v6028_v33, %v6024_v4  ;;  %v5800_v24 = vadd.f32 0.05243302, %v5799_v39 }
0x13d9   : > { %11592 = vrcp.f32 %v15113_v1  ;;  %v15121_v23 = vmul.f32 0.70710677, %v5437_v53  ;;  %v15124_v59 = vmul.f32 %v6802_v40, %v14870_v61  ;;  %v6005_v43 = vmul.f32 %v6004_v30, %v14842_v0 }
0x13da   : > { %v6059_v34 = vmul.f32 %v15087_v41, %v6058_v49  ;;  %v5814_v35 = vmul.f32 %v5813_v3, %v15039_v56  ;;  %v15130_v14 = vmul.f32 %v6807_v7, %v14873_v44  ;;  %v6045_v47 = vmul.f32 %v6044_v21, %v14854_v17 }
0x13db   : > { %v5958_v63 = vadd.f32 0.0036580483, %v5957_v11  ;;  %v5970_v52 = vmul.f32 %v5969_v19, %v15082_v31  ;;  %v6030_v2 = vmul.f32 %v6029_v10, %v6005_v43  ;;  %v6065_v18 = vand.u32 2147483647, %v15060_v58  ;;  %v5410_v43 = vpop.f32.mrf.mxu0 }
0x13dc   : > { %v5642_v61 = vadd.f32 0.18741608, %v5641_v20  ;;  %v15135_v40 = vadd.f32 1.0, %v5814_v35  ;;  %v5801_v0 = vmul.f32 %v5800_v24, %v15039_v56  ;;  %v6113_v57 = vmul.f32 %v15121_v23, %v15121_v23  ;;  %v18289_v20 = vld [vmem:[#allocation53_spill] sm:$0xff] }
0x13dd   : > { %v5971_v30 = vadd.f32 0.112945676, %v5970_v52  ;;  %v7212_v44 = vmul.f32 %v7199_v46, %v18234_v5  ;;  %v6060_v13 = vadd.f32 %v15087_v41, %v6059_v34  ;;  %vm6062_vm9 = vweird.f32 %v15087_v41  ;;  %v10848_v52 = vld [vmem:[#allocation22 + $0xd0] sm:$0xff] }
0x13de   : > { %11594 = vrcp.f32 %v15135_v40  ;;  %v15145_v17 = vmul.f32 0.5, %v15047_v42  ;;  %v6067_v22 = vand.u32 2147483648, %v15060_v58  ;;  %v5959_v39 = vmul.f32 %v5958_v63, %v15082_v31  ;;  %7160 = vmatpush.bf16.msra.mxu1 %v10848_v52 }
0x13df   : > { %v15147_v21 = vpop.eup %11592  ;;  %v5972_v38 = vmul.f32 %v5971_v30, %v15082_v31  ;;  %v15152_v7 = vmin.f32 %v6113_v57, 16.0  ;;  %v10284_v4 = vclamps-f32 %v6030_v2, 1.0  ;;  %vm6061_vm10 = vweird.f32 %v15060_v58 }
0x13e0   : > { %v5643_v49 = vmul.f32 %v5642_v61, %v15016_v9  ;;  %v5657_v62 = vmul.f32 %v15147_v21, %v15113_v1  ;;  %vm15158_vm11 = vmor %vm6061_vm10, %vm6062_vm9  ;;  %vm15162_vm12 = vcmp.eq.f32.partialorder %v6065_v18, 8.507059e+37  ;;  %v5802_v3 = vadd.f32 0.18741608, %v5801_v0 }
0x13e1   : > { %v5973_v11 = vadd.f32 0.4994258, %v5972_v38  ;;  %v15167_v19 = vsub.f32 %v18289_v20, %v7212_v44  ;;  %v6064_v9 = vsel %vm15158_vm11, %v15087_v41, %v6060_v13  ;;  %v6115_v10 = vmul.f32 2.1237322e-06, %v15152_v7  ;;  %v5439_v13 = vpop.f32.mrf.mxu1 }
0x13e2   : > { %v5658_v58 = vsub.f32 1.0, %v5657_v62  ;;  %v6126_v24 = vmul.f32 3.8918573e-05, %v15152_v7  ;;  %v6068_v34 = vor.u32 1.1754944e-38, %v6067_v22  ;;  %v5960_v35 = vadd.f32 0.05243302, %v5959_v39 }
0x13e3   : > { %v5974_v46 = vmul.f32 %v5973_v11, %v15082_v31  ;;  %v15175_v63 = vmul.f32 0.5, %v5437_v53  ;;  %v15179_v18 = vadd.f32 1.0, %v10284_v4  ;;  %v5644_v61 = vadd.f32 1.1283791, %v5643_v49 }
0x13e4   : > { %v15177_v2 = vpop.eup %11594  ;;  %v6127_v0 = vadd.f32 0.001143296, %v6126_v24  ;;  %v7228_v41 = vmul.f32 %v15167_v19, %v15167_v19  ;;  %v6069_v30 = vsel %vm15162_vm12, %v6068_v34, %v6064_v9  ;;  %v15190_v53 = vadd.f32 %v5410_v43, %v14302_v50 }
0x13e5   : > { %v5817_v57 = vmul.f32 %v15177_v2, %v15135_v40  ;;  %v15187_v44 = vadd.f32 1.0, %v5974_v46  ;;  %v5659_v22 = vmul.f32 %v15147_v21, %v5658_v58  ;;  %v5803_v39 = vmul.f32 %v5802_v3, %v15039_v56 }
0x13e6   : > { %v6116_v38 = vadd.f32 0.00028619796, %v6115_v10  ;;  %v6128_v4 = vmul.f32 %v6127_v0, %v15152_v7  ;;  %7238 = vadd.xlane.f32.xlu0 %v7228_v41  ;;  %v5667_v49 = vand.u32 2147483648, %v15113_v1  ;;  %v5961_v42 = vmul.f32 %v5960_v35, %v15082_v31 }
0x13e7   : > { %v5818_v62 = vsub.f32 1.0, %v5817_v57  ;;  %11596 = vrcp.f32 %v15187_v44  ;;  %v6070_v33 = vmul.f32 %v6069_v30, %v6045_v47  ;;  %v5645_v11 = vmul.f32 %v5644_v61, %v14987_v45 }
0x13e8   : > { %vm5661_vm13 = vweird.f32 %v15113_v1  ;;  %v15201_v9 = vadd.f32 %v5439_v13, %v14934_v27  ;;  %v5665_v56 = vand.u32 2147483647, %v15113_v1  ;;  %v6129_v58 = vadd.f32 0.014752088, %v6128_v4 }
0x13e9   : > { %v5819_v3 = vmul.f32 %v15177_v2, %v5818_v62  ;;  %v15206_v10 = vmul.f32 0.70710677, %v15190_v53  ;;  %v5660_v24 = vadd.f32 %v15147_v21, %v5659_v22  ;;  %vm5662_vm1 = vweird.f32 %v15147_v21 }
0x13ea   : > { %v5804_v47 = vadd.f32 1.1283791, %v5803_v39  ;;  %v6117_v45 = vmul.f32 %v6116_v38, %v15152_v7  ;;  %v5668_v43 = vor.u32 1.1754944e-38, %v5667_v49  ;;  %v5962_v34 = vadd.f32 0.18741608, %v5961_v42  ;;  %vm15224_vm3 = vmor %vm5661_vm13, %vm5662_vm1 }
0x13eb   : > { %v6130_v35 = vmul.f32 %v6129_v58, %v15152_v7  ;;  %v6233_v46 = vmul.f32 %v15206_v10, %v15206_v10  ;;  %v10285_v52 = vclamps-f32 %v6070_v33, 1.0  ;;  %v5827_v61 = vand.u32 2147483648, %v15135_v40 }
0x13ec   : > { %v15216_v0 = vmul.f32 0.70710677, %v15201_v9  ;;  %v6863_v41 = vpack.c.bf16 %v15130_v14, %v15070_v32  ;;  %v5820_v13 = vadd.f32 %v15177_v2, %v5819_v3  ;;  %vm5822_vm4 = vweird.f32 %v15177_v2 }
0x13ed   : > { %v15220_v30 = vpop.eup %11596  ;;  %v6131_v22 = vadd.f32 0.112945676, %v6130_v35  ;;  %v15230_v39 = vmin.f32 %v6233_v46, 16.0  ;;  %v5664_v38 = vsel %vm15224_vm3, %v15147_v21, %v5660_v24  ;;  %vm5821_vm15 = vweird.f32 %v15135_v40 }
0x13ee   : > { %v5825_v32 = vand.u32 2147483647, %v15135_v40  ;;  %v6118_v1 = vadd.f32 0.0036580483, %v6117_v45  ;;  %7139 = vmatmul.bf16.gmra.mxu0 %v6863_v41  ;;  %v5963_v14 = vmul.f32 %v5962_v34, %v15082_v31  ;;  %v5977_v4 = vmul.f32 %v15220_v30, %v15187_v44  ;;  %vm15242_vm6 = vmor %vm5821_vm15, %vm5822_vm4 }
0x13ef   : > { %v6132_v49 = vmul.f32 %v6131_v22, %v15152_v7  ;;  %v6235_v62 = vmul.f32 2.1237322e-06, %v15230_v39  ;;  %v6806_v42 = vadd.f32 1.0, %v10285_v52  ;;  %vm5666_vm2 = vcmp.eq.f32.partialorder %v5665_v56, 8.507059e+37 }
0x13f0   : > { %v6246_v21 = vmul.f32 3.8918573e-05, %v15230_v39  ;;  %v6273_v40 = vmul.f32 %v15216_v0, %v15216_v0  ;;  %v5669_v3 = vsel %vm5666_vm2, %v5668_v43, %v5664_v38  ;;  %v5824_v31 = vsel %vm15242_vm6, %v15177_v2, %v5820_v13 }
0x13f1   : > { %v5828_v58 = vor.u32 1.1754944e-38, %v5827_v61  ;;  %v6133_v24 = vadd.f32 0.4994258, %v6132_v49  ;;  %v6119_v45 = vmul.f32 %v6118_v1, %v15152_v7  ;;  %v6236_v34 = vadd.f32 0.00028619796, %v6235_v62  ;;  %v5352_v49 = vpop.f32.mrf.mxu2 }
0x13f2   : > { %v6247_v56 = vadd.f32 0.001143296, %v6246_v21  ;;  %v15253_v35 = vmin.f32 %v6273_v40, 16.0  ;;  %vm5826_vm14 = vcmp.eq.f32.partialorder %v5825_v32, 8.507059e+37  ;;  %v5964_v46 = vadd.f32 1.1283791, %v5963_v14 }
0x13f3   : > { %v5978_v52 = vsub.f32 1.0, %v5977_v4  ;;  %v6134_v41 = vmul.f32 %v6133_v24, %v15152_v7  ;;  %v5829_v57 = vsel %vm5826_vm14, %v5828_v58, %v5824_v31  ;;  %v6237_v43 = vmul.f32 %v6236_v34, %v15230_v39 }
0x13f4   : > { %v6248_v22 = vmul.f32 %v6247_v56, %v15230_v39  ;;  %v6275_v2 = vmul.f32 2.1237322e-06, %v15253_v35  ;;  %v5670_v61 = vmul.f32 %v5669_v3, %v5645_v11  ;;  %v5805_v13 = vmul.f32 %v5804_v47, %v15007_v54 }
0x13f5   : > { %v15260_v38 = vadd.f32 1.0, %v6134_v41  ;;  %v6286_v1 = vmul.f32 3.8918573e-05, %v15253_v35  ;;  %v15265_v32 = vmul.f32 %v15179_v18, %v14908_v25  ;;  %v6120_v14 = vadd.f32 0.05243302, %v6119_v45 }
0x13f6   : > { %v6238_v4 = vadd.f32 0.0036580483, %v6237_v43  ;;  %v6249_v62 = vadd.f32 0.014752088, %v6248_v22  ;;  %v15268_v33 = vmul.f32 %v6806_v42, %v14910_v29  ;;  %v5830_v21 = vmul.f32 %v5829_v57, %v5805_v13  ;;  %v5381_v42 = vpop.f32.mrf.mxu3 }
0x13f7   : > { %v5979_v11 = vmul.f32 %v15220_v30, %v5978_v52  ;;  %11598 = vrcp.f32 %v15260_v38  ;;  %v5965_v54 = vmul.f32 %v5964_v46, %v15065_v51  ;;  %v5985_v47 = vand.u32 2147483647, %v15187_v44  ;;  %v7201_v46 = vpop.xlane.xlu2 %7200 }
0x13f8   : > { %v6276_v40 = vadd.f32 0.00028619796, %v6275_v2  ;;  %v15275_v3 = vadd.f32 %v5352_v49, %v14298_v6  ;;  %v10275_v25 = vclamps-f32 %v5670_v61, 1.0  ;;  %v6239_v18 = vmul.f32 %v6238_v4, %v15230_v39 }
0x13f9   : > { %v6250_v31 = vmul.f32 %v6249_v62, %v15230_v39  ;;  %v6287_v29 = vadd.f32 0.001143296, %v6286_v1  ;;  %vm5981_vm0 = vweird.f32 %v15187_v44  ;;  %vm5982_vm5 = vweird.f32 %v15220_v30 }
0x13fa   : > { %v5987_v58 = vand.u32 2147483648, %v15187_v44  ;;  %v6121_v51 = vmul.f32 %v6120_v14, %v15152_v7  ;;  %v10279_v24 = vclamps-f32 %v5830_v21, 1.0  ;;  %v5980_v45 = vadd.f32 %v15220_v30, %v5979_v11  ;;  %vm15303_vm8 = vmor %vm5981_vm0, %vm5982_vm5 }
0x13fb   : > { %v6251_v34 = vadd.f32 0.112945676, %v6250_v31  ;;  %v6288_v56 = vmul.f32 %v6287_v29, %v15253_v35  ;;  %vm15285_vm7 = vcmp.eq.f32.partialorder %v5985_v47, 8.507059e+37  ;;  %v6277_v41 = vmul.f32 %v6276_v40, %v15253_v35 }
0x13fc   : > { %v15291_v57 = vmul.f32 0.70710677, %v15275_v3  ;;  %v15294_v43 = vadd.f32 %v5381_v42, %v18265_v15  ;;  %v6796_v2 = vadd.f32 1.0, %v10275_v25  ;;  %v6240_v61 = vadd.f32 0.05243302, %v6239_v18 }
0x13fd   : > { %v15296_v22 = vpop.eup %11598  ;;  %v6252_v13 = vmul.f32 %v6251_v34, %v15230_v39  ;;  %v6289_v1 = vadd.f32 0.014752088, %v6288_v56  ;;  %v5988_v14 = vor.u32 1.1754944e-38, %v5987_v58  ;;  %v6122_v4 = vadd.f32 0.18741608, %v6121_v51 }
0x13fe   : > { %v7213_v62 = vmul.f32 %v7201_v46, %v18234_v5  ;;  %v6153_v21 = vmul.f32 %v15291_v57, %v15291_v57  ;;  %v6800_v11 = vadd.f32 1.0, %v10279_v24  ;;  %v5984_v47 = vsel %vm15303_vm8, %v15220_v30, %v5980_v45  ;;  %v10847_v46 = vld [vmem:[#allocation22 + $0xc8] sm:$0xff] }
0x13ff   : > { %v6253_v40 = vadd.f32 0.4994258, %v6252_v13  ;;  %v6290_v25 = vmul.f32 %v6289_v1, %v15253_v35  ;;  %v6137_v44 = vmul.f32 %v15296_v22, %v15260_v38  ;;  %v6278_v18 = vadd.f32 0.0036580483, %v6277_v41  ;;  %7161 = vmatpush.bf16.msra.mxu1 %v10847_v46 }
0x1400   : > { %v15316_v31 = vmin.f32 %v6153_v21, 16.0  ;;  %v15319_v29 = vmul.f32 0.70710677, %v15294_v43  ;;  %v15322_v42 = vmul.f32 %v6796_v2, %v15079_v37  ;;  %v6241_v58 = vmul.f32 %v6240_v61, %v15230_v39 }
0x1401   : > { %v6254_v51 = vmul.f32 %v6253_v40, %v15230_v39  ;;  %v6291_v30 = vadd.f32 0.112945676, %v6290_v25  ;;  %v5989_v24 = vsel %vm15285_vm7, %v5988_v14, %v5984_v47  ;;  %v15333_v41 = vmul.f32 %v6800_v11, %v15118_v26  ;;  %v18298_v11 = vld [vmem:[#allocation54_spill] sm:$0xff] }
0x1402   : > { %v6155_v45 = vmul.f32 2.1237322e-06, %v15316_v31  ;;  %v6166_v34 = vmul.f32 3.8918573e-05, %v15316_v31  ;;  %v6193_v56 = vmul.f32 %v15319_v29, %v15319_v29  ;;  %v6123_v37 = vmul.f32 %v6122_v4, %v15152_v7 }
0x1403   : > { %v15336_v2 = vadd.f32 1.0, %v6254_v51  ;;  %v6292_v61 = vmul.f32 %v6291_v30, %v15253_v35  ;;  %v6138_v13 = vsub.f32 1.0, %v6137_v44  ;;  %v6279_v52 = vmul.f32 %v6278_v18, %v15253_v35 }
0x1404   : > { %v6156_v1 = vadd.f32 0.00028619796, %v6155_v45  ;;  %v6167_v49 = vadd.f32 0.001143296, %v6166_v34  ;;  %v5990_v14 = vmul.f32 %v5989_v24, %v5965_v54  ;;  %v6242_v21 = vadd.f32 0.18741608, %v6241_v58  ;;  %v5412_v58 = vpop.f32.mrf.mxu0 }
0x1405   : > { %11600 = vrcp.f32 %v15336_v2  ;;  %v15341_v47 = vmin.f32 %v6193_v56, 16.0  ;;  %v15344_v26 = vmul.f32 0.5, %v15190_v53  ;;  %v15347_v7 = vmul.f32 0.5, %v15201_v9 }
0x1406   : > { %v6293_v4 = vadd.f32 0.4994258, %v6292_v61  ;;  %v15350_v40 = vsub.f32 %v18298_v11, %v7213_v62  ;;  %v6860_v25 = vpack.c.bf16 %v15333_v41, %v15322_v42  ;;  %v6124_v44 = vadd.f32 1.1283791, %v6123_v37 }
0x1407   : > { %v6157_v54 = vmul.f32 %v6156_v1, %v15316_v31  ;;  %v6168_v18 = vmul.f32 %v6167_v49, %v15316_v31  ;;  %v6139_v51 = vmul.f32 %v15296_v22, %v6138_v13  ;;  %v6145_v53 = vand.u32 2147483647, %v15260_v38 }
0x1408   : > { %18299 = vst [vmem:[#allocation57_spill] sm:$0xff] %v15350_v40  ;;  %v6280_v30 = vadd.f32 0.05243302, %v6279_v52  ;;  %v6294_v9 = vmul.f32 %v6293_v4, %v15253_v35  ;;  %v10283_v24 = vclamps-f32 %v5990_v14, 1.0  ;;  %v6243_v62 = vmul.f32 %v6242_v21, %v15230_v39 }
0x1409   : > { %v6169_v45 = vadd.f32 0.014752088, %v6168_v18  ;;  %v6195_v34 = vmul.f32 2.1237322e-06, %v15341_v47  ;;  %v6147_v42 = vand.u32 2147483648, %v15260_v38  ;;  %v15365_v41 = vadd.f32 %v5412_v58, %v14302_v50 }
0x140a   : > { %v15362_v56 = vadd.f32 1.0, %v6294_v9  ;;  %v6158_v46 = vadd.f32 0.0036580483, %v6157_v54  ;;  %vm6142_vm9 = vweird.f32 %v15296_v22  ;;  %v6206_v39 = vmul.f32 3.8918573e-05, %v15341_v47 }
0x140b   : > { %v15367_v37 = vpop.eup %11600  ;;  %v6170_v61 = vmul.f32 %v6169_v45, %v15316_v31  ;;  %v6196_v13 = vadd.f32 0.00028619796, %v6195_v34  ;;  %v6140_v52 = vadd.f32 %v15296_v22, %v6139_v51  ;;  %v6281_v49 = vmul.f32 %v6280_v30, %v15253_v35 }
0x140c   : > { %v6257_v1 = vmul.f32 %v15367_v37, %v15336_v2  ;;  %11602 = vrcp.f32 %v15362_v56  ;;  %v6804_v14 = vadd.f32 1.0, %v10283_v24  ;;  %v6125_v21 = vmul.f32 %v6124_v44, %v15121_v23 }
0x140d   : > { %vm6141_vm10 = vweird.f32 %v15260_v38  ;;  %v6244_v4 = vadd.f32 1.1283791, %v6243_v62  ;;  %vm15379_vm11 = vcmp.eq.f32.partialorder %v6145_v53, 8.507059e+37  ;;  %v6159_v18 = vmul.f32 %v6158_v46, %v15316_v31  ;;  %v10846_v53 = vld [vmem:[#allocation22 + $0xc0] sm:$0xff] }
0x140e   : > { %v6171_v58 = vadd.f32 0.112945676, %v6170_v61  ;;  %v6197_v51 = vmul.f32 %v6196_v13, %v15341_v47  ;;  %vm15387_vm12 = vmor %vm6141_vm10, %vm6142_vm9  ;;  %v6148_v9 = vor.u32 1.1754944e-38, %v6147_v42  ;;  %v6258_v23 = vsub.f32 1.0, %v6257_v1  ;;  %7162 = vmatpush.bf16.msra.mxu1 %v10846_v53 }
0x140f   : > { %v15392_v38 = vmul.f32 0.5, %v15275_v3  ;;  %v6207_v44 = vadd.f32 0.001143296, %v6206_v39  ;;  %v6144_v24 = vsel %vm15387_vm12, %v15296_v22, %v6140_v52  ;;  %v6282_v62 = vadd.f32 0.18741608, %v6281_v49  ;;  %v5441_v49 = vpop.f32.mrf.mxu1 }
0x1410   : > { %v6172_v45 = vmul.f32 %v6171_v58, %v15316_v31  ;;  %v15399_v34 = vmul.f32 0.70710677, %v15365_v41  ;;  %v15402_v46 = vmul.f32 %v6804_v14, %v15145_v17  ;;  %v15405_v42 = vmul.f32 %v6244_v4, %v15206_v10 }
0x1411   : > { %v6198_v3 = vadd.f32 0.0036580483, %v6197_v51  ;;  %v6208_v61 = vmul.f32 %v6207_v44, %v15341_v47  ;;  %v6265_v22 = vand.u32 2147483647, %v15336_v2  ;;  %v6160_v39 = vadd.f32 0.05243302, %v6159_v18  ;;  %7163 = vmatmul.bf16.vlgmr.msra.gmra.mxu1 %v6860_v25 }
0x1412   : > { %v15408_v13 = vpop.eup %11602  ;;  %v6173_v52 = vadd.f32 0.4994258, %v6172_v45  ;;  %v6393_v1 = vmul.f32 %v15399_v34, %v15399_v34  ;;  %v6149_v17 = vsel %vm15379_vm11, %v6148_v9, %v6144_v24  ;;  %v6259_v10 = vmul.f32 %v15367_v37, %v6258_v23 }
0x1413   : > { %v6297_v14 = vmul.f32 %v15408_v13, %v15362_v56  ;;  %v6209_v4 = vadd.f32 0.014752088, %v6208_v61  ;;  %v6267_v58 = vand.u32 2147483648, %v15336_v2  ;;  %v6283_v51 = vmul.f32 %v6282_v62, %v15253_v35 }
0x1414   : > { %v6174_v18 = vmul.f32 %v6173_v52, %v15316_v31  ;;  %v15421_v30 = vmin.f32 %v6393_v1, 16.0  ;;  %v6199_v53 = vmul.f32 %v6198_v3, %v15341_v47  ;;  %v15426_v9 = vadd.f32 %v5441_v49, %v14934_v27 }
0x1415   : > { %v6298_v44 = vsub.f32 1.0, %v6297_v14  ;;  %v6210_v54 = vmul.f32 %v6209_v4, %v15341_v47  ;;  %v6150_v23 = vmul.f32 %v6149_v17, %v6125_v21  ;;  %vm6262_vm13 = vweird.f32 %v15367_v37 }
0x1416   : > { %v6161_v24 = vmul.f32 %v6160_v39, %v15316_v31  ;;  %v15430_v45 = vadd.f32 1.0, %v6174_v18  ;;  %v6260_v35 = vadd.f32 %v15367_v37, %v6259_v10  ;;  %v6395_v25 = vmul.f32 2.1237322e-06, %v15421_v30 }
0x1417   : > { %v6211_v62 = vadd.f32 0.112945676, %v6210_v54  ;;  %v6406_v61 = vmul.f32 3.8918573e-05, %v15421_v30  ;;  %vm6261_vm1 = vweird.f32 %v15336_v2  ;;  %vm15436_vm3 = vcmp.eq.f32.partialorder %v6265_v22, 8.507059e+37 }
0x1418   : > { %v6299_v21 = vmul.f32 %v15408_v13, %v6298_v44  ;;  %11604 = vrcp.f32 %v15430_v45  ;;  %v6268_v39 = vor.u32 1.1754944e-38, %v6267_v58  ;;  %v6200_v52 = vadd.f32 0.05243302, %v6199_v53  ;;  %vm15448_vm4 = vmor %vm6261_vm1, %vm6262_vm13 }
0x1419   : > { %v6212_v1 = vmul.f32 %v6211_v62, %v15341_v47  ;;  %v15444_v49 = vmul.f32 0.70710677, %v15426_v9  ;;  %v10287_v17 = vclamps-f32 %v6150_v23, 1.0  ;;  %v6284_v22 = vadd.f32 1.1283791, %v6283_v51 }
0x141a   : > { %vm6301_vm15 = vweird.f32 %v15362_v56  ;;  %v6407_v10 = vadd.f32 0.001143296, %v6406_v61  ;;  %v6264_v14 = vsel %vm15448_vm4, %v15367_v37, %v6260_v35  ;;  %v6162_v4 = vadd.f32 0.18741608, %v6161_v24 }
0x141b   : > { %v6213_v58 = vadd.f32 0.4994258, %v6212_v1  ;;  %v6396_v18 = vadd.f32 0.00028619796, %v6395_v25  ;;  %v6300_v44 = vadd.f32 %v15408_v13, %v6299_v21  ;;  %vm6302_vm2 = vweird.f32 %v15408_v13 }
0x141c   : > { %v6305_v53 = vand.u32 2147483647, %v15362_v56  ;;  %v6408_v54 = vmul.f32 %v6407_v10, %v15421_v30  ;;  %v6307_v51 = vand.u32 2147483648, %v15362_v56  ;;  %v6201_v23 = vmul.f32 %v6200_v52, %v15341_v47  ;;  %vm15475_vm6 = vmor %vm6301_vm15, %vm6302_vm2 }
0x141d   : > { %v6214_v62 = vmul.f32 %v6213_v58, %v15341_v47  ;;  %v6433_v37 = vmul.f32 %v15444_v49, %v15444_v49  ;;  %v6269_v35 = vsel %vm15436_vm3, %v6268_v39, %v6264_v14  ;;  %v6861_v61 = vpack.c.bf16 %v15265_v32, %v15098_v55 }
0x141e   : > { %v15465_v24 = vpop.eup %11604  ;;  %v6409_v25 = vadd.f32 0.014752088, %v6408_v54  ;;  %v6862_v21 = vpack.c.bf16 %v15268_v33, %v15124_v59  ;;  %v6808_v1 = vadd.f32 1.0, %v10287_v17  ;;  %v6163_v2 = vmul.f32 %v6162_v4, %v15316_v31 }
0x141f   : > { %v6177_v3 = vmul.f32 %v15465_v24, %v15430_v45  ;;  %v6397_v39 = vmul.f32 %v6396_v18, %v15421_v30  ;;  %v6304_v55 = vsel %vm15475_vm6, %v15408_v13, %v6300_v44  ;;  %v15486_v32 = vadd.f32 1.0, %v6214_v62  ;;  %7081 = vmatmul.bf16.gmra.mxu2 %v6861_v61 }
0x1420   : > { %v6410_v59 = vmul.f32 %v6409_v25, %v15421_v30  ;;  %v15489_v33 = vmin.f32 %v6433_v37, 16.0  ;;  %7110 = vmatmul.bf16.gmra.mxu3 %v6862_v21  ;;  %v6270_v56 = vmul.f32 %v6269_v35, %v15405_v42  ;;  %v6308_v31 = vor.u32 1.1754944e-38, %v6307_v51  ;;  %v5354_v42 = vpop.f32.mrf.mxu2 }
0x1421   : > { %v6202_v17 = vadd.f32 0.18741608, %v6201_v23  ;;  %v7229_v10 = vmul.f32 %v15350_v40, %v15350_v40  ;;  %vm6306_vm14 = vcmp.eq.f32.partialorder %v6305_v53, 8.507059e+37  ;;  %v15495_v14 = vmul.f32 0.5, %v15294_v43 }
0x1422   : > { %11606 = vrcp.f32 %v15486_v32  ;;  %v15499_v13 = vmul.f32 0.5, %v15365_v41  ;;  %v6309_v4 = vsel %vm6306_vm14, %v6308_v31, %v6304_v55  ;;  %v6178_v58 = vsub.f32 1.0, %v6177_v3 }
0x1423   : > { %v6398_v18 = vadd.f32 0.0036580483, %v6397_v39  ;;  %v6411_v44 = vadd.f32 0.112945676, %v6410_v59  ;;  %7240 = vadd.xlane.f32.xlu1 %v7229_v10  ;;  %v6285_v54 = vmul.f32 %v6284_v22, %v15216_v0  ;;  %v6164_v51 = vadd.f32 1.1283791, %v6163_v2  ;;  %v5383_v22 = vpop.f32.mrf.mxu3 }
0x1424   : > { %v6435_v23 = vmul.f32 2.1237322e-06, %v15489_v33  ;;  %v6446_v53 = vmul.f32 3.8918573e-05, %v15489_v33  ;;  %v15505_v43 = vmul.f32 %v6808_v1, %v15175_v63  ;;  %v10290_v62 = vclamps-f32 %v6270_v56, 1.0 }
0x1425   : > { %v6203_v41 = vmul.f32 %v6202_v17, %v15341_v47  ;;  %v6412_v37 = vmul.f32 %v6411_v44, %v15421_v30  ;;  %v6310_v35 = vmul.f32 %v6309_v4, %v6285_v54  ;;  %v15510_v25 = vmul.f32 0.5, %v15426_v9 }
0x1426   : > { %v6447_v61 = vadd.f32 0.001143296, %v6446_v53  ;;  %v15513_v0 = vadd.f32 %v5354_v42, %v14298_v6  ;;  %v6179_v21 = vmul.f32 %v15465_v24, %v6178_v58  ;;  %v6399_v52 = vmul.f32 %v6398_v18, %v15421_v30 }
0x1427   : > { %v6413_v63 = vadd.f32 0.4994258, %v6412_v37  ;;  %v6436_v1 = vadd.f32 0.00028619796, %v6435_v23  ;;  %v6165_v47 = vmul.f32 %v6164_v51, %v15291_v57  ;;  %v6185_v3 = vand.u32 2147483647, %v15430_v45 }
0x1428   : > { %v15517_v2 = vpop.eup %11606  ;;  %v6187_v9 = vand.u32 2147483648, %v15430_v45  ;;  %v6448_v39 = vmul.f32 %v6447_v61, %v15489_v33  ;;  %v6811_v55 = vadd.f32 1.0, %v10290_v62  ;;  %v6204_v59 = vadd.f32 1.1283791, %v6203_v41  ;;  %v7203_v41 = vpop.xlane.xlu0 %7202 }
0x1429   : > { %v6217_v56 = vmul.f32 %v15517_v2, %v15486_v32  ;;  %v15526_v31 = vadd.f32 %v5383_v22, %v18265_v15  ;;  %v10291_v17 = vclamps-f32 %v6310_v35, 1.0  ;;  %v6414_v10 = vmul.f32 %v6413_v63, %v15421_v30 }
0x142a   : > { %v6449_v4 = vadd.f32 0.014752088, %v6448_v39  ;;  %v15530_v57 = vmul.f32 0.70710677, %v15513_v0  ;;  %v6180_v58 = vadd.f32 %v15465_v24, %v6179_v21  ;;  %vm6182_vm0 = vweird.f32 %v15465_v24 }
0x142b   : > { %v6400_v18 = vadd.f32 0.05243302, %v6399_v52  ;;  %v6437_v44 = vmul.f32 %v6436_v1, %v15489_v33  ;;  %vm6181_vm5 = vweird.f32 %v15430_v45  ;;  %v15536_v42 = vadd.f32 1.0, %v6414_v10 }
0x142c   : > { %v6450_v54 = vmul.f32 %v6449_v4, %v15489_v33  ;;  %v6313_v51 = vmul.f32 %v15530_v57, %v15530_v57  ;;  %vm15541_vm7 = vcmp.eq.f32.partialorder %v6185_v3, 8.507059e+37  ;;  %v6188_v53 = vor.u32 1.1754944e-38, %v6187_v9  ;;  %vm15551_vm8 = vmor %vm6181_vm5, %vm6182_vm0 }
0x142d   : > { %v6218_v62 = vsub.f32 1.0, %v6217_v56  ;;  %v15546_v37 = vmul.f32 0.70710677, %v15526_v31  ;;  %v15549_v35 = vmul.f32 %v6811_v55, %v15344_v26  ;;  %v6812_v45 = vadd.f32 1.0, %v10291_v17 }
0x142e   : > { %v15556_v22 = vmul.f32 %v6204_v59, %v15319_v29  ;;  %11608 = vrcp.f32 %v15536_v42  ;;  %v6184_v21 = vsel %vm15551_vm8, %v15465_v24, %v6180_v58  ;;  %v6401_v52 = vmul.f32 %v6400_v18, %v15421_v30  ;;  %v5415_v59 = vpop.f32.mrf.mxu0 }
0x142f   : > { %v6438_v63 = vadd.f32 0.0036580483, %v6437_v44  ;;  %v6451_v1 = vadd.f32 0.112945676, %v6450_v54  ;;  %vm6221_vm9 = vweird.f32 %v15486_v32  ;;  %v7214_v26 = vmul.f32 %v7203_v41, %v18234_v5 }
0x1430   : > { %v15565_v3 = vmin.f32 %v6313_v51, 16.0  ;;  %v6353_v29 = vmul.f32 %v15546_v37, %v15546_v37  ;;  %v6219_v9 = vmul.f32 %v15517_v2, %v6218_v62  ;;  %v6225_v39 = vand.u32 2147483647, %v15486_v32 }
0x1431   : > { %v6227_v55 = vand.u32 2147483648, %v15486_v32  ;;  %v6452_v24 = vmul.f32 %v6451_v1, %v15489_v33  ;;  %v6189_v56 = vsel %vm15541_vm7, %v6188_v53, %v6184_v21  ;;  %v15580_v58 = vmul.f32 %v6812_v45, %v15347_v7 }
0x1432   : > { %v6315_v17 = vmul.f32 2.1237322e-06, %v15565_v3  ;;  %v6326_v10 = vmul.f32 3.8918573e-05, %v15565_v3  ;;  %v15577_v4 = vmin.f32 %v6353_v29, 16.0  ;;  %v6439_v44 = vmul.f32 %v6438_v63, %v15489_v33 }
0x1433   : > { %v6402_v18 = vadd.f32 0.18741608, %v6401_v52  ;;  %v6453_v54 = vadd.f32 0.4994258, %v6452_v24  ;;  %v15587_v53 = vadd.f32 %v5415_v59, %v14302_v50  ;;  %v15589_v61 = vmul.f32 %v6189_v56, %v6165_v47 }
0x1434   : > { %v15583_v51 = vpop.eup %11608  ;;  %v6316_v62 = vadd.f32 0.00028619796, %v6315_v17  ;;  %v6327_v41 = vadd.f32 0.001143296, %v6326_v10  ;;  %v6355_v23 = vmul.f32 2.1237322e-06, %v15577_v4  ;;  %v6220_v21 = vadd.f32 %v15517_v2, %v6219_v9 }
0x1435   : > { %vm6222_vm10 = vweird.f32 %v15517_v2  ;;  %v6417_v7 = vmul.f32 %v15583_v51, %v15536_v42  ;;  %v6454_v45 = vmul.f32 %v6453_v54, %v15489_v33  ;;  %v6403_v29 = vmul.f32 %v6402_v18, %v15421_v30 }
0x1436   : > { %v6317_v52 = vmul.f32 %v6316_v62, %v15565_v3  ;;  %v6328_v63 = vmul.f32 %v6327_v41, %v15565_v3  ;;  %v6356_v1 = vadd.f32 0.00028619796, %v6355_v23  ;;  %v6440_v59 = vadd.f32 0.05243302, %v6439_v44  ;;  %vm15602_vm11 = vmor %vm6221_vm9, %vm6222_vm10  ;;  %v18318_v41 = vld [vmem:[#allocation55_spill] sm:$0xff] }
0x1437   : > { %v6418_v24 = vsub.f32 1.0, %v6417_v7  ;;  %v6366_v47 = vmul.f32 3.8918573e-05, %v15577_v4  ;;  %vm15606_vm12 = vcmp.eq.f32.partialorder %v6225_v39, 8.507059e+37  ;;  %v15610_v17 = vadd.f32 1.0, %v6454_v45 }
0x1438   : > { %v6329_v10 = vadd.f32 0.014752088, %v6328_v63  ;;  %v15613_v54 = vmul.f32 0.70710677, %v15587_v53  ;;  %v6224_v30 = vsel %vm15602_vm11, %v15517_v2, %v6220_v21  ;;  %v6318_v18 = vadd.f32 0.0036580483, %v6317_v52 }
0x1439   : > { %v6357_v32 = vmul.f32 %v6356_v1, %v15577_v4  ;;  %v6367_v44 = vadd.f32 0.001143296, %v6366_v47  ;;  %v6228_v62 = vor.u32 1.1754944e-38, %v6227_v55  ;;  %v6419_v39 = vmul.f32 %v15583_v51, %v6418_v24 }
0x143a   : > { %11610 = vrcp.f32 %v15610_v17  ;;  %v15622_v23 = vsub.f32 %v18318_v41, %v7214_v26  ;;  %v10288_v7 = vclamps-f32 %v15589_v61, 1.0  ;;  %v6404_v45 = vadd.f32 1.1283791, %v6403_v29  ;;  %v5444_v29 = vpop.f32.mrf.mxu1 }
0x143b   : > { %v6425_v63 = vand.u32 2147483647, %v15536_v42  ;;  %v6330_v9 = vmul.f32 %v6329_v10, %v15565_v3  ;;  %v6229_v2 = vsel %vm15606_vm12, %v6228_v62, %v6224_v30  ;;  %vm6421_vm13 = vweird.f32 %v15536_v42 }
0x143c   : > { %v6368_v55 = vmul.f32 %v6367_v44, %v15577_v4  ;;  %v6553_v21 = vmul.f32 %v15613_v54, %v15613_v54  ;;  %v6441_v26 = vmul.f32 %v6440_v59, %v15489_v33  ;;  %v6319_v52 = vmul.f32 %v6318_v18, %v15565_v3 }
0x143d   : > { %v6331_v61 = vadd.f32 0.112945676, %v6330_v9  ;;  %v6358_v1 = vadd.f32 0.0036580483, %v6357_v32  ;;  %v6420_v24 = vadd.f32 %v15583_v51, %v6419_v39  ;;  %vm6422_vm1 = vweird.f32 %v15583_v51 }
0x143e   : > { %v6369_v47 = vadd.f32 0.014752088, %v6368_v55  ;;  %v15637_v56 = vmin.f32 %v6553_v21, 16.0  ;;  %v6230_v10 = vmul.f32 %v6229_v2, %v15556_v22  ;;  %vm15640_vm3 = vcmp.eq.f32.partialorder %v6425_v63, 8.507059e+37  ;;  %vm15656_vm4 = vmor %vm6421_vm13, %vm6422_vm1 }
0x143f   : > { %v6427_v59 = vand.u32 2147483648, %v15536_v42  ;;  %v6332_v18 = vmul.f32 %v6331_v61, %v15565_v3  ;;  %v15652_v9 = vadd.f32 %v5444_v29, %v14934_v27  ;;  %v6442_v63 = vadd.f32 0.18741608, %v6441_v26 }
0x1440   : > { %v15646_v44 = vpop.eup %11610  ;;  %v6370_v32 = vmul.f32 %v6369_v47, %v15577_v4  ;;  %v6555_v62 = vmul.f32 2.1237322e-06, %v15637_v56  ;;  %v6566_v39 = vmul.f32 3.8918573e-05, %v15637_v56  ;;  %v6320_v55 = vadd.f32 0.05243302, %v6319_v52 }
0x1441   : > { %v6457_v2 = vmul.f32 %v15646_v44, %v15610_v17  ;;  %v6359_v21 = vmul.f32 %v6358_v1, %v15577_v4  ;;  %v6424_v61 = vsel %vm15656_vm4, %v15583_v51, %v6420_v24  ;;  %v6333_v47 = vadd.f32 0.4994258, %v6332_v18 }
0x1442   : > { %v6371_v29 = vadd.f32 0.112945676, %v6370_v32  ;;  %v6556_v41 = vadd.f32 0.00028619796, %v6555_v62  ;;  %v10289_v11 = vclamps-f32 %v6230_v10, 1.0  ;;  %v6428_v42 = vor.u32 1.1754944e-38, %v6427_v59 }
0x1443   : > { %v6458_v20 = vsub.f32 1.0, %v6457_v2  ;;  %v6567_v36 = vadd.f32 0.001143296, %v6566_v39  ;;  %v6334_v12 = vmul.f32 %v6333_v47, %v15565_v3  ;;  %v15670_v52 = vmul.f32 0.70710677, %v15652_v9 }
0x1444   : > { %v6372_v26 = vmul.f32 %v6371_v29, %v15577_v4  ;;  %v6557_v40 = vmul.f32 %v6556_v41, %v15637_v56  ;;  %v6429_v1 = vsel %vm15640_vm3, %v6428_v42, %v6424_v61  ;;  %v6443_v51 = vmul.f32 %v6442_v63, %v15489_v33 }
0x1445   : > { %v6360_v24 = vadd.f32 0.05243302, %v6359_v21  ;;  %v6568_v10 = vmul.f32 %v6567_v36, %v15637_v56  ;;  %v6321_v59 = vmul.f32 %v6320_v55, %v15565_v3  ;;  %v15677_v18 = vadd.f32 1.0, %v6334_v12 }
0x1446   : > { %v6373_v32 = vadd.f32 0.4994258, %v6372_v26  ;;  %v6558_v62 = vadd.f32 0.0036580483, %v6557_v40  ;;  %v6405_v39 = vmul.f32 %v6404_v45, %v15399_v34  ;;  %v6459_v41 = vmul.f32 %v15646_v44, %v6458_v20 }
0x1447   : > { %v15682_v22 = vmul.f32 0.5, %v15513_v0  ;;  %v6569_v30 = vadd.f32 0.014752088, %v6568_v10  ;;  %v6809_v2 = vadd.f32 1.0, %v10288_v7  ;;  %11612 = vrcp.f32 %v15677_v18 }
0x1448   : > { %v15686_v33 = vmul.f32 0.5, %v15526_v31  ;;  %v6593_v12 = vmul.f32 %v15670_v52, %v15670_v52  ;;  %v6810_v36 = vadd.f32 1.0, %v10289_v11  ;;  %v6430_v63 = vmul.f32 %v6429_v1, %v6405_v39 }
0x1449   : > { %v6361_v40 = vmul.f32 %v6360_v24, %v15577_v4  ;;  %v6374_v34 = vmul.f32 %v6373_v32, %v15577_v4  ;;  %v6444_v20 = vadd.f32 1.1283791, %v6443_v51  ;;  %v6322_v45 = vadd.f32 0.18741608, %v6321_v59 }
0x144a   : > { %v6559_v0 = vmul.f32 %v6558_v62, %v15637_v56  ;;  %v6570_v7 = vmul.f32 %v6569_v30, %v15637_v56  ;;  %v6460_v55 = vadd.f32 %v15646_v44, %v6459_v41  ;;  %vm6461_vm15 = vweird.f32 %v15610_v17 }
0x144b   : > { %vm6462_vm2 = vweird.f32 %v15646_v44  ;;  %v15697_v31 = vadd.f32 1.0, %v6374_v34  ;;  %v6467_v11 = vand.u32 2147483648, %v15610_v17  ;;  %v15700_v61 = vmin.f32 %v6593_v12, 16.0 }
0x144c   : > { %v6571_v21 = vadd.f32 0.112945676, %v6570_v7  ;;  %v7230_v47 = vmul.f32 %v15622_v23, %v15622_v23  ;;  %v10294_v29 = vclamps-f32 %v6430_v63, 1.0  ;;  %v6465_v42 = vand.u32 2147483647, %v15610_v17  ;;  %vm15711_vm6 = vmor %vm6461_vm15, %vm6462_vm2 }
0x144d   : > { %v6362_v26 = vadd.f32 0.18741608, %v6361_v40  ;;  %11614 = vrcp.f32 %v15697_v31  ;;  %v15706_v1 = vpop.eup %11612  ;;  %v15709_v51 = vmul.f32 %v6809_v2, %v15392_v38  ;;  %v6323_v10 = vmul.f32 %v6322_v45, %v15565_v3  ;;  %v5357_v40 = vpop.f32.mrf.mxu2 }
0x144e   : > { %v6560_v59 = vadd.f32 0.05243302, %v6559_v0  ;;  %v6572_v32 = vmul.f32 %v6571_v21, %v15637_v56  ;;  %7242 = vadd.xlane.f32.xlu2 %v7230_v47  ;;  %v6464_v17 = vsel %vm15711_vm6, %v15646_v44, %v6460_v55  ;;  %v6337_v62 = vmul.f32 %v15706_v1, %v15677_v18  ;;  %v5386_v47 = vpop.f32.mrf.mxu3 }
0x144f   : > { %v15723_v38 = vmul.f32 0.5, %v15587_v53  ;;  %v6595_v39 = vmul.f32 2.1237322e-06, %v15700_v61  ;;  %v15727_v41 = vmul.f32 %v6810_v36, %v15495_v14  ;;  %v6445_v3 = vmul.f32 %v6444_v20, %v15444_v49 }
0x1450   : > { %v6468_v30 = vor.u32 1.1754944e-38, %v6467_v11  ;;  %v6573_v2 = vadd.f32 0.4994258, %v6572_v32  ;;  %v6815_v12 = vadd.f32 1.0, %v10294_v29  ;;  %vm6466_vm14 = vcmp.eq.f32.partialorder %v6465_v42, 8.507059e+37  ;;  %v7205_v32 = vpop.xlane.xlu1 %7204 }
0x1451   : > { %v6363_v63 = vmul.f32 %v6362_v26, %v15577_v4  ;;  %v6606_v44 = vmul.f32 3.8918573e-05, %v15700_v61  ;;  %v6324_v45 = vadd.f32 1.1283791, %v6323_v10  ;;  %v6561_v53 = vmul.f32 %v6560_v59, %v15637_v56 }
0x1452   : > { %v6469_v34 = vsel %vm6466_vm14, %v6468_v30, %v6464_v17  ;;  %v6574_v0 = vmul.f32 %v6573_v2, %v15637_v56  ;;  %v6338_v14 = vsub.f32 1.0, %v6337_v62  ;;  %v15737_v49 = vmul.f32 0.5, %v15652_v9 }
0x1453   : > { %v15734_v7 = vpop.eup %11614  ;;  %v6596_v36 = vadd.f32 0.00028619796, %v6595_v39  ;;  %v6607_v20 = vadd.f32 0.001143296, %v6606_v44  ;;  %v6347_v55 = vand.u32 2147483648, %v15677_v18  ;;  %v15745_v21 = vadd.f32 %v5357_v40, %v14298_v6 }
0x1454   : > { %v6377_v4 = vmul.f32 %v15734_v7, %v15697_v31  ;;  %v15742_v11 = vadd.f32 1.0, %v6574_v0  ;;  %v6470_v29 = vmul.f32 %v6469_v34, %v6445_v3  ;;  %v6345_v42 = vand.u32 2147483647, %v15677_v18  ;;  %v5417_v34 = vpop.f32.mrf.mxu0 }
0x1455   : > { %v6364_v26 = vadd.f32 1.1283791, %v6363_v63  ;;  %v6608_v9 = vmul.f32 %v6607_v20, %v15700_v61  ;;  %v15750_v24 = vmul.f32 %v6815_v12, %v15499_v13  ;;  %v15753_v10 = vmul.f32 %v6324_v45, %v15530_v57 }
0x1456   : > { %v6562_v59 = vadd.f32 0.18741608, %v6561_v53  ;;  %11616 = vrcp.f32 %v15742_v11  ;;  %v6339_v17 = vmul.f32 %v15706_v1, %v6338_v14  ;;  %vm6341_vm0 = vweird.f32 %v15677_v18 }
0x1457   : > { %v6597_v62 = vmul.f32 %v6596_v36, %v15700_v61  ;;  %v15760_v39 = vadd.f32 %v5386_v47, %v18265_v15  ;;  %v6348_v3 = vor.u32 1.1754944e-38, %v6347_v55  ;;  %v6378_v30 = vsub.f32 1.0, %v6377_v4 }
0x1458   : > { %v6609_v13 = vadd.f32 0.014752088, %v6608_v9  ;;  %v15763_v2 = vmul.f32 0.70710677, %v15745_v21  ;;  %v10295_v57 = vclamps-f32 %v6470_v29, 1.0  ;;  %vm15765_vm5 = vcmp.eq.f32.partialorder %v6345_v42, 8.507059e+37 }
0x1459   : > { %v15770_v63 = vmul.f32 %v6364_v26, %v15546_v37  ;;  %v6387_v44 = vand.u32 2147483648, %v15697_v31  ;;  %v7215_v40 = vmul.f32 %v7205_v32, %v18234_v5  ;;  %v6385_v45 = vand.u32 2147483647, %v15697_v31 }
0x145a   : > { %v6563_v53 = vmul.f32 %v6562_v59, %v15637_v56  ;;  %v6610_v0 = vmul.f32 %v6609_v13, %v15700_v61  ;;  %v6473_v14 = vmul.f32 %v15763_v2, %v15763_v2  ;;  %v6340_v36 = vadd.f32 %v15706_v1, %v6339_v17 }
0x145b   : > { %vm6342_vm7 = vweird.f32 %v15706_v1  ;;  %v6598_v37 = vadd.f32 0.0036580483, %v6597_v62  ;;  %v15782_v20 = vmul.f32 0.70710677, %v15760_v39  ;;  %v6379_v4 = vmul.f32 %v15734_v7, %v6378_v30 }
0x145c   : > { %v15784_v55 = vpop.eup %11616  ;;  %v6611_v47 = vadd.f32 0.112945676, %v6610_v0  ;;  %v15787_v29 = vmin.f32 %v6473_v14, 16.0  ;;  %v15790_v56 = vadd.f32 %v5417_v34, %v14302_v50  ;;  %v15792_v42 = vadd.f32 1.0, %v10295_v57  ;;  %vm15799_vm9 = vmor %vm6341_vm0, %vm6342_vm7 }
0x145d   : > { %vm6381_vm8 = vweird.f32 %v15697_v31  ;;  %v6388_v26 = vor.u32 1.1754944e-38, %v6387_v44  ;;  %v6577_v9 = vmul.f32 %v15784_v55, %v15742_v11  ;;  %vm6382_vm10 = vweird.f32 %v15734_v7 }
0x145e   : > { %vm15804_vm11 = vcmp.eq.f32.partialorder %v6385_v45, 8.507059e+37  ;;  %v6564_v50 = vadd.f32 1.1283791, %v6563_v53  ;;  %v6612_v17 = vmul.f32 %v6611_v47, %v15700_v61  ;;  %v6475_v62 = vmul.f32 2.1237322e-06, %v15787_v29  ;;  %vm15837_vm12 = vmor %vm6381_vm8, %vm6382_vm10 }
0x145f   : > { %v6344_v30 = vsel %vm15799_vm9, %v15706_v1, %v6340_v36  ;;  %v6599_v18 = vmul.f32 %v6598_v37, %v15700_v61  ;;  %v6486_v13 = vmul.f32 3.8918573e-05, %v15787_v29  ;;  %v6513_v57 = vmul.f32 %v15782_v20, %v15782_v20 }
0x1460   : > { %v6380_v44 = vadd.f32 %v15734_v7, %v6379_v4  ;;  %v6613_v34 = vadd.f32 0.4994258, %v6612_v17  ;;  %v6476_v45 = vadd.f32 0.00028619796, %v6475_v62  ;;  %v15819_v53 = vmul.f32 0.70710677, %v15790_v56 }
0x1461   : > { %v6578_v0 = vsub.f32 1.0, %v6577_v9  ;;  %v15822_v14 = vsub.f32 %v14616_v48, %v7215_v40  ;;  %v6487_v47 = vadd.f32 0.001143296, %v6486_v13  ;;  %v15824_v1 = vmin.f32 %v6513_v57, 16.0 }
0x1462   : > { %v6349_v36 = vsel %vm15765_vm5, %v6348_v3, %v6344_v30  ;;  %v15829_v37 = vmul.f32 %v6564_v50, %v15613_v54  ;;  %v6614_v4 = vmul.f32 %v6613_v34, %v15700_v61  ;;  %v6477_v59 = vmul.f32 %v6476_v45, %v15787_v29 }
0x1463   : > { %v6600_v9 = vadd.f32 0.05243302, %v6599_v18  ;;  %v6488_v17 = vmul.f32 %v6487_v47, %v15787_v29  ;;  %v6515_v3 = vmul.f32 2.1237322e-06, %v15824_v1  ;;  %v6526_v54 = vmul.f32 3.8918573e-05, %v15824_v1 }
0x1464   : > { %v6384_v12 = vsel %vm15837_vm12, %v15734_v7, %v6380_v44  ;;  %v15847_v50 = vadd.f32 1.0, %v6614_v4  ;;  %v6478_v62 = vadd.f32 0.0036580483, %v6477_v59  ;;  %v6713_v31 = vmul.f32 %v15819_v53, %v15819_v53 }
0x1465   : > { %v6579_v30 = vmul.f32 %v15784_v55, %v6578_v0  ;;  %v6489_v13 = vadd.f32 0.014752088, %v6488_v17  ;;  %v6516_v18 = vadd.f32 0.00028619796, %v6515_v3  ;;  %v6527_v57 = vadd.f32 0.001143296, %v6526_v54  ;;  %v5446_v3 = vpop.f32.mrf.mxu1 }
0x1466   : > { %vm6581_vm13 = vweird.f32 %v15742_v11  ;;  %v6585_v34 = vand.u32 2147483647, %v15742_v11  ;;  %v6587_v45 = vand.u32 2147483648, %v15742_v11  ;;  %11618 = vrcp.f32 %v15847_v50 }
0x1467   : > { %v6389_v7 = vsel %vm15804_vm11, %v6388_v26, %v6384_v12  ;;  %v6601_v44 = vmul.f32 %v6600_v9, %v15700_v61  ;;  %v6479_v47 = vmul.f32 %v6478_v62, %v15787_v29  ;;  %v6490_v0 = vmul.f32 %v6489_v13, %v15787_v29 }
0x1468   : > { %v6350_v4 = vmul.f32 %v6349_v36, %v15753_v10  ;;  %v6517_v59 = vmul.f32 %v6516_v18, %v15824_v1  ;;  %v6528_v40 = vmul.f32 %v6527_v57, %v15824_v1  ;;  %v15864_v17 = vmin.f32 %v6713_v31, 16.0 }
0x1469   : > { %v6580_v54 = vadd.f32 %v15784_v55, %v6579_v30  ;;  %vm6582_vm1 = vweird.f32 %v15784_v55  ;;  %v6480_v26 = vadd.f32 0.05243302, %v6479_v47  ;;  %v6491_v32 = vadd.f32 0.112945676, %v6490_v0 }
0x146a   : > { %v6390_v9 = vmul.f32 %v6389_v7, %v15770_v63  ;;  %v6518_v12 = vadd.f32 0.0036580483, %v6517_v59  ;;  %v6529_v62 = vadd.f32 0.014752088, %v6528_v40  ;;  %v6715_v13 = vmul.f32 2.1237322e-06, %v15864_v17  ;;  %vm15879_vm3 = vmor %vm6581_vm13, %vm6582_vm1 }
0x146b   : > { %v6602_v10 = vadd.f32 0.18741608, %v6601_v44  ;;  %v6492_v36 = vmul.f32 %v6491_v32, %v15787_v29  ;;  %v6726_v18 = vmul.f32 3.8918573e-05, %v15864_v17  ;;  %v15873_v31 = vadd.f32 %v5446_v3, %v14934_v27 }
0x146c   : > { %v15875_v57 = vpop.eup %11618  ;;  %vm15883_vm4 = vcmp.eq.f32.partialorder %v6585_v34, 8.507059e+37  ;;  %v6588_v7 = vor.u32 1.1754944e-38, %v6587_v45  ;;  %v6530_v44 = vmul.f32 %v6529_v62, %v15824_v1  ;;  %v6716_v47 = vadd.f32 0.00028619796, %v6715_v13 }
0x146d   : > { %v10292_v0 = vclamps-f32 %v6350_v4, 1.0  ;;  %v6584_v27 = vsel %vm15879_vm3, %v15784_v55, %v6580_v54  ;;  %v6617_v11 = vmul.f32 %v15875_v57, %v15847_v50  ;;  %v6481_v59 = vmul.f32 %v6480_v26, %v15787_v29 }
0x146e   : > { %v6493_v40 = vadd.f32 0.4994258, %v6492_v36  ;;  %v6519_v34 = vmul.f32 %v6518_v12, %v15824_v1  ;;  %v6531_v3 = vadd.f32 0.112945676, %v6530_v44  ;;  %v6717_v32 = vmul.f32 %v6716_v47, %v15864_v17 }
0x146f   : > { %v10293_v45 = vclamps-f32 %v6390_v9, 1.0  ;;  %v6603_v62 = vmul.f32 %v6602_v10, %v15700_v61  ;;  %v6727_v13 = vadd.f32 0.001143296, %v6726_v18  ;;  %v15898_v4 = vmul.f32 0.70710677, %v15873_v31 }
0x1470   : > { %v6589_v55 = vsel %vm15883_vm4, %v6588_v7, %v6584_v27  ;;  %v6618_v54 = vsub.f32 1.0, %v6617_v11  ;;  %v6494_v30 = vmul.f32 %v6493_v40, %v15787_v29  ;;  %v6532_v26 = vmul.f32 %v6531_v3, %v15824_v1 }
0x1471   : > { %v6482_v36 = vadd.f32 0.18741608, %v6481_v59  ;;  %v6718_v12 = vadd.f32 0.0036580483, %v6717_v32  ;;  %v6728_v44 = vmul.f32 %v6727_v13, %v15864_v17  ;;  %v6753_v9 = vmul.f32 %v15898_v4, %v15898_v4 }
0x1472   : > { %v15909_v61 = vmul.f32 %v15792_v42, %v15510_v25  ;;  %v15911_v10 = vadd.f32 1.0, %v6494_v30  ;;  %v6520_v18 = vadd.f32 0.05243302, %v6519_v34  ;;  %v6533_v63 = vadd.f32 0.4994258, %v6532_v26 }
0x1473   : > { %v6590_v7 = vmul.f32 %v6589_v55, %v15829_v37  ;;  %v15915_v47 = vmul.f32 0.5, %v15745_v21  ;;  %v15918_v27 = vmul.f32 0.5, %v15790_v56  ;;  %v6729_v11 = vadd.f32 0.014752088, %v6728_v44 }
0x1474   : > { %v15920_v59 = vadd.f32 1.0, %v10292_v0  ;;  %v6619_v40 = vmul.f32 %v15875_v57, %v6618_v54  ;;  %11620 = vrcp.f32 %v15911_v10  ;;  %v15924_v25 = vmin.f32 %v6753_v9, 16.0 }
0x1475   : > { %v15926_v42 = vadd.f32 1.0, %v10293_v45  ;;  %v6604_v34 = vadd.f32 1.1283791, %v6603_v62  ;;  %v6534_v37 = vmul.f32 %v6533_v63, %v15824_v1  ;;  %v6719_v21 = vmul.f32 %v6718_v12, %v15864_v17 }
0x1476   : > { %v6625_v3 = vand.u32 2147483647, %v15847_v50  ;;  %v6483_v56 = vmul.f32 %v6482_v36, %v15787_v29  ;;  %v6521_v0 = vmul.f32 %v6520_v18, %v15824_v1  ;;  %v6730_v32 = vmul.f32 %v6729_v11, %v15864_v17 }
0x1477   : > { %v10298_v13 = vclamps-f32 %v6590_v7, 1.0  ;;  %vm6622_vm15 = vweird.f32 %v15875_v57  ;;  %v6627_v55 = vand.u32 2147483648, %v15847_v50  ;;  %v15936_v45 = vadd.f32 1.0, %v6534_v37 }
0x1478   : > { %v6620_v62 = vadd.f32 %v15875_v57, %v6619_v40  ;;  %v6731_v54 = vadd.f32 0.112945676, %v6730_v32  ;;  %v6755_v30 = vmul.f32 2.1237322e-06, %v15924_v25  ;;  %v7231_v26 = vmul.f32 %v15822_v14, %v15822_v14 }
0x1479   : > { %v6605_v29 = vmul.f32 %v6604_v34, %v15670_v52  ;;  %11622 = vrcp.f32 %v15936_v45  ;;  %v6720_v36 = vadd.f32 0.05243302, %v6719_v21  ;;  %v6766_v12 = vmul.f32 3.8918573e-05, %v15924_v25 }
0x147a   : > { %v15945_v44 = vpop.eup %11620  ;;  %vm6621_vm2 = vweird.f32 %v15847_v50  ;;  %v6484_v9 = vadd.f32 1.1283791, %v6483_v56  ;;  %v6522_v18 = vadd.f32 0.18741608, %v6521_v0  ;;  %v6732_v63 = vmul.f32 %v6731_v54, %v15864_v17  ;;  %7244 = vadd.xlane.f32.xlu0 %v7231_v26  ;;  %v5359_v54 = vpop.f32.mrf.mxu2 }
0x147b   : > { %vm15951_vm6 = vmor %vm6621_vm2, %vm6622_vm15  ;;  %vm15955_vm14 = vcmp.eq.f32.partialorder %v6625_v3, 8.507059e+37  ;;  %v6628_v11 = vor.u32 1.1754944e-38, %v6627_v55  ;;  %v6497_v40 = vmul.f32 %v15945_v44, %v15911_v10  ;;  %v6756_v50 = vadd.f32 0.00028619796, %v6755_v30 }
0x147c   : > { %v15961_v34 = vadd.f32 1.0, %v10298_v13  ;;  %v6624_v37 = vsel %vm15951_vm6, %v15875_v57, %v6620_v62  ;;  %v6733_v21 = vadd.f32 0.4994258, %v6732_v63  ;;  %v15967_v56 = vmul.f32 0.5, %v15873_v31  ;;  %v5388_v63 = vpop.f32.mrf.mxu3 }
0x147d   : > { %v6498_v0 = vsub.f32 1.0, %v6497_v40  ;;  %v6721_v3 = vmul.f32 %v6720_v36, %v15864_v17  ;;  %v6757_v32 = vmul.f32 %v6756_v50, %v15924_v25  ;;  %v6767_v55 = vadd.f32 0.001143296, %v6766_v12 }
0x147e   : > { %v15972_v26 = vmul.f32 %v6484_v9, %v15763_v2  ;;  %v6505_v13 = vand.u32 2147483647, %v15911_v10  ;;  %v6523_v30 = vmul.f32 %v6522_v18, %v15824_v1  ;;  %v6734_v57 = vmul.f32 %v6733_v21, %v15864_v17 }
0x147f   : > { %v15977_v62 = vpop.eup %11622  ;;  %v6629_v31 = vsel %vm15955_vm14, %v6628_v11, %v6624_v37  ;;  %vm6501_vm0 = vweird.f32 %v15911_v10  ;;  %v6758_v36 = vadd.f32 0.0036580483, %v6757_v32  ;;  %v6768_v12 = vmul.f32 %v6767_v55, %v15924_v25 }
0x1480   : > { %v6864_v2 = vpack.c.bf16 %v15505_v43, %v15402_v46  ;;  %v6507_v9 = vand.u32 2147483648, %v15911_v10  ;;  %v6537_v1 = vmul.f32 %v15977_v62, %v15936_v45  ;;  %v15988_v18 = vadd.f32 1.0, %v6734_v57 }
0x1481   : > { %v15991_v7 = vadd.f32 %v5359_v54, %v14298_v6  ;;  %v6499_v52 = vmul.f32 %v15945_v44, %v6498_v0  ;;  %v6722_v11 = vadd.f32 0.18741608, %v6721_v3  ;;  %v6759_v40 = vmul.f32 %v6758_v36, %v15924_v25 }
0x1482   : > { %v6769_v50 = vadd.f32 0.014752088, %v6768_v12  ;;  %7168 = vmatmul.bf16.gmra.mxu1 %v6864_v2  ;;  %v15995_v37 = vmul.f32 %v6629_v31, %v6605_v29  ;;  %v6538_v46 = vsub.f32 1.0, %v6537_v1  ;;  %11624 = vrcp.f32 %v15988_v18 }
0x1483   : > { %v15999_v43 = vadd.f32 %v5388_v63, %v18265_v15  ;;  %vm16001_vm5 = vcmp.eq.f32.partialorder %v6505_v13, 8.507059e+37  ;;  %v6524_v6 = vadd.f32 1.1283791, %v6523_v30  ;;  %v6760_v32 = vadd.f32 0.05243302, %v6759_v40 }
0x1484   : > { %v6770_v0 = vmul.f32 %v6769_v50, %v15924_v25  ;;  %vm6502_vm7 = vweird.f32 %v15945_v44  ;;  %v6508_v3 = vor.u32 1.1754944e-38, %v6507_v9  ;;  %v6547_v29 = vand.u32 2147483648, %v15936_v45 }
0x1485   : > { %v16009_v55 = vmul.f32 0.70710677, %v15991_v7  ;;  %v6500_v54 = vadd.f32 %v15945_v44, %v6499_v52  ;;  %v6723_v15 = vmul.f32 %v6722_v11, %v15864_v17  ;;  %v6761_v13 = vmul.f32 %v6760_v32, %v15924_v25  ;;  %vm16031_vm9 = vmor %vm6501_vm0, %vm6502_vm7 }
0x1486   : > { %v6771_v57 = vadd.f32 0.112945676, %v6770_v0  ;;  %v6539_v31 = vmul.f32 %v15977_v62, %v6538_v46  ;;  %v16019_v12 = vmul.f32 0.70710677, %v15999_v43  ;;  %v6525_v63 = vmul.f32 %v6524_v6, %v15782_v20 }
0x1487   : > { %v6633_v36 = vmul.f32 %v16009_v55, %v16009_v55  ;;  %vm6541_vm8 = vweird.f32 %v15936_v45  ;;  %v6545_v2 = vand.u32 2147483647, %v15936_v45  ;;  %v6548_v52 = vor.u32 1.1754944e-38, %v6547_v29 }
0x1488   : > { %v6772_v17 = vmul.f32 %v6771_v57, %v15924_v25  ;;  %v16025_v9 = vpop.eup %11624  ;;  %v6762_v11 = vadd.f32 0.18741608, %v6761_v13  ;;  %v6673_v20 = vmul.f32 %v16019_v12, %v16019_v12  ;;  %v6504_v50 = vsel %vm16031_vm9, %v15945_v44, %v6500_v54 }
0x1489   : > { %v16035_v40 = vmin.f32 %v6633_v36, 16.0  ;;  %vm6542_vm10 = vweird.f32 %v15977_v62  ;;  %v6724_v46 = vadd.f32 1.1283791, %v6723_v15  ;;  %v6737_v10 = vmul.f32 %v16025_v9, %v15988_v18 }
0x148a   : > { %v6540_v6 = vadd.f32 %v15977_v62, %v6539_v31  ;;  %v6745_v32 = vand.u32 2147483647, %v15988_v18  ;;  %v6773_v0 = vadd.f32 0.4994258, %v6772_v17  ;;  %v6747_v57 = vand.u32 2147483648, %v15988_v18  ;;  %vm16060_vm11 = vmor %vm6541_vm8, %vm6542_vm10 }
0x148b   : > { %v6635_v29 = vmul.f32 2.1237322e-06, %v16035_v40  ;;  %v6738_v13 = vsub.f32 1.0, %v6737_v10  ;;  %v6646_v36 = vmul.f32 3.8918573e-05, %v16035_v40  ;;  %v16050_v1 = vmin.f32 %v6673_v20, 16.0 }
0x148c   : > { %v6509_v44 = vsel %vm16001_vm5, %v6508_v3, %v6504_v50  ;;  %v6763_v54 = vmul.f32 %v6762_v11, %v15924_v25  ;;  %v6774_v15 = vmul.f32 %v6773_v0, %v15924_v25  ;;  %v6544_v25 = vsel %vm16060_vm11, %v15977_v62, %v6540_v6 }
0x148d   : > { %v6636_v31 = vadd.f32 0.00028619796, %v6635_v29  ;;  %v6739_v10 = vmul.f32 %v16025_v9, %v6738_v13  ;;  %v6647_v20 = vadd.f32 0.001143296, %v6646_v36  ;;  %v6675_v30 = vmul.f32 2.1237322e-06, %v16050_v1 }
0x148e   : > { %v6686_v21 = vmul.f32 3.8918573e-05, %v16050_v1  ;;  %vm6742_vm12 = vweird.f32 %v16025_v9  ;;  %v16071_v3 = vadd.f32 1.0, %v6774_v15  ;;  %vm6546_vm13 = vcmp.eq.f32.partialorder %v6545_v2, 8.507059e+37 }
0x148f   : > { %v6637_v45 = vmul.f32 %v6636_v31, %v16035_v40  ;;  %v6740_v11 = vadd.f32 %v16025_v9, %v6739_v10  ;;  %v6648_v50 = vmul.f32 %v6647_v20, %v16035_v40  ;;  %v6676_v0 = vadd.f32 0.00028619796, %v6675_v30 }
0x1490   : > { %v6687_v29 = vadd.f32 0.001143296, %v6686_v21  ;;  %v6725_v13 = vmul.f32 %v6724_v46, %v15819_v53  ;;  %v6764_v36 = vadd.f32 1.1283791, %v6763_v54  ;;  %11626 = vrcp.f32 %v16071_v3  ;;  %v7207_v21 = vpop.xlane.xlu1 %7206 }
0x1491   : > { %v6549_v17 = vsel %vm6546_vm13, %v6548_v52, %v6544_v25  ;;  %vm6741_vm1 = vweird.f32 %v15988_v18  ;;  %v6638_v62 = vadd.f32 0.0036580483, %v6637_v45  ;;  %v6649_v6 = vadd.f32 0.014752088, %v6648_v50  ;;  %v7235_v18 = vpop.xlane.xlu2 %7234  ;;  %v7237_v25 = vpop.xlane.xlu0 %7236 }
0x1492   : > { %v16080_v15 = vmul.f32 %v6509_v44, %v15972_v26  ;;  %vm16084_vm3 = vmor %vm6741_vm1, %vm6742_vm12  ;;  %vm16088_vm4 = vcmp.eq.f32.partialorder %v6745_v32, 8.507059e+37  ;;  %v6677_v53 = vmul.f32 %v6676_v0, %v16050_v1  ;;  %v6688_v2 = vmul.f32 %v6687_v29, %v16050_v1 }
0x1493   : > { %v6744_v26 = vsel %vm16084_vm3, %v16025_v9, %v6740_v11  ;;  %v6748_v52 = vor.u32 1.1754944e-38, %v6747_v57  ;;  %v6639_v46 = vmul.f32 %v6638_v62, %v16035_v40  ;;  %v6650_v44 = vmul.f32 %v6649_v6, %v16035_v40 }
0x1494   : > { %v16099_v54 = vmul.f32 %v6549_v17, %v6525_v63  ;;  %v16102_v32 = vmul.f32 %v6764_v36, %v15898_v4  ;;  %v6678_v10 = vadd.f32 0.0036580483, %v6677_v53  ;;  %v6689_v20 = vadd.f32 0.014752088, %v6688_v2 }
0x1495   : > { %vm6781_vm15 = vweird.f32 %v16071_v3  ;;  %v6785_v45 = vand.u32 2147483647, %v16071_v3  ;;  %v6640_v50 = vadd.f32 0.05243302, %v6639_v46  ;;  %v6651_v9 = vadd.f32 0.112945676, %v6650_v44 }
0x1496   : > { %v7250_v57 = vmul.f32 %v7235_v18, %v18234_v5  ;;  %v11627_v11 = vpop.eup %11626  ;;  %v6749_v63 = vsel %vm16088_vm4, %v6748_v52, %v6744_v26  ;;  %v6787_v0 = vand.u32 2147483648, %v16071_v3  ;;  %v6679_v4 = vmul.f32 %v6678_v10, %v16050_v1 }
0x1497   : > { %v6690_v29 = vmul.f32 %v6689_v20, %v16050_v1  ;;  %v6777_v36 = vmul.f32 %v11627_v11, %v16071_v3  ;;  %v6641_v17 = vmul.f32 %v6640_v50, %v16035_v40  ;;  %v7216_v62 = vmul.f32 %v7207_v21, %v18234_v5 }
0x1498   : > { %v7251_v6 = vmul.f32 %v7237_v25, %v18234_v5  ;;  %v6652_v31 = vmul.f32 %v6651_v9, %v16035_v40  ;;  %v6680_v53 = vadd.f32 0.05243302, %v6679_v4  ;;  %v16117_v30 = vadd.f32 1e-05, %v7250_v57  ;;  %v10885_v4 = vld [vmem:[#allocation23 + $0xf4] sm:$0xf0] }
0x1499   : > { %v6691_v2 = vadd.f32 0.112945676, %v6690_v29  ;;  %v6750_v18 = vmul.f32 %v6749_v63, %v6725_v13  ;;  %v6778_v26 = vsub.f32 1.0, %v6777_v36  ;;  %vm16119_vm2 = vcmp.eq.f32.partialorder %v6785_v45, 8.507059e+37  ;;  %v10554_v13 = vld [vmem:[#allocation23 + $0xe8] sm:$0xf] }
0x149a   : > { %v6642_v46 = vadd.f32 0.18741608, %v6641_v17  ;;  %v6653_v44 = vadd.f32 0.4994258, %v6652_v31  ;;  %v6681_v10 = vmul.f32 %v6680_v53, %v16050_v1  ;;  %11628 = vrsqrt.f32 %v16117_v30 }
0x149b   : > { %v6692_v20 = vmul.f32 %v6691_v2, %v16050_v1  ;;  %v6779_v21 = vmul.f32 %v11627_v11, %v6778_v26  ;;  %vm6782_vm6 = vweird.f32 %v11627_v11  ;;  %v16127_v25 = vsub.f32 %v14745_v60, %v7216_v62  ;;  %v10556_v26 = vld [vmem:[#allocation23 + $0xf8] sm:$0xf0] }
0x149c   : > { %v16129_v50 = vadd.f32 1e-05, %v7251_v6  ;;  %v6654_v45 = vmul.f32 %v6653_v44, %v16035_v40  ;;  %v6682_v9 = vadd.f32 0.18741608, %v6681_v10  ;;  %v6867_v63 = vpack.c.bf16 %v15750_v24, %v15549_v35  ;;  %vm16137_vm14 = vmor %vm6781_vm15, %vm6782_vm6  ;;  %v10532_v10 = vld [vmem:[#allocation23 + $0xd0] sm:$0xf0] }
0x149d   : > { %v6693_v57 = vadd.f32 0.4994258, %v6692_v20  ;;  %v10302_v29 = vclamps-f32 %v6750_v18, 1.0  ;;  %v6780_v36 = vadd.f32 %v11627_v11, %v6779_v21  ;;  %v6788_v17 = vor.u32 1.1754944e-38, %v6787_v0  ;;  %v10883_v18 = vld [vmem:[#allocation23 + $0xec] sm:$0xf] }
0x149e   : > { %11630 = vrsqrt.f32 %v16129_v50  ;;  %v6643_v6 = vmul.f32 %v6642_v46, %v16035_v40  ;;  %v16142_v31 = vadd.f32 1.0, %v6654_v45  ;;  %7144 = vmatmul.bf16.gmra.mxu0 %v6867_v63  ;;  %v6868_v35 = vpack.c.bf16 %v15909_v61, %v15580_v58  ;;  %v10538_v21 = vld [vmem:[#allocation23 + $0xc8] sm:$0xf]  ;;  %v10878_v61 = vld [vmem:[#allocation23 + $0xc4] sm:$0xf] }
0x149f   : > { %v6694_v53 = vmul.f32 %v6693_v57, %v16050_v1  ;;  %v6784_v24 = vsel %vm16137_vm14, %v11627_v11, %v6780_v36  ;;  %v6683_v0 = vmul.f32 %v6682_v9, %v16050_v1  ;;  %v7232_v3 = vmul.f32 %v16127_v25, %v16127_v25  ;;  %v7209_v9 = vpop.xlane.xlu2 %7208  ;;  %v10881_v57 = vld [vmem:[#allocation23 + $0xd4] sm:$0xf0] }
0x14a0   : > { %v10555_v2 = vor.u32 %v10885_v4, %v10554_v13  ;;  %v16152_v40 = vpop.eup %11628  ;;  %v18355_v46 = vclamps-f32 %v15995_v37, 1.0  ;;  %v6789_v58 = vsel %vm16119_vm2, %v6788_v17, %v6784_v24  ;;  %11632 = vrcp.f32 %v16142_v31  ;;  %7173 = vmatmul.bf16.gmra.mxu1 %v6868_v35  ;;  %v10540_v35 = vld [vmem:[#allocation23 + $0xd8] sm:$0xf0]  ;;  %v10546_v24 = vld [vmem:[#allocation23 + $0xe0] sm:$0xf] }
0x14a1   : > { %v6823_v1 = vadd.f32 1.0, %v10302_v29  ;;  %v6790_v11 = vmul.f32 %v6789_v58, %v16102_v32  ;;  %v16162_v20 = vadd.f32 1.0, %v6694_v53  ;;  %7246 = vadd.xlane.f32.xlu1 %v7232_v3  ;;  %v6644_v37 = vadd.f32 1.1283791, %v6643_v6  ;;  %v10879_v53 = vld [vmem:[#allocation23 + $0xcc] sm:$0xf] }
0x14a2   : > { %v6820_v44 = vadd.f32 1.0, %v18355_v46  ;;  %7705 = vmatpush.bf16.msra.mxu0 %v10555_v2  ;;  %v6667_v13 = vand.u32 2147483648, %v16142_v31  ;;  %v7267_v52 = vmul.f32 %v16152_v40, %v16117_v30  ;;  %v10559_v45 = vor.u32 %v10883_v18, %v10556_v26  ;;  %v10877_v26 = vld [vmem:[#allocation23 + $0xb4] sm:$0xf0] }
0x14a3   : > { %v10303_v4 = vclamps-f32 %v6790_v11, 1.0  ;;  %v6665_v29 = vand.u32 2147483647, %v16142_v31  ;;  %v6684_v32 = vadd.f32 1.1283791, %v6683_v0  ;;  %11634 = vrcp.f32 %v16162_v20 }
0x14a4   : > { %v16167_v63 = vpop.eup %11630  ;;  %v6845_v36 = vmul.f32 %v15920_v59, %v15682_v22  ;;  %v6846_v17 = vmul.f32 %v15926_v42, %v15686_v33  ;;  %v16177_v62 = vmul.f32 %v15961_v34, %v15723_v38  ;;  %v7268_v6 = vmul.f32 %v16152_v40, %v7267_v52  ;;  %7734 = vmatpush.bf16.msrb.mxu1 %v10559_v45  ;;  %v10884_v59 = vld [vmem:[#allocation23 + $0xec] sm:$0xf0]  ;;  %v10882_v38 = vld [vmem:[#allocation23 + $0xe4] sm:$0xf]  ;;  %v10548_v42 = vld [vmem:[#allocation23 + $0xf0] sm:$0xf0] }
0x14a5   : > { %v16181_v0 = vmul.f32 %v6820_v44, %v15737_v49  ;;  %v16184_v3 = vmul.f32 %v6823_v1, %v15918_v27  ;;  %v7277_v22 = vmul.f32 %v16167_v63, %v16129_v50  ;;  %v7217_v33 = vmul.f32 %v7209_v9, %v18234_v5  ;;  %v10522_v27 = vld [vmem:[#allocation23 + $0xa8] sm:$0xf]  ;;  %v10875_v11 = vld [vmem:[#allocation23 + $0xac] sm:$0xf]  ;;  %v10530_v9 = vld [vmem:[#allocation23 + $0xc0] sm:$0xf] }
0x14a6   : > { %v16189_v34 = vpop.eup %11632  ;;  %v16192_v2 = vmul.f32 %v6644_v37, %v16009_v55  ;;  %vm6661_vm0 = vweird.f32 %v16142_v31  ;;  %v16195_v49 = vor.u32 1.1754944e-38, %v6667_v13  ;;  %v10539_v18 = vor.u32 %v10881_v57, %v10538_v21  ;;  %v10524_v37 = vld [vmem:[#allocation23 + $0xb8] sm:$0xf0]  ;;  %v10880_v57 = vld [vmem:[#allocation23 + $0xcc] sm:$0xf0] }
0x14a7   : > { %v6824_v46 = vadd.f32 1.0, %v10303_v4  ;;  %v6657_v44 = vmul.f32 %v16189_v34, %v16142_v31  ;;  %vm16199_vm5 = vcmp.eq.f32.partialorder %v6665_v29, 8.507059e+37  ;;  %v16204_v1 = vmul.f32 %v6684_v32, %v16019_v12 }
0x14a8   : > { %v7278_v55 = vmul.f32 %v16167_v63, %v7277_v22  ;;  %vm6701_vm7 = vweird.f32 %v16162_v20  ;;  %v16208_v21 = vmul.f32 0.5, %v7268_v6  ;;  %v16211_v13 = vsub.f32 %v14780_v8, %v7217_v33  ;;  %7706 = vmatpush.bf16.msra.mxu0 %v10539_v18  ;;  %v10508_v18 = vld [vmem:[#allocation23 + $0x98] sm:$0xf0] }
0x14a9   : > { %v10543_v52 = vor.u32 %v10879_v53, %v10540_v35  ;;  %v6865_v45 = vpack.c.bf16 %v6845_v36, %v15709_v51  ;;  %v16214_v4 = vpop.eup %11634  ;;  %v6658_v12 = vsub.f32 1.0, %v6657_v44  ;;  %v6866_v32 = vpack.c.bf16 %v6846_v17, %v15727_v41  ;;  %v10506_v36 = vld [vmem:[#allocation23 + $0x88] sm:$0xf] }
0x14aa   : > { %v7279_v29 = vmul.f32 0.5, %v7278_v55  ;;  %v10547_v22 = vor.u32 %v10884_v59, %v10546_v24  ;;  %v6697_v6 = vmul.f32 %v16214_v4, %v16162_v20  ;;  %v6705_v33 = vand.u32 2147483647, %v16162_v20  ;;  %v10873_v24 = vld [vmem:[#allocation23 + $0x94] sm:$0xf0] }
0x14ab   : > { %v6707_v53 = vand.u32 2147483648, %v16162_v20  ;;  %vm7273_vm8 = vweird.f32 %v16152_v40  ;;  %vm7282_vm9 = vweird.f32 %v16129_v50  ;;  %7735 = vmatpush.bf16.msrb.mxu1 %v10543_v52  ;;  %7086 = vmatmul.bf16.gmra.mxu2 %v6865_v45  ;;  %v10551_v51 = vor.u32 %v10882_v38, %v10548_v42  ;;  %v10871_v59 = vld [vmem:[#allocation23 + $0x8c] sm:$0xf]  ;;  %v10514_v38 = vld [vmem:[#allocation23 + $0xa0] sm:$0xf] }
0x14ac   : > { %v6659_v41 = vmul.f32 %v16189_v34, %v6658_v12  ;;  %vm6662_vm10 = vweird.f32 %v16189_v34  ;;  %7115 = vmatmul.bf16.gmra.mxu3 %v6866_v32  ;;  %7647 = vmatpush.bf16.msrb.mxu2 %v10547_v22  ;;  %v7233_v17 = vmul.f32 %v16211_v13, %v16211_v13  ;;  %v10523_v35 = vor.u32 %v10877_v26, %v10522_v27  ;;  %v10876_v42 = vld [vmem:[#allocation23 + $0xac] sm:$0xf0]  ;;  %v10874_v27 = vld [vmem:[#allocation23 + $0xa4] sm:$0xf]  ;;  %v10516_v26 = vld [vmem:[#allocation23 + $0xb0] sm:$0xf0]  ;;  %v7239_v22 = vpop.xlane.xlu0 %7238 }
0x14ad   : > { %v6698_v44 = vsub.f32 1.0, %v6697_v6  ;;  %v7280_v55 = vsub.f32 1.5, %v7279_v29  ;;  %7676 = vmatpush.bf16.msrb.mxu3 %v10551_v51  ;;  %v10527_v52 = vor.u32 %v10875_v11, %v10524_v37  ;;  %v10531_v45 = vor.u32 %v10880_v57, %v10530_v9  ;;  %vm16235_vm12 = vmor %vm6661_vm0, %vm6662_vm10  ;;  %v10490_v57 = vld [vmem:[#allocation23 + $0x68] sm:$0xf]  ;;  %v10867_v6 = vld [vmem:[#allocation23 + $0x6c] sm:$0xf] }
0x14ae   : > { %v6856_v12 = vmul.f32 %v6824_v46, %v15967_v56  ;;  %v6660_v8 = vadd.f32 %v16189_v34, %v6659_v41  ;;  %vm6702_vm11 = vweird.f32 %v16214_v4  ;;  %v7270_v32 = vsub.f32 1.5, %v16208_v21  ;;  %7248 = vadd.xlane.f32.xlu2 %v7233_v17  ;;  %7707 = vmatpush.bf16.msra.mxu0 %v10523_v35  ;;  %v10869_v21 = vld [vmem:[#allocation23 + $0x74] sm:$0xf0]  ;;  %v10492_v51 = vld [vmem:[#allocation23 + $0x78] sm:$0xf0] }
0x14af   : > { %v6699_v56 = vmul.f32 %v16214_v4, %v6698_v44  ;;  %7736 = vmatpush.bf16.msrb.mxu1 %v10527_v52  ;;  %v10535_v46 = vor.u32 %v10878_v61, %v10532_v10  ;;  %v10507_v37 = vor.u32 %v10873_v24, %v10506_v36  ;;  %v10511_v9 = vor.u32 %v10871_v59, %v10508_v18  ;;  %vm16258_vm3 = vmor %vm6701_vm7, %vm6702_vm11  ;;  %v10870_v24 = vld [vmem:[#allocation23 + $0x84] sm:$0xf]  ;;  %v10500_v59 = vld [vmem:[#allocation23 + $0x90] sm:$0xf0] }
0x14b0   : > { %v6664_v29 = vsel %vm16235_vm12, %v16189_v34, %v6660_v8  ;;  %vm16243_vm13 = vcmp.eq.f32.partialorder %v6705_v33, 8.507059e+37  ;;  %vm7283_vm1 = vweird.f32 %v16167_v63  ;;  %7648 = vmatpush.bf16.msrb.mxu2 %v10531_v45  ;;  %v10515_v31 = vor.u32 %v10876_v42, %v10514_v38  ;;  %v10498_v34 = vld [vmem:[#allocation23 + $0x80] sm:$0xf]  ;;  %v10872_v33 = vld [vmem:[#allocation23 + $0x8c] sm:$0xf0] }
0x14b1   : > { %v6669_v10 = vsel %vm16199_vm5, %v16195_v49, %v6664_v29  ;;  %v6700_v61 = vadd.f32 %v16214_v4, %v6699_v56  ;;  %v7281_v36 = vmul.f32 %v16167_v63, %v7280_v55  ;;  %7677 = vmatpush.bf16.msrb.mxu3 %v10535_v46  ;;  %v10519_v8 = vor.u32 %v10874_v27, %v10516_v26  ;;  %v10474_v55 = vld [vmem:[#allocation23 + $0x48] sm:$0xf]  ;;  %v10865_v52 = vld [vmem:[#allocation23 + $0x54] sm:$0xf0]  ;;  %vm16277_vm4 = vmor %vm7282_vm9, %vm7283_vm1 }
0x14b2   : > { %v6670_v41 = vmul.f32 %v6669_v10, %v16192_v2  ;;  %v6708_v58 = vor.u32 1.1754944e-38, %v6707_v53  ;;  %7708 = vmatpush.bf16.msra.mxu0 %v10507_v37  ;;  %v6871_v49 = vpack.c.bf16 %v16184_v3, %v16177_v62  ;;  %v6872_v35 = vpack.c.bf16 %v6856_v12, %v16181_v0  ;;  %v10476_v42 = vld [vmem:[#allocation23 + $0x58] sm:$0xf0]  ;;  %v10868_v27 = vld [vmem:[#allocation23 + $0x6c] sm:$0xf0] }
0x14b3   : > { %v6704_v2 = vsel %vm16258_vm3, %v16214_v4, %v6700_v61  ;;  %v7271_v18 = vmul.f32 %v16152_v40, %v7270_v32  ;;  %7737 = vmatpush.bf16.msrb.mxu1 %v10511_v9  ;;  %v10491_v20 = vor.u32 %v10869_v21, %v10490_v57  ;;  %v10495_v44 = vor.u32 %v10867_v6, %v10492_v51  ;;  %v10863_v4 = vld [vmem:[#allocation23 + $0x4c] sm:$0xf]  ;;  %v10482_v32 = vld [vmem:[#allocation23 + $0x60] sm:$0xf]  ;;  %v10484_v46 = vld [vmem:[#allocation23 + $0x70] sm:$0xf0] }
0x14b4   : > { %v18364_v53 = vclamps-f32 %v16080_v15, 1.0  ;;  %v10300_v38 = vclamps-f32 %v6670_v41, 1.0  ;;  %v6709_v62 = vsel %vm16243_vm13, %v6708_v58, %v6704_v2  ;;  %7649 = vmatpush.bf16.msrb.mxu2 %v10515_v31  ;;  %7149 = vmatmul.bf16.gmra.mxu0 %v6871_v49  ;;  %v10499_v3 = vor.u32 %v10872_v33, %v10498_v34  ;;  %v10458_v21 = vld [vmem:[#allocation23 + $0x28] sm:$0xf]  ;;  %v10861_v29 = vld [vmem:[#allocation23 + $0x34] sm:$0xf0] }
0x14b5   : > { %v6710_v15 = vmul.f32 %v6709_v62, %v16204_v1  ;;  %vm7272_vm15 = vweird.f32 %v16117_v30  ;;  %v7285_v12 = vsel %vm16277_vm4, %v16167_v63, %v7281_v36  ;;  %7678 = vmatpush.bf16.msrb.mxu3 %v10519_v8  ;;  %7178 = vmatmul.bf16.gmra.mxu1 %v6872_v35  ;;  %v10503_v50 = vor.u32 %v10870_v24, %v10500_v59  ;;  %v10866_v1 = vld [vmem:[#allocation23 + $0x64] sm:$0xf]  ;;  %v10460_v61 = vld [vmem:[#allocation23 + $0x38] sm:$0xf0]  ;;  %v7241_v36 = vpop.xlane.xlu1 %7240  ;;  %v10466_v41 = vld [vmem:[#allocation23 + $0x40] sm:$0xf] }
0x14b6   : > { %v6817_v45 = vadd.f32 1.0, %v18364_v53  ;;  %v5477_v26 = vmul.f32 0.5, %v15991_v7  ;;  %v6821_v11 = vadd.f32 1.0, %v10300_v38  ;;  %vm16289_vm2 = vmor %vm7272_vm15, %vm7273_vm8  ;;  %7709 = vmatpush.bf16.msra.mxu0 %v10491_v20  ;;  %v10475_v30 = vor.u32 %v10865_v52, %v10474_v55  ;;  %v10864_v58 = vld [vmem:[#allocation23 + $0x4c] sm:$0xf0] }
0x14b7   : > { %v18369_v63 = vclamps-f32 %v16099_v54, 1.0  ;;  %v10301_v9 = vclamps-f32 %v6710_v15, 1.0  ;;  %v7275_v57 = vsel %vm16289_vm2, %v16152_v40, %v7271_v18  ;;  %7738 = vmatpush.bf16.msrb.mxu1 %v10495_v44  ;;  %v10479_v7 = vor.u32 %v10863_v4, %v10476_v42  ;;  %v10859_v54 = vld [vmem:[#allocation23 + $0x2c] sm:$0xf]  ;;  %v16305_v40 = vld [vmem:[%s18370_s3] ss:$0 sm:$0xff] }
0x14b8   : > { %v6849_v31 = vmul.f32 %v6817_v45, %v15915_v47  ;;  %v5474_v6 = vmul.f32 0.5, %v15760_v39  ;;  %v6853_v51 = vmul.f32 %v6821_v11, %v5477_v26  ;;  %v7347_v10 = vmul.f32 %v7285_v12, %v14758_v28  ;;  %7650 = vmatpush.bf16.msrb.mxu2 %v10499_v3  ;;  %v10862_v49 = vld [vmem:[#allocation23 + $0x44] sm:$0xf]  ;;  %v10468_v35 = vld [vmem:[#allocation23 + $0x50] sm:$0xf0] }
0x14b9   : > { %v6818_v37 = vadd.f32 1.0, %v18369_v63  ;;  %v5478_v8 = vmul.f32 0.5, %v15999_v43  ;;  %v6822_v34 = vadd.f32 1.0, %v10301_v9  ;;  %7679 = vmatpush.bf16.msrb.mxu3 %v10503_v50  ;;  %v10483_v33 = vor.u32 %v10868_v27, %v10482_v32  ;;  %v10442_v18 = vld [vmem:[#allocation23 + $0x8] sm:$0xf] }
0x14ba   : > { %v10487_v47 = vor.u32 %v10866_v1, %v10484_v46  ;;  %v7346_v39 = vmul.f32 %v7275_v57, %v14739_v16  ;;  %7710 = vmatpush.bf16.msra.mxu0 %v10475_v30  ;;  %v6869_v28 = vpack.c.bf16 %v6853_v51, %v6849_v31  ;;  %v10459_v17 = vor.u32 %v10861_v29, %v10458_v21  ;;  %v10857_v20 = vld [vmem:[#allocation23 + $0x14] sm:$0xf0]  ;;  %v10855_v16 = vld [vmem:[#allocation23 + $0xc] sm:$0xf]  ;;  %v10444_v52 = vld [vmem:[#allocation23 + $0x18] sm:$0xf0] }
0x14bb   : > { %v7252_v43 = vmul.f32 %v7239_v22, %v18234_v5  ;;  %v6850_v24 = vmul.f32 %v6818_v37, %v5474_v6  ;;  %v6854_v59 = vmul.f32 %v6822_v34, %v5478_v8  ;;  %7739 = vmatpush.bf16.msrb.mxu1 %v10479_v7  ;;  %v10463_v2 = vor.u32 %v10859_v54, %v10460_v61  ;;  %v16316_v45 = vld [vmem:[%s18371_s1] ss:$0 sm:$0xff]  ;;  %v10450_v3 = vld [vmem:[#allocation23 + $0x20] sm:$0xf]  ;;  %v10858_v50 = vld [vmem:[#allocation23 + $0x24] sm:$0xf]  ;;  %v7077_v34 = vpop.f32.mrf.mxu2 }
0x14bc   : > { %v7253_v44 = vmul.f32 %v7241_v36, %v18234_v5  ;;  %v7358_v55 = vmul.f32 %v16305_v40, %v7347_v10  ;;  %7091 = vmatmul.bf16.gmra.mxu2 %v6869_v28  ;;  %v10467_v62 = vor.u32 %v10864_v58, %v10466_v41  ;;  %v10471_v0 = vor.u32 %v10862_v49, %v10468_v35  ;;  %v10860_v12 = vld [vmem:[#allocation23 + $0x2c] sm:$0xf0]  ;;  %v10452_v32 = vld [vmem:[#allocation23 + $0x30] sm:$0xf0]  ;;  %v10434_v30 = vld [vmem:[#allocation23] sm:$0xf] }
0x14bd   : > { %v16311_v53 = vadd.f32 1e-05, %v7252_v43  ;;  %v6870_v38 = vpack.c.bf16 %v6854_v59, %v6850_v24  ;;  %7651 = vmatpush.bf16.msrb.mxu2 %v10483_v33  ;;  %7680 = vmatpush.bf16.msrb.mxu3 %v10487_v47  ;;  %v7357_v42 = vmul.f32 %v16305_v40, %v7346_v39  ;;  %v10443_v15 = vor.u32 %v10857_v20, %v10442_v18  ;;  %v10856_v46 = vld [vmem:[#allocation23 + $0xc] sm:$0xf0]  ;;  %v10854_v63 = vld [vmem:[#allocation23 + $0x4] sm:$0xf]  ;;  %v7135_v24 = vpop.f32.mrf.mxu0 }
0x14be   : > { %v7261_v4 = vadd.f32 1e-05, %v7253_v44  ;;  %7711 = vmatpush.bf16.msra.mxu0 %v10459_v17  ;;  %v10447_v27 = vor.u32 %v10855_v16, %v10444_v52  ;;  %v7369_v26 = vadd.f32 %v16316_v45, %v7358_v55  ;;  %v10451_v11 = vor.u32 %v10860_v12, %v10450_v3  ;;  %v10436_v37 = vld [vmem:[#allocation23 + $0x10] sm:$0xf0]  ;;  %v16326_v33 = vld [vmem:[%s18372_s4] ss:$0 sm:$0xff]  ;;  %v7106_v17 = vpop.f32.mrf.mxu3  ;;  %v7164_v16 = vpop.f32.mrf.mxu1 }
0x14bf   : > { %7120 = vmatmul.bf16.gmra.mxu3 %v6870_v38  ;;  %7740 = vmatpush.bf16.msrb.mxu1 %v10463_v2  ;;  %11636 = vrsqrt.f32 %v16311_v53  ;;  %v10455_v56 = vor.u32 %v10858_v50, %v10452_v32  ;;  %v7368_v1 = vadd.f32 %v16316_v45, %v7357_v42  ;;  %v10435_v57 = vor.u32 %v10856_v46, %v10434_v30  ;;  %v18373_v18 = vld [vmem:[#allocation57_spill] sm:$0xff]  ;;  %v18374_v42 = vld [vmem:[#allocation51_spill] sm:$0xff]  ;;  %v18375_v46 = vld [vmem:[#allocation50_spill] sm:$0xff]  ;;  %s9543_s1 = sshll.u32 %s9540_s23, 4  ;;  %s9544_s1 = int_to_ptr.hbm [resolvable:$true] %s9543_s1 }
0x14c0   : > { %11638 = vrsqrt.f32 %v7261_v4  ;;  %v10439_v7 = vor.u32 %v10854_v63, %v10436_v37  ;;  %vm7292_vm0 = vweird.f32 %v16311_v53  ;;  %v7078_v28 = vadd.f32 %v16326_v33, %v7077_v34  ;;  %s12203_s28 = sshra.s32 %s9544_s1, 4  ;;  %s12204_s28 = int_to_ptr.hbm [resolvable:$true] %s12203_s28 }
0x14c1   : > { %7652 = vmatpush.bf16.msrb.mxu2 %v10467_v62  ;;  %7681 = vmatpush.bf16.msrb.mxu3 %v10471_v0  ;;  %v7376_v9 = vpack.c.bf16 %v7369_v26, %v7368_v1  ;;  %v7243_v8 = vpop.xlane.xlu2 %7242  ;;  %vm7302_vm7 = vweird.f32 %v7261_v4  ;;  %s12205_s4 = scalar_lea.hbm %s12204_s28, 64  ;;  %p12210_p7 = scmp.lt.s32.totalorder %s12204_s28, %s18478_s16 }
0x14c2   : > { %7712 = vmatpush.bf16.msra.mxu0 %v10443_v15  ;;  %v7254_v47 = vmul.f32 %v7243_v8, %v18234_v5  ;;  %v7107_v43 = vadd.f32 %v7106_v17, %v7078_v28  ;;  %p12206_p1 = scmp.ne.s32.totalorder %s12204_s28, %s12205_s4 }
0x14c3   : > { %7741 = vmatpush.bf16.msrb.mxu1 %v10447_v27  ;;  %v7079_v59 = vpop.f32.mrf.mxu2 }
0x14c4   : > { %v7262_v58 = vadd.f32 1e-05, %v7254_v47  ;;  %v7080_v44 = vadd.f32 %v16326_v33, %v7079_v59  ;;  %v7136_v55 = vadd.f32 %v7135_v24, %v7107_v43  ;;  %v18376_v24 = vld [vmem:[#allocation52_spill] sm:$0xff]  ;;  %p12207_p3 = pnand %p12206_p1, %p12608_p0 }
0x14c5   : > { %7653 = vmatpush.bf16.msrb.mxu2 %v10451_v11  ;;  %7682 = vmatpush.bf16.msrb.mxu3 %v10455_v56  ;;  %v11637_v21 = vpop.eup %11636  ;;  %v7137_v32 = vpop.f32.mrf.mxu0 }
0x14c6   : > { %7713 = vmatmul.bf16.vlgmr.msra.gmra.mxu0 %v7376_v9  ;;  %7742 = vmatmul.bf16.vlgmr.msrb.gmra.mxu1 %v7376_v9  ;;  %v11639_v29 = vpop.eup %11638  ;;  %v7287_v22 = vmul.f32 %v11637_v21, %v16311_v53  ;;  %vm7293_vm6 = vweird.f32 %v11637_v21  ;;  %11640 = vrsqrt.f32 %v7262_v58  ;;  %v7165_v38 = vadd.f32 %v7164_v16, %v7136_v55  ;;  %v7108_v0 = vpop.f32.mrf.mxu3  ;;  %p12208_p13 = pneg %p12207_p3 }
0x14c7   : > { %v7297_v31 = vmul.f32 %v11639_v29, %v7261_v4  ;;  %vm7303_vm14 = vweird.f32 %v11639_v29  ;;  %vm7294_vm5 = vmor %vm7292_vm0, %vm7293_vm6  ;;  %v7166_v26 = vpop.f32.mrf.mxu1  ;;  %vm7312_vm10 = vweird.f32 %v7262_v58 }
0x14c8   : > { %v7288_v6 = vmul.f32 %v11637_v21, %v7287_v22  ;;  %vm7304_vm8 = vmor %vm7302_vm7, %vm7303_vm14  ;;  %v7184_v15 = vadd.f32 %v7165_v38, %v18374_v42  ;;  %v18377_v38 = vld [vmem:[#allocation46_spill] sm:$0xff] }
0x14c9   : > { %7654 = vmatpush.bf16.msrb.mxu2 %v10435_v57  ;;  %7683 = vmatpush.bf16.msrb.mxu3 %v10439_v7  ;;  %v7298_v51 = vmul.f32 %v11639_v29, %v7297_v31 }
0x14ca   : > { %v7289_v10 = vmul.f32 0.5, %v7288_v6  ;;  %9506 = vst [vmem:[%s16340_s9] sm:$0xff] %v7184_v15 }
0x14cb   : > { %v7299_v54 = vmul.f32 0.5, %v7298_v51  ;;  %v7082_v37 = vpop.f32.mrf.mxu2 }
0x14cc   : > { %7655 = vmatmul.bf16.vlgmr.msrb.gmra.mxu2 %v7376_v9  ;;  %v7290_v61 = vsub.f32 1.5, %v7289_v10  ;;  %v11641_v62 = vpop.eup %11640 }
0x14cd   : > { %v7300_v36 = vsub.f32 1.5, %v7299_v54  ;;  %v7307_v50 = vmul.f32 %v11641_v62, %v7262_v58  ;;  %vm7313_vm9 = vweird.f32 %v11641_v62  ;;  %v7140_v10 = vpop.f32.mrf.mxu0 }
0x14ce   : > { %v7291_v41 = vmul.f32 %v11637_v21, %v7290_v61  ;;  %vm7314_vm11 = vmor %vm7312_vm10, %vm7313_vm9 }
0x14cf   : > { %7684 = vmatmul.bf16.vlgmr.msrb.gmra.mxu3 %v7376_v9  ;;  %v7301_v39 = vmul.f32 %v11639_v29, %v7300_v36  ;;  %v7308_v11 = vmul.f32 %v11641_v62, %v7307_v50 }
0x14d0   : > { %v7295_v49 = vsel %vm7294_vm5, %v11637_v21, %v7291_v41  ;;  %v7083_v21 = vadd.f32 %v16326_v33, %v7082_v37 }
0x14d1   : > { %v7305_v35 = vsel %vm7304_vm8, %v11639_v29, %v7301_v39  ;;  %v7348_v2 = vmul.f32 %v7295_v49, %v15167_v19  ;;  %v7109_v19 = vadd.f32 %v7108_v0, %v7080_v44  ;;  %v7309_v57 = vmul.f32 0.5, %v7308_v11  ;;  %v7111_v29 = vpop.f32.mrf.mxu3 }
0x14d2   : > { %v7349_v20 = vmul.f32 %v7305_v35, %v18373_v18  ;;  %v7112_v6 = vadd.f32 %v7111_v29, %v7083_v21 }
0x14d3   : > { %v7359_v52 = vmul.f32 %v16305_v40, %v7348_v2  ;;  %v7138_v27 = vadd.f32 %v7137_v32, %v7109_v19  ;;  %v7310_v7 = vsub.f32 1.5, %v7309_v57  ;;  %v7084_v54 = vpop.f32.mrf.mxu2 }
0x14d4   : > { %v7360_v53 = vmul.f32 %v16305_v40, %v7349_v20  ;;  %v7085_v34 = vadd.f32 %v16326_v33, %v7084_v54  ;;  %v7141_v47 = vadd.f32 %v7140_v10, %v7112_v6 }
0x14d5   : > { %v7370_v3 = vadd.f32 %v16316_v45, %v7359_v52  ;;  %v7167_v30 = vadd.f32 %v7166_v26, %v7138_v27  ;;  %v7311_v31 = vmul.f32 %v11641_v62, %v7310_v7  ;;  %v7142_v2 = vpop.f32.mrf.mxu0 }
0x14d6   : > { %v7371_v4 = vadd.f32 %v16316_v45, %v7360_v53 }
0x14d7   : > { %v7185_v63 = vadd.f32 %v7167_v30, %v18375_v46  ;;  %v7315_v36 = vsel %vm7314_vm11, %v11641_v62, %v7311_v31 }
0x14d8   : > { %v7377_v12 = vpack.c.bf16 %v7371_v4, %v7370_v3  ;;  %v7350_v17 = vmul.f32 %v7315_v36, %v15622_v23 }
0x14d9   : > { %9507 = vst [vmem:[%s16340_s9 + $0x8] sm:$0xff] %v7185_v63  ;;  %v7113_v49 = vpop.f32.mrf.mxu3 }
0x14da   : > { %7718 = vmatmul.bf16.gmra.mxu0 %v7377_v12  ;;  %7747 = vmatmul.bf16.gmra.mxu1 %v7377_v12  ;;  %v7114_v43 = vadd.f32 %v7113_v49, %v7085_v34  ;;  %v7361_v20 = vmul.f32 %v16305_v40, %v7350_v17  ;;  %v18378_v34 = vld [vmem:[#allocation45_spill] sm:$0xff] }
0x14dc   : > { %7660 = vmatmul.bf16.gmra.mxu2 %v7377_v12  ;;  %v7143_v44 = vadd.f32 %v7142_v2, %v7114_v43  ;;  %v7372_v52 = vadd.f32 %v16316_v45, %v7361_v20  ;;  %v18380_v20 = vld [vmem:[#allocation44_spill] sm:$0xff] }
0x14df   : > { %7689 = vmatmul.bf16.gmra.mxu3 %v7377_v12 }
0x14ed   : > { %v7245_v56 = vpop.xlane.xlu0 %7244 }
0x14ee   : > { %v7255_v1 = vmul.f32 %v7245_v56, %v18234_v5 }
0x14f0   : > { %v7263_v9 = vadd.f32 1e-05, %v7255_v1 }
0x14f2   : > { %11642 = vrsqrt.f32 %v7263_v9  ;;  %vm7322_vm13 = vweird.f32 %v7263_v9 }
0x14f8   : > { %v11643_v22 = vpop.eup %11642 }
0x14f9   : > { %v7317_v51 = vmul.f32 %v11643_v22, %v7263_v9  ;;  %vm7323_vm12 = vweird.f32 %v11643_v22 }
0x14fa   : > { %vm7324_vm1 = vmor %vm7322_vm13, %vm7323_vm12 }
0x14fb   : > { %v7318_v61 = vmul.f32 %v11643_v22, %v7317_v51 }
0x14fd   : > { %v7319_v8 = vmul.f32 0.5, %v7318_v61 }
0x14ff   : > { %v7169_v41 = vpop.f32.mrf.mxu1  ;;  %v7320_v39 = vsub.f32 1.5, %v7319_v8 }
0x1500   : > { %v7170_v28 = vadd.f32 %v7169_v41, %v7141_v47 }
0x1501   : > { %v7321_v35 = vmul.f32 %v11643_v22, %v7320_v39 }
0x1502   : > { %v7186_v58 = vadd.f32 %v7170_v28, %v18376_v24 }
0x1503   : > { %v7325_v59 = vsel %vm7324_vm1, %v11643_v22, %v7321_v35 }
0x1504   : > { %9508 = vst [vmem:[%s16340_s9 + $0x10] sm:$0xff] %v7186_v58  ;;  %v7351_v18 = vmul.f32 %v7325_v59, %v15822_v14 }
0x1506   : > { %v7362_v16 = vmul.f32 %v16305_v40, %v7351_v18 }
0x1507   : > { %v7171_v55 = vpop.f32.mrf.mxu1 }
0x1508   : > { %v7172_v23 = vadd.f32 %v7171_v55, %v7143_v44  ;;  %v7373_v53 = vadd.f32 %v16316_v45, %v7362_v16 }
0x150a   : > { %v7187_v62 = vadd.f32 %v7172_v23, %v18377_v38  ;;  %v7378_v0 = vpack.c.bf16 %v7373_v53, %v7372_v52 }
0x150c   : > { %9509 = vst [vmem:[%s16340_s9 + $0x18] sm:$0xff] %v7187_v62  ;;  %7665 = vmatmul.bf16.gmra.mxu2 %v7378_v0  ;;  %7694 = vmatmul.bf16.gmra.mxu3 %v7378_v0 }
0x150d   : > { %7723 = vmatmul.bf16.gmra.mxu0 %v7378_v0  ;;  %7752 = vmatmul.bf16.gmra.mxu1 %v7378_v0 }
0x1514   : > { %v7247_v14 = vpop.xlane.xlu1 %7246 }
0x1515   : > { %v7256_v3 = vmul.f32 %v7247_v14, %v18234_v5 }
0x1517   : > { %v7264_v4 = vadd.f32 1e-05, %v7256_v3 }
0x1519   : > { %11644 = vrsqrt.f32 %v7264_v4  ;;  %vm7332_vm4 = vweird.f32 %v7264_v4 }
0x151b   : > { %v7145_v19 = vpop.f32.mrf.mxu0 }
0x151d   : > { %v7174_v11 = vpop.f32.mrf.mxu1 }
0x151f   : > { %v11645_v42 = vpop.eup %11644 }
0x1520   : > { %v7327_v15 = vmul.f32 %v11645_v42, %v7264_v4  ;;  %vm7333_vm3 = vweird.f32 %v11645_v42  ;;  %v18381_v4 = vld [vmem:[#allocation43_spill] sm:$0xff] }
0x1521   : > { %v7249_v12 = vpop.xlane.xlu2 %7248  ;;  %vm7334_vm15 = vmor %vm7332_vm4, %vm7333_vm3 }
0x1522   : > { %v7257_v50 = vmul.f32 %v7249_v12, %v18234_v5  ;;  %v7328_v32 = vmul.f32 %v11645_v42, %v7327_v15 }
0x1523   : > { %v7147_v56 = vpop.f32.mrf.mxu0 }
0x1524   : > { %v7265_v27 = vadd.f32 1e-05, %v7257_v50  ;;  %v7329_v26 = vmul.f32 0.5, %v7328_v32 }
0x1525   : > { %v7176_v57 = vpop.f32.mrf.mxu1 }
0x1526   : > { %11646 = vrsqrt.f32 %v7265_v27  ;;  %v7330_v30 = vsub.f32 1.5, %v7329_v26  ;;  %vm7342_vm6 = vweird.f32 %v7265_v27 }
0x1528   : > { %v7331_v46 = vmul.f32 %v11645_v42, %v7330_v30 }
0x152a   : > { %v7335_v5 = vsel %vm7334_vm15, %v11645_v42, %v7331_v46 }
0x152b   : > { %v7352_v10 = vmul.f32 %v7335_v5, %v16127_v25 }
0x152c   : > { %v11647_v1 = vpop.eup %11646 }
0x152d   : > { %v7337_v63 = vmul.f32 %v11647_v1, %v7265_v27  ;;  %vm7343_vm2 = vweird.f32 %v11647_v1  ;;  %v7363_v17 = vmul.f32 %v16305_v40, %v7352_v10 }
0x152e   : > { %v7087_v37 = vpop.f32.mrf.mxu2  ;;  %vm7344_vm14 = vmor %vm7342_vm6, %vm7343_vm2 }
0x152f   : > { %v7338_v9 = vmul.f32 %v11647_v1, %v7337_v63  ;;  %v7088_v7 = vadd.f32 %v16326_v33, %v7087_v37  ;;  %v7116_v21 = vpop.f32.mrf.mxu3  ;;  %v7374_v58 = vadd.f32 %v16316_v45, %v7363_v17 }
0x1531   : > { %v7339_v29 = vmul.f32 0.5, %v7338_v9  ;;  %v7117_v22 = vadd.f32 %v7116_v21, %v7088_v7  ;;  %v7150_v31 = vpop.f32.mrf.mxu0 }
0x1532   : > { %v7179_v49 = vpop.f32.mrf.mxu1 }
0x1533   : > { %v7340_v6 = vsub.f32 1.5, %v7339_v29  ;;  %v7146_v51 = vadd.f32 %v7145_v19, %v7117_v22 }
0x1535   : > { %v7341_v54 = vmul.f32 %v11647_v1, %v7340_v6  ;;  %v7175_v61 = vadd.f32 %v7174_v11, %v7146_v51 }
0x1536   : > { %v7089_v36 = vpop.f32.mrf.mxu2 }
0x1537   : > { %v7345_v8 = vsel %vm7344_vm14, %v11647_v1, %v7341_v54  ;;  %v7188_v47 = vadd.f32 %v7175_v61, %v18378_v34  ;;  %v7090_v41 = vadd.f32 %v16326_v33, %v7089_v36  ;;  %v7118_v28 = vpop.f32.mrf.mxu3 }
0x1538   : > { %v7353_v39 = vmul.f32 %v7345_v8, %v16211_v13  ;;  %v16373_v13 = vld [vmem:[%s18379_s10] sm:$0xf] }
0x1539   : > { %9510 = vst [vmem:[%s16340_s9 + $0x20] sm:$0xff] %v7188_v47  ;;  %v7119_v35 = vadd.f32 %v7118_v28, %v7090_v41  ;;  %v7152_v25 = vpop.f32.mrf.mxu0  ;;  %v16396_v50 = vperm.slane %v16373_v13, 3 }
0x153a   : > { %v7364_v43 = vmul.f32 %v16305_v40, %v7353_v39  ;;  %v16378_v40 = vperm.slane %v16373_v13, 2  ;;  %v7181_v23 = vpop.f32.mrf.mxu1 }
0x153b   : > { %v7148_v24 = vadd.f32 %v7147_v56, %v7119_v35  ;;  %v18382_v35 = vld [vmem:[#allocation49_spill] sm:$0xff] }
0x153c   : > { %v7375_v59 = vadd.f32 %v16316_v45, %v7364_v43 }
0x153d   : > { %v7177_v2 = vadd.f32 %v7176_v57, %v7148_v24 }
0x153e   : > { %v7379_v18 = vpack.c.bf16 %v7375_v59, %v7374_v58 }
0x153f   : > { %v7189_v44 = vadd.f32 %v7177_v2, %v18380_v20  ;;  %v7092_v55 = vpop.f32.mrf.mxu2 }
0x1540   : > { %v7093_v16 = vadd.f32 %v16326_v33, %v7092_v55  ;;  %7670 = vmatmul.bf16.gmra.mxu2 %v7379_v18  ;;  %7699 = vmatmul.bf16.gmra.mxu3 %v7379_v18 }
0x1541   : > { %9511 = vst [vmem:[%s16340_s9 + $0x28] sm:$0xff] %v7189_v44  ;;  %7728 = vmatmul.bf16.gmra.mxu0 %v7379_v18  ;;  %7757 = vmatmul.bf16.gmra.mxu1 %v7379_v18  ;;  %v16436_v18 = vperm.slane %v16373_v13, 0 }
0x1542   : > { %v7121_v45 = vpop.f32.mrf.mxu3 }
0x1543   : > { %v7122_v52 = vadd.f32 %v7121_v45, %v7093_v16  ;;  %v7714_v53 = vpop.f32.mrf.mxu0  ;;  %v7743_v32 = vpop.f32.mrf.mxu1 }
0x1544   : > { %v16382_v38 = vadd.f32 %v7714_v53, %v16378_v40  ;;  %v16399_v11 = vadd.f32 %v7743_v32, %v16396_v50 }
0x1545   : > { %v7151_v62 = vadd.f32 %v7150_v31, %v7122_v52 }
0x1546   : > { %v16385_v0 = vmul.f32 0.70710677, %v16382_v38  ;;  %v16404_v1 = vmul.f32 0.70710677, %v16399_v11 }
0x1547   : > { %v7180_v14 = vadd.f32 %v7179_v49, %v7151_v62  ;;  %v7094_v46 = vpop.f32.mrf.mxu2 }
0x1548   : > { %v7907_v3 = vmul.f32 %v16385_v0, %v16385_v0  ;;  %v7947_v9 = vmul.f32 %v16404_v1, %v16404_v1  ;;  %v7095_v57 = vadd.f32 %v16326_v33, %v7094_v46 }
0x1549   : > { %v7190_v19 = vadd.f32 %v7180_v14, %v18381_v4 }
0x154a   : > { %v16390_v42 = vmin.f32 %v7907_v3, 16.0  ;;  %v7123_v7 = vpop.f32.mrf.mxu3  ;;  %v16410_v5 = vmin.f32 %v7947_v9, 16.0 }
0x154b   : > { %9512 = vst [vmem:[%s16340_s9 + $0x30] sm:$0xff] %v7190_v19  ;;  %v7124_v29 = vadd.f32 %v7123_v7, %v7095_v57  ;;  %v7716_v22 = vpop.f32.mrf.mxu0  ;;  %v7745_v31 = vpop.f32.mrf.mxu1 }
0x154c   : > { %v7909_v15 = vmul.f32 2.1237322e-06, %v16390_v42  ;;  %v7920_v12 = vmul.f32 3.8918573e-05, %v16390_v42  ;;  %v7949_v10 = vmul.f32 2.1237322e-06, %v16410_v5  ;;  %v16416_v36 = vadd.f32 %v7716_v22, %v16378_v40 }
0x154d   : > { %v7153_v54 = vadd.f32 %v7152_v25, %v7124_v29  ;;  %v7960_v61 = vmul.f32 3.8918573e-05, %v16410_v5  ;;  %v16419_v33 = vadd.f32 %v7745_v31, %v16396_v50 }
0x154e   : > { %v7910_v27 = vadd.f32 0.00028619796, %v7909_v15  ;;  %v7921_v26 = vadd.f32 0.001143296, %v7920_v12  ;;  %v7950_v34 = vadd.f32 0.00028619796, %v7949_v10 }
0x154f   : > { %v7182_v47 = vadd.f32 %v7181_v23, %v7153_v54  ;;  %v7961_v41 = vadd.f32 0.001143296, %v7960_v61  ;;  %v16423_v39 = vmul.f32 0.70710677, %v16416_v36  ;;  %v16431_v58 = vmul.f32 0.70710677, %v16419_v33  ;;  %v7656_v16 = vpop.f32.mrf.mxu2 }
0x1550   : > { %v7911_v56 = vmul.f32 %v7910_v27, %v16390_v42  ;;  %v7922_v30 = vmul.f32 %v7921_v26, %v16390_v42  ;;  %v7951_v49 = vmul.f32 %v7950_v34, %v16410_v5  ;;  %v16453_v4 = vadd.f32 %v7656_v16, %v16436_v18 }
0x1551   : > { %v7191_v25 = vadd.f32 %v7182_v47, %v18382_v35  ;;  %v7962_v43 = vmul.f32 %v7961_v41, %v16410_v5  ;;  %v8067_v24 = vmul.f32 %v16423_v39, %v16423_v39  ;;  %v8107_v55 = vmul.f32 %v16431_v58, %v16431_v58 }
0x1552   : > { %v7912_v63 = vadd.f32 0.0036580483, %v7911_v56  ;;  %v7923_v37 = vadd.f32 0.014752088, %v7922_v30  ;;  %v7952_v2 = vadd.f32 0.0036580483, %v7951_v49  ;;  %v7685_v49 = vpop.f32.mrf.mxu3 }
0x1553   : > { %9513 = vst [vmem:[%s16340_s9 + $0x38] sm:$0xff] %v7191_v25  ;;  %v7963_v20 = vadd.f32 0.014752088, %v7962_v43  ;;  %v16438_v44 = vmin.f32 %v8067_v24, 16.0  ;;  %v16449_v3 = vmin.f32 %v8107_v55, 16.0  ;;  %s12209_s9 = scalar_lea.hbm %s18478_s16, 128 }
0x1554   : > { %v7924_v21 = vmul.f32 %v7923_v37, %v16390_v42  ;;  %v7913_v6 = vmul.f32 %v7912_v63, %v16390_v42  ;;  %v7953_v52 = vmul.f32 %v7952_v2, %v16410_v5  ;;  %v16461_v37 = vmul.f32 0.70710677, %v16453_v4  ;;  %p12211_p9 = scmp.lt.s32.totalorder %s12209_s9, %s12205_s4 }
0x1555   : > { %v7964_v53 = vmul.f32 %v7963_v20, %v16410_v5  ;;  %v8069_v62 = vmul.f32 2.1237322e-06, %v16438_v44  ;;  %v8080_v14 = vmul.f32 3.8918573e-05, %v16438_v44  ;;  %v8109_v56 = vmul.f32 2.1237322e-06, %v16449_v3 }
0x1556   : > { %v7925_v51 = vadd.f32 0.112945676, %v7924_v21  ;;  %v7914_v28 = vadd.f32 0.05243302, %v7913_v6  ;;  %v7954_v27 = vadd.f32 0.05243302, %v7953_v52  ;;  %v7827_v10 = vmul.f32 %v16461_v37, %v16461_v37  ;;  %p12212_p8 = por %p12211_p9, %p12210_p7 }
0x1557   : > { %v7965_v19 = vadd.f32 0.112945676, %v7964_v53  ;;  %v8070_v15 = vadd.f32 0.00028619796, %v8069_v62  ;;  %v8081_v12 = vadd.f32 0.001143296, %v8080_v14 }
0x1558   : > { %v7926_v8 = vmul.f32 %v7925_v51, %v16390_v42  ;;  %v7915_v45 = vmul.f32 %v7914_v28, %v16390_v42  ;;  %v8120_v63 = vmul.f32 3.8918573e-05, %v16449_v3  ;;  %v8110_v57 = vadd.f32 0.00028619796, %v8109_v56  ;;  %p12213_p4 = pnand %p12212_p8, %p12208_p13 }
0x1559   : > { %v7966_v26 = vmul.f32 %v7965_v19, %v16410_v5  ;;  %v8071_v30 = vmul.f32 %v8070_v15, %v16438_v44  ;;  %v8082_v46 = vmul.f32 %v8081_v12, %v16438_v44  ;;  %v7955_v6 = vmul.f32 %v7954_v27, %v16410_v5 }
0x155a   : > { %v7927_v17 = vadd.f32 0.4994258, %v7926_v8  ;;  %v7916_v32 = vadd.f32 0.18741608, %v7915_v45  ;;  %v8121_v22 = vadd.f32 0.001143296, %v8120_v63  ;;  %v8111_v34 = vmul.f32 %v8110_v57, %v16449_v3  ;;  %v7658_v57 = vpop.f32.mrf.mxu2 }
0x155b   : > { %v7967_v9 = vadd.f32 0.4994258, %v7966_v26  ;;  %v8072_v21 = vadd.f32 0.0036580483, %v8071_v30  ;;  %v8083_v29 = vadd.f32 0.014752088, %v8082_v46 }
0x155c   : > { %v7928_v59 = vmul.f32 %v7927_v17, %v16390_v42  ;;  %v7917_v54 = vmul.f32 %v7916_v32, %v16390_v42  ;;  %v8122_v28 = vmul.f32 %v8121_v22, %v16449_v3  ;;  %v16479_v17 = vperm.slane %v16373_v13, 1 }
0x155d   : > { %v7968_v51 = vmul.f32 %v7967_v9, %v16410_v5  ;;  %v8073_v61 = vmul.f32 %v8072_v21, %v16438_v44  ;;  %v8084_v8 = vmul.f32 %v8083_v29, %v16438_v44  ;;  %v8112_v43 = vadd.f32 0.0036580483, %v8111_v34 }
0x155e   : > { %v16443_v23 = vadd.f32 1.0, %v7928_v59  ;;  %v7956_v24 = vadd.f32 0.18741608, %v7955_v6  ;;  %v16482_v42 = vmin.f32 %v7827_v10, 16.0  ;;  %v7918_v55 = vadd.f32 1.1283791, %v7917_v54 }
0x155f   : > { %v16475_v41 = vadd.f32 1.0, %v7968_v51  ;;  %v8074_v35 = vadd.f32 0.05243302, %v8073_v61  ;;  %v8085_v25 = vadd.f32 0.112945676, %v8084_v8  ;;  %v8113_v16 = vmul.f32 %v8112_v43, %v16449_v3 }
0x1560   : > { %11648 = vrcp.f32 %v16443_v23  ;;  %v8123_v13 = vadd.f32 0.014752088, %v8122_v28  ;;  %v16489_v45 = vmul.f32 0.5, %v16382_v38  ;;  %v16492_v53 = vadd.f32 %v7685_v49, %v16479_v17 }
0x1561   : > { %11650 = vrcp.f32 %v16475_v41  ;;  %v8075_v2 = vmul.f32 %v8074_v35, %v16438_v44  ;;  %v8086_v20 = vmul.f32 %v8085_v25, %v16438_v44  ;;  %v7939_v62 = vand.u32 2147483647, %v16443_v23  ;;  %v10917_v25 = vld [vmem:[#allocation25 + $0xf8] sm:$0xff] }
0x1562   : > { %v7957_v14 = vmul.f32 %v7956_v24, %v16410_v5  ;;  %v8124_v19 = vmul.f32 %v8123_v13, %v16449_v3  ;;  %v7829_v15 = vmul.f32 2.1237322e-06, %v16482_v42  ;;  %v7919_v26 = vmul.f32 %v7918_v55, %v16385_v0  ;;  %9469 = vmatpush.bf16.msra.mxu1 %v10917_v25 }
0x1563   : > { %v8087_v52 = vadd.f32 0.4994258, %v8086_v20  ;;  %v8076_v32 = vadd.f32 0.18741608, %v8075_v2  ;;  %v7941_v56 = vand.u32 2147483648, %v16443_v23  ;;  %vm7935_vm5 = vweird.f32 %v16443_v23 }
0x1564   : > { %v8114_v30 = vadd.f32 0.05243302, %v8113_v16  ;;  %v8125_v46 = vadd.f32 0.112945676, %v8124_v19  ;;  %v7840_v9 = vmul.f32 3.8918573e-05, %v16482_v42  ;;  %v16528_v34 = vadd.f32 %v7658_v57, %v16436_v18 }
0x1565   : > { %v8088_v38 = vmul.f32 %v8087_v52, %v16438_v44  ;;  %vm16515_vm8 = vcmp.eq.f32.partialorder %v7939_v62, 8.507059e+37  ;;  %v7958_v29 = vadd.f32 1.1283791, %v7957_v14  ;;  %v8077_v10 = vmul.f32 %v8076_v32, %v16438_v44  ;;  %v10916_v32 = vld [vmem:[#allocation25 + $0xf0] sm:$0xff]  ;;  %v10893_v14 = vld [vmem:[#allocation25 + $0x38] sm:$0xff] }
0x1566   : > { %v16463_v7 = vpop.eup %11648  ;;  %v8126_v22 = vmul.f32 %v8125_v46, %v16449_v3  ;;  %v7942_v54 = vor.u32 1.1754944e-38, %v7941_v56  ;;  %v7979_v61 = vand.u32 2147483647, %v16475_v41  ;;  %v8115_v8 = vmul.f32 %v8114_v30, %v16449_v3  ;;  %9470 = vmatpush.bf16.msra.mxu1 %v10916_v32  ;;  %9382 = vmatpush.bf16.msra.mxu2 %v10893_v14 }
0x1567   : > { %v7931_v31 = vmul.f32 %v16463_v7, %v16443_v23  ;;  %vm7936_vm0 = vweird.f32 %v16463_v7  ;;  %v16501_v27 = vpop.eup %11650  ;;  %v16508_v63 = vadd.f32 1.0, %v8088_v38  ;;  %v7830_v23 = vadd.f32 0.00028619796, %v7829_v15 }
0x1568   : > { %v7971_v5 = vmul.f32 %v16501_v27, %v16475_v41  ;;  %vm16511_vm7 = vmor %vm7935_vm5, %vm7936_vm0  ;;  %v8127_v28 = vadd.f32 0.4994258, %v8126_v22  ;;  %v7841_v49 = vadd.f32 0.001143296, %v7840_v9  ;;  %v7959_v43 = vmul.f32 %v7958_v29, %v16404_v1 }
0x1569   : > { %v7932_v47 = vsub.f32 1.0, %v7931_v31  ;;  %v7687_v31 = vpop.f32.mrf.mxu3  ;;  %11652 = vrcp.f32 %v16508_v63  ;;  %v7981_v24 = vand.u32 2147483648, %v16475_v41  ;;  %vm7976_vm9 = vweird.f32 %v16501_v27 }
0x156a   : > { %v7972_v51 = vsub.f32 1.0, %v7971_v5  ;;  %v16532_v35 = vadd.f32 %v7687_v31, %v16479_v17  ;;  %v8078_v2 = vadd.f32 1.1283791, %v8077_v10  ;;  %v8128_v20 = vmul.f32 %v8127_v28, %v16449_v3 }
0x156b   : > { %v7933_v59 = vmul.f32 %v16463_v7, %v7932_v47  ;;  %v7842_v55 = vmul.f32 %v7841_v49, %v16482_v42  ;;  %v8116_v13 = vadd.f32 0.18741608, %v8115_v8  ;;  %v16544_v52 = vmul.f32 0.70710677, %v16492_v53 }
0x156c   : > { %v7973_v47 = vmul.f32 %v16501_v27, %v7972_v51  ;;  %v16547_v1 = vmul.f32 0.70710677, %v16528_v34  ;;  %vm7975_vm10 = vweird.f32 %v16475_v41  ;;  %vm16550_vm11 = vcmp.eq.f32.partialorder %v7979_v61, 8.507059e+37  ;;  %v10915_v51 = vld [vmem:[#allocation25 + $0xe8] sm:$0xff] }
0x156d   : > { %v7934_v12 = vadd.f32 %v16463_v7, %v7933_v59  ;;  %v7831_v59 = vmul.f32 %v7830_v23, %v16482_v42  ;;  %v16554_v19 = vadd.f32 1.0, %v8128_v20  ;;  %v7843_v15 = vadd.f32 0.014752088, %v7842_v55  ;;  %vm16564_vm12 = vmor %vm7975_vm10, %vm7976_vm9  ;;  %9471 = vmatpush.bf16.msra.mxu1 %v10915_v51  ;;  %v10905_v51 = vld [vmem:[#allocation25 + $0x98] sm:$0xff] }
0x156e   : > { %v7974_v16 = vadd.f32 %v16501_v27, %v7973_v47  ;;  %v7982_v38 = vor.u32 1.1754944e-38, %v7981_v24  ;;  %v8099_v30 = vand.u32 2147483647, %v16508_v63  ;;  %v7867_v46 = vmul.f32 %v16544_v52, %v16544_v52 }
0x156f   : > { %v7938_v6 = vsel %vm16511_vm7, %v16463_v7, %v7934_v12  ;;  %v10909_v7 = vld [vmem:[#allocation25 + $0xb8] sm:$0xff]  ;;  %v11653_v62 = vpop.eup %11652  ;;  %v10908_v12 = vld [vmem:[#allocation25 + $0xb0] sm:$0xff]  ;;  %v8101_v9 = vand.u32 2147483648, %v16508_v63  ;;  %11654 = vrcp.f32 %v16554_v19  ;;  %v7832_v57 = vadd.f32 0.0036580483, %v7831_v59 }
0x1570   : > { %v7943_v44 = vsel %vm16515_vm8, %v7942_v54, %v7938_v6  ;;  %9440 = vmatpush.bf16.msrb.mxu0 %v10909_v7  ;;  %v8091_v56 = vmul.f32 %v11653_v62, %v16508_v63  ;;  %v7978_v21 = vsel %vm16564_vm12, %v16501_v27, %v7974_v16  ;;  %v7844_v29 = vmul.f32 %v7843_v15, %v16482_v42  ;;  %v10907_v6 = vld [vmem:[#allocation25 + $0xa8] sm:$0xff]  ;;  %v10901_v15 = vld [vmem:[#allocation25 + $0x78] sm:$0xff] }
0x1571   : > { %v16560_v5 = vmul.f32 %v7943_v44, %v7919_v26  ;;  %v8117_v26 = vmul.f32 %v8116_v13, %v16449_v3  ;;  %v8079_v22 = vmul.f32 %v8078_v2, %v16423_v39  ;;  %vm8095_vm13 = vweird.f32 %v16508_v63  ;;  %9411 = vmatpush.bf16.msra.mxu3 %v10901_v15 }
0x1572   : > { %v8092_v0 = vsub.f32 1.0, %v8091_v56  ;;  %v16577_v23 = vmin.f32 %v7867_v46, 16.0  ;;  %v7987_v31 = vmul.f32 %v16547_v1, %v16547_v1  ;;  %vm8096_vm1 = vweird.f32 %v11653_v62 }
0x1573   : > { %vm16581_vm3 = vcmp.eq.f32.partialorder %v8099_v30, 8.507059e+37  ;;  %v7845_v3 = vadd.f32 0.112945676, %v7844_v29  ;;  %v7983_v54 = vsel %vm16550_vm11, %v7982_v38, %v7978_v21  ;;  %v8102_v28 = vor.u32 1.1754944e-38, %v8101_v9  ;;  %vm8097_vm4 = vmor %vm8095_vm13, %vm8096_vm1  ;;  %v10914_v30 = vld [vmem:[#allocation25 + $0xe0] sm:$0xff] }
0x1574   : > { %9441 = vmatpush.bf16.msrb.mxu0 %v10908_v12  ;;  %v8093_v10 = vmul.f32 %v11653_v62, %v8092_v0  ;;  %v7869_v39 = vmul.f32 2.1237322e-06, %v16577_v23  ;;  %v7880_v61 = vmul.f32 3.8918573e-05, %v16577_v23  ;;  %v16589_v8 = vmin.f32 %v7987_v31, 16.0  ;;  %v10906_v12 = vld [vmem:[#allocation25 + $0xa0] sm:$0xff]  ;;  %9472 = vmatpush.bf16.msra.mxu1 %v10914_v30 }
0x1575   : > { %v8118_v49 = vadd.f32 1.1283791, %v8117_v26  ;;  %v7846_v7 = vmul.f32 %v7845_v3, %v16482_v42  ;;  %v16592_v25 = vpop.eup %11654  ;;  %v8139_v44 = vand.u32 2147483647, %v16554_v19  ;;  %v7833_v24 = vmul.f32 %v7832_v57, %v16482_v42  ;;  %v10892_v31 = vld [vmem:[#allocation25 + $0x30] sm:$0xff] }
0x1576   : > { %v8094_v47 = vadd.f32 %v11653_v62, %v8093_v10  ;;  %v7881_v59 = vadd.f32 0.001143296, %v7880_v61  ;;  %v7989_v2 = vmul.f32 2.1237322e-06, %v16589_v8  ;;  %v16599_v20 = vmul.f32 %v7983_v54, %v7959_v43  ;;  %v10913_v54 = vld [vmem:[#allocation25 + $0xd8] sm:$0xff]  ;;  %9383 = vmatpush.bf16.msra.mxu2 %v10892_v31 }
0x1577   : > { %v8131_v16 = vmul.f32 %v16592_v25, %v16554_v19  ;;  %v7870_v13 = vadd.f32 0.00028619796, %v7869_v39  ;;  %v8141_v32 = vand.u32 2147483648, %v16554_v19  ;;  %v7847_v38 = vadd.f32 0.4994258, %v7846_v7 }
0x1578   : > { %9442 = vmatpush.bf16.msrb.mxu0 %v10907_v6  ;;  %v8098_v55 = vsel %vm8097_vm4, %v11653_v62, %v8094_v47  ;;  %v7882_v56 = vmul.f32 %v7881_v59, %v16577_v23  ;;  %vm8136_vm15 = vweird.f32 %v16592_v25  ;;  %v8000_v62 = vmul.f32 3.8918573e-05, %v16589_v8  ;;  %v10900_v6 = vld [vmem:[#allocation25 + $0x70] sm:$0xff]  ;;  %9473 = vmatpush.bf16.msra.mxu1 %v10913_v54  ;;  %v10899_v59 = vld [vmem:[#allocation25 + $0x68] sm:$0xff] }
0x1579   : > { %v8103_v63 = vsel %vm16581_vm3, %v8102_v28, %v8098_v55  ;;  %v8132_v43 = vsub.f32 1.0, %v8131_v16  ;;  %v7848_v41 = vmul.f32 %v7847_v38, %v16482_v42  ;;  %v7990_v57 = vadd.f32 0.00028619796, %v7989_v2  ;;  %9412 = vmatpush.bf16.msra.mxu3 %v10900_v6  ;;  %v10904_v2 = vld [vmem:[#allocation25 + $0x90] sm:$0xff] }
0x157a   : > { %v8104_v46 = vmul.f32 %v8103_v63, %v8079_v22  ;;  %v7883_v9 = vadd.f32 0.014752088, %v7882_v56  ;;  %v16611_v21 = vmul.f32 0.70710677, %v16532_v35  ;;  %v10562_v0 = vclamps-f32 %v16560_v5, 1.0 }
0x157b   : > { %v8133_v26 = vmul.f32 %v16592_v25, %v8132_v43  ;;  %v7871_v29 = vmul.f32 %v7870_v13, %v16577_v23  ;;  %v8001_v22 = vadd.f32 0.001143296, %v8000_v62  ;;  %v8119_v10 = vmul.f32 %v8118_v49, %v16431_v58  ;;  %v10912_v13 = vld [vmem:[#allocation25 + $0xd0] sm:$0xff]  ;;  %v10890_v43 = vld [vmem:[#allocation25 + $0x20] sm:$0xff] }
0x157c   : > { %9443 = vmatpush.bf16.msrb.mxu0 %v10906_v12  ;;  %vm8135_vm2 = vweird.f32 %v16554_v19  ;;  %v7834_v27 = vadd.f32 0.05243302, %v7833_v24  ;;  %v7884_v3 = vmul.f32 %v7883_v9, %v16577_v23  ;;  %v10563_v39 = vclamps-f32 %v16599_v20, 1.0  ;;  %v10891_v24 = vld [vmem:[#allocation25 + $0x28] sm:$0xff]  ;;  %9474 = vmatpush.bf16.msra.mxu1 %v10912_v13  ;;  %v10898_v9 = vld [vmem:[#allocation25 + $0x60] sm:$0xff]  ;;  %v7719_v13 = vpop.f32.mrf.mxu0 }
0x157d   : > { %v10566_v61 = vclamps-f32 %v8104_v46, 1.0  ;;  %v8134_v5 = vadd.f32 %v16592_v25, %v8133_v26  ;;  %vm16623_vm6 = vmor %vm8135_vm2, %vm8136_vm15  ;;  %v8142_v28 = vor.u32 1.1754944e-38, %v8141_v32  ;;  %v16627_v58 = vadd.f32 1.0, %v7848_v41  ;;  %9384 = vmatpush.bf16.msra.mxu2 %v10891_v24  ;;  %9413 = vmatpush.bf16.msra.mxu3 %v10899_v59 }
0x157e   : > { %v7991_v19 = vmul.f32 %v7990_v57, %v16589_v8  ;;  %v8002_v49 = vmul.f32 %v8001_v22, %v16589_v8  ;;  %v8027_v7 = vmul.f32 %v16611_v21, %v16611_v21  ;;  %vm8140_vm14 = vcmp.eq.f32.partialorder %v8139_v44, 8.507059e+37  ;;  %v10911_v22 = vld [vmem:[#allocation25 + $0xc8] sm:$0xff] }
0x157f   : > { %v8138_v20 = vsel %vm16623_vm6, %v16592_v25, %v8134_v5  ;;  %v7872_v55 = vadd.f32 0.0036580483, %v7871_v29  ;;  %v7885_v16 = vadd.f32 0.112945676, %v7884_v3  ;;  %v9109_v14 = vadd.f32 1.0, %v10562_v0  ;;  %v10903_v29 = vld [vmem:[#allocation25 + $0x88] sm:$0xff] }
0x1580   : > { %9444 = vmatpush.bf16.msrb.mxu0 %v10905_v51  ;;  %v7766_v15 = vmul.f32 0.5, %v16399_v11  ;;  %v7769_v12 = vmul.f32 0.5, %v16416_v36  ;;  %v8143_v63 = vsel %vm8140_vm14, %v8142_v28, %v8138_v20  ;;  %v9113_v32 = vadd.f32 1.0, %v10566_v61  ;;  %9475 = vmatpush.bf16.msra.mxu1 %v10911_v22  ;;  %v10902_v20 = vld [vmem:[#allocation25 + $0x80] sm:$0xff] }
0x1581   : > { %v8144_v38 = vmul.f32 %v8143_v63, %v8119_v10  ;;  %v7835_v56 = vmul.f32 %v7834_v27, %v16482_v42  ;;  %v7886_v30 = vmul.f32 %v7885_v16, %v16577_v23  ;;  %11656 = vrcp.f32 %v16627_v58  ;;  %9385 = vmatpush.bf16.msra.mxu2 %v10890_v43  ;;  %9414 = vmatpush.bf16.msra.mxu3 %v10898_v9  ;;  %v10896_v43 = vld [vmem:[#allocation25 + $0x50] sm:$0xff] }
0x1582   : > { %v7992_v25 = vadd.f32 0.0036580483, %v7991_v19  ;;  %v8003_v44 = vadd.f32 0.014752088, %v8002_v49  ;;  %v16641_v46 = vmin.f32 %v8027_v7, 16.0  ;;  %v9110_v11 = vadd.f32 1.0, %v10563_v39 }
0x1583   : > { %v10567_v62 = vclamps-f32 %v8144_v38, 1.0  ;;  %v7873_v36 = vmul.f32 %v7872_v55, %v16577_v23  ;;  %v7887_v41 = vadd.f32 0.4994258, %v7886_v30  ;;  %v9145_v31 = vmul.f32 %v9113_v32, %v7769_v12  ;;  %v10889_v19 = vld [vmem:[#allocation25 + $0x18] sm:$0xff]  ;;  %v10910_v55 = vld [vmem:[#allocation25 + $0xc0] sm:$0xff] }
0x1584   : > { %9445 = vmatpush.bf16.msrb.mxu0 %v10904_v2  ;;  %v8004_v57 = vmul.f32 %v8003_v44, %v16589_v8  ;;  %v8029_v0 = vmul.f32 2.1237322e-06, %v16641_v46  ;;  %v8040_v26 = vmul.f32 3.8918573e-05, %v16641_v46  ;;  %v7770_v6 = vmul.f32 0.5, %v16419_v33  ;;  %v10897_v2 = vld [vmem:[#allocation25 + $0x58] sm:$0xff]  ;;  %9476 = vmatpush.bf16.msra.mxu1 %v10910_v55 }
0x1585   : > { %v9114_v51 = vadd.f32 1.0, %v10567_v62  ;;  %v7836_v10 = vadd.f32 0.18741608, %v7835_v56  ;;  %v7888_v27 = vmul.f32 %v7887_v41, %v16577_v23  ;;  %v7993_v3 = vmul.f32 %v7992_v25, %v16589_v8  ;;  %9386 = vmatpush.bf16.msra.mxu2 %v10889_v19  ;;  %9415 = vmatpush.bf16.msra.mxu3 %v10897_v2  ;;  %v10888_v44 = vld [vmem:[#allocation25 + $0x10] sm:$0xff] }
0x1586   : > { %v8005_v54 = vadd.f32 0.112945676, %v8004_v57  ;;  %v8030_v39 = vadd.f32 0.00028619796, %v8029_v0  ;;  %v9141_v61 = vmul.f32 %v9109_v14, %v16489_v45  ;;  %v7874_v47 = vadd.f32 0.05243302, %v7873_v36  ;;  %v7748_v0 = vpop.f32.mrf.mxu1 }
0x1587   : > { %v9146_v5 = vmul.f32 %v9114_v51, %v7770_v6  ;;  %v8041_v28 = vadd.f32 0.001143296, %v8040_v26  ;;  %v16651_v49 = vpop.eup %11656  ;;  %v9142_v33 = vmul.f32 %v9110_v11, %v7766_v15  ;;  %v16653_v7 = vadd.f32 1.0, %v7888_v27  ;;  %v7661_v27 = vpop.f32.mrf.mxu2 }
0x1588   : > { %9446 = vmatpush.bf16.msrb.mxu0 %v10903_v29  ;;  %v8006_v24 = vmul.f32 %v8005_v54, %v16589_v8  ;;  %v8031_v59 = vmul.f32 %v8030_v39, %v16641_v46  ;;  %v9173_v16 = vpack.c.bf16 %v9145_v31, %v9141_v61  ;;  %v7994_v12 = vadd.f32 0.05243302, %v7993_v3 }
0x1589   : > { %v8042_v45 = vmul.f32 %v8041_v28, %v16641_v46  ;;  %v9174_v14 = vpack.c.bf16 %v9146_v5, %v9142_v33  ;;  %v7837_v15 = vmul.f32 %v7836_v10, %v16482_v42  ;;  %v7851_v63 = vmul.f32 %v16651_v49, %v16627_v58  ;;  %9387 = vmatpush.bf16.msra.mxu2 %v10888_v44 }
0x158a   : > { %v7875_v32 = vmul.f32 %v7874_v47, %v16577_v23  ;;  %v8007_v38 = vadd.f32 0.4994258, %v8006_v24  ;;  %11658 = vrcp.f32 %v16653_v7  ;;  %v8032_v56 = vadd.f32 0.0036580483, %v8031_v59  ;;  %9416 = vmatpush.bf16.msra.mxu3 %v10896_v43 }
0x158b   : > { %v8043_v30 = vadd.f32 0.014752088, %v8042_v45  ;;  %v16664_v25 = vadd.f32 %v7719_v13, %v16378_v40  ;;  %v7995_v42 = vmul.f32 %v7994_v12, %v16589_v8  ;;  %9477 = vmatmul.bf16.vlgmr.msra.gmra.mxu1 %v9174_v14  ;;  %v7838_v41 = vadd.f32 1.1283791, %v7837_v15 }
0x158c   : > { %9447 = vmatpush.bf16.msrb.mxu0 %v10902_v20  ;;  %v8008_v11 = vmul.f32 %v8007_v38, %v16589_v8  ;;  %v7876_v9 = vadd.f32 0.18741608, %v7875_v32  ;;  %v7852_v26 = vsub.f32 1.0, %v7851_v63  ;;  %v8033_v29 = vmul.f32 %v8032_v56, %v16641_v46 }
0x158d   : > { %v8044_v62 = vmul.f32 %v8043_v30, %v16641_v46  ;;  %v16670_v36 = vmul.f32 0.70710677, %v16664_v25  ;;  %v7996_v51 = vadd.f32 0.18741608, %v7995_v42  ;;  %v16681_v10 = vadd.f32 %v7748_v0, %v16396_v50 }
0x158e   : > { %v16672_v57 = vadd.f32 1.0, %v8008_v11  ;;  %v7877_v3 = vmul.f32 %v7876_v9, %v16577_v23  ;;  %v7839_v61 = vmul.f32 %v7838_v41, %v16461_v37  ;;  %v7853_v5 = vmul.f32 %v16651_v49, %v7852_v26 }
0x158f   : > { %9448 = vmatmul.bf16.vlgmr.msrb.gmra.mxu0 %v9173_v16  ;;  %v8045_v22 = vadd.f32 0.112945676, %v8044_v62  ;;  %v8227_v31 = vmul.f32 %v16670_v36, %v16670_v36  ;;  %v8034_v47 = vadd.f32 0.05243302, %v8033_v29  ;;  %vm7855_vm0 = vweird.f32 %v16627_v58 }
0x1590   : > { %11660 = vrcp.f32 %v16672_v57  ;;  %v16678_v6 = vpop.eup %11658  ;;  %v16693_v33 = vadd.f32 %v7661_v27, %v16436_v18  ;;  %v7859_v23 = vand.u32 2147483647, %v16627_v58  ;;  %v7997_v24 = vmul.f32 %v7996_v51, %v16589_v8 }
0x1591   : > { %v8046_v54 = vmul.f32 %v8045_v22, %v16641_v46  ;;  %v16685_v39 = vmin.f32 %v8227_v31, 16.0  ;;  %v7891_v28 = vmul.f32 %v16678_v6, %v16653_v7  ;;  %v16699_v37 = vmul.f32 0.70710677, %v16681_v10 }
0x1592   : > { %vm7856_vm5 = vweird.f32 %v16651_v49  ;;  %v7861_v20 = vand.u32 2147483648, %v16627_v58  ;;  %v7878_v55 = vadd.f32 1.1283791, %v7877_v3  ;;  %v7854_v45 = vadd.f32 %v16651_v49, %v7853_v5 }
0x1593   : > { %v8047_v19 = vadd.f32 0.4994258, %v8046_v54  ;;  %v8240_v59 = vmul.f32 3.8918573e-05, %v16685_v39  ;;  %v8035_v8 = vmul.f32 %v8034_v47, %v16641_v46  ;;  %v7892_v12 = vsub.f32 1.0, %v7891_v28  ;;  %vm16723_vm7 = vmor %vm7855_vm0, %vm7856_vm5 }
0x1594   : > { %v8267_v63 = vmul.f32 %v16699_v37, %v16699_v37  ;;  %v16715_v32 = vmul.f32 0.70710677, %v16693_v33  ;;  %v7901_v38 = vand.u32 2147483648, %v16653_v7  ;;  %v7998_v56 = vadd.f32 1.1283791, %v7997_v24 }
0x1595   : > { %v8048_v16 = vmul.f32 %v8047_v19, %v16641_v46  ;;  %v8241_v14 = vadd.f32 0.001143296, %v8240_v59  ;;  %vm16727_vm8 = vcmp.eq.f32.partialorder %v7859_v23, 8.507059e+37  ;;  %v7862_v42 = vor.u32 1.1754944e-38, %v7861_v20  ;;  %v7690_v23 = vpop.f32.mrf.mxu3 }
0x1596   : > { %v16701_v2 = vpop.eup %11660  ;;  %v7899_v62 = vand.u32 2147483647, %v16653_v7  ;;  %v7858_v41 = vsel %vm16723_vm7, %v16651_v49, %v7854_v45  ;;  %v16737_v9 = vmul.f32 %v7878_v55, %v16544_v52  ;;  %v7893_v26 = vmul.f32 %v16678_v6, %v7892_v12 }
0x1597   : > { %v8011_v13 = vmul.f32 %v16701_v2, %v16672_v57  ;;  %v16710_v15 = vadd.f32 1.0, %v8048_v16  ;;  %v8242_v44 = vmul.f32 %v8241_v14, %v16685_v39  ;;  %v8036_v29 = vadd.f32 0.18741608, %v8035_v8 }
0x1598   : > { %v16741_v22 = vmin.f32 %v8267_v63, 16.0  ;;  %v8147_v31 = vmul.f32 %v16715_v32, %v16715_v32  ;;  %vm7895_vm9 = vweird.f32 %v16653_v7  ;;  %v7902_v51 = vor.u32 1.1754944e-38, %v7901_v38  ;;  %v10895_v38 = vld [vmem:[#allocation25 + $0x48] sm:$0xff] }
0x1599   : > { %v8012_v30 = vsub.f32 1.0, %v8011_v13  ;;  %11662 = vrcp.f32 %v16710_v15  ;;  %v8243_v0 = vadd.f32 0.014752088, %v8242_v44  ;;  %v7999_v27 = vmul.f32 %v7998_v56, %v16547_v1  ;;  %9417 = vmatpush.bf16.msra.mxu3 %v10895_v38 }
0x159a   : > { %v7863_v52 = vsel %vm16727_vm8, %v7862_v42, %v7858_v41  ;;  %vm16750_vm10 = vcmp.eq.f32.partialorder %v7899_v62, 8.507059e+37  ;;  %v8019_v54 = vand.u32 2147483647, %v16672_v57  ;;  %v8229_v5 = vmul.f32 2.1237322e-06, %v16685_v39 }
0x159b   : > { %v8013_v58 = vmul.f32 %v16701_v2, %v8012_v30  ;;  %v8244_v49 = vmul.f32 %v8243_v0, %v16685_v39  ;;  %v8280_v47 = vmul.f32 3.8918573e-05, %v16741_v22  ;;  %vm8016_vm11 = vweird.f32 %v16701_v2 }
0x159c   : > { %v8021_v1 = vand.u32 2147483648, %v16672_v57  ;;  %v16760_v19 = vmin.f32 %v8147_v31, 16.0  ;;  %v7894_v59 = vadd.f32 %v16678_v6, %v7893_v26  ;;  %vm7896_vm12 = vweird.f32 %v16678_v6 }
0x159d   : > { %v8014_v28 = vadd.f32 %v16701_v2, %v8013_v58  ;;  %v8037_v20 = vmul.f32 %v8036_v29, %v16641_v46  ;;  %v8281_v55 = vadd.f32 0.001143296, %v8280_v47  ;;  %v16765_v16 = vmul.f32 %v7863_v52, %v7839_v61  ;;  %v10887_v61 = vld [vmem:[#allocation25 + $0x8] sm:$0xff]  ;;  %vm16783_vm4 = vmor %vm7895_vm9, %vm7896_vm12 }
0x159e   : > { %vm8015_vm13 = vweird.f32 %v16672_v57  ;;  %v8245_v13 = vadd.f32 0.112945676, %v8244_v49  ;;  %vm16773_vm3 = vcmp.eq.f32.partialorder %v8019_v54, 8.507059e+37  ;;  %v8230_v12 = vadd.f32 0.00028619796, %v8229_v5  ;;  %9388 = vmatpush.bf16.msra.mxu2 %v10887_v61 }
0x159f   : > { %v11663_v24 = vpop.eup %11662  ;;  %vm16769_vm1 = vmor %vm8015_vm13, %vm8016_vm11  ;;  %v8282_v63 = vmul.f32 %v8281_v55, %v16741_v22  ;;  %v16779_v46 = vadd.f32 %v7690_v23, %v16479_v17  ;;  %v8022_v30 = vor.u32 1.1754944e-38, %v8021_v1  ;;  %v8160_v43 = vmul.f32 3.8918573e-05, %v16760_v19 }
0x15a0   : > { %v8051_v45 = vmul.f32 %v11663_v24, %v16710_v15  ;;  %v8018_v56 = vsel %vm16769_vm1, %v16701_v2, %v8014_v28  ;;  %v7898_v11 = vsel %vm16783_vm4, %v16678_v6, %v7894_v59  ;;  %v8038_v42 = vadd.f32 1.1283791, %v8037_v20 }
0x15a1   : > { %v8061_v62 = vand.u32 2147483648, %v16710_v15  ;;  %v8283_v7 = vadd.f32 0.014752088, %v8282_v63  ;;  %vm8056_vm15 = vweird.f32 %v11663_v24  ;;  %v8059_v58 = vand.u32 2147483647, %v16710_v15 }
0x15a2   : > { %v8052_v44 = vsub.f32 1.0, %v8051_v45  ;;  %v8246_v2 = vmul.f32 %v8245_v13, %v16685_v39  ;;  %v8023_v0 = vsel %vm16773_vm3, %v8022_v30, %v8018_v56  ;;  %v8231_v26 = vmul.f32 %v8230_v12, %v16685_v39  ;;  %v7721_v45 = vpop.f32.mrf.mxu0 }
0x15a3   : > { %v8284_v29 = vmul.f32 %v8283_v7, %v16741_v22  ;;  %v8161_v6 = vadd.f32 0.001143296, %v8160_v43  ;;  %v7903_v31 = vsel %vm16750_vm10, %v7902_v51, %v7898_v11  ;;  %vm8055_vm2 = vweird.f32 %v16710_v15 }
0x15a4   : > { %v8053_v41 = vmul.f32 %v11663_v24, %v8052_v44  ;;  %v8269_v52 = vmul.f32 2.1237322e-06, %v16741_v22  ;;  %v8039_v54 = vmul.f32 %v8038_v42, %v16611_v21  ;;  %vm8057_vm6 = vmor %vm8055_vm2, %vm8056_vm15  ;;  %v8062_v5 = vor.u32 1.1754944e-38, %v8061_v62 }
0x15a5   : > { %v8285_v47 = vadd.f32 0.112945676, %v8284_v29  ;;  %v8162_v28 = vmul.f32 %v8161_v6, %v16760_v19  ;;  %v8024_v1 = vmul.f32 %v8023_v0, %v7999_v27  ;;  %vm8060_vm14 = vcmp.eq.f32.partialorder %v8059_v58, 8.507059e+37 }
0x15a6   : > { %v8054_v49 = vadd.f32 %v11663_v24, %v8053_v41  ;;  %v8247_v59 = vadd.f32 0.4994258, %v8246_v2  ;;  %v7904_v20 = vmul.f32 %v7903_v31, %v16737_v9  ;;  %v8270_v55 = vadd.f32 0.00028619796, %v8269_v52 }
0x15a7   : > { %v8286_v15 = vmul.f32 %v8285_v47, %v16741_v22  ;;  %v10560_v13 = vclamps-f32 %v16765_v16, 1.0  ;;  %v8163_v21 = vadd.f32 0.014752088, %v8162_v28  ;;  %v16811_v8 = vmul.f32 0.70710677, %v16779_v46 }
0x15a8   : > { %v8058_v23 = vsel %vm8057_vm6, %v11663_v24, %v8054_v49  ;;  %v10564_v14 = vclamps-f32 %v8024_v1, 1.0  ;;  %v8232_v27 = vadd.f32 0.0036580483, %v8231_v26  ;;  %v8248_v24 = vmul.f32 %v8247_v59, %v16685_v39 }
0x15a9   : > { %v8063_v3 = vsel %vm8060_vm14, %v8062_v5, %v8058_v23  ;;  %v10561_v63 = vclamps-f32 %v7904_v20, 1.0  ;;  %v8287_v61 = vadd.f32 0.4994258, %v8286_v15  ;;  %v8187_v9 = vmul.f32 %v16811_v8, %v16811_v8  ;;  %v10886_v15 = vld [vmem:[#allocation25] sm:$0xff] }
0x15aa   : > { %v8064_v51 = vmul.f32 %v8063_v3, %v8039_v54  ;;  %v16817_v38 = vadd.f32 %v7721_v45, %v16378_v40  ;;  %v8271_v57 = vmul.f32 %v8270_v55, %v16741_v22  ;;  %v8149_v16 = vmul.f32 2.1237322e-06, %v16760_v19  ;;  %v7750_v54 = vpop.f32.mrf.mxu1  ;;  %v10894_v45 = vld [vmem:[#allocation25 + $0x40] sm:$0xff]  ;;  %9389 = vmatpush.bf16.msra.mxu2 %v10886_v15 }
0x15ab   : > { %v7767_v56 = vmul.f32 0.5, %v16528_v34  ;;  %v7768_v30 = vmul.f32 0.5, %v16532_v35  ;;  %v8164_v44 = vmul.f32 %v8163_v21, %v16760_v19  ;;  %v16824_v43 = vmin.f32 %v8187_v9, 16.0  ;;  %9418 = vmatpush.bf16.msra.mxu3 %v10894_v45 }
0x15ac   : > { %v10565_v12 = vclamps-f32 %v8064_v51, 1.0  ;;  %v9107_v11 = vadd.f32 1.0, %v10560_v13  ;;  %v9111_v42 = vadd.f32 1.0, %v10564_v14  ;;  %v16826_v7 = vadd.f32 1.0, %v8248_v24 }
0x15ad   : > { %v9108_v41 = vadd.f32 1.0, %v10561_v63  ;;  %v8233_v58 = vmul.f32 %v8232_v27, %v16685_v39  ;;  %v8288_v2 = vmul.f32 %v8287_v61, %v16741_v22  ;;  %v16831_v0 = vmul.f32 0.70710677, %v16817_v38 }
0x15ae   : > { %v9112_v62 = vadd.f32 1.0, %v10565_v12  ;;  %v8272_v34 = vadd.f32 0.0036580483, %v8271_v57  ;;  %v8150_v26 = vadd.f32 0.00028619796, %v8149_v16  ;;  %v7763_v29 = vmul.f32 0.5, %v16453_v4 }
0x15af   : > { %v8200_v35 = vmul.f32 3.8918573e-05, %v16824_v43  ;;  %v8165_v6 = vadd.f32 0.112945676, %v8164_v44  ;;  %v7764_v31 = vmul.f32 0.5, %v16492_v53  ;;  %v9143_v49 = vmul.f32 %v9111_v42, %v7767_v56 }
0x15b0   : > { %v9144_v52 = vmul.f32 %v9112_v62, %v7768_v30  ;;  %11664 = vrcp.f32 %v16826_v7  ;;  %v8234_v5 = vadd.f32 0.05243302, %v8233_v58  ;;  %v16837_v47 = vadd.f32 1.0, %v8288_v2 }
0x15b1   : > { %v8201_v28 = vadd.f32 0.001143296, %v8200_v35  ;;  %v8387_v1 = vmul.f32 %v16831_v0, %v16831_v0  ;;  %v9139_v23 = vmul.f32 %v9107_v11, %v7763_v29  ;;  %v9140_v59 = vmul.f32 %v9108_v41, %v7764_v31 }
0x15b2   : > { %v8273_v20 = vmul.f32 %v8272_v34, %v16741_v22  ;;  %v8151_v4 = vmul.f32 %v8150_v26, %v16760_v19  ;;  %v8166_v53 = vmul.f32 %v8165_v6, %v16760_v19  ;;  %v16848_v55 = vadd.f32 %v7750_v54, %v16396_v50 }
0x15b3   : > { %v8202_v3 = vmul.f32 %v8201_v28, %v16824_v43  ;;  %v16845_v51 = vmin.f32 %v8387_v1, 16.0  ;;  %v9171_v13 = vpack.c.bf16 %v9143_v49, %v9139_v23  ;;  %v9172_v21 = vpack.c.bf16 %v9144_v52, %v9140_v59 }
0x15b4   : > { %v8189_v14 = vmul.f32 2.1237322e-06, %v16824_v43  ;;  %v8235_v12 = vmul.f32 %v8234_v5, %v16685_v39  ;;  %11666 = vrcp.f32 %v16837_v47  ;;  %v8274_v61 = vadd.f32 0.05243302, %v8273_v20 }
0x15b5   : > { %v8203_v27 = vadd.f32 0.014752088, %v8202_v3  ;;  %v8400_v24 = vmul.f32 3.8918573e-05, %v16845_v51  ;;  %v8152_v9 = vadd.f32 0.0036580483, %v8151_v4  ;;  %9390 = vmatmul.bf16.vlgmr.msra.gmra.mxu2 %v9171_v13  ;;  %9419 = vmatmul.bf16.vlgmr.msra.gmra.mxu3 %v9172_v21  ;;  %v7663_v21 = vpop.f32.mrf.mxu2  ;;  %vm8255_vm7 = vweird.f32 %v16826_v7 }
0x15b6   : > { %v16854_v63 = vpop.eup %11664  ;;  %v8167_v57 = vadd.f32 0.4994258, %v8166_v53  ;;  %v16857_v16 = vmul.f32 0.70710677, %v16848_v55  ;;  %v8190_v56 = vadd.f32 0.00028619796, %v8189_v14  ;;  %v8275_v62 = vmul.f32 %v8274_v61, %v16741_v22 }
0x15b7   : > { %v8204_v30 = vmul.f32 %v8203_v27, %v16824_v43  ;;  %v8236_v44 = vadd.f32 0.18741608, %v8235_v12  ;;  %v8251_v11 = vmul.f32 %v16854_v63, %v16826_v7  ;;  %v8401_v42 = vadd.f32 0.001143296, %v8400_v24 }
0x15b8   : > { %v8153_v2 = vmul.f32 %v8152_v9, %v16760_v19  ;;  %v8168_v34 = vmul.f32 %v8167_v57, %v16760_v19  ;;  %v8427_v35 = vmul.f32 %v16857_v16, %v16857_v16  ;;  %v8191_v29 = vmul.f32 %v8190_v56, %v16824_v43 }
0x15b9   : > { %v8205_v41 = vadd.f32 0.112945676, %v8204_v30  ;;  %v8402_v26 = vmul.f32 %v8401_v42, %v16845_v51  ;;  %v8237_v31 = vmul.f32 %v8236_v44, %v16685_v39  ;;  %v8252_v49 = vsub.f32 1.0, %v8251_v11 }
0x15ba   : > { %v16863_v58 = vpop.eup %11666  ;;  %v16874_v54 = vmul.f32 0.5, %v16664_v25  ;;  %v16878_v28 = vmin.f32 %v8427_v35, 16.0  ;;  %v8276_v1 = vadd.f32 0.18741608, %v8275_v62  ;;  %v8154_v23 = vadd.f32 0.05243302, %v8153_v2 }
0x15bb   : > { %v8206_v6 = vmul.f32 %v8205_v41, %v16824_v43  ;;  %v8403_v52 = vadd.f32 0.014752088, %v8402_v26  ;;  %v8291_v5 = vmul.f32 %v16863_v58, %v16837_v47  ;;  %v16880_v59 = vadd.f32 1.0, %v8168_v34 }
0x15bc   : > { %v16884_v4 = vmul.f32 0.5, %v16681_v10  ;;  %v16887_v39 = vmul.f32 0.5, %v16693_v33  ;;  %v8192_v53 = vadd.f32 0.0036580483, %v8191_v29  ;;  %v8238_v3 = vadd.f32 1.1283791, %v8237_v31 }
0x15bd   : > { %v8404_v20 = vmul.f32 %v8403_v52, %v16845_v51  ;;  %v8207_v25 = vadd.f32 0.4994258, %v8206_v6  ;;  %v8253_v15 = vmul.f32 %v16854_v63, %v8252_v49  ;;  %v8440_v13 = vmul.f32 3.8918573e-05, %v16878_v28  ;;  %v7692_v49 = vpop.f32.mrf.mxu3 }
0x15be   : > { %v8259_v14 = vand.u32 2147483647, %v16826_v7  ;;  %v8261_v12 = vand.u32 2147483648, %v16826_v7  ;;  %v8292_v27 = vsub.f32 1.0, %v8291_v5  ;;  %v16894_v10 = vmul.f32 0.5, %v16779_v46 }
0x15bf   : > { %v8405_v45 = vadd.f32 0.112945676, %v8404_v20  ;;  %v8277_v33 = vmul.f32 %v8276_v1, %v16741_v22  ;;  %v8155_v24 = vmul.f32 %v8154_v23, %v16760_v19  ;;  %11668 = vrcp.f32 %v16880_v59 }
0x15c0   : > { %v8389_v61 = vmul.f32 2.1237322e-06, %v16845_v51  ;;  %v8193_v9 = vmul.f32 %v8192_v53, %v16824_v43  ;;  %v8208_v57 = vmul.f32 %v8207_v25, %v16824_v43  ;;  %v8441_v56 = vadd.f32 0.001143296, %v8440_v13 }
0x15c1   : > { %v16903_v30 = vadd.f32 %v7663_v21, %v16436_v18  ;;  %v8239_v44 = vmul.f32 %v8238_v3, %v16670_v36  ;;  %v8254_v46 = vadd.f32 %v16854_v63, %v8253_v15  ;;  %vm8256_vm0 = vweird.f32 %v16854_v63  ;;  %v7724_v15 = vpop.f32.mrf.mxu0 }
0x15c2   : > { %v8406_v22 = vmul.f32 %v8405_v45, %v16845_v51  ;;  %vm16909_vm5 = vcmp.eq.f32.partialorder %v8259_v14, 8.507059e+37  ;;  %v8262_v42 = vor.u32 1.1754944e-38, %v8261_v12  ;;  %v8293_v62 = vmul.f32 %v16863_v58, %v8292_v27  ;;  %vm16918_vm8 = vmor %vm8255_vm7, %vm8256_vm0 }
0x15c3   : > { %v16915_v41 = vmul.f32 0.5, %v16817_v38  ;;  %v8278_v2 = vadd.f32 1.1283791, %v8277_v33  ;;  %v8156_v36 = vadd.f32 0.18741608, %v8155_v24  ;;  %v16922_v29 = vadd.f32 1.0, %v8208_v57 }
0x15c4   : > { %v8390_v34 = vadd.f32 0.00028619796, %v8389_v61  ;;  %v8194_v35 = vadd.f32 0.05243302, %v8193_v9  ;;  %v8442_v6 = vmul.f32 %v8441_v56, %v16878_v28  ;;  %v16926_v31 = vmul.f32 0.70710677, %v16903_v30 }
0x15c5   : > { %v16928_v38 = vpop.eup %11668  ;;  %v8258_v7 = vsel %vm16918_vm8, %v16854_v63, %v8254_v46  ;;  %v8299_v52 = vand.u32 2147483647, %v16837_v47  ;;  %v8301_v5 = vand.u32 2147483648, %v16837_v47  ;;  %v8407_v1 = vadd.f32 0.4994258, %v8406_v22 }
0x15c6   : > { %v8294_v23 = vadd.f32 %v16863_v58, %v8293_v62  ;;  %vm8296_vm9 = vweird.f32 %v16863_v58  ;;  %v8443_v20 = vadd.f32 0.014752088, %v8442_v6  ;;  %v8307_v53 = vmul.f32 %v16926_v31, %v16926_v31 }
0x15c7   : > { %vm8295_vm10 = vweird.f32 %v16837_v47  ;;  %v8157_v25 = vmul.f32 %v8156_v36, %v16760_v19  ;;  %v8429_v3 = vmul.f32 2.1237322e-06, %v16878_v28  ;;  %v16943_v63 = vadd.f32 %v7692_v49, %v16479_v17 }
0x15c8   : > { %v8263_v45 = vsel %vm16909_vm5, %v8262_v42, %v8258_v7  ;;  %v8195_v13 = vmul.f32 %v8194_v35, %v16824_v43  ;;  %11670 = vrcp.f32 %v16922_v29  ;;  %v8391_v21 = vmul.f32 %v8390_v34, %v16845_v51  ;;  %vm16950_vm11 = vmor %vm8295_vm10, %vm8296_vm9 }
0x15c9   : > { %vm8300_vm12 = vcmp.eq.f32.partialorder %v8299_v52, 8.507059e+37  ;;  %v8171_v19 = vmul.f32 %v16928_v38, %v16880_v59  ;;  %v8408_v47 = vmul.f32 %v8407_v1, %v16845_v51  ;;  %v8444_v12 = vmul.f32 %v8443_v20, %v16878_v28 }
0x15ca   : > { %v8298_v27 = vsel %vm16950_vm11, %v16863_v58, %v8294_v23  ;;  %v8302_v33 = vor.u32 1.1754944e-38, %v8301_v5  ;;  %v16961_v24 = vmin.f32 %v8307_v53, 16.0  ;;  %v16964_v61 = vadd.f32 %v7724_v15, %v16378_v40 }
0x15cb   : > { %v8264_v9 = vmul.f32 %v8263_v45, %v8239_v44  ;;  %v8430_v57 = vadd.f32 0.00028619796, %v8429_v3  ;;  %v8445_v56 = vadd.f32 0.112945676, %v8444_v12  ;;  %v16967_v46 = vmul.f32 0.70710677, %v16943_v63 }
0x15cc   : > { %v8196_v22 = vadd.f32 0.18741608, %v8195_v13  ;;  %v8392_v11 = vadd.f32 0.0036580483, %v8391_v21  ;;  %v8320_v42 = vmul.f32 3.8918573e-05, %v16961_v24  ;;  %v8303_v62 = vsel %vm8300_vm12, %v8302_v33, %v8298_v27 }
0x15cd   : > { %v8172_v36 = vsub.f32 1.0, %v8171_v19  ;;  %v16970_v34 = vadd.f32 1.0, %v8408_v47  ;;  %v8347_v58 = vmul.f32 %v16967_v46, %v16967_v46  ;;  %v8279_v44 = vmul.f32 %v8278_v2, %v16699_v37 }
0x15ce   : > { %v16974_v26 = vpop.eup %11670  ;;  %v8446_v35 = vmul.f32 %v8445_v56, %v16878_v28  ;;  %v8321_v6 = vadd.f32 0.001143296, %v8320_v42  ;;  %v16979_v49 = vmul.f32 0.70710677, %v16964_v61  ;;  %v10570_v7 = vclamps-f32 %v8264_v9, 1.0 }
0x15cf   : > { %v8158_v52 = vadd.f32 1.1283791, %v8157_v25  ;;  %v16982_v5 = vmul.f32 0.5, %v16848_v55  ;;  %v8431_v1 = vmul.f32 %v8430_v57, %v16878_v28  ;;  %v8304_v23 = vmul.f32 %v8303_v62, %v8279_v44 }
0x15d0   : > { %v8197_v20 = vmul.f32 %v8196_v22, %v16824_v43  ;;  %v8393_v53 = vmul.f32 %v8392_v11, %v16845_v51  ;;  %v8322_v37 = vmul.f32 %v8321_v6, %v16961_v24  ;;  %v8173_v2 = vmul.f32 %v16928_v38, %v8172_v36 }
0x15d1   : > { %v8211_v3 = vmul.f32 %v16974_v26, %v16922_v29  ;;  %11672 = vrcp.f32 %v16970_v34  ;;  %v16992_v25 = vmin.f32 %v8347_v58, 16.0  ;;  %v8179_v55 = vand.u32 2147483647, %v16880_v59 }
0x15d2   : > { %v8447_v15 = vadd.f32 0.4994258, %v8446_v35  ;;  %v8323_v45 = vadd.f32 0.014752088, %v8322_v37  ;;  %v8547_v43 = vmul.f32 %v16979_v49, %v16979_v49  ;;  %v9117_v13 = vadd.f32 1.0, %v10570_v7 }
0x15d3   : > { %v8159_v21 = vmul.f32 %v8158_v52, %v16715_v32  ;;  %v8181_v14 = vand.u32 2147483648, %v16880_v59  ;;  %v8432_v19 = vadd.f32 0.0036580483, %v8431_v1  ;;  %v10571_v47 = vclamps-f32 %v8304_v23, 1.0 }
0x15d4   : > { %v8198_v12 = vadd.f32 1.1283791, %v8197_v20  ;;  %v8394_v27 = vadd.f32 0.05243302, %v8393_v53  ;;  %v8324_v33 = vmul.f32 %v8323_v45, %v16961_v24  ;;  %v8174_v9 = vadd.f32 %v16928_v38, %v8173_v2  ;;  %v7753_v2 = vpop.f32.mrf.mxu1 }
0x15d5   : > { %vm8176_vm13 = vweird.f32 %v16928_v38  ;;  %v8212_v57 = vsub.f32 1.0, %v8211_v3  ;;  %v8360_v56 = vmul.f32 3.8918573e-05, %v16992_v25  ;;  %vm8175_vm1 = vweird.f32 %v16880_v59 }
0x15d6   : > { %vm17004_vm3 = vcmp.eq.f32.partialorder %v8179_v55, 8.507059e+37  ;;  %v8448_v32 = vmul.f32 %v8447_v15, %v16878_v28  ;;  %v17009_v11 = vmin.f32 %v8547_v43, 16.0  ;;  %v17014_v62 = vmul.f32 %v9117_v13, %v16874_v54  ;;  %vm17017_vm4 = vmor %vm8175_vm1, %vm8176_vm13 }
0x15d7   : > { %v17011_v42 = vpop.eup %11672  ;;  %v8182_v36 = vor.u32 1.1754944e-38, %v8181_v14  ;;  %v8433_v58 = vmul.f32 %v8432_v19, %v16878_v28  ;;  %v8325_v44 = vadd.f32 0.112945676, %v8324_v33  ;;  %v9118_v35 = vadd.f32 1.0, %v10571_v47 }
0x15d8   : > { %v17022_v6 = vmul.f32 %v8198_v12, %v16811_v8  ;;  %vm8215_vm15 = vweird.f32 %v16922_v29  ;;  %v8395_v7 = vmul.f32 %v8394_v27, %v16845_v51  ;;  %v8178_v54 = vsel %vm17017_vm4, %v16928_v38, %v8174_v9 }
0x15d9   : > { %v8213_v52 = vmul.f32 %v16974_v26, %v8212_v57  ;;  %v8309_v1 = vmul.f32 2.1237322e-06, %v16961_v24  ;;  %v8361_v23 = vadd.f32 0.001143296, %v8360_v56  ;;  %v8219_v20 = vand.u32 2147483647, %v16922_v29 }
0x15da   : > { %v8411_v53 = vmul.f32 %v17011_v42, %v16970_v34  ;;  %v17034_v8 = vadd.f32 1.0, %v8448_v32  ;;  %v8560_v37 = vmul.f32 3.8918573e-05, %v17009_v11  ;;  %v8221_v3 = vand.u32 2147483648, %v16922_v29 }
0x15db   : > { %v8434_v55 = vadd.f32 0.05243302, %v8433_v58  ;;  %v8326_v38 = vmul.f32 %v8325_v44, %v16961_v24  ;;  %v8362_v15 = vmul.f32 %v8361_v23, %v16992_v25  ;;  %v17041_v45 = vmul.f32 %v9118_v35, %v16884_v4 }
0x15dc   : > { %v8183_v43 = vsel %vm17004_vm3, %v8182_v36, %v8178_v54  ;;  %v8396_v13 = vadd.f32 0.18741608, %v8395_v7  ;;  %v8561_v14 = vadd.f32 0.001143296, %v8560_v37  ;;  %v8214_v19 = vadd.f32 %v16974_v26, %v8213_v52 }
0x15dd   : > { %vm8216_vm2 = vweird.f32 %v16974_v26  ;;  %v8310_v47 = vadd.f32 0.00028619796, %v8309_v1  ;;  %v17048_v12 = vadd.f32 %v7753_v2, %v16396_v50  ;;  %v8412_v27 = vsub.f32 1.0, %v8411_v53 }
0x15de   : > { %11674 = vrcp.f32 %v17034_v8  ;;  %v8349_v33 = vmul.f32 2.1237322e-06, %v16992_v25  ;;  %v8363_v4 = vadd.f32 0.014752088, %v8362_v15  ;;  %v8184_v9 = vmul.f32 %v8183_v43, %v8159_v21  ;;  %vm17064_vm14 = vmor %vm8215_vm15, %vm8216_vm2 }
0x15df   : > { %v8435_v57 = vmul.f32 %v8434_v55, %v16878_v28  ;;  %v8327_v56 = vadd.f32 0.4994258, %v8326_v38  ;;  %v8562_v22 = vmul.f32 %v8561_v14, %v17009_v11  ;;  %vm17054_vm6 = vcmp.eq.f32.partialorder %v8219_v20, 8.507059e+37 }
0x15e0   : > { %v8222_v36 = vor.u32 1.1754944e-38, %v8221_v3  ;;  %v8397_v58 = vmul.f32 %v8396_v13, %v16845_v51  ;;  %v8364_v44 = vmul.f32 %v8363_v4, %v16992_v25  ;;  %v17069_v35 = vmul.f32 0.5, %v16903_v30  ;;  %v7666_v51 = vpop.f32.mrf.mxu2 }
0x15e1   : > { %v8311_v59 = vmul.f32 %v8310_v47, %v16961_v24  ;;  %v8563_v7 = vadd.f32 0.014752088, %v8562_v22  ;;  %v17073_v54 = vmul.f32 0.70710677, %v17048_v12  ;;  %v8218_v52 = vsel %vm17064_vm14, %v16974_v26, %v8214_v19 }
0x15e2   : > { %v8413_v29 = vmul.f32 %v17011_v42, %v8412_v27  ;;  %v8350_v1 = vadd.f32 0.00028619796, %v8349_v33  ;;  %v8549_v23 = vmul.f32 2.1237322e-06, %v17009_v11  ;;  %v10568_v20 = vclamps-f32 %v8184_v9, 1.0 }
0x15e3   : > { %vm8415_vm0 = vweird.f32 %v16970_v34  ;;  %v8436_v30 = vadd.f32 0.18741608, %v8435_v57  ;;  %v8328_v53 = vmul.f32 %v8327_v56, %v16961_v24  ;;  %v8421_v2 = vand.u32 2147483648, %v16970_v34 }
0x15e4   : > { %v17082_v37 = vpop.eup %11674  ;;  %v8365_v3 = vadd.f32 0.112945676, %v8364_v44  ;;  %v8587_v55 = vmul.f32 %v17073_v54, %v17073_v54  ;;  %v17088_v26 = vadd.f32 %v7666_v51, %v16436_v18  ;;  %v8223_v38 = vsel %vm17054_vm6, %v8222_v36, %v8218_v52 }
0x15e5   : > { %vm8416_vm5 = vweird.f32 %v17011_v42  ;;  %v8312_v15 = vadd.f32 0.0036580483, %v8311_v59  ;;  %v8564_v43 = vmul.f32 %v8563_v7, %v17009_v11  ;;  %v8414_v13 = vadd.f32 %v17011_v42, %v8413_v29 }
0x15e6   : > { %v8351_v14 = vmul.f32 %v8350_v1, %v16992_v25  ;;  %v8550_v19 = vadd.f32 0.00028619796, %v8549_v23  ;;  %v17096_v47 = vmin.f32 %v8587_v55, 16.0  ;;  %v8419_v27 = vand.u32 2147483647, %v16970_v34  ;;  %vm17114_vm7 = vmor %vm8415_vm0, %vm8416_vm5 }
0x15e7   : > { %v8437_v33 = vmul.f32 %v8436_v30, %v16878_v28  ;;  %v8451_v4 = vmul.f32 %v17082_v37, %v17034_v8  ;;  %v17102_v9 = vadd.f32 1.0, %v8328_v53  ;;  %v8224_v57 = vmul.f32 %v8223_v38, %v17022_v6 }
0x15e8   : > { %v8366_v56 = vmul.f32 %v8365_v3, %v16992_v25  ;;  %v8600_v22 = vmul.f32 3.8918573e-05, %v17096_v47  ;;  %v17108_v32 = vmul.f32 0.70710677, %v17088_v26  ;;  %v9115_v36 = vadd.f32 1.0, %v10568_v20 }
0x15e9   : > { %v8398_v44 = vadd.f32 1.1283791, %v8397_v58  ;;  %v8313_v21 = vmul.f32 %v8312_v15, %v16961_v24  ;;  %v8565_v6 = vadd.f32 0.112945676, %v8564_v43  ;;  %v8418_v59 = vsel %vm17114_vm7, %v17011_v42, %v8414_v13 }
0x15ea   : > { %v8422_v7 = vor.u32 1.1754944e-38, %v8421_v2  ;;  %v8352_v51 = vadd.f32 0.0036580483, %v8351_v14  ;;  %v8551_v52 = vmul.f32 %v8550_v19, %v17009_v11  ;;  %v8452_v58 = vsub.f32 1.0, %v8451_v4 }
0x15eb   : > { %11676 = vrcp.f32 %v17102_v9  ;;  %v8601_v29 = vadd.f32 0.001143296, %v8600_v22  ;;  %v8467_v34 = vmul.f32 %v17108_v32, %v17108_v32  ;;  %v10569_v1 = vclamps-f32 %v8224_v57, 1.0 }
0x15ec   : > { %vm8420_vm8 = vcmp.eq.f32.partialorder %v8419_v27, 8.507059e+37  ;;  %v8438_v23 = vadd.f32 1.1283791, %v8437_v33  ;;  %v8367_v20 = vadd.f32 0.4994258, %v8366_v56  ;;  %v8566_v3 = vmul.f32 %v8565_v6, %v17009_v11  ;;  %v7695_v27 = vpop.f32.mrf.mxu3 }
0x15ed   : > { %v8423_v30 = vsel %vm8420_vm8, %v8422_v7, %v8418_v59  ;;  %v8314_v53 = vadd.f32 0.05243302, %v8313_v21  ;;  %v8602_v42 = vmul.f32 %v8601_v29, %v17096_v47  ;;  %v17129_v2 = vmul.f32 %v9115_v36, %v16887_v39 }
0x15ee   : > { %v8399_v55 = vmul.f32 %v8398_v44, %v16831_v0  ;;  %v17133_v38 = vmul.f32 0.5, %v16943_v63  ;;  %v8353_v15 = vmul.f32 %v8352_v51, %v16992_v25  ;;  %v8453_v43 = vmul.f32 %v17082_v37, %v8452_v58 }
0x15ef   : > { %v17138_v13 = vmul.f32 0.5, %v16964_v61  ;;  %v8552_v14 = vadd.f32 0.0036580483, %v8551_v52  ;;  %v17140_v19 = vmin.f32 %v8467_v34, 16.0  ;;  %v8439_v39 = vmul.f32 %v8438_v23, %v16857_v16 }
0x15f0   : > { %v8424_v33 = vmul.f32 %v8423_v30, %v8399_v55  ;;  %v8368_v4 = vmul.f32 %v8367_v20, %v16992_v25  ;;  %v8603_v0 = vadd.f32 0.014752088, %v8602_v42  ;;  %v9116_v63 = vadd.f32 1.0, %v10569_v1 }
0x15f1   : > { %v17144_v57 = vpop.eup %11676  ;;  %v8459_v56 = vand.u32 2147483647, %v17034_v8  ;;  %v8315_v22 = vmul.f32 %v8314_v53, %v16961_v24  ;;  %v8567_v36 = vadd.f32 0.4994258, %v8566_v3  ;;  %vm8456_vm9 = vweird.f32 %v17082_v37 }
0x15f2   : > { %v8461_v61 = vand.u32 2147483648, %v17034_v8  ;;  %v8354_v44 = vadd.f32 0.05243302, %v8353_v15  ;;  %v17151_v28 = vadd.f32 %v7695_v27, %v16479_v17  ;;  %v8454_v16 = vadd.f32 %v17082_v37, %v8453_v43 }
0x15f3   : > { %v8553_v21 = vmul.f32 %v8552_v14, %v17009_v11  ;;  %v8604_v6 = vmul.f32 %v8603_v0, %v17096_v47  ;;  %v8480_v59 = vmul.f32 3.8918573e-05, %v17140_v19  ;;  %v10574_v7 = vclamps-f32 %v8424_v33, 1.0  ;;  %v7726_v33 = vpop.f32.mrf.mxu0 }
0x15f4   : > { %v8331_v51 = vmul.f32 %v17144_v57, %v17102_v9  ;;  %v17159_v52 = vadd.f32 1.0, %v8368_v4  ;;  %v8589_v58 = vmul.f32 2.1237322e-06, %v17096_v47  ;;  %vm8455_vm10 = vweird.f32 %v17034_v8 }
0x15f5   : > { %v8316_v29 = vadd.f32 0.18741608, %v8315_v22  ;;  %v8568_v34 = vmul.f32 %v8567_v36, %v17009_v11  ;;  %v8605_v1 = vadd.f32 0.112945676, %v8604_v6  ;;  %vm17166_vm11 = vmor %vm8455_vm10, %vm8456_vm9  ;;  %vm17170_vm12 = vcmp.eq.f32.partialorder %v8459_v56, 8.507059e+37 }
0x15f6   : > { %v8462_v30 = vor.u32 1.1754944e-38, %v8461_v61  ;;  %v8355_v53 = vmul.f32 %v8354_v44, %v16992_v25  ;;  %v8481_v3 = vadd.f32 0.001143296, %v8480_v59  ;;  %v8458_v8 = vsel %vm17166_vm11, %v17082_v37, %v8454_v16 }
0x15f7   : > { %v8554_v42 = vadd.f32 0.05243302, %v8553_v21  ;;  %v8606_v55 = vmul.f32 %v8605_v1, %v17096_v47  ;;  %v17180_v15 = vmul.f32 0.70710677, %v17151_v28  ;;  %v9121_v43 = vadd.f32 1.0, %v10574_v7 }
0x15f8   : > { %v8332_v14 = vsub.f32 1.0, %v8331_v51  ;;  %11678 = vrcp.f32 %v17159_v52  ;;  %v8590_v27 = vadd.f32 0.00028619796, %v8589_v58  ;;  %v8317_v4 = vmul.f32 %v8316_v29, %v16961_v24 }
0x15f9   : > { %v17184_v0 = vadd.f32 1.0, %v8568_v34  ;;  %v8607_v56 = vadd.f32 0.4994258, %v8606_v55  ;;  %v8482_v22 = vmul.f32 %v8481_v3, %v17140_v19  ;;  %v17188_v37 = vmul.f32 %v9116_v63, %v16894_v10 }
0x15fa   : > { %v8463_v36 = vsel %vm17170_vm12, %v8462_v30, %v8458_v8  ;;  %v8356_v61 = vadd.f32 0.18741608, %v8355_v53  ;;  %v17193_v44 = vmul.f32 0.5, %v17048_v12  ;;  %v8555_v16 = vmul.f32 %v8554_v42, %v17009_v11 }
0x15fb   : > { %v8483_v21 = vadd.f32 0.014752088, %v8482_v22  ;;  %v8507_v24 = vmul.f32 %v17180_v15, %v17180_v15  ;;  %v17199_v6 = vadd.f32 %v7726_v33, %v16378_v40  ;;  %v17202_v59 = vmul.f32 %v9121_v43, %v16915_v41 }
0x15fc   : > { %v8333_v10 = vmul.f32 %v17144_v57, %v8332_v14  ;;  %v8591_v63 = vmul.f32 %v8590_v27, %v17096_v47  ;;  %v8469_v7 = vmul.f32 2.1237322e-06, %v17140_v19  ;;  %v8318_v12 = vadd.f32 1.1283791, %v8317_v4 }
0x15fd   : > { %11680 = vrcp.f32 %v17184_v0  ;;  %v8608_v51 = vmul.f32 %v8607_v56, %v17096_v47  ;;  %v8484_v58 = vmul.f32 %v8483_v21, %v17140_v19  ;;  %v8464_v34 = vmul.f32 %v8463_v36, %v8439_v39 }
0x15fe   : > { %v17210_v29 = vpop.eup %11678  ;;  %v8339_v1 = vand.u32 2147483647, %v17102_v9  ;;  %v8341_v41 = vand.u32 2147483648, %v17102_v9  ;;  %v8357_v23 = vmul.f32 %v8356_v61, %v16992_v25  ;;  %vm8336_vm13 = vweird.f32 %v17144_v57 }
0x15ff   : > { %v8556_v20 = vadd.f32 0.18741608, %v8555_v16  ;;  %v17216_v30 = vmin.f32 %v8507_v24, 16.0  ;;  %v17219_v53 = vmul.f32 0.70710677, %v17199_v6  ;;  %v8334_v3 = vadd.f32 %v17144_v57, %v8333_v10  ;;  %v7755_v16 = vpop.f32.mrf.mxu1 }
0x1600   : > { %v8592_v8 = vadd.f32 0.0036580483, %v8591_v63  ;;  %v8470_v42 = vadd.f32 0.00028619796, %v8469_v7  ;;  %v8485_v55 = vadd.f32 0.112945676, %v8484_v58  ;;  %v8319_v39 = vmul.f32 %v8318_v12, %v16926_v31 }
0x1601   : > { %vm8335_vm1 = vweird.f32 %v17102_v9  ;;  %v8371_v25 = vmul.f32 %v17210_v29, %v17159_v52  ;;  %v17226_v43 = vadd.f32 1.0, %v8608_v51  ;;  %v10575_v14 = vclamps-f32 %v8464_v34, 1.0 }
0x1602   : > { %vm17228_vm3 = vcmp.eq.f32.partialorder %v8339_v1, 8.507059e+37  ;;  %v8342_v33 = vor.u32 1.1754944e-38, %v8341_v41  ;;  %v8486_v4 = vmul.f32 %v8485_v55, %v17140_v19  ;;  %vm17237_vm4 = vmor %vm8335_vm1, %vm8336_vm13  ;;  %v8358_v9 = vadd.f32 1.1283791, %v8357_v23 }
0x1603   : > { %v17233_v56 = vpop.eup %11680  ;;  %v8557_v22 = vmul.f32 %v8556_v20, %v17009_v11  ;;  %v8520_v36 = vmul.f32 3.8918573e-05, %v17216_v30  ;;  %v8707_v61 = vmul.f32 %v17219_v53, %v17219_v53  ;;  %v8338_v21 = vsel %vm17237_vm4, %v17144_v57, %v8334_v3 }
0x1604   : > { %v8593_v24 = vmul.f32 %v8592_v8, %v17096_v47  ;;  %v8471_v10 = vmul.f32 %v8470_v42, %v17140_v19  ;;  %v8487_v63 = vadd.f32 0.4994258, %v8486_v4  ;;  %v8372_v7 = vsub.f32 1.0, %v8371_v25 }
0x1605   : > { %11682 = vrcp.f32 %v17226_v43  ;;  %v8521_v12 = vadd.f32 0.001143296, %v8520_v36  ;;  %v17251_v11 = vmin.f32 %v8707_v61, 16.0  ;;  %v9122_v51 = vadd.f32 1.0, %v10575_v14 }
0x1606   : > { %v8571_v58 = vmul.f32 %v17233_v56, %v17184_v0  ;;  %v17256_v34 = vmul.f32 0.5, %v17088_v26  ;;  %v17259_v57 = vadd.f32 %v7755_v16, %v16396_v50  ;;  %v8379_v1 = vand.u32 2147483647, %v17159_v52  ;;  %v7668_v16 = vpop.f32.mrf.mxu2 }
0x1607   : > { %v8381_v41 = vand.u32 2147483648, %v17159_v52  ;;  %v8558_v23 = vadd.f32 1.1283791, %v8557_v22  ;;  %v8522_v20 = vmul.f32 %v8521_v12, %v17216_v30  ;;  %v8343_v3 = vsel %vm17228_vm3, %v8342_v33, %v8338_v21 }
0x1608   : > { %v8594_v8 = vadd.f32 0.05243302, %v8593_v24  ;;  %v8488_v42 = vmul.f32 %v8487_v63, %v17140_v19  ;;  %v8720_v55 = vmul.f32 3.8918573e-05, %v17251_v11  ;;  %v17269_v26 = vmul.f32 %v8358_v9, %v16967_v46 }
0x1609   : > { %v8373_v25 = vmul.f32 %v17210_v29, %v8372_v7  ;;  %v8472_v14 = vadd.f32 0.0036580483, %v8471_v10  ;;  %v8523_v4 = vadd.f32 0.014752088, %v8522_v20  ;;  %v17273_v31 = vmul.f32 %v9122_v51, %v16982_v5 }
0x160a   : > { %v8572_v22 = vsub.f32 1.0, %v8571_v58  ;;  %v8509_v36 = vmul.f32 2.1237322e-06, %v17216_v30  ;;  %v17277_v27 = vmul.f32 0.70710677, %v17259_v57  ;;  %v8344_v61 = vmul.f32 %v8343_v3, %v8319_v39 }
0x160b   : > { %v17279_v33 = vpop.eup %11682  ;;  %vm8375_vm15 = vweird.f32 %v17159_v52  ;;  %v8382_v46 = vor.u32 1.1754944e-38, %v8381_v41  ;;  %v8721_v9 = vadd.f32 0.001143296, %v8720_v55  ;;  %vm8376_vm2 = vweird.f32 %v17210_v29 }
0x160c   : > { %vm17283_vm6 = vcmp.eq.f32.partialorder %v8379_v1, 8.507059e+37  ;;  %v17288_v5 = vmul.f32 %v8558_v23, %v16979_v49  ;;  %v8595_v24 = vmul.f32 %v8594_v8, %v17096_v47  ;;  %v17291_v10 = vadd.f32 1.0, %v8488_v42  ;;  %vm17312_vm14 = vmor %vm8375_vm15, %vm8376_vm2 }
0x160d   : > { %v8374_v39 = vadd.f32 %v17210_v29, %v8373_v25  ;;  %v8473_v63 = vmul.f32 %v8472_v14, %v17140_v19  ;;  %v8524_v7 = vmul.f32 %v8523_v4, %v17216_v30  ;;  %v8747_v12 = vmul.f32 %v17277_v27, %v17277_v27 }
0x160e   : > { %v8573_v51 = vmul.f32 %v17233_v56, %v8572_v22  ;;  %v8611_v58 = vmul.f32 %v17279_v33, %v17226_v43  ;;  %v8510_v49 = vadd.f32 0.00028619796, %v8509_v36  ;;  %v17302_v1 = vadd.f32 %v7668_v16, %v16436_v18 }
0x160f   : > { %v10572_v41 = vclamps-f32 %v8344_v61, 1.0  ;;  %v8579_v23 = vand.u32 2147483647, %v17184_v0  ;;  %v8722_v20 = vmul.f32 %v8721_v9, %v17251_v11  ;;  %v17306_v3 = vmin.f32 %v8747_v12, 16.0 }
0x1610   : > { %vm8576_vm0 = vweird.f32 %v17233_v56  ;;  %v8581_v42 = vand.u32 2147483648, %v17184_v0  ;;  %v8596_v55 = vadd.f32 0.18741608, %v8595_v24  ;;  %11684 = vrcp.f32 %v17291_v10 }
0x1611   : > { %v8378_v25 = vsel %vm17312_vm14, %v17210_v29, %v8374_v39  ;;  %v8474_v14 = vadd.f32 0.05243302, %v8473_v63  ;;  %v8525_v4 = vadd.f32 0.112945676, %v8524_v7  ;;  %v8760_v22 = vmul.f32 3.8918573e-05, %v17306_v3 }
0x1612   : > { %v8574_v52 = vadd.f32 %v17233_v56, %v8573_v51  ;;  %v8612_v36 = vsub.f32 1.0, %v8611_v58  ;;  %v8511_v61 = vmul.f32 %v8510_v49, %v17216_v30  ;;  %v17326_v9 = vmul.f32 0.70710677, %v17302_v1 }
0x1613   : > { %v9119_v16 = vadd.f32 1.0, %v10572_v41  ;;  %vm8575_vm5 = vweird.f32 %v17184_v0  ;;  %v8709_v24 = vmul.f32 2.1237322e-06, %v17251_v11  ;;  %v8723_v12 = vadd.f32 0.014752088, %v8722_v20  ;;  %v7697_v0 = vpop.f32.mrf.mxu3 }
0x1614   : > { %vm17330_vm7 = vcmp.eq.f32.partialorder %v8579_v23, 8.507059e+37  ;;  %v8582_v39 = vor.u32 1.1754944e-38, %v8581_v42  ;;  %v8597_v63 = vmul.f32 %v8596_v55, %v17096_v47  ;;  %v17336_v7 = vmul.f32 0.5, %v17151_v28  ;;  %vm17342_vm8 = vmor %vm8575_vm5, %vm8576_vm0 }
0x1615   : > { %v8383_v51 = vsel %vm17283_vm6, %v8382_v46, %v8378_v25  ;;  %v8475_v58 = vmul.f32 %v8474_v14, %v17140_v19  ;;  %v8526_v49 = vmul.f32 %v8525_v4, %v17216_v30  ;;  %v8761_v41 = vadd.f32 0.001143296, %v8760_v22 }
0x1616   : > { %v17348_v23 = vpop.eup %11684  ;;  %v8578_v47 = vsel %vm17342_vm8, %v17233_v56, %v8574_v52  ;;  %v8613_v28 = vmul.f32 %v17279_v33, %v8612_v36  ;;  %v8512_v46 = vadd.f32 0.0036580483, %v8511_v61  ;;  %v8627_v21 = vmul.f32 %v17326_v9, %v17326_v9 }
0x1617   : > { %v17357_v20 = vmul.f32 %v9119_v16, %v17069_v35  ;;  %v8710_v8 = vadd.f32 0.00028619796, %v8709_v24  ;;  %v8724_v42 = vmul.f32 %v8723_v12, %v17251_v11  ;;  %v8762_v55 = vmul.f32 %v8761_v41, %v17306_v3 }
0x1618   : > { %v8384_v25 = vmul.f32 %v8383_v51, %v17269_v26  ;;  %v8598_v14 = vadd.f32 1.1283791, %v8597_v63  ;;  %v17363_v4 = vmul.f32 0.5, %v17199_v6  ;;  %v8749_v56 = vmul.f32 2.1237322e-06, %v17306_v3 }
0x1619   : > { %v8583_v22 = vsel %vm17330_vm7, %v8582_v39, %v8578_v47  ;;  %v8476_v52 = vadd.f32 0.18741608, %v8475_v58  ;;  %v8491_v35 = vmul.f32 %v17348_v23, %v17291_v10  ;;  %v8527_v36 = vadd.f32 0.4994258, %v8526_v49 }
0x161a   : > { %v8614_v61 = vadd.f32 %v17279_v33, %v8613_v28  ;;  %vm8616_vm9 = vweird.f32 %v17279_v33  ;;  %v8513_v26 = vmul.f32 %v8512_v46, %v17216_v30  ;;  %v17373_v16 = vmin.f32 %v8627_v21, 16.0 }
0x161b   : > { %v8621_v6 = vand.u32 2147483648, %v17226_v43  ;;  %v8711_v24 = vmul.f32 %v8710_v8, %v17251_v11  ;;  %v8725_v12 = vadd.f32 0.112945676, %v8724_v42  ;;  %v8763_v29 = vadd.f32 0.014752088, %v8762_v55 }
0x161c   : > { %v10573_v39 = vclamps-f32 %v8384_v25, 1.0  ;;  %vm8615_vm10 = vweird.f32 %v17226_v43  ;;  %v8619_v63 = vand.u32 2147483647, %v17226_v43  ;;  %v8750_v51 = vadd.f32 0.00028619796, %v8749_v56 }
0x161d   : > { %v8584_v58 = vmul.f32 %v8583_v22, %v17288_v5  ;;  %vm17380_vm11 = vmor %vm8615_vm10, %vm8616_vm9  ;;  %v8492_v41 = vsub.f32 1.0, %v8491_v35  ;;  %v8528_v47 = vmul.f32 %v8527_v36, %v17216_v30  ;;  %v8764_v28 = vmul.f32 %v8763_v29, %v17306_v3 }
0x161e   : > { %v8618_v46 = vsel %vm17380_vm11, %v17279_v33, %v8614_v61  ;;  %v8477_v21 = vmul.f32 %v8476_v52, %v17140_v19  ;;  %v8514_v43 = vadd.f32 0.05243302, %v8513_v26  ;;  %v8640_v8 = vmul.f32 3.8918573e-05, %v17373_v16 }
0x161f   : > { %v8622_v42 = vor.u32 1.1754944e-38, %v8621_v6  ;;  %v8712_v5 = vadd.f32 0.0036580483, %v8711_v24  ;;  %v8726_v55 = vmul.f32 %v8725_v12, %v17251_v11  ;;  %v17393_v25 = vadd.f32 %v7697_v0, %v16479_v17 }
0x1620   : > { %v9120_v56 = vadd.f32 1.0, %v10573_v39  ;;  %v8599_v22 = vmul.f32 %v8598_v14, %v17073_v54  ;;  %vm8620_vm12 = vcmp.eq.f32.partialorder %v8619_v63, 8.507059e+37  ;;  %v8751_v35 = vmul.f32 %v8750_v51, %v17306_v3 }
0x1621   : > { %v8623_v36 = vsel %vm8620_vm12, %v8622_v42, %v8618_v46  ;;  %v8493_v33 = vmul.f32 %v17348_v23, %v8492_v41  ;;  %v17398_v19 = vadd.f32 1.0, %v8528_v47  ;;  %v8765_v52 = vadd.f32 0.112945676, %v8764_v28 }
0x1622   : > { %v10578_v61 = vclamps-f32 %v8584_v58, 1.0  ;;  %v8478_v26 = vadd.f32 1.1283791, %v8477_v21  ;;  %v8515_v6 = vmul.f32 %v8514_v43, %v17216_v30  ;;  %v8641_v24 = vadd.f32 0.001143296, %v8640_v8 }
0x1623   : > { %v8499_v12 = vand.u32 2147483647, %v17291_v10  ;;  %v8713_v29 = vmul.f32 %v8712_v5, %v17251_v11  ;;  %v8727_v39 = vadd.f32 0.4994258, %v8726_v55  ;;  %v17404_v54 = vmul.f32 0.70710677, %v17393_v25 }
0x1624   : > { %v8624_v14 = vmul.f32 %v8623_v36, %v8599_v22  ;;  %v8752_v63 = vadd.f32 0.0036580483, %v8751_v35  ;;  %v8642_v51 = vmul.f32 %v8641_v24, %v17373_v16  ;;  %v9177_v0 = vpack.c.bf16 %v17202_v59, %v17014_v62 }
0x1625   : > { %v8494_v58 = vadd.f32 %v17348_v23, %v8493_v33  ;;  %vm8496_vm13 = vweird.f32 %v17348_v23  ;;  %11686 = vrcp.f32 %v17398_v19  ;;  %v8766_v49 = vmul.f32 %v8765_v52, %v17306_v3 }
0x1626   : > { %v8501_v41 = vand.u32 2147483648, %v17291_v10  ;;  %v8516_v47 = vadd.f32 0.18741608, %v8515_v6  ;;  %v8643_v28 = vadd.f32 0.014752088, %v8642_v51  ;;  %v8667_v46 = vmul.f32 %v17404_v54, %v17404_v54  ;;  %9453 = vmatmul.bf16.gmra.mxu0 %v9177_v0 }
0x1627   : > { %v9125_v21 = vadd.f32 1.0, %v10578_v61  ;;  %vm8495_vm1 = vweird.f32 %v17291_v10  ;;  %v8714_v62 = vadd.f32 0.05243302, %v8713_v29  ;;  %v8728_v59 = vmul.f32 %v8727_v39, %v17251_v11  ;;  %v7729_v39 = vpop.f32.mrf.mxu0 }
0x1628   : > { %v10579_v43 = vclamps-f32 %v8624_v14, 1.0  ;;  %vm17418_vm3 = vmor %vm8495_vm1, %vm8496_vm13  ;;  %v8753_v42 = vmul.f32 %v8752_v63, %v17306_v3  ;;  %v8644_v5 = vmul.f32 %v8643_v28, %v17373_v16  ;;  %v17424_v55 = vmin.f32 %v8667_v46, 16.0  ;;  %v7758_v46 = vpop.f32.mrf.mxu1 }
0x1629   : > { %v17427_v22 = vmul.f32 %v9120_v56, %v17133_v38  ;;  %v8498_v10 = vsel %vm17418_vm3, %v17348_v23, %v8494_v58  ;;  %v8767_v35 = vadd.f32 0.4994258, %v8766_v49  ;;  %v8629_v36 = vmul.f32 2.1237322e-06, %v17373_v16 }
0x162a   : > { %v8479_v33 = vmul.f32 %v8478_v26, %v17108_v32  ;;  %vm8500_vm4 = vcmp.eq.f32.partialorder %v8499_v12, 8.507059e+37  ;;  %v8502_v52 = vor.u32 1.1754944e-38, %v8501_v41  ;;  %v8517_v61 = vmul.f32 %v8516_v47, %v17216_v30 }
0x162b   : > { %v17435_v6 = vpop.eup %11686  ;;  %v8715_v24 = vmul.f32 %v8714_v62, %v17251_v11  ;;  %v17438_v29 = vadd.f32 1.0, %v8728_v59  ;;  %v8645_v38 = vadd.f32 0.112945676, %v8644_v5  ;;  %v8680_v56 = vmul.f32 3.8918573e-05, %v17424_v55 }
0x162c   : > { %v17442_v23 = vmul.f32 %v9125_v21, %v17138_v13  ;;  %v9126_v14 = vadd.f32 1.0, %v10579_v43  ;;  %v8503_v63 = vsel %vm8500_vm4, %v8502_v52, %v8498_v10  ;;  %v8754_v32 = vadd.f32 0.05243302, %v8753_v42 }
0x162d   : > { %v8768_v26 = vmul.f32 %v8767_v35, %v17306_v3  ;;  %v8630_v12 = vadd.f32 0.00028619796, %v8629_v36  ;;  %v8646_v30 = vmul.f32 %v8645_v38, %v17373_v16  ;;  %v8681_v51 = vadd.f32 0.001143296, %v8680_v56 }
0x162e   : > { %v8518_v0 = vadd.f32 1.1283791, %v8517_v61  ;;  %v8531_v58 = vmul.f32 %v17435_v6, %v17398_v19  ;;  %v17449_v49 = vmul.f32 0.5, %v17259_v57  ;;  %v17452_v41 = vadd.f32 %v7729_v39, %v16378_v40 }
0x162f   : > { %v8716_v13 = vadd.f32 0.18741608, %v8715_v24  ;;  %11688 = vrcp.f32 %v17438_v29  ;;  %v8647_v47 = vadd.f32 0.4994258, %v8646_v30  ;;  %v8682_v28 = vmul.f32 %v8681_v51, %v17424_v55 }
0x1630   : > { %v17457_v21 = vmul.f32 %v9126_v14, %v17193_v44  ;;  %v8504_v62 = vmul.f32 %v8503_v63, %v8479_v33  ;;  %v8755_v59 = vmul.f32 %v8754_v32, %v17306_v3  ;;  %v17461_v43 = vmul.f32 0.5, %v17302_v1 }
0x1631   : > { %v17463_v57 = vadd.f32 1.0, %v8768_v26  ;;  %v8631_v8 = vmul.f32 %v8630_v12, %v17373_v16  ;;  %v8648_v42 = vmul.f32 %v8647_v47, %v17373_v16  ;;  %v8683_v5 = vadd.f32 0.014752088, %v8682_v28 }
0x1632   : > { %v8532_v10 = vsub.f32 1.0, %v8531_v58  ;;  %v8541_v35 = vand.u32 2147483648, %v17398_v19  ;;  %v17469_v36 = vmul.f32 0.70710677, %v17452_v41  ;;  %v17472_v44 = vadd.f32 %v7758_v46, %v16396_v50 }
0x1633   : > { %v17475_v33 = vmul.f32 %v8518_v0, %v17180_v15  ;;  %v8717_v1 = vmul.f32 %v8716_v13, %v17251_v11  ;;  %v17478_v52 = vadd.f32 1.0, %v8648_v42  ;;  %v8684_v61 = vmul.f32 %v8683_v5, %v17424_v55 }
0x1634   : > { %vm8535_vm15 = vweird.f32 %v17398_v19  ;;  %v8539_v24 = vand.u32 2147483647, %v17398_v19  ;;  %v8756_v38 = vadd.f32 0.18741608, %v8755_v59  ;;  %v8867_v56 = vmul.f32 %v17469_v36, %v17469_v36 }
0x1635   : > { %v17486_v39 = vmul.f32 0.70710677, %v17472_v44  ;;  %v17488_v14 = vpop.eup %11688  ;;  %v10576_v15 = vclamps-f32 %v8504_v62, 1.0  ;;  %11690 = vrcp.f32 %v17463_v57  ;;  %v8632_v11 = vadd.f32 0.0036580483, %v8631_v8 }
0x1636   : > { %v8669_v63 = vmul.f32 2.1237322e-06, %v17424_v55  ;;  %v8533_v32 = vmul.f32 %v17435_v6, %v8532_v10  ;;  %v8542_v26 = vor.u32 1.1754944e-38, %v8541_v35  ;;  %11692 = vrcp.f32 %v17478_v52 }
0x1637   : > { %v8685_v12 = vadd.f32 0.112945676, %v8684_v61  ;;  %v8718_v30 = vadd.f32 1.1283791, %v8717_v1  ;;  %v17494_v51 = vmin.f32 %v8867_v56, 16.0  ;;  %v8907_v0 = vmul.f32 %v17486_v39, %v17486_v39 }
0x1638   : > { %v9178_v58 = vpack.c.bf16 %v17273_v31, %v17041_v45  ;;  %vm17500_vm2 = vcmp.eq.f32.partialorder %v8539_v24, 8.507059e+37  ;;  %v8731_v47 = vmul.f32 %v17488_v14, %v17438_v29  ;;  %v8741_v28 = vand.u32 2147483648, %v17438_v29 }
0x1639   : > { %v8757_v46 = vmul.f32 %v8756_v38, %v17306_v3  ;;  %v8686_v62 = vmul.f32 %v8685_v12, %v17424_v55  ;;  %v9123_v59 = vadd.f32 1.0, %v10576_v15  ;;  %v8633_v8 = vmul.f32 %v8632_v11, %v17373_v16 }
0x163a   : > { %v8670_v42 = vadd.f32 0.00028619796, %v8669_v63  ;;  %v8880_v5 = vmul.f32 3.8918573e-05, %v17494_v51  ;;  %9482 = vmatmul.bf16.gmra.mxu1 %v9178_v58  ;;  %v8534_v45 = vadd.f32 %v17435_v6, %v8533_v32  ;;  %vm8536_vm6 = vweird.f32 %v17435_v6  ;;  %v7700_v32 = vpop.f32.mrf.mxu3 }
0x163b   : > { %v8687_v31 = vadd.f32 0.4994258, %v8686_v62  ;;  %v17513_v10 = vmin.f32 %v8907_v0, 16.0  ;;  %v17515_v35 = vpop.eup %11690  ;;  %v17518_v3 = vmul.f32 %v8718_v30, %v17219_v53  ;;  %v8739_v1 = vand.u32 2147483647, %v17438_v29  ;;  %vm17531_vm14 = vmor %vm8535_vm15, %vm8536_vm6 }
0x163c   : > { %v17522_v61 = vmul.f32 0.5, %v17393_v25  ;;  %v8881_v24 = vadd.f32 0.001143296, %v8880_v5  ;;  %v17524_v38 = vpop.eup %11692  ;;  %v8732_v56 = vsub.f32 1.0, %v8731_v47  ;;  %v17526_v15 = vor.u32 1.1754944e-38, %v8741_v28  ;;  %v7671_v28 = vpop.f32.mrf.mxu2 }
0x163d   : > { %v8758_v11 = vadd.f32 1.1283791, %v8757_v46  ;;  %v8869_v63 = vmul.f32 2.1237322e-06, %v17494_v51  ;;  %v8634_v53 = vadd.f32 0.05243302, %v8633_v8  ;;  %v8671_v12 = vmul.f32 %v8670_v42, %v17424_v55 }
0x163e   : > { %v8688_v25 = vmul.f32 %v8687_v31, %v17424_v55  ;;  %v8882_v30 = vmul.f32 %v8881_v24, %v17494_v51  ;;  %v17539_v0 = vmul.f32 %v9123_v59, %v17256_v34  ;;  %v8538_v58 = vsel %vm17531_vm14, %v17435_v6, %v8534_v45 }
0x163f   : > { %vm8735_vm0 = vweird.f32 %v17438_v29  ;;  %v8771_v19 = vmul.f32 %v17515_v35, %v17463_v57  ;;  %v8920_v47 = vmul.f32 3.8918573e-05, %v17513_v10  ;;  %vm8736_vm5 = vweird.f32 %v17488_v14 }
0x1640   : > { %v8651_v46 = vmul.f32 %v17524_v38, %v17478_v52  ;;  %v17551_v62 = vadd.f32 1.0, %v8688_v25  ;;  %v8883_v34 = vadd.f32 0.014752088, %v8882_v30  ;;  %v8733_v59 = vmul.f32 %v17488_v14, %v8732_v56  ;;  %vm17592_vm9 = vmor %vm8735_vm0, %vm8736_vm5 }
0x1641   : > { %v17555_v6 = vmul.f32 %v8758_v11, %v17277_v27  ;;  %v8870_v8 = vadd.f32 0.00028619796, %v8869_v63  ;;  %v8921_v42 = vadd.f32 0.001143296, %v8920_v47  ;;  %v8543_v5 = vsel %vm17500_vm2, %v8542_v26, %v8538_v58 }
0x1642   : > { %v8635_v45 = vmul.f32 %v8634_v53, %v17373_v16  ;;  %v8672_v31 = vadd.f32 0.0036580483, %v8671_v12  ;;  %v17561_v24 = vadd.f32 %v7671_v28, %v16436_v18  ;;  %v8772_v25 = vsub.f32 1.0, %v8771_v19 }
0x1643   : > { %11694 = vrcp.f32 %v17551_v62  ;;  %v8884_v56 = vmul.f32 %v8883_v34, %v17494_v51  ;;  %v8909_v27 = vmul.f32 2.1237322e-06, %v17513_v10  ;;  %v8779_v11 = vand.u32 2147483647, %v17463_v57 }
0x1644   : > { %v8781_v63 = vand.u32 2147483648, %v17463_v57  ;;  %v8652_v13 = vsub.f32 1.0, %v8651_v46  ;;  %v8922_v26 = vmul.f32 %v8921_v42, %v17513_v10  ;;  %v8734_v53 = vadd.f32 %v17488_v14, %v8733_v59 }
0x1645   : > { %vm17570_vm7 = vcmp.eq.f32.partialorder %v8739_v1, 8.507059e+37  ;;  %vm8775_vm8 = vweird.f32 %v17463_v57  ;;  %v8871_v30 = vmul.f32 %v8870_v8, %v17494_v51  ;;  %v8885_v58 = vadd.f32 0.112945676, %v8884_v56 }
0x1646   : > { %v17577_v19 = vadd.f32 %v7700_v32, %v16479_v17  ;;  %v17580_v47 = vmul.f32 %v8543_v5, %v17475_v33  ;;  %v8636_v28 = vadd.f32 0.18741608, %v8635_v45  ;;  %v8923_v46 = vadd.f32 0.014752088, %v8922_v26 }
0x1647   : > { %v17583_v34 = vmul.f32 0.70710677, %v17561_v24  ;;  %v8773_v1 = vmul.f32 %v17515_v35, %v8772_v25  ;;  %v8673_v59 = vmul.f32 %v8672_v31, %v17424_v55  ;;  %v8886_v42 = vmul.f32 %v8885_v58, %v17494_v51 }
0x1648   : > { %v8910_v60 = vadd.f32 0.00028619796, %v8909_v27  ;;  %v8653_v33 = vmul.f32 %v17524_v38, %v8652_v13  ;;  %v8924_v5 = vmul.f32 %v8923_v46, %v17513_v10  ;;  %v9175_v31 = vpack.c.bf16 %v17357_v20, %v17129_v2 }
0x1649   : > { %v8787_v45 = vmul.f32 %v17583_v34, %v17583_v34  ;;  %v17602_v32 = vpop.eup %11694  ;;  %v8738_v29 = vsel %vm17592_vm9, %v17488_v14, %v8734_v53  ;;  %vm17607_vm10 = vcmp.eq.f32.partialorder %v8779_v11, 8.507059e+37  ;;  %v8872_v56 = vadd.f32 0.0036580483, %v8871_v30 }
0x164a   : > { %v17612_v27 = vmul.f32 0.70710677, %v17577_v19  ;;  %vm8776_vm11 = vweird.f32 %v17515_v35  ;;  %v8637_v13 = vmul.f32 %v8636_v28, %v17373_v16  ;;  %v8887_v26 = vadd.f32 0.4994258, %v8886_v42  ;;  %9395 = vmatmul.bf16.gmra.mxu2 %v9175_v31 }
0x164b   : > { %v17616_v2 = vmin.f32 %v8787_v45, 16.0  ;;  %v8774_v20 = vadd.f32 %v17515_v35, %v8773_v1  ;;  %v8661_v14 = vand.u32 2147483648, %v17478_v52  ;;  %v8674_v11 = vadd.f32 0.05243302, %v8673_v59  ;;  %vm17637_vm13 = vmor %vm8775_vm8, %vm8776_vm11 }
0x164c   : > { %v8911_v53 = vmul.f32 %v8910_v60, %v17513_v10  ;;  %v8654_v30 = vadd.f32 %v17524_v38, %v8653_v33  ;;  %vm8656_vm12 = vweird.f32 %v17524_v38  ;;  %v8691_v58 = vmul.f32 %v17602_v32, %v17551_v62 }
0x164d   : > { %v8925_v46 = vadd.f32 0.112945676, %v8924_v5  ;;  %v8873_v16 = vmul.f32 %v8872_v56, %v17494_v51  ;;  %v8888_v28 = vmul.f32 %v8887_v26, %v17494_v51  ;;  %v8800_v42 = vmul.f32 3.8918573e-05, %v17616_v2 }
0x164e   : > { %v8827_v1 = vmul.f32 %v17612_v27, %v17612_v27  ;;  %v8743_v60 = vsel %vm17570_vm7, %v17526_v15, %v8738_v29  ;;  %v8782_v8 = vor.u32 1.1754944e-38, %v8781_v63  ;;  %vm8655_vm1 = vweird.f32 %v17478_v52 }
0x164f   : > { %v8659_v33 = vand.u32 2147483647, %v17478_v52  ;;  %v8778_v5 = vsel %vm17637_vm13, %v17515_v35, %v8774_v20  ;;  %vm17646_vm3 = vmor %vm8655_vm1, %vm8656_vm12  ;;  %v8675_v15 = vmul.f32 %v8674_v11, %v17424_v55  ;;  %v8912_v57 = vadd.f32 0.0036580483, %v8911_v53 }
0x1650   : > { %v8801_v45 = vadd.f32 0.001143296, %v8800_v42  ;;  %v8638_v31 = vadd.f32 1.1283791, %v8637_v13  ;;  %v8658_v63 = vsel %vm17646_vm3, %v17524_v38, %v8654_v30  ;;  %v8692_v29 = vsub.f32 1.0, %v8691_v58 }
0x1651   : > { %v8926_v52 = vmul.f32 %v8925_v46, %v17513_v10  ;;  %v8662_v56 = vor.u32 1.1754944e-38, %v8661_v14  ;;  %v8874_v26 = vadd.f32 0.05243302, %v8873_v16  ;;  %v17655_v59 = vadd.f32 1.0, %v8888_v28 }
0x1652   : > { %v17657_v35 = vmin.f32 %v8827_v1, 16.0  ;;  %v10577_v20 = vclamps-f32 %v17580_v47, 1.0  ;;  %v8744_v11 = vmul.f32 %v8743_v60, %v17518_v3  ;;  %v8783_v13 = vsel %vm17607_vm10, %v8782_v8, %v8778_v5 }
0x1653   : > { %vm8660_vm4 = vcmp.eq.f32.partialorder %v8659_v33, 8.507059e+37  ;;  %v8676_v42 = vadd.f32 0.18741608, %v8675_v15  ;;  %v8913_v38 = vmul.f32 %v8912_v57, %v17513_v10  ;;  %v8802_v30 = vmul.f32 %v8801_v45, %v17616_v2  ;;  %v7731_v33 = vpop.f32.mrf.mxu0 }
0x1654   : > { %v8663_v53 = vsel %vm8660_vm4, %v8662_v56, %v8658_v63  ;;  %v8693_v14 = vmul.f32 %v17602_v32, %v8692_v29  ;;  %v8927_v58 = vadd.f32 0.4994258, %v8926_v52  ;;  %v8789_v46 = vmul.f32 2.1237322e-06, %v17616_v2 }
0x1655   : > { %v9176_v47 = vpack.c.bf16 %v17427_v22, %v17188_v37  ;;  %v8639_v3 = vmul.f32 %v8638_v31, %v17326_v9  ;;  %v8875_v25 = vmul.f32 %v8874_v26, %v17494_v51  ;;  %11696 = vrcp.f32 %v17655_v59 }
0x1656   : > { %v8840_v16 = vmul.f32 3.8918573e-05, %v17657_v35  ;;  %v9124_v28 = vadd.f32 1.0, %v10577_v20  ;;  %v10582_v1 = vclamps-f32 %v8744_v11, 1.0  ;;  %v8784_v60 = vmul.f32 %v8783_v13, %v17555_v6 }
0x1657   : > { %v17675_v8 = vmul.f32 0.5, %v17452_v41  ;;  %9424 = vmatmul.bf16.gmra.mxu3 %v9176_v47  ;;  %v8664_v5 = vmul.f32 %v8663_v53, %v8639_v3  ;;  %v8677_v37 = vmul.f32 %v8676_v42, %v17424_v55  ;;  %v8914_v22 = vadd.f32 0.05243302, %v8913_v38 }
0x1658   : > { %v8803_v9 = vadd.f32 0.014752088, %v8802_v30  ;;  %v8694_v12 = vadd.f32 %v17602_v32, %v8693_v14  ;;  %vm8696_vm15 = vweird.f32 %v17602_v32  ;;  %v8928_v15 = vmul.f32 %v8927_v58, %v17513_v10 }
0x1659   : > { %v8790_v57 = vadd.f32 0.00028619796, %v8789_v46  ;;  %v8701_v45 = vand.u32 2147483648, %v17551_v62  ;;  %v8876_v6 = vadd.f32 0.18741608, %v8875_v25  ;;  %v17683_v41 = vadd.f32 %v7731_v33, %v16378_v40 }
0x165a   : > { %v8841_v31 = vadd.f32 0.001143296, %v8840_v16  ;;  %v9129_v63 = vadd.f32 1.0, %v10582_v1  ;;  %v10583_v29 = vclamps-f32 %v8784_v60, 1.0  ;;  %vm8695_vm2 = vweird.f32 %v17551_v62 }
0x165b   : > { %v8699_v55 = vand.u32 2147483647, %v17551_v62  ;;  %v17687_v52 = vpop.eup %11696  ;;  %v8678_v56 = vadd.f32 1.1283791, %v8677_v37  ;;  %vm17689_vm6 = vmor %vm8695_vm2, %vm8696_vm15  ;;  %v8915_v20 = vmul.f32 %v8914_v22, %v17513_v10  ;;  %v8804_v11 = vmul.f32 %v8803_v9, %v17616_v2 }
0x165c   : > { %v17696_v40 = vmul.f32 0.70710677, %v17683_v41  ;;  %v10580_v13 = vclamps-f32 %v8664_v5, 1.0  ;;  %v8698_v53 = vsel %vm17689_vm6, %v17602_v32, %v8694_v12  ;;  %v17701_v62 = vadd.f32 1.0, %v8928_v15  ;;  %v7760_v5 = vpop.f32.mrf.mxu1 }
0x165d   : > { %v8791_v42 = vmul.f32 %v8790_v57, %v17616_v2  ;;  %v8702_v38 = vor.u32 1.1754944e-38, %v8701_v45  ;;  %v8877_v30 = vmul.f32 %v8876_v6, %v17494_v51  ;;  %v8842_v14 = vmul.f32 %v8841_v31, %v17657_v35 }
0x165e   : > { %v9027_v58 = vmul.f32 %v17696_v40, %v17696_v40  ;;  %v9130_v46 = vadd.f32 1.0, %v10583_v29  ;;  %vm8700_vm14 = vcmp.eq.f32.partialorder %v8699_v55, 8.507059e+37  ;;  %v8891_v47 = vmul.f32 %v17687_v52, %v17655_v59 }
0x165f   : > { %v17711_v3 = vmul.f32 0.5, %v17472_v44  ;;  %v8703_v32 = vsel %vm8700_vm14, %v8702_v38, %v8698_v53  ;;  %v8916_v25 = vadd.f32 0.18741608, %v8915_v20  ;;  %v8805_v16 = vadd.f32 0.112945676, %v8804_v11 }
0x1660   : > { %v17713_v1 = vmin.f32 %v9027_v58, 16.0  ;;  %v9127_v60 = vadd.f32 1.0, %v10580_v13  ;;  %v8679_v51 = vmul.f32 %v8678_v56, %v17404_v54  ;;  %11698 = vrcp.f32 %v17701_v62 }
0x1661   : > { %v8792_v33 = vadd.f32 0.0036580483, %v8791_v42  ;;  %v17718_v37 = vmul.f32 %v9124_v28, %v17336_v7  ;;  %v8878_v22 = vadd.f32 1.1283791, %v8877_v30  ;;  %v8843_v9 = vadd.f32 0.014752088, %v8842_v14 }
0x1662   : > { %v9029_v44 = vmul.f32 2.1237322e-06, %v17713_v1  ;;  %v17722_v12 = vmul.f32 %v9129_v63, %v17363_v4  ;;  %v8704_v15 = vmul.f32 %v8703_v32, %v8679_v51  ;;  %v8892_v57 = vsub.f32 1.0, %v8891_v47 }
0x1663   : > { %v8829_v45 = vmul.f32 2.1237322e-06, %v17657_v35  ;;  %v17726_v54 = vmul.f32 %v9130_v46, %v17449_v49  ;;  %v8917_v6 = vmul.f32 %v8916_v25, %v17513_v10  ;;  %v8806_v31 = vmul.f32 %v8805_v16, %v17616_v2  ;;  %v7673_v25 = vpop.f32.mrf.mxu2 }
0x1664   : > { %v17731_v7 = vadd.f32 %v7760_v5, %v16396_v50  ;;  %v8901_v28 = vand.u32 2147483648, %v17655_v59  ;;  %v8793_v29 = vmul.f32 %v8792_v33, %v17616_v2  ;;  %v9030_v4 = vadd.f32 0.00028619796, %v9029_v44 }
0x1665   : > { %v9040_v63 = vmul.f32 3.8918573e-05, %v17713_v1  ;;  %v17737_v55 = vmul.f32 %v9127_v60, %v17461_v43  ;;  %v17740_v49 = vmul.f32 %v8878_v22, %v17469_v36  ;;  %vm8895_vm0 = vweird.f32 %v17655_v59 }
0x1666   : > { %v8844_v10 = vmul.f32 %v8843_v9, %v17657_v35  ;;  %v17744_v56 = vpop.eup %11698  ;;  %v10581_v50 = vclamps-f32 %v8704_v15, 1.0  ;;  %v8893_v26 = vmul.f32 %v17687_v52, %v8892_v57  ;;  %v8899_v20 = vand.u32 2147483647, %v17655_v59 }
0x1667   : > { %v8830_v11 = vadd.f32 0.00028619796, %v8829_v45  ;;  %v8807_v13 = vadd.f32 0.4994258, %v8806_v31  ;;  %v9031_v53 = vmul.f32 %v9030_v4, %v17713_v1  ;;  %v9041_v43 = vadd.f32 0.001143296, %v9040_v63 }
0x1668   : > { %v17750_v42 = vmul.f32 0.70710677, %v17731_v7  ;;  %v8902_v36 = vor.u32 1.1754944e-38, %v8901_v28  ;;  %v8918_v38 = vadd.f32 1.1283791, %v8917_v6  ;;  %v8941_v30 = vand.u32 2147483648, %v17701_v62 }
0x1669   : > { %v8794_v14 = vadd.f32 0.05243302, %v8793_v29  ;;  %v8931_v58 = vmul.f32 %v17744_v56, %v17701_v62  ;;  %v8845_v46 = vadd.f32 0.112945676, %v8844_v10  ;;  %v9042_v47 = vmul.f32 %v9041_v43, %v17713_v1 }
0x166a   : > { %v9067_v32 = vmul.f32 %v17750_v42, %v17750_v42  ;;  %v9128_v16 = vadd.f32 1.0, %v10581_v50  ;;  %v8894_v60 = vadd.f32 %v17687_v52, %v8893_v26  ;;  %vm8896_vm5 = vweird.f32 %v17687_v52 }
0x166b   : > { %vm17760_vm7 = vcmp.eq.f32.partialorder %v8899_v20, 8.507059e+37  ;;  %v8831_v33 = vmul.f32 %v8830_v11, %v17657_v35  ;;  %v8808_v5 = vmul.f32 %v8807_v13, %v17616_v2  ;;  %v9032_v22 = vadd.f32 0.0036580483, %v9031_v53  ;;  %vm17787_vm8 = vmor %vm8895_vm0, %vm8896_vm5  ;;  %v7702_v11 = vpop.f32.mrf.mxu3 }
0x166c   : > { %v9043_v9 = vadd.f32 0.014752088, %v9042_v47  ;;  %v17766_v44 = vmin.f32 %v9067_v32, 16.0  ;;  %v17769_v15 = vmul.f32 %v8918_v38, %v17486_v39  ;;  %v8939_v57 = vand.u32 2147483647, %v17701_v62 }
0x166d   : > { %v17772_v45 = vor.u32 1.1754944e-38, %v8941_v30  ;;  %v17775_v6 = vadd.f32 %v7673_v25, %v16436_v18  ;;  %v8932_v31 = vsub.f32 1.0, %v8931_v58  ;;  %v8795_v28 = vmul.f32 %v8794_v14, %v17616_v2 }
0x166e   : > { %v8846_v29 = vmul.f32 %v8845_v46, %v17657_v35  ;;  %v9044_v4 = vmul.f32 %v9043_v9, %v17713_v1  ;;  %v17781_v63 = vmul.f32 %v9128_v16, %v17522_v61  ;;  %v8832_v18 = vadd.f32 0.0036580483, %v8831_v33 }
0x166f   : > { %v9069_v10 = vmul.f32 2.1237322e-06, %v17766_v44  ;;  %v9080_v50 = vmul.f32 3.8918573e-05, %v17766_v44  ;;  %v8898_v26 = vsel %vm17787_vm8, %v17687_v52, %v8894_v60  ;;  %vm8935_vm9 = vweird.f32 %v17701_v62 }
0x1670   : > { %v17797_v61 = vadd.f32 1.0, %v8808_v5  ;;  %v9033_v20 = vmul.f32 %v9032_v22, %v17713_v1  ;;  %v9045_v59 = vadd.f32 0.112945676, %v9044_v4  ;;  %v17801_v43 = vmul.f32 0.70710677, %v17775_v6 }
0x1671   : > { %v9070_v13 = vadd.f32 0.00028619796, %v9069_v10  ;;  %v9081_v53 = vadd.f32 0.001143296, %v9080_v50  ;;  %v9181_v38 = vpack.c.bf16 %v17722_v12, %v17442_v23  ;;  %v8933_v30 = vmul.f32 %v17744_v56, %v8932_v31 }
0x1672   : > { %v8796_v14 = vadd.f32 0.18741608, %v8795_v28  ;;  %v8847_v52 = vadd.f32 0.4994258, %v8846_v29  ;;  %v9046_v58 = vmul.f32 %v9045_v59, %v17713_v1  ;;  %v8947_v32 = vmul.f32 %v17801_v43, %v17801_v43 }
0x1673   : > { %v9071_v46 = vmul.f32 %v9070_v13, %v17766_v44  ;;  %v9082_v47 = vmul.f32 %v9081_v53, %v17766_v44  ;;  %v17812_v25 = vadd.f32 %v7702_v11, %v16479_v17  ;;  %9458 = vmatmul.bf16.gmra.mxu0 %v9181_v38  ;;  %v8903_v23 = vsel %vm17760_vm7, %v8902_v36, %v8898_v26 }
0x1674   : > { %vm17816_vm10 = vcmp.eq.f32.partialorder %v8939_v57, 8.507059e+37  ;;  %11700 = vrcp.f32 %v17797_v61  ;;  %v8833_v16 = vmul.f32 %v8832_v18, %v17657_v35  ;;  %v9034_v60 = vadd.f32 0.05243302, %v9033_v20 }
0x1675   : > { %v9047_v33 = vadd.f32 0.4994258, %v9046_v58  ;;  %v9072_v5 = vadd.f32 0.0036580483, %v9071_v46  ;;  %v9083_v22 = vadd.f32 0.014752088, %v9082_v47  ;;  %v9182_v17 = vpack.c.bf16 %v17726_v54, %v17457_v21 }
0x1676   : > { %v8934_v9 = vadd.f32 %v17744_v56, %v8933_v30  ;;  %vm8936_vm11 = vweird.f32 %v17744_v56  ;;  %v8848_v36 = vmul.f32 %v8847_v52, %v17657_v35  ;;  %v17827_v51 = vmin.f32 %v8947_v32, 16.0 }
0x1677   : > { %v8797_v57 = vmul.f32 %v8796_v14, %v17616_v2  ;;  %v9048_v31 = vmul.f32 %v9047_v33, %v17713_v1  ;;  %v9084_v28 = vmul.f32 %v9083_v22, %v17766_v44  ;;  %v17833_v29 = vmul.f32 0.70710677, %v17812_v25  ;;  %9487 = vmatmul.bf16.gmra.mxu1 %v9182_v17  ;;  %vm17840_vm12 = vmor %vm8935_vm9, %vm8936_vm11 }
0x1678   : > { %v8904_v21 = vmul.f32 %v8903_v23, %v17740_v49  ;;  %v8834_v54 = vadd.f32 0.05243302, %v8833_v16  ;;  %v9035_v4 = vmul.f32 %v9034_v60, %v17713_v1  ;;  %v8949_v39 = vmul.f32 2.1237322e-06, %v17827_v51 }
0x1679   : > { %v17845_v2 = vmul.f32 0.5, %v17683_v41  ;;  %v17847_v10 = vadd.f32 1.0, %v9048_v31  ;;  %v9073_v50 = vmul.f32 %v9072_v5, %v17766_v44  ;;  %v9085_v26 = vadd.f32 0.112945676, %v9084_v28 }
0x167a   : > { %v17850_v49 = vpop.eup %11700  ;;  %v8938_v20 = vsel %vm17840_vm12, %v17744_v56, %v8934_v9  ;;  %v17855_v59 = vadd.f32 1.0, %v8848_v36  ;;  %v8950_v62 = vadd.f32 0.00028619796, %v8949_v39  ;;  %v8960_v11 = vmul.f32 3.8918573e-05, %v17827_v51 }
0x167b   : > { %v17858_v13 = vadd.f32 1.1283791, %v8797_v57  ;;  %11702 = vrcp.f32 %v17847_v10  ;;  %v17862_v41 = vmul.f32 0.5, %v17731_v7  ;;  %v8987_v53 = vmul.f32 %v17833_v29, %v17833_v29 }
0x167c   : > { %v10586_v38 = vclamps-f32 %v8904_v21, 1.0  ;;  %v8835_v30 = vmul.f32 %v8834_v54, %v17657_v35  ;;  %v9036_v14 = vadd.f32 0.18741608, %v9035_v4  ;;  %v9086_v56 = vmul.f32 %v9085_v26, %v17766_v44 }
0x167d   : > { %v8943_v52 = vsel %vm17816_vm10, %v17772_v45, %v8938_v20  ;;  %v8819_v58 = vand.u32 2147483647, %v17797_v61  ;;  %v9074_v46 = vadd.f32 0.05243302, %v9073_v50  ;;  %v8961_v47 = vadd.f32 0.001143296, %v8960_v11 }
0x167e   : > { %v8811_v7 = vmul.f32 %v17850_v49, %v17797_v61  ;;  %11704 = vrcp.f32 %v17855_v59  ;;  %v9087_v32 = vadd.f32 0.4994258, %v9086_v56  ;;  %v8951_v23 = vmul.f32 %v8950_v62, %v17827_v51 }
0x167f   : > { %v8962_v16 = vmul.f32 %v8961_v47, %v17827_v51  ;;  %v17877_v60 = vmin.f32 %v8987_v53, 16.0  ;;  %v9179_v12 = vpack.c.bf16 %v17737_v55, %v17539_v0  ;;  %v9180_v45 = vpack.c.bf16 %v17781_v63, %v17718_v37 }
0x1680   : > { %v8821_v33 = vand.u32 2147483648, %v17797_v61  ;;  %v17884_v5 = vadd.f32 0.18741608, %v8835_v30  ;;  %v9037_v22 = vmul.f32 %v9036_v14, %v17713_v1  ;;  %v9088_v17 = vmul.f32 %v9087_v32, %v17766_v44 }
0x1681   : > { %v11703_v9 = vpop.eup %11702  ;;  %v9075_v36 = vmul.f32 %v9074_v46, %v17766_v44  ;;  %v8963_v57 = vadd.f32 0.014752088, %v8962_v16  ;;  %v8989_v31 = vmul.f32 2.1237322e-06, %v17877_v60  ;;  %v9000_v28 = vmul.f32 3.8918573e-05, %v17877_v60  ;;  %9400 = vmatmul.bf16.gmra.mxu2 %v9179_v12  ;;  %9429 = vmatmul.bf16.gmra.mxu3 %v9180_v45 }
0x1682   : > { %v9133_v0 = vadd.f32 1.0, %v10586_v38  ;;  %v8944_v37 = vmul.f32 %v8943_v52, %v17769_v15  ;;  %v9051_v55 = vmul.f32 %v11703_v9, %v17847_v10  ;;  %v8952_v63 = vadd.f32 0.0036580483, %v8951_v23 }
0x1683   : > { %v8812_v21 = vsub.f32 1.0, %v8811_v7  ;;  %v17893_v1 = vadd.f32 1.0, %v9088_v17  ;;  %v8964_v54 = vmul.f32 %v8963_v57, %v17827_v51  ;;  %v8990_v4 = vadd.f32 0.00028619796, %v8989_v31 }
0x1684   : > { %v17896_v39 = vpop.eup %11704  ;;  %v17898_v18 = vor.u32 1.1754944e-38, %v8821_v33  ;;  %v9038_v50 = vadd.f32 1.1283791, %v9037_v22  ;;  %v9052_v26 = vsub.f32 1.0, %v9051_v55  ;;  %v9001_v20 = vadd.f32 0.001143296, %v9000_v28 }
0x1685   : > { %v9059_v62 = vand.u32 2147483647, %v17847_v10  ;;  %v9061_v15 = vand.u32 2147483648, %v17847_v10  ;;  %v9076_v11 = vadd.f32 0.18741608, %v9075_v36  ;;  %11706 = vrcp.f32 %v17893_v1 }
0x1686   : > { %v9053_v53 = vmul.f32 %v11703_v9, %v9052_v26  ;;  %vm9056_vm13 = vweird.f32 %v11703_v9  ;;  %v8953_v38 = vmul.f32 %v8952_v63, %v17827_v51  ;;  %v8965_v30 = vadd.f32 0.112945676, %v8964_v54 }
0x1687   : > { %v10587_v14 = vclamps-f32 %v8944_v37, 1.0  ;;  %v8813_v56 = vmul.f32 %v17850_v49, %v8812_v21  ;;  %vm8815_vm1 = vweird.f32 %v17797_v61  ;;  %v8991_v52 = vmul.f32 %v8990_v4, %v17877_v60 }
0x1688   : > { %v9002_v46 = vmul.f32 %v9001_v20, %v17877_v60  ;;  %v8851_v47 = vmul.f32 %v17896_v39, %v17855_v59  ;;  %v9054_v7 = vadd.f32 %v11703_v9, %v9053_v53  ;;  %vm9055_vm3 = vweird.f32 %v17847_v10 }
0x1689   : > { %v8966_v32 = vmul.f32 %v8965_v30, %v17827_v51  ;;  %v9039_v23 = vmul.f32 %v9038_v50, %v17696_v40  ;;  %vm9057_vm4 = vmor %vm9055_vm3, %vm9056_vm13  ;;  %vm9060_vm15 = vcmp.eq.f32.partialorder %v9059_v62, 8.507059e+37  ;;  %v9062_v16 = vor.u32 1.1754944e-38, %v9061_v15 }
0x168a   : > { %v9003_v12 = vadd.f32 0.014752088, %v9002_v46  ;;  %v9058_v45 = vsel %vm9057_vm4, %v11703_v9, %v9054_v7  ;;  %v9077_v33 = vmul.f32 %v9076_v11, %v17766_v44  ;;  %v8954_v22 = vadd.f32 0.05243302, %v8953_v38 }
0x168b   : > { %v8967_v17 = vadd.f32 0.4994258, %v8966_v32  ;;  %v11707_v36 = vpop.eup %11706  ;;  %v9165_v57 = vmul.f32 %v9133_v0, %v17675_v8  ;;  %v9063_v31 = vsel %vm9060_vm15, %v9062_v16, %v9058_v45  ;;  %v8992_v28 = vadd.f32 0.0036580483, %v8991_v52  ;;  %v9420_v45 = vpop.f32.mrf.mxu3 }
0x168c   : > { %v9004_v10 = vmul.f32 %v9003_v12, %v17877_v60  ;;  %v9134_v37 = vadd.f32 1.0, %v10587_v14  ;;  %vm8816_vm2 = vweird.f32 %v17850_v49  ;;  %vm17919_vm6 = vcmp.eq.f32.partialorder %v8819_v58, 8.507059e+37 }
0x168d   : > { %v9064_v9 = vmul.f32 %v9063_v31, %v9039_v23  ;;  %v9091_v44 = vmul.f32 %v11707_v36, %v17893_v1  ;;  %v8814_v55 = vadd.f32 %v17850_v49, %v8813_v56  ;;  %v8852_v63 = vsub.f32 1.0, %v8851_v47  ;;  %vm17936_vm14 = vmor %vm8815_vm1, %vm8816_vm2  ;;  %v9449_v31 = vpop.f32.mrf.mxu0 }
0x168e   : > { %v8968_v8 = vmul.f32 %v8967_v17, %v17827_v51  ;;  %v9005_v0 = vadd.f32 0.112945676, %v9004_v10  ;;  %v9078_v54 = vadd.f32 1.1283791, %v9077_v33  ;;  %v8955_v50 = vmul.f32 %v8954_v22, %v17827_v51 }
0x168f   : > { %v10590_v21 = vclamps-f32 %v9064_v9, 1.0  ;;  %v9092_v4 = vsub.f32 1.0, %v9091_v44  ;;  %v9101_v26 = vand.u32 2147483648, %v17893_v1  ;;  %v8993_v20 = vmul.f32 %v8992_v28, %v17877_v60 }
0x1690   : > { %v17928_v58 = vadd.f32 1.0, %v8968_v8  ;;  %v9006_v62 = vmul.f32 %v9005_v0, %v17877_v60  ;;  %vm9096_vm0 = vweird.f32 %v11707_v36  ;;  %v9099_v38 = vand.u32 2147483647, %v17893_v1 }
0x1691   : > { %v9137_v11 = vadd.f32 1.0, %v10590_v21  ;;  %v9093_v53 = vmul.f32 %v11707_v36, %v9092_v4  ;;  %v8818_v30 = vsel %vm17936_vm14, %v17850_v49, %v8814_v55  ;;  %v8853_v14 = vmul.f32 %v17896_v39, %v8852_v63 }
0x1692   : > { %vm9095_vm5 = vweird.f32 %v17893_v1  ;;  %11708 = vrcp.f32 %v17928_v58  ;;  %v8956_v52 = vadd.f32 0.18741608, %v8955_v50  ;;  %v9007_v46 = vadd.f32 0.4994258, %v9006_v62  ;;  %v17954_v1 = vld [vmem:[%s18471_s5] ss:$0 sm:$0xff] }
0x1693   : > { %v9169_v61 = vmul.f32 %v9137_v11, %v17845_v2  ;;  %v9094_v56 = vadd.f32 %v11707_v36, %v9093_v53  ;;  %v8859_v47 = vand.u32 2147483647, %v17855_v59  ;;  %v9079_v7 = vmul.f32 %v9078_v54, %v17750_v42  ;;  %vm9097_vm7 = vmor %vm9095_vm5, %vm9096_vm0  ;;  %v9391_v2 = vpop.f32.mrf.mxu2 }
0x1694   : > { %v9102_v32 = vor.u32 1.1754944e-38, %v9101_v26  ;;  %v8994_v23 = vadd.f32 0.05243302, %v8993_v20  ;;  %vm9100_vm8 = vcmp.eq.f32.partialorder %v9099_v38, 8.507059e+37  ;;  %v9008_v49 = vmul.f32 %v9007_v46, %v17877_v60 }
0x1695   : > { %v9098_v16 = vsel %vm9097_vm7, %v11707_v36, %v9094_v56  ;;  %v9185_v12 = vpack.c.bf16 %v9169_v61, %v9165_v57  ;;  %v8823_v33 = vsel %vm17919_vm6, %v17898_v18, %v8818_v30  ;;  %v8854_v42 = vadd.f32 %v17896_v39, %v8853_v14  ;;  %v9422_v56 = vpop.f32.mrf.mxu3 }
0x1696   : > { %vm8856_vm9 = vweird.f32 %v17896_v39  ;;  %v9103_v22 = vsel %vm9100_vm8, %v9102_v32, %v9098_v16  ;;  %v8957_v36 = vmul.f32 %v8956_v52, %v17827_v51  ;;  %v17962_v57 = vadd.f32 1.0, %v9008_v49  ;;  %v9451_v16 = vpop.f32.mrf.mxu0  ;;  %v18476_v49 = vld [vmem:[#allocation48_spill] sm:$0xff] }
0x1697   : > { %v9104_v17 = vmul.f32 %v9103_v22, %v9079_v7  ;;  %9463 = vmatmul.bf16.gmra.mxu0 %v9185_v12  ;;  %v9392_v28 = vadd.f32 %v17954_v1, %v9391_v2  ;;  %v8799_v9 = vmul.f32 %v17858_v13, %v17583_v34  ;;  %vm8855_vm10 = vweird.f32 %v17855_v59  ;;  %v9478_v13 = vpop.f32.mrf.mxu1 }
0x1698   : > { %v11709_v10 = vpop.eup %11708  ;;  %v8861_v18 = vand.u32 2147483648, %v17855_v59  ;;  %v8995_v40 = vmul.f32 %v8994_v23, %v17877_v60  ;;  %v9166_v44 = vmul.f32 %v9134_v37, %v17711_v3  ;;  %v8837_v51 = vmul.f32 %v17884_v5, %v17657_v35  ;;  %vm17975_vm11 = vmor %vm8855_vm10, %vm8856_vm9 }
0x1699   : > { %v10591_v63 = vclamps-f32 %v9104_v17, 1.0  ;;  %v8971_v34 = vmul.f32 %v11709_v10, %v17928_v58  ;;  %v8824_v8 = vmul.f32 %v8823_v33, %v8799_v9  ;;  %v8858_v59 = vsel %vm17975_vm11, %v17896_v39, %v8854_v42 }
0x169a   : > { %vm17983_vm12 = vcmp.eq.f32.partialorder %v8859_v47, 8.507059e+37  ;;  %11710 = vrcp.f32 %v17962_v57  ;;  %v8958_v5 = vadd.f32 1.1283791, %v8957_v36  ;;  %v9421_v0 = vadd.f32 %v9420_v45, %v9392_v28 }
0x169b   : > { %v9138_v35 = vadd.f32 1.0, %v10591_v63  ;;  %v8972_v37 = vsub.f32 1.0, %v8971_v34  ;;  %v8862_v21 = vor.u32 1.1754944e-38, %v8861_v18  ;;  %v8979_v54 = vand.u32 2147483647, %v17928_v58  ;;  %v9393_v62 = vpop.f32.mrf.mxu2  ;;  %v18477_v18 = vld [vmem:[#allocation47_spill] sm:$0xff] }
0x169c   : > { %v8981_v4 = vand.u32 2147483648, %v17928_v58  ;;  %v8996_v50 = vadd.f32 0.18741608, %v8995_v40  ;;  %vm8976_vm13 = vweird.f32 %v11709_v10  ;;  %v9450_v39 = vadd.f32 %v9449_v31, %v9421_v0 }
0x169d   : > { %v9170_v26 = vmul.f32 %v9138_v35, %v17862_v41  ;;  %v8973_v20 = vmul.f32 %v11709_v10, %v8972_v37  ;;  %v10584_v15 = vclamps-f32 %v8824_v8, 1.0  ;;  %v8838_v11 = vadd.f32 1.1283791, %v8837_v51 }
0x169e   : > { %v8863_v53 = vsel %vm17983_vm12, %v8862_v21, %v8858_v59  ;;  %v9394_v38 = vadd.f32 %v17954_v1, %v9393_v62  ;;  %vm8975_vm1 = vweird.f32 %v17928_v58  ;;  %v9479_v61 = vadd.f32 %v9478_v13, %v9450_v39 }
0x169f   : > { %v8974_v30 = vadd.f32 %v11709_v10, %v8973_v20  ;;  %v9186_v14 = vpack.c.bf16 %v9170_v26, %v9166_v44  ;;  %v8959_v41 = vmul.f32 %v8958_v5, %v17801_v43  ;;  %vm8977_vm3 = vmor %vm8975_vm1, %vm8976_vm13  ;;  %v8982_v46 = vor.u32 1.1754944e-38, %v8981_v4  ;;  %v9480_v22 = vpop.f32.mrf.mxu1 }
0x16a0   : > { %v11711_v52 = vpop.eup %11710  ;;  %v8997_v47 = vmul.f32 %v8996_v50, %v17877_v60  ;;  %v9423_v7 = vadd.f32 %v9422_v56, %v9394_v38  ;;  %vm8980_vm4 = vcmp.eq.f32.partialorder %v8979_v54, 8.507059e+37  ;;  %v9498_v58 = vadd.f32 %v9479_v61, %v18476_v49 }
0x16a1   : > { %v8978_v32 = vsel %vm8977_vm3, %v11709_v10, %v8974_v30  ;;  %v9011_v23 = vmul.f32 %v11711_v52, %v17962_v57  ;;  %9492 = vmatmul.bf16.gmra.mxu1 %v9186_v14  ;;  %v8839_v12 = vmul.f32 %v8838_v11, %v17612_v27  ;;  %v9131_v33 = vadd.f32 1.0, %v10584_v15 }
0x16a2   : > { %v8983_v2 = vsel %vm8980_vm4, %v8982_v46, %v8978_v32  ;;  %v9452_v45 = vadd.f32 %v9451_v16, %v9423_v7  ;;  %9514 = vst [vmem:[%s18001_s27] sm:$0xff] %v9498_v58  ;;  %v8998_v17 = vadd.f32 1.1283791, %v8997_v47  ;;  %v9021_v36 = vand.u32 2147483648, %v17962_v57 }
0x16a3   : > { %v8984_v43 = vmul.f32 %v8983_v2, %v8959_v41  ;;  %v9012_v42 = vsub.f32 1.0, %v9011_v23  ;;  %v8864_v60 = vmul.f32 %v8863_v53, %v8839_v12  ;;  %vm9016_vm15 = vweird.f32 %v11711_v52 }
0x16a4   : > { %v9481_v31 = vadd.f32 %v9480_v22, %v9452_v45  ;;  %v9019_v27 = vand.u32 2147483647, %v17962_v57  ;;  %v7787_v9 = vmul.f32 0.5, %v17561_v24  ;;  %v7791_v44 = vmul.f32 0.5, %v17775_v6 }
0x16a5   : > { %v10588_v28 = vclamps-f32 %v8984_v43, 1.0  ;;  %v9013_v10 = vmul.f32 %v11711_v52, %v9012_v42  ;;  %vm9015_vm2 = vweird.f32 %v17962_v57  ;;  %v10585_v34 = vclamps-f32 %v8864_v60, 1.0 }
0x16a6   : > { %v9499_v40 = vadd.f32 %v9481_v31, %v18477_v18  ;;  %v9163_v63 = vmul.f32 %v9131_v33, %v7787_v9  ;;  %vm9017_vm6 = vmor %vm9015_vm2, %vm9016_vm15  ;;  %v9022_v13 = vor.u32 1.1754944e-38, %v9021_v36  ;;  %v8999_v59 = vmul.f32 %v8998_v17, %v17833_v29 }
0x16a7   : > { %v9135_v51 = vadd.f32 1.0, %v10588_v28  ;;  %v9014_v55 = vadd.f32 %v11711_v52, %v9013_v10  ;;  %vm9020_vm14 = vcmp.eq.f32.partialorder %v9019_v27, 8.507059e+37  ;;  %v9132_v5 = vadd.f32 1.0, %v10585_v34 }
0x16a8   : > { %9515 = vst [vmem:[%s18001_s27 + $0x8] sm:$0xff] %v9499_v40  ;;  %v7788_v57 = vmul.f32 0.5, %v17577_v19  ;;  %v7792_v0 = vmul.f32 0.5, %v17812_v25 }
0x16a9   : > { %v9167_v8 = vmul.f32 %v9135_v51, %v7791_v44  ;;  %v9018_v3 = vsel %vm9017_vm6, %v11711_v52, %v9014_v55 }
0x16aa   : > { %v9023_v24 = vsel %vm9020_vm14, %v9022_v13, %v9018_v3  ;;  %v9164_v54 = vmul.f32 %v9132_v5, %v7788_v57 }
0x16ab   : > { %v9024_v35 = vmul.f32 %v9023_v24, %v8999_v59  ;;  %v9183_v6 = vpack.c.bf16 %v9167_v8, %v9163_v63 }
0x16ad   : > { %v10589_v37 = vclamps-f32 %v9024_v35, 1.0  ;;  %9405 = vmatmul.bf16.gmra.mxu2 %v9183_v6 }
0x16af   : > { %v9136_v21 = vadd.f32 1.0, %v10589_v37 }
0x16b1   : > { %v9168_v29 = vmul.f32 %v9136_v21, %v7792_v0 }
0x16b3   : > { %v9184_v4 = vpack.c.bf16 %v9168_v29, %v9164_v54 }
0x16b5   : > { %9434 = vmatmul.bf16.gmra.mxu3 %v9184_v4 }
0x16b6   : > { %12216 = shalt.err (!%p12213_p4)
}
0x16b7   : > { %s12346_s26 = smov 128   ;;  %s12347_s5 = smov 8   ;;  %v9454_v50 = vpop.f32.mrf.mxu0  ;;  %v9483_v39 = vpop.f32.mrf.mxu1  ;;  %v18479_v38 = vld [vmem:[#allocation53_spill] sm:$0xff]  ;;  %v18480_v47 = vld [vmem:[#allocation54_spill] sm:$0xff]  ;;  %v18481_v43 = vld [vmem:[#allocation55_spill] sm:$0xff] }
0x16b8   : > { %10986 = dma.vmem_to_hbm [thread:$0]  (%p12608_p0), %s9542_s24, 1024, %s9544_s1, %s9523_s21, %s12346_s26, %s12346_s26, %s12347_s5   ;;  %v18482_v59 = vld [vmem:[#allocation56_spill] sm:$0xff]  ;;  %v18484_v57 = vld [vmem:[#allocation42_spill] sm:$0xff] }
0x16b9   : > { %s18483_s3 = sld [smem:[#allocation80_spill]]  ;;  %s9559_s1 = sshll.u32 %s18001_s27, 4  ;;  %s9560_s1 = int_to_ptr.vmem [resolvable:$true] %s9559_s1 }
0x16ba   : > { %s9528_s28 = scalar_lea.sflag [#allocation28], %s12663_s6 }
0x16bf   : > { %v9456_v56 = vpop.f32.mrf.mxu0  ;;  %v9485_v41 = vpop.f32.mrf.mxu1  ;;  %s9558_s23 = scalar_lea.hbm %s18483_s3, %s10919_s7  ;;  %s12237_s17 = scalar_lea.hbm %s18483_s3, 128 }
0x16c0   : > { %s9561_s21 = sshll.u32 %s9558_s23, 4  ;;  %s9562_s21 = int_to_ptr.hbm [resolvable:$true] %s9561_s21 }
0x16c1   : > { %s12231_s4 = sshra.s32 %s9562_s21, 4  ;;  %s12232_s4 = int_to_ptr.hbm [resolvable:$true] %s12231_s4 }
0x16c2   : > { %s12233_s8 = scalar_lea.hbm %s12232_s4, 64  ;;  %p12238_p2 = scmp.lt.s32.totalorder %s12232_s4, %s18483_s3 }
0x16c3   : > { %p12234_p10 = scmp.ne.s32.totalorder %s12232_s4, %s12233_s8  ;;  %p12239_p5 = scmp.lt.s32.totalorder %s12237_s17, %s12233_s8 }
0x16c5   : > { %p12235_p11 = pnand %p12234_p10, %p12608_p0  ;;  %p12240_p1 = por %p12239_p5, %p12238_p2 }
0x16c7   : > { %p12236_p12 = pneg %p12235_p11 }
0x16c9   : > { %p12241_p3 = pnand %p12240_p1, %p12236_p12 }
0x16cd   : > { %v9396_v19 = vpop.f32.mrf.mxu2 }
0x16ce   : > { %v9397_v25 = vadd.f32 %v17954_v1, %v9396_v19 }
0x16d5   : > { %v9398_v62 = vpop.f32.mrf.mxu2 }
0x16d6   : > { %v9399_v53 = vadd.f32 %v17954_v1, %v9398_v62 }
0x16da   : > { %v9425_v26 = vpop.f32.mrf.mxu3 }
0x16db   : > { %v9426_v20 = vadd.f32 %v9425_v26, %v9397_v25 }
0x16dd   : > { %v9455_v15 = vadd.f32 %v9454_v50, %v9426_v20 }
0x16df   : > { %v9484_v11 = vadd.f32 %v9483_v39, %v9455_v15 }
0x16e1   : > { %v9500_v30 = vadd.f32 %v9484_v11, %v18479_v38 }
0x16e2   : > { %v9427_v14 = vpop.f32.mrf.mxu3 }
0x16e3   : > { %9516 = vst [vmem:[%s18001_s27 + $0x10] sm:$0xff] %v9500_v30  ;;  %v9428_v61 = vadd.f32 %v9427_v14, %v9399_v53 }
0x16e5   : > { %v9457_v52 = vadd.f32 %v9456_v56, %v9428_v61 }
0x16e7   : > { %v9486_v46 = vadd.f32 %v9485_v41, %v9457_v52 }
0x16e9   : > { %v9501_v7 = vadd.f32 %v9486_v46, %v18480_v47 }
0x16eb   : > { %9517 = vst [vmem:[%s18001_s27 + $0x18] sm:$0xff] %v9501_v7 }
0x16f0   : > { %v9459_v49 = vpop.f32.mrf.mxu0 }
0x16f4   : > { %v9488_v12 = vpop.f32.mrf.mxu1 }
0x16f8   : > { %v9461_v36 = vpop.f32.mrf.mxu0 }
0x16fc   : > { %v9490_v28 = vpop.f32.mrf.mxu1 }
0x1704   : > { %v9401_v32 = vpop.f32.mrf.mxu2  ;;  %v9430_v23 = vpop.f32.mrf.mxu3 }
0x1705   : > { %v9402_v16 = vadd.f32 %v17954_v1, %v9401_v32 }
0x1707   : > { %v9431_v58 = vadd.f32 %v9430_v23, %v9402_v16 }
0x1709   : > { %v9460_v2 = vadd.f32 %v9459_v49, %v9431_v58 }
0x170b   : > { %v9489_v45 = vadd.f32 %v9488_v12, %v9460_v2 }
0x170c   : > { %v9403_v33 = vpop.f32.mrf.mxu2  ;;  %v9432_v60 = vpop.f32.mrf.mxu3 }
0x170d   : > { %v9502_v42 = vadd.f32 %v9489_v45, %v18481_v43  ;;  %v9404_v22 = vadd.f32 %v17954_v1, %v9403_v33 }
0x170f   : > { %9518 = vst [vmem:[%s18001_s27 + $0x20] sm:$0xff] %v9502_v42  ;;  %v9433_v17 = vadd.f32 %v9432_v60, %v9404_v22 }
0x1711   : > { %v9462_v31 = vadd.f32 %v9461_v36, %v9433_v17 }
0x1713   : > { %v9491_v10 = vadd.f32 %v9490_v28, %v9462_v31 }
0x1714   : > { %v9464_v40 = vpop.f32.mrf.mxu0 }
0x1715   : > { %v9503_v27 = vadd.f32 %v9491_v10, %v14616_v48 }
0x1717   : > { %9519 = vst [vmem:[%s18001_s27 + $0x28] sm:$0xff] %v9503_v27 }
0x171c   : > { %v9466_v35 = vpop.f32.mrf.mxu0 }
0x171e   : > { %v9493_v55 = vpop.f32.mrf.mxu1 }
0x1726   : > { %v9495_v5 = vpop.f32.mrf.mxu1 }
0x1730   : > { %v9406_v9 = vpop.f32.mrf.mxu2 }
0x1731   : > { %v9407_v18 = vadd.f32 %v17954_v1, %v9406_v9 }
0x1738   : > { %v9435_v44 = vpop.f32.mrf.mxu3  ;;  %v9408_v63 = vpop.f32.mrf.mxu2 }
0x1739   : > { %v9436_v51 = vadd.f32 %v9435_v44, %v9407_v18  ;;  %v9409_v8 = vadd.f32 %v17954_v1, %v9408_v63 }
0x173b   : > { %v9465_v34 = vadd.f32 %v9464_v40, %v9436_v51 }
0x173d   : > { %v9494_v13 = vadd.f32 %v9493_v55, %v9465_v34 }
0x173f   : > { %v9504_v3 = vadd.f32 %v9494_v13, %v18482_v59 }
0x1740   : > { %v9437_v48 = vpop.f32.mrf.mxu3 }
0x1741   : > { %9520 = vst [vmem:[%s18001_s27 + $0x30] sm:$0xff] %v9504_v3  ;;  %v9438_v24 = vadd.f32 %v9437_v48, %v9409_v8 }
0x1743   : > { %v9467_v6 = vadd.f32 %v9466_v35, %v9438_v24 }
0x1745   : > { %v9496_v37 = vadd.f32 %v9495_v5, %v9467_v6 }
0x1747   : > { %v9505_v1 = vadd.f32 %v9496_v37, %v18484_v57 }
0x1749   : > { %9521 = vst [vmem:[%s18001_s27 + $0x38] sm:$0xff] %v9505_v1 }
0x174a   : > { %12244 = shalt.err (!%p12241_p3)
}
0x174b   : > { %10987 = dma.vmem_to_hbm [thread:$0]  (%p12608_p0), %s9560_s1, 1024, %s9562_s21, %s9528_s28, %s12346_s26, %s12346_s26, %s12347_s5  }
0x174c PF: > { %s9576_s6 = sand.u32 1, %s12307_s29   ;;  %p18485_p13 = scmp.ge.s32.totalorder %s12319_s30, 2 }
0x174d   : > { %s9577_s27 = scalar_lea.sflag [#allocation4], %s9576_s6 }
0x174e   : > { %p11038_p7 = pnand %p18485_p13, %p12614_p6 }
0x1750   : > { %p11039_p9 = pneg %p11038_p7 }
0x1752   : > { %12298 = dma.done.wait (%p11039_p9), %s9577_s27, 1024  }
0x1753   : > { %12300 = vsyncadd (%p11039_p9), %s9577_s27, 4294966272  ;;  %s9587_s20 = scalar_lea.sflag [#allocation28], %s9576_s6 }
0x1754   : > { %12302 = dma.done.wait (%p11039_p9), %s9587_s20, 1024  }
0x1755   : > { %12304 = vsyncadd (%p11039_p9), %s9587_s20, 4294966272  ;;  %s18486_s19 = sld [smem:[#allocation40_spill]]  ;;  %p51_p0 = scmp.ge.s32.totalorder %s12584_s14, 4  }
0x1756   : > { %s18487_s6 = sld [smem:[#allocation41_spill]]  ;;  %s18488_s29 = smov %s12311_s2 }
0x1757   : > { %s18490_s30 = smov %s12584_s14  ;;  %53 = sbr.rel (!%p51_p0) target bundleno = 39 (0x27), region = 243 }
0x175b   : > { %s18489_s2 = smov %s18486_s19 }
0x175c   :  { %9593 = vsyncpa [#allocation3], 1 }
0x175d   :  { %9595 = vsyncpa [#allocation3 + $0x1], 1 }
0x175e   :  { %9596 = vsyncpa [#allocation6], 1 }
0x175f   :  { %9598 = vsyncpa [#allocation6 + $0x1], 1 }
0x1760   :  { %9599 = vsyncpa [#allocation9], 1 }
0x1761   :  { %9600 = vsyncpa [#allocation12], 1 }
0x1762   :  { %9601 = vsyncpa [#allocation15], 1 }
0x1763   :  { %9602 = vsyncpa [#allocation18], 1 }
0x1764   :  { %9603 = vsyncpa [#allocation21], 1 }
0x1765   :  { %9604 = vsyncpa [#allocation24], 1 }
0x1766   :  { %9605 = vsyncpa [#allocation4], 1 }
0x1767   :  { %9607 = vsyncpa [#allocation4 + $0x1], 1 }
0x1768   :  { %9608 = vsyncpa [#allocation28], 1 }
0x1769   :  { %9610 = vsyncpa [#allocation28 + $0x1], 1 }

</bundles_post_ra>
